<compile_context>
chip_gen: v7x
topology: tpu7x:2x2x1
jax: 0.10.0
libtpu: 0.0.40
codegen_flags: <defaults>
</compile_context>

<pallas_src>
import functools
from typing import NamedTuple

import jax
import jax.numpy as jnp
from jax import lax
from jax.experimental import pallas as pl
from jax.experimental.pallas import tpu as pltpu


def _round_up(x, m):
    return (x + m - 1) // m * m


@functools.lru_cache(maxsize=1)
def _preferred_channel_tile():
    """256-wide output tiles on v6e/v7x (2x256^2 MXU); 128-wide on v5e (4x128^2 MXU)."""
    try:
        kind = jax.devices()[0].device_kind.lower()
    except Exception:
        kind = ""
    if "v5 lite" in kind or "v5e" in kind:
        return 128
    return 256


class LayerMeta(NamedTuple):
    kh: int
    kw: int
    stride: int
    pad: int
    cin: int
    cin_p: int     # cin rounded up to 8 (so K = kh*kw*cin_p is lane friendly)
    cout: int
    cp: int        # cout rounded up to 128 (lane-dense stores)
    norm: bool     # InstanceNorm2d(affine=False, eps=1e-5)
    act: bool      # LeakyReLU(0.2)


def _layer_kernel(p_ref, w_ref, b_ref, o_ref, *, hw, use_norm, use_act, eps=1e-5):
    """Fused conv-as-GEMM + bias [+ InstanceNorm2d] [+ LeakyReLU(0.2)] for one
    (sample, out-channel-tile) grid point.

    p_ref: [HWp, K]  bf16  im2col patches of ONE sample (HWp = HW rounded up to 8)
    w_ref: [K, CT]   bf16  weight tile
    b_ref: [1, CT]   f32   bias tile
    o_ref: [HWp, CT]       output tile
    """
    # MXU GEMM: bf16 x bf16 -> f32 accumulate.
    y = jnp.dot(p_ref[...], w_ref[...], preferred_element_type=jnp.float32)
    y = y + b_ref[...]

    if use_norm:
        # InstanceNorm2d (affine=False, biased var, eps=1e-5): per-sample, per-channel
        # statistics over the valid spatial rows via an in-kernel sublane reduction.
        hwp = y.shape[0]
        if hwp != hw:
            # Exclude zero-padded spatial rows from the statistics (only when needed).
            row = lax.broadcasted_iota(jnp.int32, (hwp, 1), 0)
            valid = (row < hw).astype(jnp.float32)
            yv = y * valid
            mean = jnp.sum(yv, axis=0, keepdims=True) * (1.0 / hw)
            msq = jnp.sum(yv * y, axis=0, keepdims=True) * (1.0 / hw)
        else:
            mean = jnp.mean(y, axis=0, keepdims=True)
            msq = jnp.mean(y * y, axis=0, keepdims=True)
        # One-pass variance can dip slightly below zero in reduced precision -> clamp.
        var = jnp.maximum(msq - mean * mean, 0.0)
        y = (y - mean) * lax.rsqrt(var + eps)

    if use_act:
        y = jnp.where(y > 0.0, y, 0.2 * y)                    # LeakyReLU(0.2)

    o_ref[...] = y.astype(o_ref.dtype)


def conv_layer_pallas(x_nhwc, w_mat, b_mat, *, meta: LayerMeta, out_dtype):
    """One discriminator layer on prepacked weights.

    x_nhwc: [N, H, W, Cin], w_mat: [K, Cp] bf16 (K = kh*kw*cin_p), b_mat: [1, Cp] f32.
    Returns [N, Ho, Wo, Cout] in `out_dtype`.
    """
    N, H, W, C = x_nhwc.shape
    assert C == meta.cin
    KH, KW, stride, pad = meta.kh, meta.kw, meta.stride, meta.pad
    cin_p, cout, cp = meta.cin_p, meta.cout, meta.cp

    if cin_p != C:
        x_nhwc = jnp.pad(x_nhwc, ((0, 0), (0, 0), (0, 0), (0, cin_p - C)))

    # ---- host-side NHWC im2col (patch order: (kh, kw, cin)), fused by XLA -----------
    # TODO(synk): for large images move im2col into the kernel (tap loop over (kh, kw)
    # on a VMEM-resident padded activation) to avoid the ~KH*KW x HBM patch expansion.
    xp = jnp.pad(x_nhwc, ((0, 0), (pad, pad), (pad, pad), (0, 0)))
    Hp, Wp = H + 2 * pad, W + 2 * pad
    Ho = (Hp - KH) // stride + 1
    Wo = (Wp - KW) // stride + 1
    cols = [xp[:, i:i + stride * Ho:stride, j:j + stride * Wo:stride, :]
            for i in range(KH) for j in range(KW)]
    patches = jnp.concatenate(cols, axis=-1)                  # [N, Ho, Wo, K]

    K = KH * KW * cin_p
    HW = Ho * Wo
    HWp = _round_up(HW, 8)
    patches = patches.reshape(N, HW, K)
    if HWp != HW:
        patches = jnp.pad(patches, ((0, 0), (0, HWp - HW), (0, 0)))
    patches = patches.astype(jnp.bfloat16)                    # bf16 operands, f32 accum

    # Output-channel tiling: lane-dense, generation-aware width.  Together with the
    # batch axis, every layer exposes >= 2 "parallel" grid points.
    ct = min(cp, _preferred_channel_tile())
    n_ct = cp // ct

    kernel = functools.partial(_layer_kernel, hw=HW,
                               use_norm=meta.norm, use_act=meta.act)

    out_itemsize = 4 if out_dtype == jnp.float32 else 2
    flops = 2 * N * HWp * K * cp + (8 * N * HWp * cp if meta.norm else 0)
    bytes_accessed = (patches.size * patches.dtype.itemsize
                      + w_mat.size * w_mat.dtype.itemsize
                      + b_mat.size * b_mat.dtype.itemsize
                      + N * HWp * cp * out_itemsize)
    cost = pl.CostEstimate(flops=int(flops),
                           transcendentals=int(N * cp) if meta.norm else 0,
                           bytes_accessed=int(bytes_accessed))

    # NOTE: whole-layer blocks fit comfortably in VMEM at PatchGAN sizes; for large
    # images this would need HW/K tiling with a trailing "arbitrary" K-reduction axis.
    out = pl.pallas_call(
        kernel,
        out_shape=jax.ShapeDtypeStruct((N, HWp, cp), out_dtype),
        grid=(N, n_ct),
        in_specs=[
            pl.BlockSpec((None, HWp, K), lambda n, c: (n, 0, 0)),   # per-sample patches
            pl.BlockSpec((K, ct), lambda n, c: (0, c)),             # weight tile
            pl.BlockSpec((1, ct), lambda n, c: (0, c)),             # bias tile
        ],
        out_specs=pl.BlockSpec((None, HWp, ct), lambda n, c: (n, 0, c)),
        compiler_params=pltpu.CompilerParams(
            dimension_semantics=("parallel", "parallel")),
        cost_estimate=cost,
    )(patches, w_mat, b_mat)

    out = out[:, :HW, :cout]
    return out.reshape(N, Ho, Wo, cout)


def init_discriminator_params(key, in_ch, num_layers=4):
    """Deterministic init mirroring the torch Discriminator's layer structure."""
    specs = [(in_ch, 64, 4, 2, 1, False, True)]                    # Conv + LeakyReLU
    for i in range(1, num_layers):
        in_chs = 64 * 2 ** (i - 1)
        out_chs = in_chs * 2
        stride = 1 if i == num_layers - 1 else 2
        specs.append((in_chs, out_chs, 4, stride, 1, True, True))  # Conv + IN + LeakyReLU
    specs.append((64 * 2 ** (num_layers - 1), 1, 4, 1, 1, False, False))  # final Conv

    params, cfgs = [], []
    for (cin, cout, k, s, p, norm, act) in specs:
        key, kw_, kb_ = jax.random.split(key, 3)
        fan_in = cin * k * k
        bound = float(1.0 / (fan_in ** 0.5))          # torch default conv init range
        w = jax.random.uniform(kw_, (cout, cin, k, k), jnp.float32, -bound, bound)
        b = jax.random.uniform(kb_, (cout,), jnp.float32, -bound, bound)
        params.append({"w": w, "b": b})
        cfgs.append(dict(stride=s, pad=p, norm=norm, act=act))
    return params, cfgs


def prepack_discriminator(params, cfgs):
    """One-time packing of torch-layout conv weights into MXU-friendly GEMM operands.

    Hoisted out of the jitted forward: [Cout,Cin,KH,KW] -> [(kh,kw,cin_p), Cp] bf16,
    bias -> [1, Cp] f32, with cin padded to 8 and Cout padded to 128.
    """
    packed, meta = [], []
    for p, cfg in zip(params, cfgs):
        w, b = p["w"], p["b"]
        cout, cin, kh, kw = w.shape
        cin_p = _round_up(cin, 8)
        cp = _round_up(cout, 128)
        wp = jnp.pad(w, ((0, 0), (0, cin_p - cin), (0, 0), (0, 0)))
        w_mat = wp.transpose(2, 3, 1, 0).reshape(kh * kw * cin_p, cout)
        w_mat = jnp.pad(w_mat, ((0, 0), (0, cp - cout))).astype(jnp.bfloat16)
        b_mat = jnp.pad(b.reshape(1, cout).astype(jnp.float32),
                        ((0, 0), (0, cp - cout)))
        packed.append((w_mat, b_mat))
        meta.append(LayerMeta(kh=kh, kw=kw, stride=cfg["stride"], pad=cfg["pad"],
                              cin=cin, cin_p=cin_p, cout=cout, cp=cp,
                              norm=cfg["norm"], act=cfg["act"]))
    return packed, tuple(meta)


def discriminator_forward(packed, x_nchw, *, meta):
    x = jnp.transpose(x_nchw, (0, 2, 3, 1))               # NCHW -> NHWC, once
    n_layers = len(packed)
    # TODO(synk): fuse the tiny tail layers (HW <= 16) into a single pallas_call with
    # their weights VMEM-resident to remove launch overhead + HBM bounces at small inputs.
    for idx, ((w_mat, b_mat), m) in enumerate(zip(packed, meta)):
        last = idx == n_layers - 1
        x = conv_layer_pallas(
            x, w_mat, b_mat, meta=m,
            out_dtype=jnp.float32 if last else jnp.bfloat16)
    return jnp.transpose(x, (0, 3, 1, 2))                 # final scores back to NCHW


if __name__ == "__main__":
    key = jax.random.PRNGKey(0)
    kparam, kx = jax.random.split(key)

    # NCHW input; 32x32 is the smallest spatial size that survives all five convs
    # (32 -> 16 -> 8 -> 4 -> 3 -> 2).
    x = jax.random.normal(kx, (2, 3, 32, 32), dtype=jnp.float32)
    params, cfgs = init_discriminator_params(kparam, in_ch=3, num_layers=4)
    packed, meta = prepack_discriminator(params, cfgs)    # one-time prepack, outside jit

    fwd = jax.jit(functools.partial(discriminator_forward, meta=meta))
    out = jax.block_until_ready(fwd(packed, x))

    assert out.shape == (2, 1, 2, 2), out.shape
    assert bool(jnp.all(jnp.isfinite(out)))
    print("KERNEL_OK")
</pallas_src>

<mosaic_0001>
module attributes {stable_mosaic.version = 11 : i64} {
  func.func @_layer_kernel(%arg0: i32, %arg1: i32, %arg2: memref<1x256x128xbf16, #tpu.memory_space<vmem>>, %arg3: memref<128x128xbf16, #tpu.memory_space<vmem>>, %arg4: memref<1x128xf32, #tpu.memory_space<vmem>>, %arg5: memref<1x256x128xbf16, #tpu.memory_space<vmem>>) attributes {dimension_semantics = [#tpu.dimension_semantics<parallel>, #tpu.dimension_semantics<parallel>], iteration_bounds = array<i64: 2, 1>, scalar_prefetch = 0 : i64, scratch_operands = 0 : i64, tpu.core_type = #tpu.core_type<tc>, window_params = [{transform_indices = @transform_0, window_bounds = array<i64: 1, 256, 128>}, {transform_indices = @transform_1, window_bounds = array<i64: 128, 128>}, {transform_indices = @transform_2, window_bounds = array<i64: 1, 128>}, {transform_indices = @transform_3, window_bounds = array<i64: 1, 256, 128>}]} {
    %c0 = arith.constant 0 : index
    %c0_0 = arith.constant 0 : index
    %c0_1 = arith.constant 0 : index
    %0 = vector.load %arg2[%c0, %c0_0, %c0_1] : memref<1x256x128xbf16, #tpu.memory_space<vmem>>, vector<1x256x128xbf16>
    %1 = vector.shape_cast %0 : vector<1x256x128xbf16> to vector<256x128xbf16>
    %c0_2 = arith.constant 0 : index
    %c0_3 = arith.constant 0 : index
    %2 = vector.load %arg3[%c0_2, %c0_3] : memref<128x128xbf16, #tpu.memory_space<vmem>>, vector<128x128xbf16>
    %cst = arith.constant dense<0.000000e+00> : vector<256x128xf32>
    %3 = tpu.matmul %1, %2, %cst {dimension_numbers = #tpu.dot_dimension_numbers<[1], [0], [0], [1], [0, 0, 1, 1], [], []>} : vector<256x128xbf16>, vector<128x128xbf16>, vector<256x128xf32> -> vector<256x128xf32>
    %c0_4 = arith.constant 0 : index
    %c0_5 = arith.constant 0 : index
    %4 = vector.load %arg4[%c0_4, %c0_5] : memref<1x128xf32, #tpu.memory_space<vmem>>, vector<1x128xf32>
    %5 = vector.broadcast %4 : vector<1x128xf32> to vector<256x128xf32>
    %6 = arith.addf %3, %5 : vector<256x128xf32>
    %cst_6 = arith.constant 0.000000e+00 : f32
    %7 = vector.broadcast %cst_6 : f32 to vector<256x128xf32>
    %8 = arith.cmpf ogt, %6, %7 : vector<256x128xf32>
    %cst_7 = arith.constant 2.000000e-01 : f32
    %9 = vector.broadcast %cst_7 : f32 to vector<256x128xf32>
    %10 = arith.mulf %9, %6 : vector<256x128xf32>
    %11 = arith.select %8, %6, %10 : vector<256x128xi1>, vector<256x128xf32>
    %12 = arith.truncf %11 : vector<256x128xf32> to vector<256x128xbf16>
    %c0_8 = arith.constant 0 : index
    %c0_9 = arith.constant 0 : index
    %c0_10 = arith.constant 0 : index
    %13 = vector.load %arg5[%c0_8, %c0_9, %c0_10] : memref<1x256x128xbf16, #tpu.memory_space<vmem>>, vector<1x256x128xbf16>
    %14 = vector.shape_cast %13 : vector<1x256x128xbf16> to vector<256x128xbf16>
    %15 = vector.shape_cast %12 : vector<256x128xbf16> to vector<1x256x128xbf16>
    tpu.vector_store %arg5[%c0_8, %c0_9, %c0_10], %15 {strides = array<i32>} : memref<1x256x128xbf16, #tpu.memory_space<vmem>>, vector<1x256x128xbf16>,
    return
  }
  func.func @transform_0(%arg0: i32, %arg1: i32) -> (i32, i32, i32) {
    %c0_i32 = arith.constant 0 : i32
    %c0_i32_0 = arith.constant 0 : i32
    %c0_i32_1 = arith.constant 0 : i32
    return %arg0, %c0_i32, %c0_i32_0 : i32, i32, i32
  }
  func.func @transform_1(%arg0: i32, %arg1: i32) -> (i32, i32) {
    %c0_i32 = arith.constant 0 : i32
    %c0_i32_0 = arith.constant 0 : i32
    return %c0_i32, %arg1 : i32, i32
  }
  func.func @transform_2(%arg0: i32, %arg1: i32) -> (i32, i32) {
    %c0_i32 = arith.constant 0 : i32
    %c0_i32_0 = arith.constant 0 : i32
    return %c0_i32, %arg1 : i32, i32
  }
  func.func @transform_3(%arg0: i32, %arg1: i32) -> (i32, i32, i32) {
    %c0_i32 = arith.constant 0 : i32
    %c0_i32_0 = arith.constant 0 : i32
    return %arg0, %c0_i32, %arg1 : i32, i32, i32
  }
}

module attributes {stable_mosaic.version = 11 : i64} {
  func.func @_layer_kernel(%arg0: i32, %arg1: i32, %arg2: memref<1x64x1024xbf16, #tpu.memory_space<vmem>>, %arg3: memref<1024x128xbf16, #tpu.memory_space<vmem>>, %arg4: memref<1x128xf32, #tpu.memory_space<vmem>>, %arg5: memref<1x64x128xbf16, #tpu.memory_space<vmem>>) attributes {dimension_semantics = [#tpu.dimension_semantics<parallel>, #tpu.dimension_semantics<parallel>], iteration_bounds = array<i64: 2, 1>, scalar_prefetch = 0 : i64, scratch_operands = 0 : i64, tpu.core_type = #tpu.core_type<tc>, window_params = [{transform_indices = @transform_0, window_bounds = array<i64: 1, 64, 1024>}, {transform_indices = @transform_1, window_bounds = array<i64: 1024, 128>}, {transform_indices = @transform_2, window_bounds = array<i64: 1, 128>}, {transform_indices = @transform_3, window_bounds = array<i64: 1, 64, 128>}]} {
    %c0 = arith.constant 0 : index
    %c0_0 = arith.constant 0 : index
    %c0_1 = arith.constant 0 : index
    %0 = vector.load %arg2[%c0, %c0_0, %c0_1] : memref<1x64x1024xbf16, #tpu.memory_space<vmem>>, vector<1x64x1024xbf16>
    %1 = vector.shape_cast %0 : vector<1x64x1024xbf16> to vector<64x1024xbf16>
    %c0_2 = arith.constant 0 : index
    %c0_3 = arith.constant 0 : index
    %2 = vector.load %arg3[%c0_2, %c0_3] : memref<1024x128xbf16, #tpu.memory_space<vmem>>, vector<1024x128xbf16>
    %cst = arith.constant dense<0.000000e+00> : vector<64x128xf32>
    %3 = tpu.matmul %1, %2, %cst {dimension_numbers = #tpu.dot_dimension_numbers<[1], [0], [0], [1], [0, 0, 1, 1], [], []>} : vector<64x1024xbf16>, vector<1024x128xbf16>, vector<64x128xf32> -> vector<64x128xf32>
    %c0_4 = arith.constant 0 : index
    %c0_5 = arith.constant 0 : index
    %4 = vector.load %arg4[%c0_4, %c0_5] : memref<1x128xf32, #tpu.memory_space<vmem>>, vector<1x128xf32>
    %5 = vector.broadcast %4 : vector<1x128xf32> to vector<64x128xf32>
    %6 = arith.addf %3, %5 : vector<64x128xf32>
    %cst_6 = arith.constant dense<0.000000e+00> : vector<128xf32>
    %7 = vector.multi_reduction <add>, %6, %cst_6 [0] : vector<64x128xf32> to vector<128xf32>
    %8 = vector.shape_cast %7 : vector<128xf32> to vector<1x128xf32>
    %cst_7 = arith.constant 6.400000e+01 : f32
    %9 = vector.broadcast %cst_7 : f32 to vector<1x128xf32>
    %10 = arith.divf %8, %9 : vector<1x128xf32>
    %11 = arith.mulf %6, %6 : vector<64x128xf32>
    %cst_8 = arith.constant dense<0.000000e+00> : vector<128xf32>
    %12 = vector.multi_reduction <add>, %11, %cst_8 [0] : vector<64x128xf32> to vector<128xf32>
    %13 = vector.shape_cast %12 : vector<128xf32> to vector<1x128xf32>
    %cst_9 = arith.constant 6.400000e+01 : f32
    %14 = vector.broadcast %cst_9 : f32 to vector<1x128xf32>
    %15 = arith.divf %13, %14 : vector<1x128xf32>
    %16 = arith.mulf %10, %10 : vector<1x128xf32>
    %17 = arith.subf %15, %16 : vector<1x128xf32>
    %cst_10 = arith.constant 0.000000e+00 : f32
    %18 = vector.broadcast %cst_10 : f32 to vector<1x128xf32>
    %19 = arith.maximumf %17, %18 : vector<1x128xf32>
    %20 = vector.broadcast %10 : vector<1x128xf32> to vector<64x128xf32>
    %21 = arith.subf %6, %20 : vector<64x128xf32>
    %cst_11 = arith.constant 9.99999974E-6 : f32
    %22 = vector.broadcast %cst_11 : f32 to vector<1x128xf32>
    %23 = arith.addf %19, %22 : vector<1x128xf32>
    %24 = math.rsqrt %23 : vector<1x128xf32>
    %25 = vector.broadcast %24 : vector<1x128xf32> to vector<64x128xf32>
    %26 = arith.mulf %21, %25 : vector<64x128xf32>
    %cst_12 = arith.constant 0.000000e+00 : f32
    %27 = vector.broadcast %cst_12 : f32 to vector<64x128xf32>
    %28 = arith.cmpf ogt, %26, %27 : vector<64x128xf32>
    %cst_13 = arith.constant 2.000000e-01 : f32
    %29 = vector.broadcast %cst_13 : f32 to vector<64x128xf32>
    %30 = arith.mulf %29, %26 : vector<64x128xf32>
    %31 = arith.select %28, %26, %30 : vector<64x128xi1>, vector<64x128xf32>
    %32 = arith.truncf %31 : vector<64x128xf32> to vector<64x128xbf16>
    %c0_14 = arith.constant 0 : index
    %c0_15 = arith.constant 0 : index
    %c0_16 = arith.constant 0 : index
    %33 = vector.load %arg5[%c0_14, %c0_15, %c0_16] : memref<1x64x128xbf16, #tpu.memory_space<vmem>>, vector<1x64x128xbf16>
    %34 = vector.shape_cast %33 : vector<1x64x128xbf16> to vector<64x128xbf16>
    %35 = vector.shape_cast %32 : vector<64x128xbf16> to vector<1x64x128xbf16>
    tpu.vector_store %arg5[%c0_14, %c0_15, %c0_16], %35 {strides = array<i32>} : memref<1x64x128xbf16, #tpu.memory_space<vmem>>, vector<1x64x128xbf16>,
    return
  }
  func.func @transform_0(%arg0: i32, %arg1: i32) -> (i32, i32, i32) {
    %c0_i32 = arith.constant 0 : i32
    %c0_i32_0 = arith.constant 0 : i32
    %c0_i32_1 = arith.constant 0 : i32
    return %arg0, %c0_i32, %c0_i32_0 : i32, i32, i32
  }
  func.func @transform_1(%arg0: i32, %arg1: i32) -> (i32, i32) {
    %c0_i32 = arith.constant 0 : i32
    %c0_i32_0 = arith.constant 0 : i32
    return %c0_i32, %arg1 : i32, i32
  }
  func.func @transform_2(%arg0: i32, %arg1: i32) -> (i32, i32) {
    %c0_i32 = arith.constant 0 : i32
    %c0_i32_0 = arith.constant 0 : i32
    return %c0_i32, %arg1 : i32, i32
  }
  func.func @transform_3(%arg0: i32, %arg1: i32) -> (i32, i32, i32) {
    %c0_i32 = arith.constant 0 : i32
    %c0_i32_0 = arith.constant 0 : i32
    return %arg0, %c0_i32, %arg1 : i32, i32, i32
  }
}

module attributes {stable_mosaic.version = 11 : i64} {
  func.func @_layer_kernel(%arg0: i32, %arg1: i32, %arg2: memref<1x16x2048xbf16, #tpu.memory_space<vmem>>, %arg3: memref<2048x256xbf16, #tpu.memory_space<vmem>>, %arg4: memref<1x256xf32, #tpu.memory_space<vmem>>, %arg5: memref<1x16x256xbf16, #tpu.memory_space<vmem>>) attributes {dimension_semantics = [#tpu.dimension_semantics<parallel>, #tpu.dimension_semantics<parallel>], iteration_bounds = array<i64: 2, 1>, scalar_prefetch = 0 : i64, scratch_operands = 0 : i64, tpu.core_type = #tpu.core_type<tc>, window_params = [{transform_indices = @transform_0, window_bounds = array<i64: 1, 16, 2048>}, {transform_indices = @transform_1, window_bounds = array<i64: 2048, 256>}, {transform_indices = @transform_2, window_bounds = array<i64: 1, 256>}, {transform_indices = @transform_3, window_bounds = array<i64: 1, 16, 256>}]} {
    %c0 = arith.constant 0 : index
    %c0_0 = arith.constant 0 : index
    %c0_1 = arith.constant 0 : index
    %0 = vector.load %arg2[%c0, %c0_0, %c0_1] : memref<1x16x2048xbf16, #tpu.memory_space<vmem>>, vector<1x16x2048xbf16>
    %1 = vector.shape_cast %0 : vector<1x16x2048xbf16> to vector<16x2048xbf16>
    %c0_2 = arith.constant 0 : index
    %c0_3 = arith.constant 0 : index
    %2 = vector.load %arg3[%c0_2, %c0_3] : memref<2048x256xbf16, #tpu.memory_space<vmem>>, vector<2048x256xbf16>
    %cst = arith.constant dense<0.000000e+00> : vector<16x256xf32>
    %3 = tpu.matmul %1, %2, %cst {dimension_numbers = #tpu.dot_dimension_numbers<[1], [0], [0], [1], [0, 0, 1, 1], [], []>} : vector<16x2048xbf16>, vector<2048x256xbf16>, vector<16x256xf32> -> vector<16x256xf32>
    %c0_4 = arith.constant 0 : index
    %c0_5 = arith.constant 0 : index
    %4 = vector.load %arg4[%c0_4, %c0_5] : memref<1x256xf32, #tpu.memory_space<vmem>>, vector<1x256xf32>
    %5 = vector.broadcast %4 : vector<1x256xf32> to vector<16x256xf32>
    %6 = arith.addf %3, %5 : vector<16x256xf32>
    %cst_6 = arith.constant dense<0.000000e+00> : vector<256xf32>
    %7 = vector.multi_reduction <add>, %6, %cst_6 [0] : vector<16x256xf32> to vector<256xf32>
    %8 = vector.shape_cast %7 : vector<256xf32> to vector<1x256xf32>
    %cst_7 = arith.constant 1.600000e+01 : f32
    %9 = vector.broadcast %cst_7 : f32 to vector<1x256xf32>
    %10 = arith.divf %8, %9 : vector<1x256xf32>
    %11 = arith.mulf %6, %6 : vector<16x256xf32>
    %cst_8 = arith.constant dense<0.000000e+00> : vector<256xf32>
    %12 = vector.multi_reduction <add>, %11, %cst_8 [0] : vector<16x256xf32> to vector<256xf32>
    %13 = vector.shape_cast %12 : vector<256xf32> to vector<1x256xf32>
    %cst_9 = arith.constant 1.600000e+01 : f32
    %14 = vector.broadcast %cst_9 : f32 to vector<1x256xf32>
    %15 = arith.divf %13, %14 : vector<1x256xf32>
    %16 = arith.mulf %10, %10 : vector<1x256xf32>
    %17 = arith.subf %15, %16 : vector<1x256xf32>
    %cst_10 = arith.constant 0.000000e+00 : f32
    %18 = vector.broadcast %cst_10 : f32 to vector<1x256xf32>
    %19 = arith.maximumf %17, %18 : vector<1x256xf32>
    %20 = vector.broadcast %10 : vector<1x256xf32> to vector<16x256xf32>
    %21 = arith.subf %6, %20 : vector<16x256xf32>
    %cst_11 = arith.constant 9.99999974E-6 : f32
    %22 = vector.broadcast %cst_11 : f32 to vector<1x256xf32>
    %23 = arith.addf %19, %22 : vector<1x256xf32>
    %24 = math.rsqrt %23 : vector<1x256xf32>
    %25 = vector.broadcast %24 : vector<1x256xf32> to vector<16x256xf32>
    %26 = arith.mulf %21, %25 : vector<16x256xf32>
    %cst_12 = arith.constant 0.000000e+00 : f32
    %27 = vector.broadcast %cst_12 : f32 to vector<16x256xf32>
    %28 = arith.cmpf ogt, %26, %27 : vector<16x256xf32>
    %cst_13 = arith.constant 2.000000e-01 : f32
    %29 = vector.broadcast %cst_13 : f32 to vector<16x256xf32>
    %30 = arith.mulf %29, %26 : vector<16x256xf32>
    %31 = arith.select %28, %26, %30 : vector<16x256xi1>, vector<16x256xf32>
    %32 = arith.truncf %31 : vector<16x256xf32> to vector<16x256xbf16>
    %c0_14 = arith.constant 0 : index
    %c0_15 = arith.constant 0 : index
    %c0_16 = arith.constant 0 : index
    %33 = vector.load %arg5[%c0_14, %c0_15, %c0_16] : memref<1x16x256xbf16, #tpu.memory_space<vmem>>, vector<1x16x256xbf16>
    %34 = vector.shape_cast %33 : vector<1x16x256xbf16> to vector<16x256xbf16>
    %35 = vector.shape_cast %32 : vector<16x256xbf16> to vector<1x16x256xbf16>
    tpu.vector_store %arg5[%c0_14, %c0_15, %c0_16], %35 {strides = array<i32>} : memref<1x16x256xbf16, #tpu.memory_space<vmem>>, vector<1x16x256xbf16>,
    return
  }
  func.func @transform_0(%arg0: i32, %arg1: i32) -> (i32, i32, i32) {
    %c0_i32 = arith.constant 0 : i32
    %c0_i32_0 = arith.constant 0 : i32
    %c0_i32_1 = arith.constant 0 : i32
    return %arg0, %c0_i32, %c0_i32_0 : i32, i32, i32
  }
  func.func @transform_1(%arg0: i32, %arg1: i32) -> (i32, i32) {
    %c0_i32 = arith.constant 0 : i32
    %c0_i32_0 = arith.constant 0 : i32
    return %c0_i32, %arg1 : i32, i32
  }
  func.func @transform_2(%arg0: i32, %arg1: i32) -> (i32, i32) {
    %c0_i32 = arith.constant 0 : i32
    %c0_i32_0 = arith.constant 0 : i32
    return %c0_i32, %arg1 : i32, i32
  }
  func.func @transform_3(%arg0: i32, %arg1: i32) -> (i32, i32, i32) {
    %c0_i32 = arith.constant 0 : i32
    %c0_i32_0 = arith.constant 0 : i32
    return %arg0, %c0_i32, %arg1 : i32, i32, i32
  }
}

module attributes {stable_mosaic.version = 11 : i64} {
  func.func @_layer_kernel(%arg0: i32, %arg1: i32, %arg2: memref<1x16x4096xbf16, #tpu.memory_space<vmem>>, %arg3: memref<4096x256xbf16, #tpu.memory_space<vmem>>, %arg4: memref<1x256xf32, #tpu.memory_space<vmem>>, %arg5: memref<1x16x256xbf16, #tpu.memory_space<vmem>>) attributes {dimension_semantics = [#tpu.dimension_semantics<parallel>, #tpu.dimension_semantics<parallel>], iteration_bounds = array<i64: 2, 2>, scalar_prefetch = 0 : i64, scratch_operands = 0 : i64, tpu.core_type = #tpu.core_type<tc>, window_params = [{transform_indices = @transform_0, window_bounds = array<i64: 1, 16, 4096>}, {transform_indices = @transform_1, window_bounds = array<i64: 4096, 256>}, {transform_indices = @transform_2, window_bounds = array<i64: 1, 256>}, {transform_indices = @transform_3, window_bounds = array<i64: 1, 16, 256>}]} {
    %c0 = arith.constant 0 : index
    %c0_0 = arith.constant 0 : index
    %c0_1 = arith.constant 0 : index
    %0 = vector.load %arg2[%c0, %c0_0, %c0_1] : memref<1x16x4096xbf16, #tpu.memory_space<vmem>>, vector<1x16x4096xbf16>
    %1 = vector.shape_cast %0 : vector<1x16x4096xbf16> to vector<16x4096xbf16>
    %c0_2 = arith.constant 0 : index
    %c0_3 = arith.constant 0 : index
    %2 = vector.load %arg3[%c0_2, %c0_3] : memref<4096x256xbf16, #tpu.memory_space<vmem>>, vector<4096x256xbf16>
    %cst = arith.constant dense<0.000000e+00> : vector<16x256xf32>
    %3 = tpu.matmul %1, %2, %cst {dimension_numbers = #tpu.dot_dimension_numbers<[1], [0], [0], [1], [0, 0, 1, 1], [], []>} : vector<16x4096xbf16>, vector<4096x256xbf16>, vector<16x256xf32> -> vector<16x256xf32>
    %c0_4 = arith.constant 0 : index
    %c0_5 = arith.constant 0 : index
    %4 = vector.load %arg4[%c0_4, %c0_5] : memref<1x256xf32, #tpu.memory_space<vmem>>, vector<1x256xf32>
    %5 = vector.broadcast %4 : vector<1x256xf32> to vector<16x256xf32>
    %6 = arith.addf %3, %5 : vector<16x256xf32>
    %7 = tpu.iota {dimensions = array<i32: 0>} : vector<16x1xi32>
    %c9_i32 = arith.constant 9 : i32
    %8 = vector.broadcast %c9_i32 : i32 to vector<16x1xi32>
    %9 = arith.cmpi slt, %7, %8 : vector<16x1xi32>
    %10 = arith.extui %9 : vector<16x1xi1> to vector<16x1xi32>
    %11 = arith.sitofp %10 : vector<16x1xi32> to vector<16x1xf32>
    %12 = vector.broadcast %11 : vector<16x1xf32> to vector<16x256xf32>
    %13 = arith.mulf %6, %12 : vector<16x256xf32>
    %cst_6 = arith.constant dense<0.000000e+00> : vector<256xf32>
    %14 = vector.multi_reduction <add>, %13, %cst_6 [0] : vector<16x256xf32> to vector<256xf32>
    %15 = vector.shape_cast %14 : vector<256xf32> to vector<1x256xf32>
    %cst_7 = arith.constant 0.111111112 : f32
    %16 = vector.broadcast %cst_7 : f32 to vector<1x256xf32>
    %17 = arith.mulf %15, %16 : vector<1x256xf32>
    %18 = arith.mulf %13, %6 : vector<16x256xf32>
    %cst_8 = arith.constant dense<0.000000e+00> : vector<256xf32>
    %19 = vector.multi_reduction <add>, %18, %cst_8 [0] : vector<16x256xf32> to vector<256xf32>
    %20 = vector.shape_cast %19 : vector<256xf32> to vector<1x256xf32>
    %cst_9 = arith.constant 0.111111112 : f32
    %21 = vector.broadcast %cst_9 : f32 to vector<1x256xf32>
    %22 = arith.mulf %20, %21 : vector<1x256xf32>
    %23 = arith.mulf %17, %17 : vector<1x256xf32>
    %24 = arith.subf %22, %23 : vector<1x256xf32>
    %cst_10 = arith.constant 0.000000e+00 : f32
    %25 = vector.broadcast %cst_10 : f32 to vector<1x256xf32>
    %26 = arith.maximumf %24, %25 : vector<1x256xf32>
    %27 = vector.broadcast %17 : vector<1x256xf32> to vector<16x256xf32>
    %28 = arith.subf %6, %27 : vector<16x256xf32>
    %cst_11 = arith.constant 9.99999974E-6 : f32
    %29 = vector.broadcast %cst_11 : f32 to vector<1x256xf32>
    %30 = arith.addf %26, %29 : vector<1x256xf32>
    %31 = math.rsqrt %30 : vector<1x256xf32>
    %32 = vector.broadcast %31 : vector<1x256xf32> to vector<16x256xf32>
    %33 = arith.mulf %28, %32 : vector<16x256xf32>
    %cst_12 = arith.constant 0.000000e+00 : f32
    %34 = vector.broadcast %cst_12 : f32 to vector<16x256xf32>
    %35 = arith.cmpf ogt, %33, %34 : vector<16x256xf32>
    %cst_13 = arith.constant 2.000000e-01 : f32
    %36 = vector.broadcast %cst_13 : f32 to vector<16x256xf32>
    %37 = arith.mulf %36, %33 : vector<16x256xf32>
    %38 = arith.select %35, %33, %37 : vector<16x256xi1>, vector<16x256xf32>
    %39 = arith.truncf %38 : vector<16x256xf32> to vector<16x256xbf16>
    %c0_14 = arith.constant 0 : index
    %c0_15 = arith.constant 0 : index
    %c0_16 = arith.constant 0 : index
    %40 = vector.load %arg5[%c0_14, %c0_15, %c0_16] : memref<1x16x256xbf16, #tpu.memory_space<vmem>>, vector<1x16x256xbf16>
    %41 = vector.shape_cast %40 : vector<1x16x256xbf16> to vector<16x256xbf16>
    %42 = vector.shape_cast %39 : vector<16x256xbf16> to vector<1x16x256xbf16>
    tpu.vector_store %arg5[%c0_14, %c0_15, %c0_16], %42 {strides = array<i32>} : memref<1x16x256xbf16, #tpu.memory_space<vmem>>, vector<1x16x256xbf16>,
    return
  }
  func.func @transform_0(%arg0: i32, %arg1: i32) -> (i32, i32, i32) {
    %c0_i32 = arith.constant 0 : i32
    %c0_i32_0 = arith.constant 0 : i32
    %c0_i32_1 = arith.constant 0 : i32
    return %arg0, %c0_i32, %c0_i32_0 : i32, i32, i32
  }
  func.func @transform_1(%arg0: i32, %arg1: i32) -> (i32, i32) {
    %c0_i32 = arith.constant 0 : i32
    %c0_i32_0 = arith.constant 0 : i32
    return %c0_i32, %arg1 : i32, i32
  }
  func.func @transform_2(%arg0: i32, %arg1: i32) -> (i32, i32) {
    %c0_i32 = arith.constant 0 : i32
    %c0_i32_0 = arith.constant 0 : i32
    return %c0_i32, %arg1 : i32, i32
  }
  func.func @transform_3(%arg0: i32, %arg1: i32) -> (i32, i32, i32) {
    %c0_i32 = arith.constant 0 : i32
    %c0_i32_0 = arith.constant 0 : i32
    return %arg0, %c0_i32, %arg1 : i32, i32, i32
  }
}

module attributes {stable_mosaic.version = 11 : i64} {
  func.func @_layer_kernel(%arg0: i32, %arg1: i32, %arg2: memref<1x8x8192xbf16, #tpu.memory_space<vmem>>, %arg3: memref<8192x128xbf16, #tpu.memory_space<vmem>>, %arg4: memref<1x128xf32, #tpu.memory_space<vmem>>, %arg5: memref<1x8x128xf32, #tpu.memory_space<vmem>>) attributes {dimension_semantics = [#tpu.dimension_semantics<parallel>, #tpu.dimension_semantics<parallel>], iteration_bounds = array<i64: 2, 1>, scalar_prefetch = 0 : i64, scratch_operands = 0 : i64, tpu.core_type = #tpu.core_type<tc>, window_params = [{transform_indices = @transform_0, window_bounds = array<i64: 1, 8, 8192>}, {transform_indices = @transform_1, window_bounds = array<i64: 8192, 128>}, {transform_indices = @transform_2, window_bounds = array<i64: 1, 128>}, {transform_indices = @transform_3, window_bounds = array<i64: 1, 8, 128>}]} {
    %c0 = arith.constant 0 : index
    %c0_0 = arith.constant 0 : index
    %c0_1 = arith.constant 0 : index
    %0 = vector.load %arg2[%c0, %c0_0, %c0_1] : memref<1x8x8192xbf16, #tpu.memory_space<vmem>>, vector<1x8x8192xbf16>
    %1 = vector.shape_cast %0 : vector<1x8x8192xbf16> to vector<8x8192xbf16>
    %c0_2 = arith.constant 0 : index
    %c0_3 = arith.constant 0 : index
    %2 = vector.load %arg3[%c0_2, %c0_3] : memref<8192x128xbf16, #tpu.memory_space<vmem>>, vector<8192x128xbf16>
    %cst = arith.constant dense<0.000000e+00> : vector<8x128xf32>
    %3 = tpu.matmul %1, %2, %cst {dimension_numbers = #tpu.dot_dimension_numbers<[1], [0], [0], [1], [0, 0, 1, 1], [], []>} : vector<8x8192xbf16>, vector<8192x128xbf16>, vector<8x128xf32> -> vector<8x128xf32>
    %c0_4 = arith.constant 0 : index
    %c0_5 = arith.constant 0 : index
    %4 = vector.load %arg4[%c0_4, %c0_5] : memref<1x128xf32, #tpu.memory_space<vmem>>, vector<1x128xf32>
    %5 = vector.broadcast %4 : vector<1x128xf32> to vector<8x128xf32>
    %6 = arith.addf %3, %5 : vector<8x128xf32>
    %c0_6 = arith.constant 0 : index
    %c0_7 = arith.constant 0 : index
    %c0_8 = arith.constant 0 : index
    %7 = vector.load %arg5[%c0_6, %c0_7, %c0_8] : memref<1x8x128xf32, #tpu.memory_space<vmem>>, vector<1x8x128xf32>
    %8 = vector.shape_cast %7 : vector<1x8x128xf32> to vector<8x128xf32>
    %9 = vector.shape_cast %6 : vector<8x128xf32> to vector<1x8x128xf32>
    tpu.vector_store %arg5[%c0_6, %c0_7, %c0_8], %9 {strides = array<i32>} : memref<1x8x128xf32, #tpu.memory_space<vmem>>, vector<1x8x128xf32>,
    return
  }
  func.func @transform_0(%arg0: i32, %arg1: i32) -> (i32, i32, i32) {
    %c0_i32 = arith.constant 0 : i32
    %c0_i32_0 = arith.constant 0 : i32
    %c0_i32_1 = arith.constant 0 : i32
    return %arg0, %c0_i32, %c0_i32_0 : i32, i32, i32
  }
  func.func @transform_1(%arg0: i32, %arg1: i32) -> (i32, i32) {
    %c0_i32 = arith.constant 0 : i32
    %c0_i32_0 = arith.constant 0 : i32
    return %c0_i32, %arg1 : i32, i32
  }
  func.func @transform_2(%arg0: i32, %arg1: i32) -> (i32, i32) {
    %c0_i32 = arith.constant 0 : i32
    %c0_i32_0 = arith.constant 0 : i32
    return %c0_i32, %arg1 : i32, i32
  }
  func.func @transform_3(%arg0: i32, %arg1: i32) -> (i32, i32, i32) {
    %c0_i32 = arith.constant 0 : i32
    %c0_i32_0 = arith.constant 0 : i32
    return %arg0, %c0_i32, %arg1 : i32, i32, i32
  }
}

</mosaic_0001>

<bundles_post_ra>
// kernel: discriminator_forward.5
= control target key start
LH: loop header
LB: loop body
LE: loop exit
PB: predicated region body
PF: predicated region fallthrough
CT: control target
= control target key end

     0   :  { %s1323_s12 = smov 0   ;;  %s1325_s13 = smov 0   ;;  %s1466_s0 = inlined_call_operand.vmem [shape: bf16[2,256,128], index: 0, kind: input, shape index: {}]   ;;  %s1467_s1 = inlined_call_operand.vmem [shape: bf16[128,128], index: 1, kind: input, shape index: {}]   ;;  %s1468_s2 = inlined_call_operand.vmem [shape: f32[1,128], index: 2, kind: input, shape index: {}]   ;;  %s1469_s3 = inlined_call_operand.vmem [shape: bf16[2,256,128], index: 3, kind: output, shape index: {}]  }
   0x1   :  { %s1327_s14 = smov 0  }
   0x2 LB: > { %s25_s15 = sadd.s32 1, %s1297_s13  ;;  %p950_p0 = scmp.ge.s32.totalorder %s1301_s14, 1  ;;  %s1301_s14 = sphi %s1327_s14, %s13_s14   ;;  %s1297_s13 = sphi %s1325_s13, %s1471_s13   ;;  %s1293_s12 = sphi %s1323_s12, %s1470_s12  }
   0x3   : > { %p27_p1 = scmp.ge.s32.totalorder %s25_s15, 2  ;;  %p168_p2 = scmp.lt.s32.totalorder %s1301_s14, 3 }
   0x5   : > { %s1473_s15 = smov (%p27_p1, %s25_s15), 0  ;;  %p169_p3 = pnand %p950_p0, %p168_p2 }
   0x6   : > { %v1255_v0 = vld [vmem:[%s1467_s1] sm:$0xff] (!%p169_p3)   ;;  %p202_p4 = scmp.lt.s32.totalorder (!%p169_p3), %s1293_s12, 1  ;;  %v1256_v1 = vld [vmem:[%s1467_s1 + $0x8] sm:$0xff] (!%p169_p3)   ;;  %v1257_v2 = vld [vmem:[%s1467_s1 + $0x10] sm:$0xff] (!%p169_p3)  }
   0x7   : > { %172 = sbr.rel (%p169_p3) target bundleno = 294 (0x126), region = 32  ;;  %1167 = vmatprep.subr.bf16.mxu0 (!%p169_p3), %v1255_v0  ;;  %1215 = vmatprep.subr.bf16.mxu1 (!%p169_p3), %v1255_v0  ;;  %v1258_v3 = vld [vmem:[%s1467_s1 + $0x18] sm:$0xff] (!%p169_p3)   ;;  %v1259_v6 = vld [vmem:[%s1467_s1 + $0x20] sm:$0xff] (!%p169_p3)   ;;  %v1260_v7 = vld [vmem:[%s1467_s1 + $0x28] sm:$0xff] (!%p169_p3)  }
   0x8   : > { %1168 = vmatpush3.bf16.msra.mxu0 (!%p169_p3), %v1255_v0  ;;  %1223 = vmatpush3.bf16.msra.mxu1 (!%p169_p3), %v1255_v0  ;;  %v1261_v8 = vld [vmem:[%s1467_s1 + $0x30] sm:$0xff] (!%p169_p3)   ;;  %v1262_v9 = vld [vmem:[%s1467_s1 + $0x38] sm:$0xff] (!%p169_p3)   ;;  %v1394_v24 = vld [vmem:[%s1468_s2] ss:$0 sm:$0xff] (!%p169_p3) }
   0x9   : > { %1169 = vmatprep.subr.bf16.mxu0 (!%p169_p3), %v1256_v1  ;;  %1216 = vmatprep.subr.bf16.mxu1 (!%p169_p3), %v1256_v1 }
   0xc   : > { %1170 = vmatpush3.bf16.msra.mxu0 (!%p169_p3), %v1256_v1  ;;  %1224 = vmatpush3.bf16.msra.mxu1 (!%p169_p3), %v1256_v1 }
   0xd   : > { %1171 = vmatprep.subr.bf16.mxu0 (!%p169_p3), %v1257_v2  ;;  %1217 = vmatprep.subr.bf16.mxu1 (!%p169_p3), %v1257_v2 }
   0xe   : > { %s1475_s12 = smov (!%p202_p4, %s1293_s12), 1 }
   0xf   : > { %s1014_s22 = sshll.u32 %s1475_s12, 7 }
  0x10   : > { %s1358_s25 = scalar_lea.vmem %s1466_s0, %s1014_s22  ;;  %1172 = vmatpush3.bf16.msra.mxu0 %v1257_v2  ;;  %1225 = vmatpush3.bf16.msra.mxu1 %v1257_v2  ;;  %s1411_s17 = scalar_lea.vmem %s1469_s3, %s1014_s22 }
  0x11   : > { %v1263_v4 = vld [vmem:[%s1358_s25] sm:$0xff]   ;;  %1173 = vmatprep.subr.bf16.mxu0 %v1258_v3  ;;  %1218 = vmatprep.subr.bf16.mxu1 %v1258_v3  ;;  %v1265_v10 = vld [vmem:[%s1358_s25 + $0x8] sm:$0xff]   ;;  %v1267_v12 = vld [vmem:[%s1358_s25 + $0x10] sm:$0xff]  }
  0x12   : > { %v1264_v5 = vld [vmem:[%s1358_s25 + $0x40] sm:$0xff]   ;;  %1183 = vmatprep.mubr.bf16.mxu0 %v1263_v4  ;;  %v1266_v11 = vld [vmem:[%s1358_s25 + $0x48] sm:$0xff]   ;;  %v1268_v13 = vld [vmem:[%s1358_s25 + $0x50] sm:$0xff]  }
  0x13   : > { %1199 = vmatprep.mubr.bf16.mxu1 %v1264_v5  ;;  %v1269_v14 = vld [vmem:[%s1358_s25 + $0x18] sm:$0xff]   ;;  %v1271_v16 = vld [vmem:[%s1358_s25 + $0x20] sm:$0xff]   ;;  %v1273_v18 = vld [vmem:[%s1358_s25 + $0x28] sm:$0xff]  }
  0x14   : > { %1174 = vmatpush3.bf16.msra.mxu0 %v1258_v3  ;;  %1226 = vmatpush3.bf16.msra.mxu1 %v1258_v3  ;;  %v1270_v15 = vld [vmem:[%s1358_s25 + $0x58] sm:$0xff]   ;;  %v1272_v17 = vld [vmem:[%s1358_s25 + $0x60] sm:$0xff]   ;;  %v1274_v19 = vld [vmem:[%s1358_s25 + $0x68] sm:$0xff]  }
  0x15   : > { %1175 = vmatprep.subr.bf16.mxu0 %v1259_v6  ;;  %1219 = vmatprep.subr.bf16.mxu1 %v1259_v6  ;;  %v1275_v20 = vld [vmem:[%s1358_s25 + $0x30] sm:$0xff]   ;;  %v1277_v22 = vld [vmem:[%s1358_s25 + $0x38] sm:$0xff]  }
  0x16   : > { %v1276_v21 = vld [vmem:[%s1358_s25 + $0x70] sm:$0xff]   ;;  %v1278_v23 = vld [vmem:[%s1358_s25 + $0x78] sm:$0xff]  }
  0x18   : > { %1176 = vmatpush3.bf16.msra.mxu0 %v1259_v6  ;;  %1227 = vmatpush3.bf16.msra.mxu1 %v1259_v6 }
  0x19   : > { %1177 = vmatprep.subr.bf16.mxu0 %v1260_v7  ;;  %1220 = vmatprep.subr.bf16.mxu1 %v1260_v7 }
  0x1c   : > { %1178 = vmatpush3.bf16.msra.mxu0 %v1260_v7  ;;  %1228 = vmatpush3.bf16.msra.mxu1 %v1260_v7 }
  0x1d   : > { %1179 = vmatprep.subr.bf16.mxu0 %v1261_v8  ;;  %1221 = vmatprep.subr.bf16.mxu1 %v1261_v8 }
  0x20   : > { %1180 = vmatpush3.bf16.msra.mxu0 %v1261_v8  ;;  %1229 = vmatpush3.bf16.msra.mxu1 %v1261_v8 }
  0x21   : > { %1181 = vmatprep.subr.bf16.mxu0 %v1262_v9  ;;  %1222 = vmatprep.subr.bf16.mxu1 %v1262_v9 }
  0x24   : > { %1182 = vmatpush3.bf16.msra.mxu0 %v1262_v9  ;;  %1230 = vmatpush3.bf16.msra.mxu1 %v1262_v9 }
  0x27   : > { %1184 = vmatmul.mubr.bf16.vlgmr.msra.gmra.mrb[0].mxu0 %v1265_v10  ;;  %1200 = vmatmul.mubr.bf16.vlgmr.msra.gmra.mrb[0].mxu1 %v1266_v11 }
  0x28   : > { %1187 = vmatprep.mubr.bf16.mxu0 %v1267_v12  ;;  %1203 = vmatprep.mubr.bf16.mxu1 %v1268_v13 }
  0x2f   : > { %1188 = vmatmul.mubr.bf16.gmra.mrb[4].mxu0 %v1269_v14  ;;  %1204 = vmatmul.mubr.bf16.gmra.mrb[4].mxu1 %v1270_v15 }
  0x30   : > { %1191 = vmatprep.mubr.bf16.mxu0 %v1271_v16  ;;  %1207 = vmatprep.mubr.bf16.mxu1 %v1272_v17 }
  0x37   : > { %1192 = vmatmul.mubr.bf16.gmra.mrb[8].mxu0 %v1273_v18  ;;  %1208 = vmatmul.mubr.bf16.gmra.mrb[8].mxu1 %v1274_v19 }
  0x38   : > { %1195 = vmatprep.mubr.bf16.mxu0 %v1275_v20  ;;  %1211 = vmatprep.mubr.bf16.mxu1 %v1276_v21 }
  0x3f   : > { %1196 = vmatmul.mubr.bf16.gmra.mrb[12].mxu0 %v1277_v22  ;;  %1212 = vmatmul.mubr.bf16.gmra.mrb[12].mxu1 %v1278_v23 }
  0xfa   : > { %v1185_v25 = vpop.f32.mrb[0].mxu0  ;;  %v1201_v26 = vpop.f32.mrb[0].mxu1 }
  0xfb   : > { %v465_v27 = vadd.f32 %v1185_v25, %v1394_v24  ;;  %v529_v28 = vadd.f32 %v1201_v26, %v1394_v24  ;;  %v456_v29 = vpop.f32.mrb[1].mxu0  ;;  %v520_v30 = vpop.f32.mrb[1].mxu1 }
  0xfc   : > { %v457_v31 = vadd.f32 %v1394_v24, %v456_v29  ;;  %v521_v32 = vadd.f32 %v1394_v24, %v520_v30  ;;  %v1186_v33 = vpop.f32.mrb[2].mxu0  ;;  %v1202_v34 = vpop.f32.mrb[2].mxu1 }
  0xfd   : > { %vm585_vm0 = vcmp.gt.f32.partialorder %v465_v27, 0.0  ;;  %v617_v35 = vmul.f32 0.2, %v465_v27  ;;  %vm601_vm1 = vcmp.gt.f32.partialorder %v529_v28, 0.0  ;;  %v633_v36 = vmul.f32 0.2, %v529_v28 }
  0xfe   : > { %vm583_vm2 = vcmp.gt.f32.partialorder %v457_v31, 0.0  ;;  %v615_v37 = vmul.f32 0.2, %v457_v31  ;;  %vm599_vm3 = vcmp.gt.f32.partialorder %v521_v32, 0.0  ;;  %v631_v38 = vmul.f32 0.2, %v521_v32 }
  0xff   : > { %v468_v39 = vadd.f32 %v1186_v33, %v1394_v24  ;;  %v532_v40 = vadd.f32 %v1202_v34, %v1394_v24  ;;  %v459_v41 = vpop.f32.mrb[3].mxu0  ;;  %v523_v42 = vpop.f32.mrb[3].mxu1  ;;  %v649_v43 = vsel %vm585_vm0, %v465_v27, %v617_v35  ;;  %v665_v44 = vsel %vm601_vm1, %v529_v28, %v633_v36 }
 0x100   : > { %v460_v45 = vadd.f32 %v1394_v24, %v459_v41  ;;  %v524_v46 = vadd.f32 %v1394_v24, %v523_v42  ;;  %v647_v51 = vsel %vm583_vm2, %v457_v31, %v615_v37  ;;  %v663_v52 = vsel %vm599_vm3, %v521_v32, %v631_v38 }
 0x101   : > { %vm586_vm4 = vcmp.gt.f32.partialorder %v468_v39, 0.0  ;;  %v618_v47 = vmul.f32 0.2, %v468_v39  ;;  %vm602_vm5 = vcmp.gt.f32.partialorder %v532_v40, 0.0  ;;  %v634_v48 = vmul.f32 0.2, %v532_v40 }
 0x102   : > { %vm584_vm6 = vcmp.gt.f32.partialorder %v460_v45, 0.0  ;;  %v616_v49 = vmul.f32 0.2, %v460_v45  ;;  %vm600_vm7 = vcmp.gt.f32.partialorder %v524_v46, 0.0  ;;  %v632_v50 = vmul.f32 0.2, %v524_v46 }
 0x103   : > { %v650_v53 = vsel %vm586_vm4, %v468_v39, %v618_v47  ;;  %v666_v54 = vsel %vm602_vm5, %v532_v40, %v634_v48  ;;  %v1189_v55 = vpop.f32.mrb[4].mxu0  ;;  %v1205_v56 = vpop.f32.mrb[4].mxu1 }
 0x104   : > { %v1056_v57 = vpack.c.bf16 %v650_v53, %v649_v43  ;;  %v1096_v58 = vpack.c.bf16 %v666_v54, %v665_v44  ;;  %v648_v59 = vsel %vm584_vm6, %v460_v45, %v616_v49  ;;  %v664_v60 = vsel %vm600_vm7, %v524_v46, %v632_v50  ;;  %v472_v61 = vpop.f32.mrb[5].mxu0  ;;  %v536_v62 = vpop.f32.mrb[5].mxu1 }
 0x105   : > { %v1051_v63 = vpack.c.bf16 %v648_v59, %v647_v51  ;;  %v1091_v0 = vpack.c.bf16 %v664_v60, %v663_v52  ;;  %v481_v1 = vadd.f32 %v1189_v55, %v1394_v24  ;;  %v545_v2 = vadd.f32 %v1205_v56, %v1394_v24  ;;  %v1190_v3 = vpop.f32.mrb[6].mxu0  ;;  %v1206_v4 = vpop.f32.mrb[6].mxu1 }
 0x106   : > { %1128 = vst [vmem:[%s1411_s17 + $0x8] sm:$0xff] %v1056_v57   ;;  %1136 = vst [vmem:[%s1411_s17 + $0x48] sm:$0xff] %v1096_v58   ;;  %v473_v5 = vadd.f32 %v1394_v24, %v472_v61  ;;  %v537_v6 = vadd.f32 %v1394_v24, %v536_v62  ;;  %v484_v7 = vadd.f32 %v1190_v3, %v1394_v24  ;;  %v475_v9 = vpop.f32.mrb[7].mxu0  ;;  %v539_v10 = vpop.f32.mrb[7].mxu1 }
 0x107   : > { %v548_v8 = vadd.f32 %v1206_v4, %v1394_v24  ;;  %1052 = vst [vmem:[%s1411_s17] sm:$0xff] %v1051_v63   ;;  %1135 = vst [vmem:[%s1411_s17 + $0x40] sm:$0xff] %v1091_v0   ;;  %vm589_vm8 = vcmp.gt.f32.partialorder %v481_v1, 0.0  ;;  %v621_v11 = vmul.f32 0.2, %v481_v1  ;;  %vm605_vm9 = vcmp.gt.f32.partialorder %v545_v2, 0.0 }
 0x108   : > { %v637_v12 = vmul.f32 0.2, %v545_v2  ;;  %vm587_vm10 = vcmp.gt.f32.partialorder %v473_v5, 0.0  ;;  %v619_v13 = vmul.f32 0.2, %v473_v5  ;;  %vm603_vm11 = vcmp.gt.f32.partialorder %v537_v6, 0.0 }
 0x109   : > { %v653_v14 = vsel %vm589_vm8, %v481_v1, %v621_v11  ;;  %v635_v15 = vmul.f32 0.2, %v537_v6  ;;  %vm590_vm12 = vcmp.gt.f32.partialorder %v484_v7, 0.0  ;;  %v622_v16 = vmul.f32 0.2, %v484_v7 }
 0x10a   : > { %v669_v17 = vsel %vm605_vm9, %v545_v2, %v637_v12  ;;  %v651_v18 = vsel %vm587_vm10, %v473_v5, %v619_v13  ;;  %vm606_vm13 = vcmp.gt.f32.partialorder %v548_v8, 0.0  ;;  %v638_v19 = vmul.f32 0.2, %v548_v8  ;;  %v1193_v20 = vpop.f32.mrb[8].mxu0  ;;  %v1209_v21 = vpop.f32.mrb[8].mxu1 }
 0x10b   : > { %v654_v22 = vsel %vm590_vm12, %v484_v7, %v622_v16  ;;  %v476_v23 = vadd.f32 %v1394_v24, %v475_v9  ;;  %v540_v25 = vadd.f32 %v1394_v24, %v539_v10  ;;  %v497_v26 = vadd.f32 %v1193_v20, %v1394_v24  ;;  %v488_v27 = vpop.f32.mrb[9].mxu0  ;;  %v552_v28 = vpop.f32.mrb[9].mxu1 }
 0x10c   : > { %v1066_v29 = vpack.c.bf16 %v654_v22, %v653_v14  ;;  %v670_v30 = vsel %vm606_vm13, %v548_v8, %v638_v19  ;;  %v561_v31 = vadd.f32 %v1209_v21, %v1394_v24  ;;  %v489_v32 = vadd.f32 %v1394_v24, %v488_v27  ;;  %v1194_v33 = vpop.f32.mrb[10].mxu0  ;;  %v1210_v34 = vpop.f32.mrb[10].mxu1 }
 0x10d   : > { %v1106_v35 = vpack.c.bf16 %v670_v30, %v669_v17  ;;  %vm588_vm14 = vcmp.gt.f32.partialorder %v476_v23, 0.0  ;;  %v620_v36 = vmul.f32 0.2, %v476_v23  ;;  %vm604_vm15 = vcmp.gt.f32.partialorder %v540_v25, 0.0  ;;  %v491_v37 = vpop.f32.mrb[11].mxu0  ;;  %v555_v38 = vpop.f32.mrb[11].mxu1 }
 0x10e   : > { %1130 = vst [vmem:[%s1411_s17 + $0x18] sm:$0xff] %v1066_v29   ;;  %v636_v39 = vmul.f32 0.2, %v540_v25  ;;  %vm593_vm0 = vcmp.gt.f32.partialorder %v497_v26, 0.0  ;;  %v625_v40 = vmul.f32 0.2, %v497_v26  ;;  %v667_v41 = vsel %vm603_vm11, %v537_v6, %v635_v15 }
 0x10f   : > { %vm609_vm1 = vcmp.gt.f32.partialorder %v561_v31, 0.0  ;;  %1138 = vst [vmem:[%s1411_s17 + $0x58] sm:$0xff] %v1106_v35   ;;  %v652_v42 = vsel %vm588_vm14, %v476_v23, %v620_v36  ;;  %v641_v43 = vmul.f32 0.2, %v561_v31  ;;  %vm591_vm2 = vcmp.gt.f32.partialorder %v489_v32, 0.0 }
 0x110   : > { %v1061_v44 = vpack.c.bf16 %v652_v42, %v651_v18  ;;  %v668_v45 = vsel %vm604_vm15, %v540_v25, %v636_v39  ;;  %v623_v46 = vmul.f32 0.2, %v489_v32  ;;  %v553_v47 = vadd.f32 %v1394_v24, %v552_v28 }
 0x111   : > { %v1101_v48 = vpack.c.bf16 %v668_v45, %v667_v41  ;;  %v657_v49 = vsel %vm593_vm0, %v497_v26, %v625_v40  ;;  %v673_v50 = vsel %vm609_vm1, %v561_v31, %v641_v43  ;;  %v500_v51 = vadd.f32 %v1194_v33, %v1394_v24 }
 0x112   : > { %1129 = vst [vmem:[%s1411_s17 + $0x10] sm:$0xff] %v1061_v44   ;;  %vm607_vm3 = vcmp.gt.f32.partialorder %v553_v47, 0.0  ;;  %v639_v52 = vmul.f32 0.2, %v553_v47  ;;  %v564_v53 = vadd.f32 %v1210_v34, %v1394_v24  ;;  %v492_v54 = vadd.f32 %v1394_v24, %v491_v37  ;;  %v1197_v55 = vpop.f32.mrb[12].mxu0  ;;  %v1213_v56 = vpop.f32.mrb[12].mxu1 }
 0x113   : > { %1137 = vst [vmem:[%s1411_s17 + $0x50] sm:$0xff] %v1101_v48   ;;  %vm594_vm4 = vcmp.gt.f32.partialorder %v500_v51, 0.0  ;;  %v626_v57 = vmul.f32 0.2, %v500_v51  ;;  %v556_v58 = vadd.f32 %v1394_v24, %v555_v38  ;;  %v513_v59 = vadd.f32 %v1197_v55, %v1394_v24  ;;  %v504_v60 = vpop.f32.mrb[13].mxu0  ;;  %v568_v61 = vpop.f32.mrb[13].mxu1 }
 0x114   : > { %v655_v62 = vsel %vm591_vm2, %v489_v32, %v623_v46  ;;  %vm610_vm5 = vcmp.gt.f32.partialorder %v564_v53, 0.0  ;;  %v642_v63 = vmul.f32 0.2, %v564_v53  ;;  %vm592_vm6 = vcmp.gt.f32.partialorder %v492_v54, 0.0  ;;  %v1198_v0 = vpop.f32.mrb[14].mxu0  ;;  %v1214_v1 = vpop.f32.mrb[14].mxu1 }
 0x115   : > { %v658_v2 = vsel %vm594_vm4, %v500_v51, %v626_v57  ;;  %v624_v3 = vmul.f32 0.2, %v492_v54  ;;  %vm608_vm7 = vcmp.gt.f32.partialorder %v556_v58, 0.0  ;;  %v640_v4 = vmul.f32 0.2, %v556_v58  ;;  %v507_v5 = vpop.f32.mrb[15].mxu0 }
 0x116   : > { %v671_v6 = vsel %vm607_vm3, %v553_v47, %v639_v52  ;;  %v1076_v7 = vpack.c.bf16 %v658_v2, %v657_v49  ;;  %v674_v8 = vsel %vm610_vm5, %v564_v53, %v642_v63  ;;  %v629_v9 = vmul.f32 0.2, %v513_v59  ;;  %v571_v10 = vpop.f32.mrb[15].mxu1 }
 0x117   : > { %v1116_v11 = vpack.c.bf16 %v674_v8, %v673_v50  ;;  %v656_v12 = vsel %vm592_vm6, %v492_v54, %v624_v3  ;;  %v672_v13 = vsel %vm608_vm7, %v556_v58, %v640_v4  ;;  %v577_v14 = vadd.f32 %v1213_v56, %v1394_v24 }
 0x118   : > { %1132 = vst [vmem:[%s1411_s17 + $0x28] sm:$0xff] %v1076_v7   ;;  %v1071_v15 = vpack.c.bf16 %v656_v12, %v655_v62  ;;  %v1111_v16 = vpack.c.bf16 %v672_v13, %v671_v6  ;;  %vm597_vm8 = vcmp.gt.f32.partialorder %v513_v59, 0.0  ;;  %v505_v17 = vadd.f32 %v1394_v24, %v504_v60 }
 0x119   : > { %1140 = vst [vmem:[%s1411_s17 + $0x68] sm:$0xff] %v1116_v11   ;;  %vm613_vm9 = vcmp.gt.f32.partialorder %v577_v14, 0.0  ;;  %v645_v18 = vmul.f32 0.2, %v577_v14  ;;  %v569_v19 = vadd.f32 %v1394_v24, %v568_v61  ;;  %v516_v20 = vadd.f32 %v1198_v0, %v1394_v24 }
 0x11a   : > { %1131 = vst [vmem:[%s1411_s17 + $0x20] sm:$0xff] %v1071_v15   ;;  %1139 = vst [vmem:[%s1411_s17 + $0x60] sm:$0xff] %v1111_v16   ;;  %v627_v21 = vmul.f32 0.2, %v505_v17  ;;  %v580_v22 = vadd.f32 %v1214_v1, %v1394_v24  ;;  %v508_v23 = vadd.f32 %v1394_v24, %v507_v5  ;;  %v661_v25 = vsel %vm597_vm8, %v513_v59, %v629_v9 }
 0x11b   : > { %vm595_vm10 = vcmp.gt.f32.partialorder %v505_v17, 0.0  ;;  %vm598_vm11 = vcmp.gt.f32.partialorder %v516_v20, 0.0  ;;  %v677_v26 = vsel %vm613_vm9, %v577_v14, %v645_v18  ;;  %v630_v27 = vmul.f32 0.2, %v516_v20 }
 0x11c   : > { %vm614_vm12 = vcmp.gt.f32.partialorder %v580_v22, 0.0  ;;  %v646_v28 = vmul.f32 0.2, %v580_v22  ;;  %vm611_vm13 = vcmp.gt.f32.partialorder %v569_v19, 0.0  ;;  %vm596_vm14 = vcmp.gt.f32.partialorder %v508_v23, 0.0 }
 0x11d   : > { %v628_v29 = vmul.f32 0.2, %v508_v23  ;;  %v572_v30 = vadd.f32 %v1394_v24, %v571_v10  ;;  %v659_v31 = vsel %vm595_vm10, %v505_v17, %v627_v21  ;;  %v643_v32 = vmul.f32 0.2, %v569_v19 }
 0x11e   : > { %v662_v33 = vsel %vm598_vm11, %v516_v20, %v630_v27  ;;  %v678_v34 = vsel %vm614_vm12, %v580_v22, %v646_v28 }
 0x11f   : > { %v1086_v35 = vpack.c.bf16 %v662_v33, %v661_v25  ;;  %v1126_v36 = vpack.c.bf16 %v678_v34, %v677_v26  ;;  %v660_v37 = vsel %vm596_vm14, %v508_v23, %v628_v29  ;;  %vm612_vm15 = vcmp.gt.f32.partialorder %v572_v30, 0.0 }
 0x120   : > { %v1081_v38 = vpack.c.bf16 %v660_v37, %v659_v31  ;;  %v644_v39 = vmul.f32 0.2, %v572_v30  ;;  %v675_v40 = vsel %vm611_vm13, %v569_v19, %v643_v32 }
 0x121   : > { %1134 = vst [vmem:[%s1411_s17 + $0x38] sm:$0xff] %v1086_v35   ;;  %1142 = vst [vmem:[%s1411_s17 + $0x78] sm:$0xff] %v1126_v36  }
 0x122   : > { %1133 = vst [vmem:[%s1411_s17 + $0x30] sm:$0xff] %v1081_v38   ;;  %v676_v41 = vsel %vm612_vm15, %v572_v30, %v644_v39 }
 0x123   : > { %v1121_v42 = vpack.c.bf16 %v676_v41, %v675_v40 }
 0x125   : > { %1141 = vst [vmem:[%s1411_s17 + $0x70] sm:$0xff] %v1121_v42  }
 0x126 PF: > { %s13_s14 = sadd.s32 1, %s1301_s14   ;;  %s1470_s12 = smov %s1297_s13 }
 0x127   : > { %p10_p5 = scmp.ge.s32.totalorder %s13_s14, 4   ;;  %s1471_s13 = smov %s1473_s15 }
 0x129   :  { %12 = sbr.rel (!%p10_p5) target bundleno = 2 (0x2), region = 68 }

// kernel: discriminator_forward.6
= control target key start
LH: loop header
LB: loop body
LE: loop exit
PB: predicated region body
PF: predicated region fallthrough
CT: control target
= control target key end

     0   :  { %s1866_s12 = smov 0   ;;  %s1868_s13 = smov 0   ;;  %s2195_s0 = inlined_call_operand.vmem [shape: bf16[2,64,1024], index: 0, kind: input, shape index: {}]   ;;  %s2196_s1 = inlined_call_operand.vmem [shape: bf16[1024,128], index: 1, kind: input, shape index: {}]   ;;  %s2197_s2 = inlined_call_operand.vmem [shape: f32[1,128], index: 2, kind: input, shape index: {}]   ;;  %s2198_s3 = inlined_call_operand.vmem [shape: bf16[2,64,128], index: 3, kind: output, shape index: {}]  }
   0x1   :  { %s1870_s14 = smov 0  }
   0x2 LB: > { %s25_s15 = sadd.s32 1, %s1840_s13  ;;  %p1427_p0 = scmp.ge.s32.totalorder %s1844_s14, 1  ;;  %s1844_s14 = sphi %s1870_s14, %s13_s14   ;;  %s1840_s13 = sphi %s1868_s13, %s2200_s13   ;;  %s1836_s12 = sphi %s1866_s12, %s2199_s12  }
   0x3   : > { %p27_p1 = scmp.ge.s32.totalorder %s25_s15, 2  ;;  %p168_p2 = scmp.lt.s32.totalorder %s1844_s14, 3 }
   0x5   : > { %s2202_s15 = smov (%p27_p1, %s25_s15), 0  ;;  %p169_p3 = pnand %p1427_p0, %p168_p2 }
   0x6   : > { %v1756_v0 = vld [vmem:[%s2196_s1 + $0x40] sm:$0xff] (!%p169_p3)   ;;  %v1760_v4 = vld [vmem:[%s2196_s1 + $0x48] sm:$0xff] (!%p169_p3)   ;;  %v1764_v8 = vld [vmem:[%s2196_s1 + $0x50] sm:$0xff] (!%p169_p3)   ;;  %p202_p4 = scmp.lt.s32.totalorder (!%p169_p3), %s1836_s12, 1 }
   0x7   : > { %172 = sbr.rel (%p169_p3) target bundleno = 364 (0x16c), region = 32  ;;  %v1757_v1 = vld [vmem:[%s2196_s1 + $0xc0] sm:$0xff] (!%p169_p3)   ;;  %1572 = vmatprep.subr.bf16.mxu0 (!%p169_p3), %v1756_v0  ;;  %v1761_v5 = vld [vmem:[%s2196_s1 + $0xc8] sm:$0xff] (!%p169_p3)   ;;  %v1765_v9 = vld [vmem:[%s2196_s1 + $0xd0] sm:$0xff] (!%p169_p3)  }
   0x8   : > { %v1758_v2 = vld [vmem:[%s2196_s1] sm:$0xff] (!%p169_p3)   ;;  %1612 = vmatprep.subr.bf16.mxu1 (!%p169_p3), %v1757_v1  ;;  %v1762_v6 = vld [vmem:[%s2196_s1 + $0x8] sm:$0xff] (!%p169_p3)   ;;  %v1766_v10 = vld [vmem:[%s2196_s1 + $0x10] sm:$0xff] (!%p169_p3)  }
   0x9   : > { %v1759_v3 = vld [vmem:[%s2196_s1 + $0x80] sm:$0xff] (!%p169_p3)   ;;  %1573 = vmatpush3.bf16.msra.mxu0 (!%p169_p3), %v1758_v2  ;;  %v1763_v7 = vld [vmem:[%s2196_s1 + $0x88] sm:$0xff] (!%p169_p3)   ;;  %v1767_v11 = vld [vmem:[%s2196_s1 + $0x90] sm:$0xff] (!%p169_p3)  }
   0xa   : > { %1613 = vmatpush3.bf16.msra.mxu1 (!%p169_p3), %v1759_v3  ;;  %1574 = vmatprep.subr.bf16.mxu0 (!%p169_p3), %v1760_v4  ;;  %v1768_v12 = vld [vmem:[%s2196_s1 + $0x58] sm:$0xff] (!%p169_p3)   ;;  %v1772_v16 = vld [vmem:[%s2196_s1 + $0x60] sm:$0xff] (!%p169_p3)   ;;  %v1776_v20 = vld [vmem:[%s2196_s1 + $0x68] sm:$0xff] (!%p169_p3)  }
   0xb   : > { %1614 = vmatprep.subr.bf16.mxu1 (!%p169_p3), %v1761_v5  ;;  %v1769_v13 = vld [vmem:[%s2196_s1 + $0xd8] sm:$0xff] (!%p169_p3)   ;;  %v1773_v17 = vld [vmem:[%s2196_s1 + $0xe0] sm:$0xff] (!%p169_p3)   ;;  %v1777_v21 = vld [vmem:[%s2196_s1 + $0xe8] sm:$0xff] (!%p169_p3)  }
   0xc   : > { %v1770_v14 = vld [vmem:[%s2196_s1 + $0x18] sm:$0xff] (!%p169_p3)   ;;  %v1774_v18 = vld [vmem:[%s2196_s1 + $0x20] sm:$0xff] (!%p169_p3)   ;;  %v1778_v22 = vld [vmem:[%s2196_s1 + $0x28] sm:$0xff] (!%p169_p3)  }
   0xd   : > { %1575 = vmatpush3.bf16.msra.mxu0 (!%p169_p3), %v1762_v6  ;;  %v1771_v15 = vld [vmem:[%s2196_s1 + $0x98] sm:$0xff] (!%p169_p3)   ;;  %v1775_v19 = vld [vmem:[%s2196_s1 + $0xa0] sm:$0xff] (!%p169_p3)   ;;  %v1779_v23 = vld [vmem:[%s2196_s1 + $0xa8] sm:$0xff] (!%p169_p3)  }
   0xe   : > { %1615 = vmatpush3.bf16.msra.mxu1 %v1763_v7  ;;  %1576 = vmatprep.subr.bf16.mxu0 %v1764_v8  ;;  %s2204_s12 = smov (!%p202_p4, %s1836_s12), 1  ;;  %v1780_v24 = vld [vmem:[%s2196_s1 + $0x70] sm:$0xff]   ;;  %v1784_v28 = vld [vmem:[%s2196_s1 + $0x78] sm:$0xff]   ;;  %v1788_v40 = vld [vmem:[%s2196_s1 + $0x140] sm:$0xff]  }
   0xf   : > { %1616 = vmatprep.subr.bf16.mxu1 %v1765_v9  ;;  %v1781_v25 = vld [vmem:[%s2196_s1 + $0xf0] sm:$0xff]   ;;  %s1539_s24 = sshll.u32 %s2204_s12, 8  ;;  %v1785_v29 = vld [vmem:[%s2196_s1 + $0xf8] sm:$0xff]   ;;  %v1789_v41 = vld [vmem:[%s2196_s1 + $0x1c0] sm:$0xff]  }
  0x10   : > { %v1782_v26 = vld [vmem:[%s2196_s1 + $0x30] sm:$0xff]   ;;  %s1984_s6 = scalar_lea.vmem %s2195_s0, %s1539_s24  ;;  %v1786_v30 = vld [vmem:[%s2196_s1 + $0x38] sm:$0xff]   ;;  %v1790_v42 = vld [vmem:[%s2196_s1 + $0x100] sm:$0xff]  }
  0x11   : > { %1577 = vmatpush3.bf16.msra.mxu0 %v1766_v10  ;;  %v1783_v27 = vld [vmem:[%s2196_s1 + $0xb0] sm:$0xff]   ;;  %v1787_v31 = vld [vmem:[%s2196_s1 + $0xb8] sm:$0xff]   ;;  %v223_v32 = vld [vmem:[%s1984_s6] sm:$0xff] }
  0x12   : > { %1617 = vmatpush3.bf16.msra.mxu1 %v1767_v11  ;;  %1578 = vmatprep.subr.bf16.mxu0 %v1768_v12  ;;  %v227_v33 = vld [vmem:[%s1984_s6 + $0x20] sm:$0xff]  ;;  %v224_v34 = vld [vmem:[%s1984_s6 + $0x8] sm:$0xff]  ;;  %v1796_v56 = vld [vmem:[%s2196_s1 + $0x150] sm:$0xff]  }
  0x13   : > { %1618 = vmatprep.subr.bf16.mxu1 %v1769_v13  ;;  %v1433_v35 = vcombine.low %v223_v32, %v227_v33  ;;  %v1434_v36 = vcombine.high %v223_v32, %v227_v33  ;;  %v228_v37 = vld [vmem:[%s1984_s6 + $0x28] sm:$0xff]  ;;  %v1791_v43 = vld [vmem:[%s2196_s1 + $0x180] sm:$0xff]   ;;  %v1797_v57 = vld [vmem:[%s2196_s1 + $0x1d0] sm:$0xff]  }
  0x14   : > { %v1435_v38 = vcombine.low %v224_v34, %v228_v37  ;;  %v1436_v39 = vcombine.high %v224_v34, %v228_v37  ;;  %v1792_v44 = vld [vmem:[%s2196_s1 + $0x148] sm:$0xff]   ;;  %v231_v48 = vld [vmem:[%s1984_s6 + $0x40] sm:$0xff]  ;;  %v1798_v58 = vld [vmem:[%s2196_s1 + $0x110] sm:$0xff]  }
  0x15   : > { %1579 = vmatpush3.bf16.msra.mxu0 %v1770_v14  ;;  %966 = vmatprep.mubr.bf16.mxu0 %v1434_v36  ;;  %v1793_v45 = vld [vmem:[%s2196_s1 + $0x1c8] sm:$0xff]   ;;  %v235_v49 = vld [vmem:[%s1984_s6 + $0x60] sm:$0xff]  ;;  %v1799_v59 = vld [vmem:[%s2196_s1 + $0x190] sm:$0xff]  }
  0x16   : > { %1619 = vmatpush3.bf16.msra.mxu1 %v1771_v15  ;;  %1580 = vmatprep.subr.bf16.mxu0 %v1772_v16  ;;  %v1794_v46 = vld [vmem:[%s2196_s1 + $0x108] sm:$0xff]   ;;  %v1442_v50 = vcombine.high %v231_v48, %v235_v49  ;;  %v1441_v53 = vcombine.low %v231_v48, %v235_v49  ;;  %v1800_v60 = vld [vmem:[%s2196_s1 + $0x158] sm:$0xff]   ;;  %v239_v0 = vld [vmem:[%s1984_s6 + $0x80] sm:$0xff] }
  0x17   : > { %1620 = vmatprep.subr.bf16.mxu1 %v1773_v17  ;;  %1031 = vmatprep.mubr.bf16.mxu1 %v1436_v39  ;;  %v1795_v47 = vld [vmem:[%s2196_s1 + $0x188] sm:$0xff]   ;;  %v1801_v61 = vld [vmem:[%s2196_s1 + $0x1d8] sm:$0xff]   ;;  %v243_v1 = vld [vmem:[%s1984_s6 + $0xa0] sm:$0xff] }
  0x18   : > { %v232_v51 = vld [vmem:[%s1984_s6 + $0x48] sm:$0xff]  ;;  %v1802_v62 = vld [vmem:[%s2196_s1 + $0x118] sm:$0xff]   ;;  %v1450_v4 = vcombine.high %v239_v0, %v243_v1  ;;  %v1449_v6 = vcombine.low %v239_v0, %v243_v1  ;;  %v1804_v8 = vld [vmem:[%s2196_s1 + $0x160] sm:$0xff]  }
  0x19   : > { %1581 = vmatpush3.bf16.msra.mxu0 %v1774_v18  ;;  %v236_v52 = vld [vmem:[%s1984_s6 + $0x68] sm:$0xff]  ;;  %v1803_v63 = vld [vmem:[%s2196_s1 + $0x198] sm:$0xff]   ;;  %v1805_v9 = vld [vmem:[%s2196_s1 + $0x1e0] sm:$0xff]  }
  0x1a   : > { %1621 = vmatpush3.bf16.msra.mxu1 %v1775_v19  ;;  %1582 = vmatprep.subr.bf16.mxu0 %v1776_v20  ;;  %v1444_v54 = vcombine.high %v232_v51, %v236_v52  ;;  %v1443_v55 = vcombine.low %v232_v51, %v236_v52  ;;  %v240_v2 = vld [vmem:[%s1984_s6 + $0x88] sm:$0xff]  ;;  %v1806_v10 = vld [vmem:[%s2196_s1 + $0x120] sm:$0xff]   ;;  %v225_v32 = vld [vmem:[%s1984_s6 + $0x10] sm:$0xff] }
  0x1b   : > { %1622 = vmatprep.subr.bf16.mxu1 %v1777_v21  ;;  %v244_v3 = vld [vmem:[%s1984_s6 + $0xa8] sm:$0xff]  ;;  %v1807_v11 = vld [vmem:[%s2196_s1 + $0x1a0] sm:$0xff]   ;;  %v229_v33 = vld [vmem:[%s1984_s6 + $0x30] sm:$0xff] }
  0x1c   : > { %v1452_v5 = vcombine.high %v240_v2, %v244_v3  ;;  %v1451_v7 = vcombine.low %v240_v2, %v244_v3  ;;  %v1808_v12 = vld [vmem:[%s2196_s1 + $0x168] sm:$0xff]   ;;  %v247_v16 = vld [vmem:[%s1984_s6 + $0xc0] sm:$0xff]  ;;  %v1437_v34 = vcombine.low %v225_v32, %v229_v33  ;;  %v226_v36 = vld [vmem:[%s1984_s6 + $0x18] sm:$0xff] }
  0x1d   : > { %1583 = vmatpush3.bf16.msra.mxu0 %v1778_v22  ;;  %v1809_v13 = vld [vmem:[%s2196_s1 + $0x1e8] sm:$0xff]   ;;  %v251_v17 = vld [vmem:[%s1984_s6 + $0xe0] sm:$0xff]  ;;  %v230_v37 = vld [vmem:[%s1984_s6 + $0x38] sm:$0xff] }
  0x1e   : > { %1623 = vmatpush3.bf16.msra.mxu1 %v1779_v23  ;;  %1584 = vmatprep.subr.bf16.mxu0 %v1780_v24  ;;  %v1810_v14 = vld [vmem:[%s2196_s1 + $0x128] sm:$0xff]   ;;  %v1458_v19 = vcombine.high %v247_v16, %v251_v17  ;;  %v1457_v21 = vcombine.low %v247_v16, %v251_v17  ;;  %v1812_v24 = vld [vmem:[%s2196_s1 + $0x170] sm:$0xff]   ;;  %v1439_v39 = vcombine.low %v226_v36, %v230_v37  ;;  %v242_v48 = vld [vmem:[%s1984_s6 + $0x98] sm:$0xff] }
  0x1f   : > { %1624 = vmatprep.subr.bf16.mxu1 %v1781_v25  ;;  %v1811_v15 = vld [vmem:[%s2196_s1 + $0x1a8] sm:$0xff]   ;;  %v1813_v25 = vld [vmem:[%s2196_s1 + $0x1f0] sm:$0xff]   ;;  %v246_v49 = vld [vmem:[%s1984_s6 + $0xb8] sm:$0xff] }
  0x20   : > { %v248_v18 = vld [vmem:[%s1984_s6 + $0xc8] sm:$0xff]  ;;  %v1432_v2 = vld [vmem:[%s2197_s2] ss:$0 sm:$0xff] }
  0x21   : > { %1585 = vmatpush3.bf16.msra.mxu0 %v1782_v26  ;;  %v252_v20 = vld [vmem:[%s1984_s6 + $0xe8] sm:$0xff]  ;;  %v1814_v26 = vld [vmem:[%s2196_s1 + $0x130] sm:$0xff]  }
  0x22   : > { %1625 = vmatpush3.bf16.msra.mxu1 %v1783_v27  ;;  %1586 = vmatprep.subr.bf16.mxu0 %v1784_v28  ;;  %v1460_v22 = vcombine.high %v248_v18, %v252_v20  ;;  %v1459_v23 = vcombine.low %v248_v18, %v252_v20  ;;  %v1815_v27 = vld [vmem:[%s2196_s1 + $0x1b0] sm:$0xff]   ;;  %v1816_v28 = vld [vmem:[%s2196_s1 + $0x178] sm:$0xff]  }
  0x23   : > { %1626 = vmatprep.subr.bf16.mxu1 %v1785_v29  ;;  %v1817_v29 = vld [vmem:[%s2196_s1 + $0x1f8] sm:$0xff]  }
  0x25   : > { %1587 = vmatpush3.bf16.msra.mxu0 %v1786_v30  ;;  %v1818_v30 = vld [vmem:[%s2196_s1 + $0x138] sm:$0xff]  }
  0x26   : > { %1627 = vmatpush3.bf16.msra.mxu1 %v1787_v31  ;;  %1652 = vmatprep.subr.bf16.mxu0 %v1788_v40  ;;  %v1819_v31 = vld [vmem:[%s2196_s1 + $0x1b8] sm:$0xff]   ;;  %v1440_v40 = vcombine.high %v226_v36, %v230_v37 }
  0x27   : > { %1692 = vmatprep.subr.bf16.mxu1 %v1789_v41  ;;  %v237_v41 = vld [vmem:[%s1984_s6 + $0x70] sm:$0xff] }
  0x28   : > { %967 = vmatmul.mubr.bf16.vlgmr.msra.gmra.mrb[0].mxu0 %v1433_v35  ;;  %v1438_v35 = vcombine.high %v225_v32, %v229_v33 }
  0x29   : > { %1032 = vmatmul.mubr.bf16.vlgmr.msra.gmra.mrb[0].mxu1 %v1435_v38  ;;  %1653 = vmatpush3.bf16.msra.mxu0 %v1790_v42  ;;  %v233_v38 = vld [vmem:[%s1984_s6 + $0x50] sm:$0xff]  ;;  %v234_v42 = vld [vmem:[%s1984_s6 + $0x58] sm:$0xff] }
  0x2a   : > { %1693 = vmatpush3.bf16.msra.mxu1 %v1791_v43  ;;  %1654 = vmatprep.subr.bf16.mxu0 %v1792_v44  ;;  %v238_v43 = vld [vmem:[%s1984_s6 + $0x78] sm:$0xff]  ;;  %v1446_v44 = vcombine.high %v233_v38, %v237_v41 }
  0x2b   : > { %1694 = vmatprep.subr.bf16.mxu1 %v1793_v45  ;;  %974 = vmatprep.mubr.bf16.mxu0 %v1442_v50  ;;  %v1448_v45 = vcombine.high %v234_v42, %v238_v43  ;;  %v1445_v50 = vcombine.low %v233_v38, %v237_v41  ;;  %v1447_v51 = vcombine.low %v234_v42, %v238_v43 }
  0x2c   : > { %1039 = vmatprep.mubr.bf16.mxu1 %v1444_v54  ;;  %v249_v54 = vld [vmem:[%s1984_s6 + $0xd0] sm:$0xff] }
  0x2d   : > { %1655 = vmatpush3.bf16.msra.mxu0 %v1794_v46  ;;  %v241_v46 = vld [vmem:[%s1984_s6 + $0x90] sm:$0xff] }
  0x2e   : > { %1695 = vmatpush3.bf16.msra.mxu1 %v1795_v47  ;;  %1656 = vmatprep.subr.bf16.mxu0 %v1796_v56  ;;  %v245_v47 = vld [vmem:[%s1984_s6 + $0xb0] sm:$0xff]  ;;  %v250_v56 = vld [vmem:[%s1984_s6 + $0xd8] sm:$0xff] }
  0x2f   : > { %1696 = vmatprep.subr.bf16.mxu1 %v1797_v57  ;;  %v1454_v52 = vcombine.high %v241_v46, %v245_v47  ;;  %v254_v57 = vld [vmem:[%s1984_s6 + $0xf8] sm:$0xff] }
  0x30   : > { %975 = vmatmul.mubr.bf16.gmra.mrb[4].mxu0 %v1441_v53  ;;  %v1456_v53 = vcombine.high %v242_v48, %v246_v49 }
  0x31   : > { %1040 = vmatmul.mubr.bf16.gmra.mrb[4].mxu1 %v1443_v55  ;;  %1657 = vmatpush3.bf16.msra.mxu0 %v1798_v58  ;;  %v253_v55 = vld [vmem:[%s1984_s6 + $0xf0] sm:$0xff]  ;;  %v1453_v58 = vcombine.low %v241_v46, %v245_v47  ;;  %s1540_s6 = sshll.u32 %s2204_s12, 5 }
  0x32   : > { %1697 = vmatpush3.bf16.msra.mxu1 %v1799_v59  ;;  %1658 = vmatprep.subr.bf16.mxu0 %v1800_v60  ;;  %v1455_v59 = vcombine.low %v242_v48, %v246_v49  ;;  %v1462_v60 = vcombine.high %v249_v54, %v253_v55  ;;  %s221_s12 = scalar_lea.vmem %s2198_s3, %s1540_s6 }
  0x33   : > { %1698 = vmatprep.subr.bf16.mxu1 %v1801_v61  ;;  %982 = vmatprep.mubr.bf16.mxu0 %v1450_v4  ;;  %v1464_v61 = vcombine.high %v250_v56, %v254_v57 }
  0x34   : > { %1047 = vmatprep.mubr.bf16.mxu1 %v1452_v5 }
  0x35   : > { %1659 = vmatpush3.bf16.msra.mxu0 %v1802_v62  ;;  %v1461_v62 = vcombine.low %v249_v54, %v253_v55 }
  0x36   : > { %1699 = vmatpush3.bf16.msra.mxu1 %v1803_v63  ;;  %1660 = vmatprep.subr.bf16.mxu0 %v1804_v8  ;;  %v1463_v63 = vcombine.low %v250_v56, %v254_v57 }
  0x37   : > { %1700 = vmatprep.subr.bf16.mxu1 %v1805_v9 }
  0x38   : > { %983 = vmatmul.mubr.bf16.gmra.mrb[8].mxu0 %v1449_v6 }
  0x39   : > { %1048 = vmatmul.mubr.bf16.gmra.mrb[8].mxu1 %v1451_v7  ;;  %1661 = vmatpush3.bf16.msra.mxu0 %v1806_v10 }
  0x3a   : > { %1701 = vmatpush3.bf16.msra.mxu1 %v1807_v11  ;;  %1662 = vmatprep.subr.bf16.mxu0 %v1808_v12 }
  0x3b   : > { %1702 = vmatprep.subr.bf16.mxu1 %v1809_v13  ;;  %990 = vmatprep.mubr.bf16.mxu0 %v1458_v19 }
  0x3c   : > { %1055 = vmatprep.mubr.bf16.mxu1 %v1460_v22 }
  0x3d   : > { %1663 = vmatpush3.bf16.msra.mxu0 %v1810_v14 }
  0x3e   : > { %1703 = vmatpush3.bf16.msra.mxu1 %v1811_v15  ;;  %1664 = vmatprep.subr.bf16.mxu0 %v1812_v24 }
  0x3f   : > { %1704 = vmatprep.subr.bf16.mxu1 %v1813_v25 }
  0x40   : > { %991 = vmatmul.mubr.bf16.gmra.mrb[12].mxu0 %v1457_v21 }
  0x41   : > { %1056 = vmatmul.mubr.bf16.gmra.mrb[12].mxu1 %v1459_v23  ;;  %1665 = vmatpush3.bf16.msra.mxu0 %v1814_v26 }
  0x42   : > { %1705 = vmatpush3.bf16.msra.mxu1 %v1815_v27  ;;  %1666 = vmatprep.subr.bf16.mxu0 %v1816_v28 }
  0x43   : > { %1706 = vmatprep.subr.bf16.mxu1 %v1817_v29  ;;  %1096 = vmatprep.mubr.bf16.mxu0 %v1438_v35 }
  0x44   : > { %1161 = vmatprep.mubr.bf16.mxu1 %v1440_v40 }
  0x45   : > { %1667 = vmatpush3.bf16.msra.mxu0 %v1818_v30 }
  0x46   : > { %1707 = vmatpush3.bf16.msra.mxu1 %v1819_v31 }
  0x48   : > { %1097 = vmatmul.mubr.bf16.vlgmr.msra.gmra.mrb[16].mxu0 %v1437_v34 }
  0x49   : > { %1162 = vmatmul.mubr.bf16.vlgmr.msra.gmra.mrb[16].mxu1 %v1439_v39  ;;  %1104 = vmatprep.mubr.bf16.mxu0 %v1446_v44 }
  0x4a   : > { %1169 = vmatprep.mubr.bf16.mxu1 %v1448_v45 }
  0x50   : > { %1105 = vmatmul.mubr.bf16.gmra.mrb[20].mxu0 %v1445_v50 }
  0x51   : > { %1170 = vmatmul.mubr.bf16.gmra.mrb[20].mxu1 %v1447_v51  ;;  %1112 = vmatprep.mubr.bf16.mxu0 %v1454_v52 }
  0x52   : > { %1177 = vmatprep.mubr.bf16.mxu1 %v1456_v53 }
  0x58   : > { %1113 = vmatmul.mubr.bf16.gmra.mrb[24].mxu0 %v1453_v58 }
  0x59   : > { %1178 = vmatmul.mubr.bf16.gmra.mrb[24].mxu1 %v1455_v59  ;;  %1120 = vmatprep.mubr.bf16.mxu0 %v1462_v60 }
  0x5a   : > { %1185 = vmatprep.mubr.bf16.mxu1 %v1464_v61 }
  0x60   : > { %1121 = vmatmul.mubr.bf16.gmra.mrb[28].mxu0 %v1461_v62 }
  0x61   : > { %1186 = vmatmul.mubr.bf16.gmra.mrb[28].mxu1 %v1463_v63 }
  0xfb   : > { %v1588_v0 = vpop.f32.mrb[0].mxu0 }
  0xfc   : > { %v1628_v1 = vpop.f32.mrb[0].mxu1  ;;  %v1589_v3 = vpop.f32.mrb[1].mxu0 }
  0xfd   : > { %v1590_v4 = vadd.f32 %v1589_v3, %v1588_v0  ;;  %v1629_v5 = vpop.f32.mrb[1].mxu1  ;;  %v1591_v6 = vpop.f32.mrb[2].mxu0 }
  0xfe   : > { %v1630_v7 = vadd.f32 %v1629_v5, %v1628_v1  ;;  %v1631_v8 = vpop.f32.mrb[2].mxu1  ;;  %v1592_v9 = vpop.f32.mrb[3].mxu0 }
  0xff   : > { %v969_v10 = vadd.f32 %v1590_v4, %v1432_v2  ;;  %v1593_v11 = vadd.f32 %v1592_v9, %v1591_v6  ;;  %v1632_v12 = vpop.f32.mrb[3].mxu1 }
 0x100   : > { %v1633_v13 = vadd.f32 %v1632_v12, %v1631_v8 }
 0x101   : > { %v1034_v14 = vadd.f32 %v1630_v7, %v969_v10  ;;  %v972_v15 = vadd.f32 %v1593_v11, %v1432_v2 }
 0x103   : > { %v2123_v16 = vadd.f32 %v1633_v13, %v972_v15  ;;  %v1594_v17 = vpop.f32.mrb[4].mxu0 }
 0x104   : > { %v1634_v18 = vpop.f32.mrb[4].mxu1  ;;  %v1595_v19 = vpop.f32.mrb[5].mxu0 }
 0x105   : > { %v1596_v20 = vadd.f32 %v1595_v19, %v1594_v17  ;;  %v1635_v21 = vpop.f32.mrb[5].mxu1  ;;  %v1597_v22 = vpop.f32.mrb[6].mxu0 }
 0x106   : > { %v1636_v23 = vadd.f32 %v1635_v21, %v1634_v18  ;;  %v1637_v24 = vpop.f32.mrb[6].mxu1  ;;  %v1598_v25 = vpop.f32.mrb[7].mxu0 }
 0x107   : > { %v977_v26 = vadd.f32 %v1596_v20, %v1432_v2  ;;  %v1599_v27 = vadd.f32 %v1598_v25, %v1597_v22  ;;  %v1638_v28 = vpop.f32.mrb[7].mxu1 }
 0x108   : > { %v1639_v29 = vadd.f32 %v1638_v28, %v1637_v24 }
 0x109   : > { %v2125_v30 = vadd.f32 %v1636_v23, %v977_v26  ;;  %v980_v31 = vadd.f32 %v1599_v27, %v1432_v2 }
 0x10b   : > { %v2127_v32 = vadd.f32 %v1639_v29, %v980_v31  ;;  %v1600_v33 = vpop.f32.mrb[8].mxu0 }
 0x10c   : > { %v1640_v34 = vpop.f32.mrb[8].mxu1  ;;  %v1601_v35 = vpop.f32.mrb[9].mxu0 }
 0x10d   : > { %v1641_v36 = vpop.f32.mrb[9].mxu1  ;;  %v1602_v37 = vadd.f32 %v1601_v35, %v1600_v33  ;;  %v1603_v39 = vpop.f32.mrb[10].mxu0 }
 0x10e   : > { %v1642_v38 = vadd.f32 %v1641_v36, %v1640_v34  ;;  %v1643_v40 = vpop.f32.mrb[10].mxu1  ;;  %v1604_v41 = vpop.f32.mrb[11].mxu0 }
 0x10f   : > { %v1644_v42 = vpop.f32.mrb[11].mxu1  ;;  %v985_v43 = vadd.f32 %v1602_v37, %v1432_v2  ;;  %v1605_v44 = vadd.f32 %v1604_v41, %v1603_v39 }
 0x110   : > { %v1645_v45 = vadd.f32 %v1644_v42, %v1643_v40 }
 0x111   : > { %v2129_v46 = vadd.f32 %v1642_v38, %v985_v43  ;;  %v988_v47 = vadd.f32 %v1605_v44, %v1432_v2 }
 0x113   : > { %v2131_v48 = vadd.f32 %v1645_v45, %v988_v47  ;;  %v1606_v49 = vpop.f32.mrb[12].mxu0 }
 0x114   : > { %v1646_v50 = vpop.f32.mrb[12].mxu1  ;;  %v1607_v51 = vpop.f32.mrb[13].mxu0 }
 0x115   : > { %v1608_v52 = vadd.f32 %v1607_v51, %v1606_v49  ;;  %v1647_v53 = vpop.f32.mrb[13].mxu1  ;;  %v1609_v54 = vpop.f32.mrb[14].mxu0 }
 0x116   : > { %v1648_v55 = vadd.f32 %v1647_v53, %v1646_v50  ;;  %v1649_v56 = vpop.f32.mrb[14].mxu1  ;;  %v1610_v57 = vpop.f32.mrb[15].mxu0 }
 0x117   : > { %v993_v58 = vadd.f32 %v1608_v52, %v1432_v2  ;;  %v1611_v59 = vadd.f32 %v1610_v57, %v1609_v54  ;;  %v1650_v60 = vpop.f32.mrb[15].mxu1 }
 0x118   : > { %v1651_v61 = vadd.f32 %v1650_v60, %v1649_v56 }
 0x119   : > { %v2133_v62 = vadd.f32 %v1648_v55, %v993_v58  ;;  %v996_v63 = vadd.f32 %v1611_v59, %v1432_v2 }
 0x11b   : > { %v2135_v0 = vadd.f32 %v1651_v61, %v996_v63  ;;  %v1668_v1 = vpop.f32.mrb[16].mxu0 }
 0x11c   : > { %v1708_v3 = vpop.f32.mrb[16].mxu1  ;;  %v1669_v4 = vpop.f32.mrb[17].mxu0 }
 0x11d   : > { %v1670_v5 = vadd.f32 %v1669_v4, %v1668_v1  ;;  %v1709_v6 = vpop.f32.mrb[17].mxu1  ;;  %v1671_v7 = vpop.f32.mrb[18].mxu0 }
 0x11e   : > { %v1710_v8 = vadd.f32 %v1709_v6, %v1708_v3  ;;  %v1711_v9 = vpop.f32.mrb[18].mxu1  ;;  %v1672_v10 = vpop.f32.mrb[19].mxu0 }
 0x11f   : > { %v1099_v11 = vadd.f32 %v1670_v5, %v1034_v14  ;;  %v1673_v12 = vadd.f32 %v1672_v10, %v1671_v7  ;;  %v1712_v13 = vpop.f32.mrb[19].mxu1 }
 0x120   : > { %v1713_v15 = vadd.f32 %v1712_v13, %v1711_v9 }
 0x121   : > { %v2137_v17 = vadd.f32 %v1710_v8, %v1099_v11  ;;  %v1102_v18 = vadd.f32 %v1673_v12, %v2123_v16 }
 0x123   : > { %v2140_v2 = vadd.f32 %v1713_v15, %v1102_v18  ;;  %v1674_v19 = vpop.f32.mrb[20].mxu0  ;;  %v1209_v22 = vmul.f32 %v2137_v17, %v2137_v17 }
 0x124   : > { %v1714_v20 = vpop.f32.mrb[20].mxu1  ;;  %v1675_v21 = vpop.f32.mrb[21].mxu0 }
 0x125   : > { %v1194_v23 = vadd.f32 %v2140_v2, %v2137_v17  ;;  %v1210_v14 = vmul.f32 %v2140_v2, %v2140_v2  ;;  %v1676_v24 = vadd.f32 %v1675_v21, %v1674_v19  ;;  %v1715_v25 = vpop.f32.mrb[21].mxu1  ;;  %v1677_v26 = vpop.f32.mrb[22].mxu0 }
 0x126   : > { %v1716_v27 = vadd.f32 %v1715_v25, %v1714_v20  ;;  %v1717_v28 = vpop.f32.mrb[22].mxu1  ;;  %v1678_v16 = vpop.f32.mrb[23].mxu0 }
 0x127   : > { %v1217_v29 = vadd.f32 %v1210_v14, %v1209_v22  ;;  %v1107_v31 = vadd.f32 %v1676_v24, %v2125_v30  ;;  %v1679_v33 = vadd.f32 %v1678_v16, %v1677_v26  ;;  %v1718_v34 = vpop.f32.mrb[23].mxu1 }
 0x128   : > { %v1719_v35 = vadd.f32 %v1718_v34, %v1717_v28 }
 0x129   : > { %v2149_v36 = vadd.f32 %v1716_v27, %v1107_v31  ;;  %v1110_v37 = vadd.f32 %v1679_v33, %v2127_v32 }
 0x12b   : > { %v1195_v38 = vadd.f32 %v1194_v23, %v2149_v36  ;;  %v1211_v39 = vmul.f32 %v2149_v36, %v2149_v36  ;;  %v2155_v40 = vadd.f32 %v1719_v35, %v1110_v37  ;;  %v1680_v41 = vpop.f32.mrb[24].mxu0 }
 0x12c   : > { %v1720_v42 = vpop.f32.mrb[24].mxu1  ;;  %v1681_v43 = vpop.f32.mrb[25].mxu0 }
 0x12d   : > { %v1218_v44 = vadd.f32 %v1217_v29, %v1211_v39  ;;  %v1196_v30 = vadd.f32 %v1195_v38, %v2155_v40  ;;  %v1212_v45 = vmul.f32 %v2155_v40, %v2155_v40  ;;  %v1682_v47 = vadd.f32 %v1681_v43, %v1680_v41  ;;  %v1721_v49 = vpop.f32.mrb[25].mxu1  ;;  %v1683_v50 = vpop.f32.mrb[26].mxu0 }
 0x12e   : > { %v1722_v32 = vadd.f32 %v1721_v49, %v1720_v42  ;;  %v1723_v51 = vpop.f32.mrb[26].mxu1  ;;  %v1684_v52 = vpop.f32.mrb[27].mxu0 }
 0x12f   : > { %v1219_v53 = vadd.f32 %v1218_v44, %v1212_v45  ;;  %v1115_v54 = vadd.f32 %v1682_v47, %v2129_v46  ;;  %v1685_v55 = vadd.f32 %v1684_v52, %v1683_v50  ;;  %v1724_v56 = vpop.f32.mrb[27].mxu1 }
 0x130   : > { %v1725_v57 = vadd.f32 %v1724_v56, %v1723_v51 }
 0x131   : > { %v2161_v58 = vadd.f32 %v1722_v32, %v1115_v54  ;;  %v1118_v59 = vadd.f32 %v1685_v55, %v2131_v48 }
 0x133   : > { %v1197_v60 = vadd.f32 %v1196_v30, %v2161_v58  ;;  %v1213_v61 = vmul.f32 %v2161_v58, %v2161_v58  ;;  %v1183_v63 = vadd.f32 %v1725_v57, %v1118_v59  ;;  %v1686_v1 = vpop.f32.mrb[28].mxu0 }
 0x134   : > { %v1726_v3 = vpop.f32.mrb[28].mxu1  ;;  %v1687_v4 = vpop.f32.mrb[29].mxu0 }
 0x135   : > { %v1220_v5 = vadd.f32 %v1219_v53, %v1213_v61  ;;  %v1198_v6 = vadd.f32 %v1197_v60, %v1183_v63  ;;  %v1214_v7 = vmul.f32 %v1183_v63, %v1183_v63  ;;  %v1688_v46 = vadd.f32 %v1687_v4, %v1686_v1  ;;  %v1727_v8 = vpop.f32.mrb[29].mxu1  ;;  %v1689_v9 = vpop.f32.mrb[30].mxu0 }
 0x136   : > { %v1728_v10 = vadd.f32 %v1727_v8, %v1726_v3  ;;  %v1729_v11 = vpop.f32.mrb[30].mxu1  ;;  %v1690_v12 = vpop.f32.mrb[31].mxu0 }
 0x137   : > { %v1221_v13 = vadd.f32 %v1220_v5, %v1214_v7  ;;  %v1123_v48 = vadd.f32 %v1688_v46, %v2133_v62  ;;  %v1691_v15 = vadd.f32 %v1690_v12, %v1689_v9  ;;  %v1730_v18 = vpop.f32.mrb[31].mxu1 }
 0x138   : > { %v1731_v19 = vadd.f32 %v1730_v18, %v1729_v11 }
 0x139   : > { %v1188_v20 = vadd.f32 %v1728_v10, %v1123_v48  ;;  %v1126_v21 = vadd.f32 %v1691_v15, %v2135_v0 }
 0x13b   : > { %v1199_v22 = vadd.f32 %v1198_v6, %v1188_v20  ;;  %v1215_v23 = vmul.f32 %v1188_v20, %v1188_v20  ;;  %v1191_v14 = vadd.f32 %v1731_v19, %v1126_v21 }
 0x13d   : > { %v1222_v24 = vadd.f32 %v1221_v13, %v1215_v23  ;;  %v1200_v25 = vadd.f32 %v1199_v22, %v1191_v14  ;;  %v1216_v26 = vmul.f32 %v1191_v14, %v1191_v14 }
 0x13f   : > { %v1201_v27 = vrot.slane %v1200_v25, 4  ;;  %v1223_v28 = vadd.f32 %v1222_v24, %v1216_v26 }
 0x141   : > { %v1202_v16 = vadd.f32 %v1201_v27, %v1200_v25  ;;  %v1224_v29 = vrot.slane %v1223_v28, 4 }
 0x143   : > { %v1203_v31 = vrot.slane %v1202_v16, 2  ;;  %v1225_v33 = vadd.f32 %v1224_v29, %v1223_v28 }
 0x145   : > { %v1204_v34 = vadd.f32 %v1203_v31, %v1202_v16  ;;  %v1226_v62 = vrot.slane %v1225_v33, 2 }
 0x147   : > { %v1205_v35 = vrot.slane %v1204_v34, 1  ;;  %v1227_v37 = vadd.f32 %v1226_v62, %v1225_v33 }
 0x149   : > { %v1206_v38 = vadd.f32 %v1205_v35, %v1204_v34  ;;  %v1228_v39 = vrot.slane %v1227_v37, 1 }
 0x14b   : > { %v1208_v41 = vmul.f32 0.015625, %v1206_v38  ;;  %v1229_v0 = vadd.f32 %v1228_v39, %v1227_v37 }
 0x14d   : > { %v1230_v42 = vmul.f32 0.015625, %v1229_v0  ;;  %v1231_v43 = vmul.f32 %v1208_v41, %v1208_v41  ;;  %v1234_v44 = vsub.f32 %v2137_v17, %v1208_v41  ;;  %v1235_v30 = vsub.f32 %v2140_v2, %v1208_v41 }
 0x14e   : > { %v1236_v45 = vsub.f32 %v2149_v36, %v1208_v41  ;;  %v1237_v47 = vsub.f32 %v2155_v40, %v1208_v41  ;;  %v1238_v49 = vsub.f32 %v2161_v58, %v1208_v41  ;;  %v1239_v50 = vsub.f32 %v1183_v63, %v1208_v41 }
 0x14f   : > { %v1232_v32 = vsub.f32 %v1230_v42, %v1231_v43  ;;  %v1240_v51 = vsub.f32 %v1188_v20, %v1208_v41  ;;  %v1241_v52 = vsub.f32 %v1191_v14, %v1208_v41 }
 0x151   : > { %v1233_v53 = vmax.f32 %v1232_v32, 0.0 }
 0x153   : > { %v1242_v54 = vadd.f32 1e-05, %v1233_v53 }
 0x155   : > { %1820 = vrsqrt.f32 %v1242_v54 }
 0x15f   : > { %v1821_v55 = vpop.eup %1820 }
 0x160   : > { %v1244_v56 = vmul.f32 %v1821_v55, %v1234_v44  ;;  %v1245_v57 = vmul.f32 %v1821_v55, %v1235_v30  ;;  %v1246_v17 = vmul.f32 %v1821_v55, %v1236_v45  ;;  %v1247_v59 = vmul.f32 %v1821_v55, %v1237_v47 }
 0x161   : > { %v1248_v2 = vmul.f32 %v1821_v55, %v1238_v49  ;;  %v1249_v60 = vmul.f32 %v1821_v55, %v1239_v50  ;;  %v1250_v36 = vmul.f32 %v1821_v55, %v1240_v51  ;;  %v1251_v61 = vmul.f32 %v1821_v55, %v1241_v52 }
 0x162   : > { %vm1252_vm0 = vcmp.gt.f32.partialorder %v1244_v56, 0.0  ;;  %vm1253_vm1 = vcmp.gt.f32.partialorder %v1245_v57, 0.0  ;;  %vm1254_vm2 = vcmp.gt.f32.partialorder %v1246_v17, 0.0  ;;  %vm1255_vm3 = vcmp.gt.f32.partialorder %v1247_v59, 0.0 }
 0x163   : > { %vm1256_vm4 = vcmp.gt.f32.partialorder %v1248_v2, 0.0  ;;  %vm1257_vm5 = vcmp.gt.f32.partialorder %v1249_v60, 0.0  ;;  %vm1258_vm6 = vcmp.gt.f32.partialorder %v1250_v36, 0.0  ;;  %vm1259_vm7 = vcmp.gt.f32.partialorder %v1251_v61, 0.0 }
 0x164   : > { %v1260_v40 = vmul.f32 0.2, %v1244_v56  ;;  %v1261_v58 = vmul.f32 0.2, %v1245_v57  ;;  %v1262_v63 = vmul.f32 0.2, %v1246_v17 }
 0x165   : > { %v1263_v1 = vmul.f32 0.2, %v1247_v59  ;;  %v1264_v3 = vmul.f32 0.2, %v1248_v2  ;;  %v1265_v4 = vmul.f32 0.2, %v1249_v60 }
 0x166   : > { %v1266_v5 = vmul.f32 0.2, %v1250_v36  ;;  %v1267_v6 = vmul.f32 0.2, %v1251_v61  ;;  %v1268_v7 = vsel %vm1252_vm0, %v1244_v56, %v1260_v40  ;;  %v1269_v46 = vsel %vm1253_vm1, %v1245_v57, %v1261_v58 }
 0x167   : > { %v1270_v8 = vsel %vm1254_vm2, %v1246_v17, %v1262_v63  ;;  %v1271_v9 = vsel %vm1255_vm3, %v1247_v59, %v1263_v1  ;;  %v1272_v10 = vsel %vm1256_vm4, %v1248_v2, %v1264_v3  ;;  %v1273_v11 = vsel %vm1257_vm5, %v1249_v60, %v1265_v4 }
 0x168   : > { %v1274_v12 = vsel %vm1258_vm6, %v1250_v36, %v1266_v5  ;;  %v1275_v13 = vsel %vm1259_vm7, %v1251_v61, %v1267_v6  ;;  %v1552_v48 = vpack.c.bf16 %v1269_v46, %v1268_v7  ;;  %v1557_v15 = vpack.c.bf16 %v1271_v9, %v1270_v8 }
 0x169   : > { %v1562_v18 = vpack.c.bf16 %v1273_v11, %v1272_v10  ;;  %v1567_v19 = vpack.c.bf16 %v1275_v13, %v1274_v12 }
 0x16a   : > { %1553 = vst [vmem:[%s221_s12] sm:$0xff] %v1552_v48   ;;  %1569 = vst [vmem:[%s221_s12 + $0x8] sm:$0xff] %v1557_v15  }
 0x16b   : > { %1570 = vst [vmem:[%s221_s12 + $0x10] sm:$0xff] %v1562_v18   ;;  %1571 = vst [vmem:[%s221_s12 + $0x18] sm:$0xff] %v1567_v19  }
 0x16c PF: > { %s13_s14 = sadd.s32 1, %s1844_s14   ;;  %s2199_s12 = smov %s1840_s13 }
 0x16d   : > { %p10_p5 = scmp.ge.s32.totalorder %s13_s14, 4   ;;  %s2200_s13 = smov %s2202_s15 }
 0x16f   :  { %12 = sbr.rel (!%p10_p5) target bundleno = 2 (0x2), region = 68 }

// kernel: discriminator_forward.7
= control target key start
LH: loop header
LB: loop body
LE: loop exit
PB: predicated region body
PF: predicated region fallthrough
CT: control target
= control target key end

     0   :  { %s3191_s12 = smov 0   ;;  %s3193_s13 = smov 0   ;;  %s4069_s0 = inlined_call_operand.vmem [shape: bf16[2,16,2048], index: 0, kind: input, shape index: {}]   ;;  %s4070_s1 = inlined_call_operand.vmem [shape: bf16[2048,256], index: 1, kind: input, shape index: {}]   ;;  %s4071_s2 = inlined_call_operand.vmem [shape: f32[1,256], index: 2, kind: input, shape index: {}]   ;;  %s4072_s3 = inlined_call_operand.vmem [shape: bf16[2,16,256], index: 3, kind: output, shape index: {}]  }
   0x1   :  { %s3195_s14 = smov 0  }
   0x2 LB: > { %s25_s15 = sadd.s32 1, %s3165_s13  ;;  %p2418_p0 = scmp.ge.s32.totalorder %s3169_s14, 1  ;;  %s3169_s14 = sphi %s3195_s14, %s13_s14   ;;  %s3165_s13 = sphi %s3193_s13, %s4074_s13   ;;  %s3161_s12 = sphi %s3191_s12, %s4073_s12  }
   0x3   : > { %p27_p1 = scmp.ge.s32.totalorder %s25_s15, 2  ;;  %p172_p2 = scmp.lt.s32.totalorder %s3169_s14, 3 }
   0x5   : > { %s4076_s15 = smov (%p27_p1, %s25_s15), 0  ;;  %p173_p3 = pnand %p2418_p0, %p172_p2 }
   0x6   : > { %v2759_v0 = vld [vmem:[%s4070_s1 + $0x4] ss:$8 sps:$4 sm:$0xff] (!%p173_p3)   ;;  %v2763_v2 = vld [vmem:[%s4070_s1] ss:$8 sps:$4 sm:$0xff] (!%p173_p3)   ;;  %v2765_v4 = vld [vmem:[%s4070_s1 + $0x14] ss:$8 sps:$4 sm:$0xff] (!%p173_p3)  }
   0x7   : > { %176 = sbr.rel (%p173_p3) target bundleno = 525 (0x20d), region = 32  ;;  %v2761_v1 = vld [vmem:[%s4070_s1 + $0x404] ss:$8 sps:$4 sm:$0xff] (!%p173_p3)   ;;  %1879 = vmatprep.subr.bf16.mxu1 (!%p173_p3), %v2759_v0  ;;  %v2764_v3 = vld [vmem:[%s4070_s1 + $0x400] ss:$8 sps:$4 sm:$0xff] (!%p173_p3)   ;;  %p209_p4 = scmp.lt.s32.totalorder (!%p173_p3), %s3161_s12, 1 }
   0x8   : > { %2051 = vmatprep.subr.bf16.mxu0 (!%p173_p3), %v2761_v1  ;;  %1880 = vmatpush1.bf16.msra.mxu1 (!%p173_p3), %v2763_v2  ;;  %v2767_v5 = vld [vmem:[%s4070_s1 + $0x414] ss:$8 sps:$4 sm:$0xff] (!%p173_p3)   ;;  %v2769_v6 = vld [vmem:[%s4070_s1 + $0x10] ss:$8 sps:$4 sm:$0xff] (!%p173_p3)   ;;  %v2771_v8 = vld [vmem:[%s4070_s1 + $0x24] ss:$8 sps:$4 sm:$0xff] (!%p173_p3)  }
   0x9   : > { %2052 = vmatpush1.bf16.msra.mxu0 (!%p173_p3), %v2764_v3  ;;  %1881 = vmatprep.subr.bf16.mxu1 (!%p173_p3), %v2765_v4  ;;  %v2770_v7 = vld [vmem:[%s4070_s1 + $0x410] ss:$8 sps:$4 sm:$0xff] (!%p173_p3)   ;;  %v2773_v9 = vld [vmem:[%s4070_s1 + $0x424] ss:$8 sps:$4 sm:$0xff] (!%p173_p3)   ;;  %v2775_v10 = vld [vmem:[%s4070_s1 + $0x20] ss:$8 sps:$4 sm:$0xff] (!%p173_p3)  }
   0xa   : > { %2053 = vmatprep.subr.bf16.mxu0 (!%p173_p3), %v2767_v5  ;;  %v2776_v11 = vld [vmem:[%s4070_s1 + $0x420] ss:$8 sps:$4 sm:$0xff] (!%p173_p3)   ;;  %v2777_v12 = vld [vmem:[%s4070_s1 + $0x34] ss:$8 sps:$4 sm:$0xff] (!%p173_p3)   ;;  %v2781_v14 = vld [vmem:[%s4070_s1 + $0x30] ss:$8 sps:$4 sm:$0xff] (!%p173_p3)  }
   0xb   : > { %v2779_v13 = vld [vmem:[%s4070_s1 + $0x434] ss:$8 sps:$4 sm:$0xff] (!%p173_p3)   ;;  %v2782_v15 = vld [vmem:[%s4070_s1 + $0x430] ss:$8 sps:$4 sm:$0xff] (!%p173_p3)   ;;  %v2783_v16 = vld [vmem:[%s4070_s1 + $0x44] ss:$8 sps:$4 sm:$0xff] (!%p173_p3)  }
   0xc   : > { %1882 = vmatpush1.bf16.msra.mxu1 (!%p173_p3), %v2769_v6  ;;  %v2785_v17 = vld [vmem:[%s4070_s1 + $0x444] ss:$8 sps:$4 sm:$0xff] (!%p173_p3)   ;;  %v2787_v18 = vld [vmem:[%s4070_s1 + $0x40] ss:$8 sps:$4 sm:$0xff] (!%p173_p3)   ;;  %v2789_v20 = vld [vmem:[%s4070_s1 + $0x54] ss:$8 sps:$4 sm:$0xff] (!%p173_p3)  }
   0xd   : > { %2054 = vmatpush1.bf16.msra.mxu0 (!%p173_p3), %v2770_v7  ;;  %1883 = vmatprep.subr.bf16.mxu1 (!%p173_p3), %v2771_v8  ;;  %v2788_v19 = vld [vmem:[%s4070_s1 + $0x440] ss:$8 sps:$4 sm:$0xff] (!%p173_p3)   ;;  %v2791_v21 = vld [vmem:[%s4070_s1 + $0x454] ss:$8 sps:$4 sm:$0xff] (!%p173_p3)   ;;  %v2793_v22 = vld [vmem:[%s4070_s1 + $0x50] ss:$8 sps:$4 sm:$0xff] (!%p173_p3)  }
   0xe   : > { %2055 = vmatprep.subr.bf16.mxu0 %v2773_v9  ;;  %v2794_v23 = vld [vmem:[%s4070_s1 + $0x450] ss:$8 sps:$4 sm:$0xff]   ;;  %v2795_v24 = vld [vmem:[%s4070_s1 + $0x64] ss:$8 sps:$4 sm:$0xff]   ;;  %v2799_v26 = vld [vmem:[%s4070_s1 + $0x60] ss:$8 sps:$4 sm:$0xff]  }
   0xf   : > { %v2797_v25 = vld [vmem:[%s4070_s1 + $0x464] ss:$8 sps:$4 sm:$0xff]   ;;  %v2800_v27 = vld [vmem:[%s4070_s1 + $0x460] ss:$8 sps:$4 sm:$0xff]   ;;  %v2801_v28 = vld [vmem:[%s4070_s1 + $0x74] ss:$8 sps:$4 sm:$0xff]  }
  0x10   : > { %1884 = vmatpush1.bf16.msra.mxu1 %v2775_v10  ;;  %v2803_v29 = vld [vmem:[%s4070_s1 + $0x474] ss:$8 sps:$4 sm:$0xff]   ;;  %v2805_v30 = vld [vmem:[%s4070_s1 + $0x70] ss:$8 sps:$4 sm:$0xff]   ;;  %v2807_v32 = vld [vmem:[%s4070_s1 + $0x84] ss:$8 sps:$4 sm:$0xff]  }
  0x11   : > { %2056 = vmatpush1.bf16.msra.mxu0 %v2776_v11  ;;  %1885 = vmatprep.subr.bf16.mxu1 %v2777_v12  ;;  %v2806_v31 = vld [vmem:[%s4070_s1 + $0x470] ss:$8 sps:$4 sm:$0xff]   ;;  %v2809_v33 = vld [vmem:[%s4070_s1 + $0x484] ss:$8 sps:$4 sm:$0xff]   ;;  %v2811_v34 = vld [vmem:[%s4070_s1 + $0x80] ss:$8 sps:$4 sm:$0xff]  }
  0x12   : > { %2057 = vmatprep.subr.bf16.mxu0 %v2779_v13  ;;  %v2812_v35 = vld [vmem:[%s4070_s1 + $0x480] ss:$8 sps:$4 sm:$0xff]   ;;  %v2813_v36 = vld [vmem:[%s4070_s1 + $0x94] ss:$8 sps:$4 sm:$0xff]   ;;  %s4078_s12 = smov (!%p209_p4, %s3161_s12), 1 }
  0x13   : > { %v2815_v37 = vld [vmem:[%s4070_s1 + $0x494] ss:$8 sps:$4 sm:$0xff]   ;;  %v2817_v38 = vld [vmem:[%s4070_s1 + $0x90] ss:$8 sps:$4 sm:$0xff]   ;;  %v2819_v40 = vld [vmem:[%s4070_s1 + $0xa4] ss:$8 sps:$4 sm:$0xff]  }
  0x14   : > { %1886 = vmatpush1.bf16.msra.mxu1 %v2781_v14  ;;  %v2818_v39 = vld [vmem:[%s4070_s1 + $0x490] ss:$8 sps:$4 sm:$0xff]   ;;  %s2699_s29 = sshll.u32 %s4078_s12, 7  ;;  %v2821_v41 = vld [vmem:[%s4070_s1 + $0x4a4] ss:$8 sps:$4 sm:$0xff]   ;;  %s2700_s18 = sshll.u32 %s4078_s12, 4 }
  0x15   : > { %2058 = vmatpush1.bf16.msra.mxu0 %v2782_v15  ;;  %1887 = vmatprep.subr.bf16.mxu1 %v2783_v16  ;;  %v2823_v42 = vld [vmem:[%s4070_s1 + $0xa0] ss:$8 sps:$4 sm:$0xff]   ;;  %s3351_s11 = scalar_lea.vmem %s4069_s0, %s2699_s29  ;;  %v2825_v44 = vld [vmem:[%s4070_s1 + $0xb4] ss:$8 sps:$4 sm:$0xff]   ;;  %v2829_v46 = vld [vmem:[%s4070_s1 + $0xb0] ss:$8 sps:$4 sm:$0xff]   ;;  %s233_s21 = scalar_lea.vmem %s4072_s3, %s2700_s18 }
  0x16   : > { %2059 = vmatprep.subr.bf16.mxu0 %v2785_v17  ;;  %v2824_v43 = vld [vmem:[%s4070_s1 + $0x4a0] ss:$8 sps:$4 sm:$0xff]   ;;  %v2827_v45 = vld [vmem:[%s4070_s1 + $0x4b4] ss:$8 sps:$4 sm:$0xff]   ;;  %v2830_v47 = vld [vmem:[%s4070_s1 + $0x4b0] ss:$8 sps:$4 sm:$0xff]  }
  0x17   : > { %v235_v48 = vld [vmem:[%s3351_s11] sm:$0xff]  ;;  %v2837_v58 = vld [vmem:[%s4070_s1 + $0xd4] ss:$8 sps:$4 sm:$0xff]   ;;  %v2841_v60 = vld [vmem:[%s4070_s1 + $0xd0] ss:$8 sps:$4 sm:$0xff]  }
  0x18   : > { %1888 = vmatpush1.bf16.msra.mxu1 %v2787_v18  ;;  %v243_v49 = vld [vmem:[%s3351_s11 + $0x40] sm:$0xff]  ;;  %v2839_v59 = vld [vmem:[%s4070_s1 + $0x4d4] ss:$8 sps:$4 sm:$0xff]   ;;  %v2842_v61 = vld [vmem:[%s4070_s1 + $0x4d0] ss:$8 sps:$4 sm:$0xff]  }
  0x19   : > { %2060 = vmatpush1.bf16.msra.mxu0 %v2788_v19  ;;  %1889 = vmatprep.subr.bf16.mxu1 %v2789_v20  ;;  %v2831_v50 = vld [vmem:[%s4070_s1 + $0xc4] ss:$8 sps:$4 sm:$0xff]   ;;  %v2424_v52 = vcombine.high %v235_v48, %v243_v49  ;;  %v2835_v56 = vld [vmem:[%s4070_s1 + $0xc0] ss:$8 sps:$4 sm:$0xff]   ;;  %v2849_v2 = vld [vmem:[%s4070_s1 + $0xf4] ss:$8 sps:$4 sm:$0xff]   ;;  %v2423_v8 = vcombine.low %v235_v48, %v243_v49 }
  0x1a   : > { %2061 = vmatprep.subr.bf16.mxu0 %v2791_v21  ;;  %v2833_v51 = vld [vmem:[%s4070_s1 + $0x4c4] ss:$8 sps:$4 sm:$0xff]   ;;  %v2836_v57 = vld [vmem:[%s4070_s1 + $0x4c0] ss:$8 sps:$4 sm:$0xff]   ;;  %v2851_v3 = vld [vmem:[%s4070_s1 + $0x4f4] ss:$8 sps:$4 sm:$0xff]  }
  0x1b   : > { %v239_v53 = vld [vmem:[%s3351_s11 + $0x20] sm:$0xff]  ;;  %1911 = vmatprep.mubr.bf16.mxu1 %v2424_v52  ;;  %v2853_v4 = vld [vmem:[%s4070_s1 + $0xf0] ss:$8 sps:$4 sm:$0xff]   ;;  %v2863_v12 = vld [vmem:[%s4070_s1 + $0x114] ss:$8 sps:$4 sm:$0xff]  }
  0x1c   : > { %1890 = vmatpush1.bf16.msra.mxu1 %v2793_v22  ;;  %v247_v54 = vld [vmem:[%s3351_s11 + $0x60] sm:$0xff]  ;;  %v2854_v5 = vld [vmem:[%s4070_s1 + $0x4f0] ss:$8 sps:$4 sm:$0xff]   ;;  %v2866_v13 = vld [vmem:[%s4070_s1 + $0x514] ss:$8 sps:$4 sm:$0xff]  }
  0x1d   : > { %2062 = vmatpush1.bf16.msra.mxu0 %v2794_v23  ;;  %1891 = vmatprep.subr.bf16.mxu1 %v2795_v24  ;;  %v2432_v55 = vcombine.high %v239_v53, %v247_v54  ;;  %v2843_v62 = vld [vmem:[%s4070_s1 + $0xe4] ss:$8 sps:$4 sm:$0xff]   ;;  %v2847_v0 = vld [vmem:[%s4070_s1 + $0xe0] ss:$8 sps:$4 sm:$0xff]   ;;  %v2431_v10 = vcombine.low %v239_v53, %v247_v54  ;;  %v2861_v14 = vld [vmem:[%s4070_s1 + $0x110] ss:$8 sps:$4 sm:$0xff]  }
  0x1e   : > { %2063 = vmatprep.subr.bf16.mxu0 %v2797_v25  ;;  %v2845_v63 = vld [vmem:[%s4070_s1 + $0x4e4] ss:$8 sps:$4 sm:$0xff]   ;;  %v2848_v1 = vld [vmem:[%s4070_s1 + $0x4e0] ss:$8 sps:$4 sm:$0xff]   ;;  %v2864_v15 = vld [vmem:[%s4070_s1 + $0x510] ss:$8 sps:$4 sm:$0xff]  }
  0x1f   : > { %2083 = vmatprep.mubr.bf16.mxu0 %v2432_v55  ;;  %v2857_v6 = vld [vmem:[%s4070_s1 + $0x104] ss:$8 sps:$4 sm:$0xff]   ;;  %v2855_v9 = vld [vmem:[%s4070_s1 + $0x100] ss:$8 sps:$4 sm:$0xff]   ;;  %v2875_v20 = vld [vmem:[%s4070_s1 + $0x134] ss:$8 sps:$4 sm:$0xff]  }
  0x20   : > { %1892 = vmatpush1.bf16.msra.mxu1 %v2799_v26  ;;  %v2860_v7 = vld [vmem:[%s4070_s1 + $0x504] ss:$8 sps:$4 sm:$0xff]   ;;  %v2858_v11 = vld [vmem:[%s4070_s1 + $0x500] ss:$8 sps:$4 sm:$0xff]   ;;  %v2878_v21 = vld [vmem:[%s4070_s1 + $0x534] ss:$8 sps:$4 sm:$0xff]  }
  0x21   : > { %2064 = vmatpush1.bf16.msra.mxu0 %v2800_v27  ;;  %1893 = vmatprep.subr.bf16.mxu1 %v2801_v28  ;;  %v2869_v16 = vld [vmem:[%s4070_s1 + $0x124] ss:$8 sps:$4 sm:$0xff]   ;;  %v2867_v18 = vld [vmem:[%s4070_s1 + $0x120] ss:$8 sps:$4 sm:$0xff]   ;;  %v2873_v22 = vld [vmem:[%s4070_s1 + $0x130] ss:$8 sps:$4 sm:$0xff]  }
  0x22   : > { %2065 = vmatprep.subr.bf16.mxu0 %v2803_v29  ;;  %v2872_v17 = vld [vmem:[%s4070_s1 + $0x524] ss:$8 sps:$4 sm:$0xff]   ;;  %v2870_v19 = vld [vmem:[%s4070_s1 + $0x520] ss:$8 sps:$4 sm:$0xff]   ;;  %v2876_v23 = vld [vmem:[%s4070_s1 + $0x530] ss:$8 sps:$4 sm:$0xff]  }
  0x23   : > { %v2881_v24 = vld [vmem:[%s4070_s1 + $0x144] ss:$8 sps:$4 sm:$0xff]   ;;  %v2879_v26 = vld [vmem:[%s4070_s1 + $0x140] ss:$8 sps:$4 sm:$0xff]   ;;  %v2887_v28 = vld [vmem:[%s4070_s1 + $0x154] ss:$8 sps:$4 sm:$0xff]  }
  0x24   : > { %1894 = vmatpush1.bf16.msra.mxu1 %v2805_v30  ;;  %v2884_v25 = vld [vmem:[%s4070_s1 + $0x544] ss:$8 sps:$4 sm:$0xff]   ;;  %v2882_v27 = vld [vmem:[%s4070_s1 + $0x540] ss:$8 sps:$4 sm:$0xff]   ;;  %v2890_v29 = vld [vmem:[%s4070_s1 + $0x554] ss:$8 sps:$4 sm:$0xff]  }
  0x25   : > { %2066 = vmatpush1.bf16.msra.mxu0 %v2806_v31  ;;  %1895 = vmatprep.subr.bf16.mxu1 %v2807_v32  ;;  %v2885_v30 = vld [vmem:[%s4070_s1 + $0x150] ss:$8 sps:$4 sm:$0xff]   ;;  %v2893_v32 = vld [vmem:[%s4070_s1 + $0x164] ss:$8 sps:$4 sm:$0xff]   ;;  %v2903_v48 = vld [vmem:[%s4070_s1 + $0x180] ss:$8 sps:$4 sm:$0xff]  }
  0x26   : > { %2067 = vmatprep.subr.bf16.mxu0 %v2809_v33  ;;  %v2888_v31 = vld [vmem:[%s4070_s1 + $0x550] ss:$8 sps:$4 sm:$0xff]   ;;  %v2896_v33 = vld [vmem:[%s4070_s1 + $0x564] ss:$8 sps:$4 sm:$0xff]   ;;  %v2906_v49 = vld [vmem:[%s4070_s1 + $0x580] ss:$8 sps:$4 sm:$0xff]  }
  0x27   : > { %v2909_v52 = vld [vmem:[%s4070_s1 + $0x190] ss:$8 sps:$4 sm:$0xff]   ;;  %v2917_v54 = vld [vmem:[%s4070_s1 + $0x1a4] ss:$8 sps:$4 sm:$0xff]  }
  0x28   : > { %1896 = vmatpush1.bf16.msra.mxu1 %v2811_v34  ;;  %v2891_v34 = vld [vmem:[%s4070_s1 + $0x160] ss:$8 sps:$4 sm:$0xff]   ;;  %v2912_v53 = vld [vmem:[%s4070_s1 + $0x590] ss:$8 sps:$4 sm:$0xff]   ;;  %v2920_v55 = vld [vmem:[%s4070_s1 + $0x5a4] ss:$8 sps:$4 sm:$0xff]  }
  0x29   : > { %2068 = vmatpush1.bf16.msra.mxu0 %v2812_v35  ;;  %1897 = vmatprep.subr.bf16.mxu1 %v2813_v36  ;;  %v2894_v35 = vld [vmem:[%s4070_s1 + $0x560] ss:$8 sps:$4 sm:$0xff]  }
  0x2a   : > { %2069 = vmatprep.subr.bf16.mxu0 %v2815_v37  ;;  %v3502_v36 = vld [vmem:[%s3351_s11 + $0x8] sm:$0xff] }
  0x2b   : > { %v3505_v37 = vld [vmem:[%s3351_s11 + $0x48] sm:$0xff] }
  0x2c   : > { %1898 = vmatpush1.bf16.msra.mxu1 %v2817_v38  ;;  %v2899_v38 = vld [vmem:[%s4070_s1 + $0x174] ss:$8 sps:$4 sm:$0xff]  }
  0x2d   : > { %2070 = vmatpush1.bf16.msra.mxu0 %v2818_v39  ;;  %1899 = vmatprep.subr.bf16.mxu1 %v2819_v40  ;;  %v2902_v39 = vld [vmem:[%s4070_s1 + $0x574] ss:$8 sps:$4 sm:$0xff]   ;;  %v2426_v40 = vcombine.high %v3502_v36, %v3505_v37 }
  0x2e   : > { %2071 = vmatprep.subr.bf16.mxu0 %v2821_v41  ;;  %v3516_v41 = vld [vmem:[%s3351_s11 + $0x28] sm:$0xff] }
  0x30   : > { %1900 = vmatpush1.bf16.msra.mxu1 %v2823_v42  ;;  %v3519_v42 = vld [vmem:[%s3351_s11 + $0x68] sm:$0xff] }
  0x31   : > { %2072 = vmatpush1.bf16.msra.mxu0 %v2824_v43  ;;  %1901 = vmatprep.subr.bf16.mxu1 %v2825_v44  ;;  %v2434_v43 = vcombine.high %v3516_v41, %v3519_v42  ;;  %v2897_v44 = vld [vmem:[%s4070_s1 + $0x170] ss:$8 sps:$4 sm:$0xff]  }
  0x32   : > { %2073 = vmatprep.subr.bf16.mxu0 %v2827_v45  ;;  %v2900_v45 = vld [vmem:[%s4070_s1 + $0x570] ss:$8 sps:$4 sm:$0xff]  }
  0x34   : > { %1902 = vmatpush1.bf16.msra.mxu1 %v2829_v46  ;;  %v2905_v46 = vld [vmem:[%s4070_s1 + $0x184] ss:$8 sps:$4 sm:$0xff]  }
  0x35   : > { %2074 = vmatpush1.bf16.msra.mxu0 %v2830_v47  ;;  %1903 = vmatprep.subr.bf16.mxu1 %v2831_v50  ;;  %v2908_v47 = vld [vmem:[%s4070_s1 + $0x584] ss:$8 sps:$4 sm:$0xff]   ;;  %v2911_v50 = vld [vmem:[%s4070_s1 + $0x194] ss:$8 sps:$4 sm:$0xff]  }
  0x36   : > { %2075 = vmatprep.subr.bf16.mxu0 %v2833_v51  ;;  %v2914_v51 = vld [vmem:[%s4070_s1 + $0x594] ss:$8 sps:$4 sm:$0xff]  }
  0x38   : > { %1904 = vmatpush1.bf16.msra.mxu1 %v2835_v56  ;;  %v2915_v56 = vld [vmem:[%s4070_s1 + $0x1a0] ss:$8 sps:$4 sm:$0xff]  }
  0x39   : > { %2076 = vmatpush1.bf16.msra.mxu0 %v2836_v57  ;;  %1905 = vmatprep.subr.bf16.mxu1 %v2837_v58  ;;  %v2918_v57 = vld [vmem:[%s4070_s1 + $0x5a0] ss:$8 sps:$4 sm:$0xff]   ;;  %v2923_v58 = vld [vmem:[%s4070_s1 + $0x1b4] ss:$8 sps:$4 sm:$0xff]  }
  0x3a   : > { %2077 = vmatprep.subr.bf16.mxu0 %v2839_v59  ;;  %v2926_v59 = vld [vmem:[%s4070_s1 + $0x5b4] ss:$8 sps:$4 sm:$0xff]  }
  0x3c   : > { %1906 = vmatpush1.bf16.msra.mxu1 %v2841_v60  ;;  %v2921_v60 = vld [vmem:[%s4070_s1 + $0x1b0] ss:$8 sps:$4 sm:$0xff]  }
  0x3d   : > { %2078 = vmatpush1.bf16.msra.mxu0 %v2842_v61  ;;  %1907 = vmatprep.subr.bf16.mxu1 %v2843_v62  ;;  %v2924_v61 = vld [vmem:[%s4070_s1 + $0x5b0] ss:$8 sps:$4 sm:$0xff]   ;;  %v2929_v62 = vld [vmem:[%s4070_s1 + $0x1c4] ss:$8 sps:$4 sm:$0xff]  }
  0x3e   : > { %2079 = vmatprep.subr.bf16.mxu0 %v2845_v63  ;;  %v2932_v63 = vld [vmem:[%s4070_s1 + $0x5c4] ss:$8 sps:$4 sm:$0xff]  }
  0x40   : > { %1908 = vmatpush1.bf16.msra.mxu1 %v2847_v0  ;;  %v2927_v0 = vld [vmem:[%s4070_s1 + $0x1c0] ss:$8 sps:$4 sm:$0xff]  }
  0x41   : > { %2080 = vmatpush1.bf16.msra.mxu0 %v2848_v1  ;;  %1909 = vmatprep.subr.bf16.mxu1 %v2849_v2  ;;  %v2930_v1 = vld [vmem:[%s4070_s1 + $0x5c0] ss:$8 sps:$4 sm:$0xff]   ;;  %v2935_v2 = vld [vmem:[%s4070_s1 + $0x1d4] ss:$8 sps:$4 sm:$0xff]  }
  0x42   : > { %2081 = vmatprep.subr.bf16.mxu0 %v2851_v3  ;;  %v2938_v3 = vld [vmem:[%s4070_s1 + $0x5d4] ss:$8 sps:$4 sm:$0xff]  }
  0x44   : > { %1910 = vmatpush1.bf16.msra.mxu1 %v2853_v4  ;;  %v2933_v4 = vld [vmem:[%s4070_s1 + $0x1d0] ss:$8 sps:$4 sm:$0xff]  }
  0x45   : > { %2082 = vmatpush1.bf16.msra.mxu0 %v2854_v5  ;;  %1922 = vmatprep.subr.bf16.mxu1 %v2857_v6  ;;  %v2936_v5 = vld [vmem:[%s4070_s1 + $0x5d0] ss:$8 sps:$4 sm:$0xff]   ;;  %v2941_v6 = vld [vmem:[%s4070_s1 + $0x1e4] ss:$8 sps:$4 sm:$0xff]  }
  0x46   : > { %2094 = vmatprep.subr.bf16.mxu0 %v2860_v7  ;;  %v2944_v7 = vld [vmem:[%s4070_s1 + $0x5e4] ss:$8 sps:$4 sm:$0xff]  }
  0x47   : > { %1912 = vmatmul.mubr.bf16.vlgmr.msra.gmra.mrb[0].mxu1 %v2423_v8  ;;  %v2939_v8 = vld [vmem:[%s4070_s1 + $0x1e0] ss:$8 sps:$4 sm:$0xff]  }
  0x48   : > { %2084 = vmatmul.mubr.bf16.vlgmr.msra.gmra.mrb[0].mxu0 %v2431_v10  ;;  %1923 = vmatpush1.bf16.msra.mxu1 %v2855_v9  ;;  %v2942_v9 = vld [vmem:[%s4070_s1 + $0x5e0] ss:$8 sps:$4 sm:$0xff]   ;;  %v2947_v10 = vld [vmem:[%s4070_s1 + $0x1f4] ss:$8 sps:$4 sm:$0xff]  }
  0x49   : > { %2095 = vmatpush1.bf16.msra.mxu0 %v2858_v11  ;;  %1924 = vmatprep.subr.bf16.mxu1 %v2863_v12  ;;  %v2950_v11 = vld [vmem:[%s4070_s1 + $0x5f4] ss:$8 sps:$4 sm:$0xff]   ;;  %v2945_v12 = vld [vmem:[%s4070_s1 + $0x1f0] ss:$8 sps:$4 sm:$0xff]  }
  0x4a   : > { %2096 = vmatprep.subr.bf16.mxu0 %v2866_v13  ;;  %1954 = vmatprep.mubr.bf16.mxu1 %v2426_v40  ;;  %v2948_v13 = vld [vmem:[%s4070_s1 + $0x5f0] ss:$8 sps:$4 sm:$0xff]   ;;  %v2975_v40 = vld [vmem:[%s4070_s1 + $0x240] ss:$8 sps:$4 sm:$0xff]  }
  0x4b   : > { %2126 = vmatprep.mubr.bf16.mxu0 %v2434_v43  ;;  %v2986_v43 = vld [vmem:[%s4070_s1 + $0x654] ss:$8 sps:$4 sm:$0xff]  }
  0x4c   : > { %1925 = vmatpush1.bf16.msra.mxu1 %v2861_v14  ;;  %v2953_v14 = vld [vmem:[%s4070_s1 + $0x204] ss:$8 sps:$4 sm:$0xff]  }
  0x4d   : > { %2097 = vmatpush1.bf16.msra.mxu0 %v2864_v15  ;;  %1926 = vmatprep.subr.bf16.mxu1 %v2869_v16  ;;  %v2956_v15 = vld [vmem:[%s4070_s1 + $0x604] ss:$8 sps:$4 sm:$0xff]   ;;  %v2425_v16 = vcombine.low %v3502_v36, %v3505_v37  ;;  %v2969_v36 = vld [vmem:[%s4070_s1 + $0x230] ss:$8 sps:$4 sm:$0xff]  }
  0x4e   : > { %2098 = vmatprep.subr.bf16.mxu0 %v2872_v17  ;;  %v2951_v17 = vld [vmem:[%s4070_s1 + $0x200] ss:$8 sps:$4 sm:$0xff]   ;;  %v2972_v37 = vld [vmem:[%s4070_s1 + $0x630] ss:$8 sps:$4 sm:$0xff]  }
  0x50   : > { %1927 = vmatpush1.bf16.msra.mxu1 %v2867_v18  ;;  %v2433_v18 = vcombine.low %v3516_v41, %v3519_v42  ;;  %v2978_v41 = vld [vmem:[%s4070_s1 + $0x640] ss:$8 sps:$4 sm:$0xff]   ;;  %v2983_v42 = vld [vmem:[%s4070_s1 + $0x254] ss:$8 sps:$4 sm:$0xff]  }
  0x51   : > { %2099 = vmatpush1.bf16.msra.mxu0 %v2870_v19  ;;  %1928 = vmatprep.subr.bf16.mxu1 %v2875_v20  ;;  %v2954_v19 = vld [vmem:[%s4070_s1 + $0x600] ss:$8 sps:$4 sm:$0xff]   ;;  %v2959_v20 = vld [vmem:[%s4070_s1 + $0x214] ss:$8 sps:$4 sm:$0xff]  }
  0x52   : > { %2100 = vmatprep.subr.bf16.mxu0 %v2878_v21  ;;  %v2962_v21 = vld [vmem:[%s4070_s1 + $0x614] ss:$8 sps:$4 sm:$0xff]  }
  0x54   : > { %1929 = vmatpush1.bf16.msra.mxu1 %v2873_v22  ;;  %v2957_v22 = vld [vmem:[%s4070_s1 + $0x210] ss:$8 sps:$4 sm:$0xff]  }
  0x55   : > { %2101 = vmatpush1.bf16.msra.mxu0 %v2876_v23  ;;  %1930 = vmatprep.subr.bf16.mxu1 %v2881_v24  ;;  %v2960_v23 = vld [vmem:[%s4070_s1 + $0x610] ss:$8 sps:$4 sm:$0xff]  }
  0x56   : > { %2102 = vmatprep.subr.bf16.mxu0 %v2884_v25  ;;  %v3654_v24 = vld [vmem:[%s3351_s11 + $0x10] sm:$0xff] }
  0x57   : > { %v3657_v25 = vld [vmem:[%s3351_s11 + $0x50] sm:$0xff] }
  0x58   : > { %1931 = vmatpush1.bf16.msra.mxu1 %v2879_v26  ;;  %v2965_v26 = vld [vmem:[%s4070_s1 + $0x224] ss:$8 sps:$4 sm:$0xff]  }
  0x59   : > { %2103 = vmatpush1.bf16.msra.mxu0 %v2882_v27  ;;  %1932 = vmatprep.subr.bf16.mxu1 %v2887_v28  ;;  %v2968_v27 = vld [vmem:[%s4070_s1 + $0x624] ss:$8 sps:$4 sm:$0xff]   ;;  %v2428_v28 = vcombine.high %v3654_v24, %v3657_v25 }
  0x5a   : > { %2104 = vmatprep.subr.bf16.mxu0 %v2890_v29  ;;  %v3668_v29 = vld [vmem:[%s3351_s11 + $0x30] sm:$0xff] }
  0x5c   : > { %1933 = vmatpush1.bf16.msra.mxu1 %v2885_v30  ;;  %v3671_v30 = vld [vmem:[%s3351_s11 + $0x70] sm:$0xff] }
  0x5d   : > { %2105 = vmatpush1.bf16.msra.mxu0 %v2888_v31  ;;  %1934 = vmatprep.subr.bf16.mxu1 %v2893_v32  ;;  %v2436_v31 = vcombine.high %v3668_v29, %v3671_v30  ;;  %v2963_v32 = vld [vmem:[%s4070_s1 + $0x220] ss:$8 sps:$4 sm:$0xff]  }
  0x5e   : > { %2106 = vmatprep.subr.bf16.mxu0 %v2896_v33  ;;  %v2966_v33 = vld [vmem:[%s4070_s1 + $0x620] ss:$8 sps:$4 sm:$0xff]  }
  0x60   : > { %1935 = vmatpush1.bf16.msra.mxu1 %v2891_v34  ;;  %v2971_v34 = vld [vmem:[%s4070_s1 + $0x234] ss:$8 sps:$4 sm:$0xff]  }
  0x61   : > { %2107 = vmatpush1.bf16.msra.mxu0 %v2894_v35  ;;  %1936 = vmatprep.subr.bf16.mxu1 %v2899_v38  ;;  %v2974_v35 = vld [vmem:[%s4070_s1 + $0x634] ss:$8 sps:$4 sm:$0xff]   ;;  %v2977_v38 = vld [vmem:[%s4070_s1 + $0x244] ss:$8 sps:$4 sm:$0xff]  }
  0x62   : > { %2108 = vmatprep.subr.bf16.mxu0 %v2902_v39  ;;  %v2980_v39 = vld [vmem:[%s4070_s1 + $0x644] ss:$8 sps:$4 sm:$0xff]  }
  0x64   : > { %1937 = vmatpush1.bf16.msra.mxu1 %v2897_v44  ;;  %v2981_v44 = vld [vmem:[%s4070_s1 + $0x250] ss:$8 sps:$4 sm:$0xff]  }
  0x65   : > { %2109 = vmatpush1.bf16.msra.mxu0 %v2900_v45  ;;  %1938 = vmatprep.subr.bf16.mxu1 %v2905_v46  ;;  %v2984_v45 = vld [vmem:[%s4070_s1 + $0x650] ss:$8 sps:$4 sm:$0xff]   ;;  %v2989_v46 = vld [vmem:[%s4070_s1 + $0x264] ss:$8 sps:$4 sm:$0xff]  }
  0x66   : > { %2110 = vmatprep.subr.bf16.mxu0 %v2908_v47  ;;  %v2992_v47 = vld [vmem:[%s4070_s1 + $0x664] ss:$8 sps:$4 sm:$0xff]  }
  0x68   : > { %1939 = vmatpush1.bf16.msra.mxu1 %v2903_v48  ;;  %v2987_v48 = vld [vmem:[%s4070_s1 + $0x260] ss:$8 sps:$4 sm:$0xff]  }
  0x69   : > { %2111 = vmatpush1.bf16.msra.mxu0 %v2906_v49  ;;  %1940 = vmatprep.subr.bf16.mxu1 %v2911_v50  ;;  %v2990_v49 = vld [vmem:[%s4070_s1 + $0x660] ss:$8 sps:$4 sm:$0xff]   ;;  %v2995_v50 = vld [vmem:[%s4070_s1 + $0x274] ss:$8 sps:$4 sm:$0xff]  }
  0x6a   : > { %2112 = vmatprep.subr.bf16.mxu0 %v2914_v51  ;;  %v2998_v51 = vld [vmem:[%s4070_s1 + $0x674] ss:$8 sps:$4 sm:$0xff]  }
  0x6c   : > { %1941 = vmatpush1.bf16.msra.mxu1 %v2909_v52  ;;  %v2993_v52 = vld [vmem:[%s4070_s1 + $0x270] ss:$8 sps:$4 sm:$0xff]  }
  0x6d   : > { %2113 = vmatpush1.bf16.msra.mxu0 %v2912_v53  ;;  %1942 = vmatprep.subr.bf16.mxu1 %v2917_v54  ;;  %v2996_v53 = vld [vmem:[%s4070_s1 + $0x670] ss:$8 sps:$4 sm:$0xff]   ;;  %v3001_v54 = vld [vmem:[%s4070_s1 + $0x284] ss:$8 sps:$4 sm:$0xff]  }
  0x6e   : > { %2114 = vmatprep.subr.bf16.mxu0 %v2920_v55  ;;  %v3004_v55 = vld [vmem:[%s4070_s1 + $0x684] ss:$8 sps:$4 sm:$0xff]  }
  0x70   : > { %1943 = vmatpush1.bf16.msra.mxu1 %v2915_v56  ;;  %v2999_v56 = vld [vmem:[%s4070_s1 + $0x280] ss:$8 sps:$4 sm:$0xff]  }
  0x71   : > { %2115 = vmatpush1.bf16.msra.mxu0 %v2918_v57  ;;  %1944 = vmatprep.subr.bf16.mxu1 %v2923_v58  ;;  %v3002_v57 = vld [vmem:[%s4070_s1 + $0x680] ss:$8 sps:$4 sm:$0xff]   ;;  %v3007_v58 = vld [vmem:[%s4070_s1 + $0x294] ss:$8 sps:$4 sm:$0xff]  }
  0x72   : > { %2116 = vmatprep.subr.bf16.mxu0 %v2926_v59  ;;  %v3010_v59 = vld [vmem:[%s4070_s1 + $0x694] ss:$8 sps:$4 sm:$0xff]  }
  0x74   : > { %1945 = vmatpush1.bf16.msra.mxu1 %v2921_v60  ;;  %v3005_v60 = vld [vmem:[%s4070_s1 + $0x290] ss:$8 sps:$4 sm:$0xff]  }
  0x75   : > { %2117 = vmatpush1.bf16.msra.mxu0 %v2924_v61  ;;  %1946 = vmatprep.subr.bf16.mxu1 %v2929_v62  ;;  %v3008_v61 = vld [vmem:[%s4070_s1 + $0x690] ss:$8 sps:$4 sm:$0xff]   ;;  %v3013_v62 = vld [vmem:[%s4070_s1 + $0x2a4] ss:$8 sps:$4 sm:$0xff]  }
  0x76   : > { %2118 = vmatprep.subr.bf16.mxu0 %v2932_v63  ;;  %v3016_v63 = vld [vmem:[%s4070_s1 + $0x6a4] ss:$8 sps:$4 sm:$0xff]  }
  0x78   : > { %1947 = vmatpush1.bf16.msra.mxu1 %v2927_v0  ;;  %v3011_v0 = vld [vmem:[%s4070_s1 + $0x2a0] ss:$8 sps:$4 sm:$0xff]  }
  0x79   : > { %2119 = vmatpush1.bf16.msra.mxu0 %v2930_v1  ;;  %1948 = vmatprep.subr.bf16.mxu1 %v2935_v2  ;;  %v3014_v1 = vld [vmem:[%s4070_s1 + $0x6a0] ss:$8 sps:$4 sm:$0xff]   ;;  %v3019_v2 = vld [vmem:[%s4070_s1 + $0x2b4] ss:$8 sps:$4 sm:$0xff]  }
  0x7a   : > { %2120 = vmatprep.subr.bf16.mxu0 %v2938_v3  ;;  %v3022_v3 = vld [vmem:[%s4070_s1 + $0x6b4] ss:$8 sps:$4 sm:$0xff]  }
  0x7c   : > { %1949 = vmatpush1.bf16.msra.mxu1 %v2933_v4  ;;  %v3017_v4 = vld [vmem:[%s4070_s1 + $0x2b0] ss:$8 sps:$4 sm:$0xff]  }
  0x7d   : > { %2121 = vmatpush1.bf16.msra.mxu0 %v2936_v5  ;;  %1950 = vmatprep.subr.bf16.mxu1 %v2941_v6  ;;  %v3020_v5 = vld [vmem:[%s4070_s1 + $0x6b0] ss:$8 sps:$4 sm:$0xff]   ;;  %v3025_v6 = vld [vmem:[%s4070_s1 + $0x2c4] ss:$8 sps:$4 sm:$0xff]  }
  0x7e   : > { %2122 = vmatprep.subr.bf16.mxu0 %v2944_v7  ;;  %v3028_v7 = vld [vmem:[%s4070_s1 + $0x6c4] ss:$8 sps:$4 sm:$0xff]  }
  0x80   : > { %1951 = vmatpush1.bf16.msra.mxu1 %v2939_v8  ;;  %v3023_v8 = vld [vmem:[%s4070_s1 + $0x2c0] ss:$8 sps:$4 sm:$0xff]  }
  0x81   : > { %2123 = vmatpush1.bf16.msra.mxu0 %v2942_v9  ;;  %1952 = vmatprep.subr.bf16.mxu1 %v2947_v10  ;;  %v3026_v9 = vld [vmem:[%s4070_s1 + $0x6c0] ss:$8 sps:$4 sm:$0xff]   ;;  %v3031_v10 = vld [vmem:[%s4070_s1 + $0x2d4] ss:$8 sps:$4 sm:$0xff]  }
  0x82   : > { %2124 = vmatprep.subr.bf16.mxu0 %v2950_v11  ;;  %v3034_v11 = vld [vmem:[%s4070_s1 + $0x6d4] ss:$8 sps:$4 sm:$0xff]  }
  0x84   : > { %1953 = vmatpush1.bf16.msra.mxu1 %v2945_v12  ;;  %v3029_v12 = vld [vmem:[%s4070_s1 + $0x2d0] ss:$8 sps:$4 sm:$0xff]  }
  0x85   : > { %2125 = vmatpush1.bf16.msra.mxu0 %v2948_v13  ;;  %1965 = vmatprep.subr.bf16.mxu1 %v2953_v14  ;;  %v3032_v13 = vld [vmem:[%s4070_s1 + $0x6d0] ss:$8 sps:$4 sm:$0xff]   ;;  %v3037_v14 = vld [vmem:[%s4070_s1 + $0x2e4] ss:$8 sps:$4 sm:$0xff]  }
  0x86   : > { %2137 = vmatprep.subr.bf16.mxu0 %v2956_v15  ;;  %v3040_v15 = vld [vmem:[%s4070_s1 + $0x6e4] ss:$8 sps:$4 sm:$0xff]  }
  0x87   : > { %1955 = vmatmul.mubr.bf16.vlgmr.msra.gmra.mrb[0].mxu1 %v2425_v16  ;;  %v3035_v16 = vld [vmem:[%s4070_s1 + $0x2e0] ss:$8 sps:$4 sm:$0xff]  }
  0x88   : > { %2127 = vmatmul.mubr.bf16.vlgmr.msra.gmra.mrb[0].mxu0 %v2433_v18  ;;  %1966 = vmatpush1.bf16.msra.mxu1 %v2951_v17  ;;  %v3038_v17 = vld [vmem:[%s4070_s1 + $0x6e0] ss:$8 sps:$4 sm:$0xff]   ;;  %v3043_v18 = vld [vmem:[%s4070_s1 + $0x2f4] ss:$8 sps:$4 sm:$0xff]  }
  0x89   : > { %2138 = vmatpush1.bf16.msra.mxu0 %v2954_v19  ;;  %1967 = vmatprep.subr.bf16.mxu1 %v2959_v20  ;;  %v3046_v19 = vld [vmem:[%s4070_s1 + $0x6f4] ss:$8 sps:$4 sm:$0xff]   ;;  %v3041_v20 = vld [vmem:[%s4070_s1 + $0x2f0] ss:$8 sps:$4 sm:$0xff]  }
  0x8a   : > { %2139 = vmatprep.subr.bf16.mxu0 %v2962_v21  ;;  %1997 = vmatprep.mubr.bf16.mxu1 %v2428_v28  ;;  %v3044_v21 = vld [vmem:[%s4070_s1 + $0x6f0] ss:$8 sps:$4 sm:$0xff]   ;;  %v2435_v28 = vcombine.low %v3668_v29, %v3671_v30 }
  0x8b   : > { %2169 = vmatprep.mubr.bf16.mxu0 %v2436_v31  ;;  %v3851_v31 = vld [vmem:[%s3351_s11 + $0x58] sm:$0xff] }
  0x8c   : > { %1968 = vmatpush1.bf16.msra.mxu1 %v2957_v22  ;;  %v3049_v22 = vld [vmem:[%s4070_s1 + $0x304] ss:$8 sps:$4 sm:$0xff]  }
  0x8d   : > { %2140 = vmatpush1.bf16.msra.mxu0 %v2960_v23  ;;  %1969 = vmatprep.subr.bf16.mxu1 %v2965_v26  ;;  %v3052_v23 = vld [vmem:[%s4070_s1 + $0x704] ss:$8 sps:$4 sm:$0xff]   ;;  %v3844_v26 = vld [vmem:[%s3351_s11 + $0x18] sm:$0xff] }
  0x8e   : > { %2141 = vmatprep.subr.bf16.mxu0 %v2968_v27  ;;  %v2427_v27 = vcombine.low %v3654_v24, %v3657_v25  ;;  %v3055_v24 = vld [vmem:[%s4070_s1 + $0x314] ss:$8 sps:$4 sm:$0xff]   ;;  %v2430_v29 = vcombine.high %v3844_v26, %v3851_v31 }
  0x8f   : > { %v3058_v25 = vld [vmem:[%s4070_s1 + $0x714] ss:$8 sps:$4 sm:$0xff]  }
  0x90   : > { %1970 = vmatpush1.bf16.msra.mxu1 %v2963_v32  ;;  %v3854_v32 = vld [vmem:[%s3351_s11 + $0x38] sm:$0xff] }
  0x91   : > { %2142 = vmatpush1.bf16.msra.mxu0 %v2966_v33  ;;  %1971 = vmatprep.subr.bf16.mxu1 %v2971_v34  ;;  %v3857_v33 = vld [vmem:[%s3351_s11 + $0x78] sm:$0xff]  ;;  %v3047_v34 = vld [vmem:[%s4070_s1 + $0x300] ss:$8 sps:$4 sm:$0xff]  }
  0x92   : > { %2143 = vmatprep.subr.bf16.mxu0 %v2974_v35  ;;  %v3050_v35 = vld [vmem:[%s4070_s1 + $0x700] ss:$8 sps:$4 sm:$0xff]   ;;  %v2438_v30 = vcombine.high %v3854_v32, %v3857_v33 }
  0x94   : > { %1972 = vmatpush1.bf16.msra.mxu1 %v2969_v36  ;;  %v3053_v36 = vld [vmem:[%s4070_s1 + $0x310] ss:$8 sps:$4 sm:$0xff]  }
  0x95   : > { %2144 = vmatpush1.bf16.msra.mxu0 %v2972_v37  ;;  %1973 = vmatprep.subr.bf16.mxu1 %v2977_v38  ;;  %v3056_v37 = vld [vmem:[%s4070_s1 + $0x710] ss:$8 sps:$4 sm:$0xff]   ;;  %v3061_v38 = vld [vmem:[%s4070_s1 + $0x324] ss:$8 sps:$4 sm:$0xff]  }
  0x96   : > { %2145 = vmatprep.subr.bf16.mxu0 %v2980_v39  ;;  %v3064_v39 = vld [vmem:[%s4070_s1 + $0x724] ss:$8 sps:$4 sm:$0xff]  }
  0x98   : > { %1974 = vmatpush1.bf16.msra.mxu1 %v2975_v40  ;;  %v3059_v40 = vld [vmem:[%s4070_s1 + $0x320] ss:$8 sps:$4 sm:$0xff]  }
  0x99   : > { %2146 = vmatpush1.bf16.msra.mxu0 %v2978_v41  ;;  %1975 = vmatprep.subr.bf16.mxu1 %v2983_v42  ;;  %v3062_v41 = vld [vmem:[%s4070_s1 + $0x720] ss:$8 sps:$4 sm:$0xff]   ;;  %v3067_v42 = vld [vmem:[%s4070_s1 + $0x334] ss:$8 sps:$4 sm:$0xff]  }
  0x9a   : > { %2147 = vmatprep.subr.bf16.mxu0 %v2986_v43  ;;  %v3070_v43 = vld [vmem:[%s4070_s1 + $0x734] ss:$8 sps:$4 sm:$0xff]  }
  0x9c   : > { %1976 = vmatpush1.bf16.msra.mxu1 %v2981_v44  ;;  %v3065_v44 = vld [vmem:[%s4070_s1 + $0x330] ss:$8 sps:$4 sm:$0xff]  }
  0x9d   : > { %2148 = vmatpush1.bf16.msra.mxu0 %v2984_v45  ;;  %1977 = vmatprep.subr.bf16.mxu1 %v2989_v46  ;;  %v3068_v45 = vld [vmem:[%s4070_s1 + $0x730] ss:$8 sps:$4 sm:$0xff]   ;;  %v3073_v46 = vld [vmem:[%s4070_s1 + $0x344] ss:$8 sps:$4 sm:$0xff]  }
  0x9e   : > { %2149 = vmatprep.subr.bf16.mxu0 %v2992_v47  ;;  %v3076_v47 = vld [vmem:[%s4070_s1 + $0x744] ss:$8 sps:$4 sm:$0xff]  }
  0xa0   : > { %1978 = vmatpush1.bf16.msra.mxu1 %v2987_v48  ;;  %v3071_v48 = vld [vmem:[%s4070_s1 + $0x340] ss:$8 sps:$4 sm:$0xff]  }
  0xa1   : > { %2150 = vmatpush1.bf16.msra.mxu0 %v2990_v49  ;;  %1979 = vmatprep.subr.bf16.mxu1 %v2995_v50  ;;  %v3074_v49 = vld [vmem:[%s4070_s1 + $0x740] ss:$8 sps:$4 sm:$0xff]   ;;  %v3079_v50 = vld [vmem:[%s4070_s1 + $0x354] ss:$8 sps:$4 sm:$0xff]  }
  0xa2   : > { %2151 = vmatprep.subr.bf16.mxu0 %v2998_v51  ;;  %v3082_v51 = vld [vmem:[%s4070_s1 + $0x754] ss:$8 sps:$4 sm:$0xff]  }
  0xa4   : > { %1980 = vmatpush1.bf16.msra.mxu1 %v2993_v52  ;;  %v3077_v52 = vld [vmem:[%s4070_s1 + $0x350] ss:$8 sps:$4 sm:$0xff]  }
  0xa5   : > { %2152 = vmatpush1.bf16.msra.mxu0 %v2996_v53  ;;  %1981 = vmatprep.subr.bf16.mxu1 %v3001_v54  ;;  %v3080_v53 = vld [vmem:[%s4070_s1 + $0x750] ss:$8 sps:$4 sm:$0xff]   ;;  %v3085_v54 = vld [vmem:[%s4070_s1 + $0x364] ss:$8 sps:$4 sm:$0xff]  }
  0xa6   : > { %2153 = vmatprep.subr.bf16.mxu0 %v3004_v55  ;;  %v3088_v55 = vld [vmem:[%s4070_s1 + $0x764] ss:$8 sps:$4 sm:$0xff]  }
  0xa8   : > { %1982 = vmatpush1.bf16.msra.mxu1 %v2999_v56  ;;  %v3083_v56 = vld [vmem:[%s4070_s1 + $0x360] ss:$8 sps:$4 sm:$0xff]  }
  0xa9   : > { %2154 = vmatpush1.bf16.msra.mxu0 %v3002_v57  ;;  %1983 = vmatprep.subr.bf16.mxu1 %v3007_v58  ;;  %v3086_v57 = vld [vmem:[%s4070_s1 + $0x760] ss:$8 sps:$4 sm:$0xff]   ;;  %v3091_v58 = vld [vmem:[%s4070_s1 + $0x374] ss:$8 sps:$4 sm:$0xff]  }
  0xaa   : > { %2155 = vmatprep.subr.bf16.mxu0 %v3010_v59  ;;  %v3094_v59 = vld [vmem:[%s4070_s1 + $0x774] ss:$8 sps:$4 sm:$0xff]  }
  0xac   : > { %1984 = vmatpush1.bf16.msra.mxu1 %v3005_v60  ;;  %v3089_v60 = vld [vmem:[%s4070_s1 + $0x370] ss:$8 sps:$4 sm:$0xff]  }
  0xad   : > { %2156 = vmatpush1.bf16.msra.mxu0 %v3008_v61  ;;  %1985 = vmatprep.subr.bf16.mxu1 %v3013_v62  ;;  %v3092_v61 = vld [vmem:[%s4070_s1 + $0x770] ss:$8 sps:$4 sm:$0xff]   ;;  %v3097_v62 = vld [vmem:[%s4070_s1 + $0x384] ss:$8 sps:$4 sm:$0xff]  }
  0xae   : > { %2157 = vmatprep.subr.bf16.mxu0 %v3016_v63  ;;  %v3100_v63 = vld [vmem:[%s4070_s1 + $0x784] ss:$8 sps:$4 sm:$0xff]  }
  0xb0   : > { %1986 = vmatpush1.bf16.msra.mxu1 %v3011_v0  ;;  %v3095_v0 = vld [vmem:[%s4070_s1 + $0x380] ss:$8 sps:$4 sm:$0xff]  }
  0xb1   : > { %2158 = vmatpush1.bf16.msra.mxu0 %v3014_v1  ;;  %1987 = vmatprep.subr.bf16.mxu1 %v3019_v2  ;;  %v3098_v1 = vld [vmem:[%s4070_s1 + $0x780] ss:$8 sps:$4 sm:$0xff]   ;;  %v3103_v2 = vld [vmem:[%s4070_s1 + $0x394] ss:$8 sps:$4 sm:$0xff]  }
  0xb2   : > { %2159 = vmatprep.subr.bf16.mxu0 %v3022_v3  ;;  %v3106_v3 = vld [vmem:[%s4070_s1 + $0x794] ss:$8 sps:$4 sm:$0xff]  }
  0xb4   : > { %1988 = vmatpush1.bf16.msra.mxu1 %v3017_v4  ;;  %v3101_v4 = vld [vmem:[%s4070_s1 + $0x390] ss:$8 sps:$4 sm:$0xff]  }
  0xb5   : > { %2160 = vmatpush1.bf16.msra.mxu0 %v3020_v5  ;;  %1989 = vmatprep.subr.bf16.mxu1 %v3025_v6  ;;  %v3104_v5 = vld [vmem:[%s4070_s1 + $0x790] ss:$8 sps:$4 sm:$0xff]   ;;  %v3109_v6 = vld [vmem:[%s4070_s1 + $0x3a4] ss:$8 sps:$4 sm:$0xff]  }
  0xb6   : > { %2161 = vmatprep.subr.bf16.mxu0 %v3028_v7  ;;  %v3112_v7 = vld [vmem:[%s4070_s1 + $0x7a4] ss:$8 sps:$4 sm:$0xff]  }
  0xb8   : > { %1990 = vmatpush1.bf16.msra.mxu1 %v3023_v8  ;;  %v3107_v8 = vld [vmem:[%s4070_s1 + $0x3a0] ss:$8 sps:$4 sm:$0xff]  }
  0xb9   : > { %2162 = vmatpush1.bf16.msra.mxu0 %v3026_v9  ;;  %1991 = vmatprep.subr.bf16.mxu1 %v3031_v10  ;;  %v3110_v9 = vld [vmem:[%s4070_s1 + $0x7a0] ss:$8 sps:$4 sm:$0xff]   ;;  %v3115_v10 = vld [vmem:[%s4070_s1 + $0x3b4] ss:$8 sps:$4 sm:$0xff]  }
  0xba   : > { %2163 = vmatprep.subr.bf16.mxu0 %v3034_v11  ;;  %v3118_v11 = vld [vmem:[%s4070_s1 + $0x7b4] ss:$8 sps:$4 sm:$0xff]  }
  0xbc   : > { %1992 = vmatpush1.bf16.msra.mxu1 %v3029_v12  ;;  %v3113_v12 = vld [vmem:[%s4070_s1 + $0x3b0] ss:$8 sps:$4 sm:$0xff]  }
  0xbd   : > { %2164 = vmatpush1.bf16.msra.mxu0 %v3032_v13  ;;  %1993 = vmatprep.subr.bf16.mxu1 %v3037_v14  ;;  %v3116_v13 = vld [vmem:[%s4070_s1 + $0x7b0] ss:$8 sps:$4 sm:$0xff]   ;;  %v3121_v14 = vld [vmem:[%s4070_s1 + $0x3c4] ss:$8 sps:$4 sm:$0xff]  }
  0xbe   : > { %2165 = vmatprep.subr.bf16.mxu0 %v3040_v15  ;;  %v3124_v15 = vld [vmem:[%s4070_s1 + $0x7c4] ss:$8 sps:$4 sm:$0xff]  }
  0xc0   : > { %1994 = vmatpush1.bf16.msra.mxu1 %v3035_v16  ;;  %v3119_v16 = vld [vmem:[%s4070_s1 + $0x3c0] ss:$8 sps:$4 sm:$0xff]  }
  0xc1   : > { %2166 = vmatpush1.bf16.msra.mxu0 %v3038_v17  ;;  %1995 = vmatprep.subr.bf16.mxu1 %v3043_v18  ;;  %v3122_v17 = vld [vmem:[%s4070_s1 + $0x7c0] ss:$8 sps:$4 sm:$0xff]   ;;  %v3127_v18 = vld [vmem:[%s4070_s1 + $0x3d4] ss:$8 sps:$4 sm:$0xff]  }
  0xc2   : > { %2167 = vmatprep.subr.bf16.mxu0 %v3046_v19  ;;  %v3130_v19 = vld [vmem:[%s4070_s1 + $0x7d4] ss:$8 sps:$4 sm:$0xff]  }
  0xc4   : > { %1996 = vmatpush1.bf16.msra.mxu1 %v3041_v20  ;;  %v3125_v20 = vld [vmem:[%s4070_s1 + $0x3d0] ss:$8 sps:$4 sm:$0xff]  }
  0xc5   : > { %2168 = vmatpush1.bf16.msra.mxu0 %v3044_v21  ;;  %2008 = vmatprep.subr.bf16.mxu1 %v3049_v22  ;;  %v3128_v21 = vld [vmem:[%s4070_s1 + $0x7d0] ss:$8 sps:$4 sm:$0xff]   ;;  %v3133_v22 = vld [vmem:[%s4070_s1 + $0x3e4] ss:$8 sps:$4 sm:$0xff]  }
  0xc6   : > { %2180 = vmatprep.subr.bf16.mxu0 %v3052_v23  ;;  %v3136_v23 = vld [vmem:[%s4070_s1 + $0x7e4] ss:$8 sps:$4 sm:$0xff]  }
  0xc7   : > { %1998 = vmatmul.mubr.bf16.vlgmr.msra.gmra.mrb[0].mxu1 %v2427_v27  ;;  %v3131_v27 = vld [vmem:[%s4070_s1 + $0x3e0] ss:$8 sps:$4 sm:$0xff]  }
  0xc8   : > { %2170 = vmatmul.mubr.bf16.vlgmr.msra.gmra.mrb[0].mxu0 %v2435_v28  ;;  %2009 = vmatpush1.bf16.msra.mxu1 %v3047_v34  ;;  %v3134_v28 = vld [vmem:[%s4070_s1 + $0x7e0] ss:$8 sps:$4 sm:$0xff]   ;;  %v3139_v34 = vld [vmem:[%s4070_s1 + $0x3f4] ss:$8 sps:$4 sm:$0xff]  }
  0xc9   : > { %2181 = vmatpush1.bf16.msra.mxu0 %v3050_v35  ;;  %2010 = vmatprep.subr.bf16.mxu1 %v3055_v24  ;;  %v3142_v35 = vld [vmem:[%s4070_s1 + $0x7f4] ss:$8 sps:$4 sm:$0xff]   ;;  %v3137_v24 = vld [vmem:[%s4070_s1 + $0x3f0] ss:$8 sps:$4 sm:$0xff]  }
  0xca   : > { %2182 = vmatprep.subr.bf16.mxu0 %v3058_v25  ;;  %2040 = vmatprep.mubr.bf16.mxu1 %v2430_v29  ;;  %v3140_v25 = vld [vmem:[%s4070_s1 + $0x7f0] ss:$8 sps:$4 sm:$0xff]   ;;  %v2429_v29 = vcombine.low %v3844_v26, %v3851_v31 }
  0xcb   : > { %2212 = vmatprep.mubr.bf16.mxu0 %v2438_v30  ;;  %v2437_v30 = vcombine.low %v3854_v32, %v3857_v33 }
  0xcc   : > { %2011 = vmatpush1.bf16.msra.mxu1 %v3053_v36  ;;  %v509_v36 = vlaneseq }
  0xcd   : > { %2183 = vmatpush1.bf16.msra.mxu0 %v3056_v37  ;;  %2012 = vmatprep.subr.bf16.mxu1 %v3061_v38 }
  0xce   : > { %2184 = vmatprep.subr.bf16.mxu0 %v3064_v39  ;;  %v510_v37 = vshrl.u32 %v509_v36, 7  ;;  %v507_v39 = vld [vmem:[%s4071_s2] sm:$0x3] }
  0xd0   : > { %2013 = vmatpush1.bf16.msra.mxu1 %v3059_v40  ;;  %v511_v38 = vsub.s32 0, %v510_v37  ;;  %v515_v40 = vsub.s32 1, %v510_v37 }
  0xd1   : > { %2185 = vmatpush1.bf16.msra.mxu0 %v3062_v41  ;;  %2014 = vmatprep.subr.bf16.mxu1 %v3067_v42 }
  0xd2   : > { %2186 = vmatprep.subr.bf16.mxu0 %v3070_v43  ;;  %v512_v41 = vrot.slane %v507_v39, %v511_v38  ;;  %v516_v42 = vrot.slane %v507_v39, %v515_v40 }
  0xd4   : > { %2015 = vmatpush1.bf16.msra.mxu1 %v3065_v44 }
  0xd5   : > { %2187 = vmatpush1.bf16.msra.mxu0 %v3068_v45  ;;  %2016 = vmatprep.subr.bf16.mxu1 %v3073_v46 }
  0xd6   : > { %2188 = vmatprep.subr.bf16.mxu0 %v3076_v47 }
  0xd8   : > { %2017 = vmatpush1.bf16.msra.mxu1 %v3071_v48 }
  0xd9   : > { %2189 = vmatpush1.bf16.msra.mxu0 %v3074_v49  ;;  %2018 = vmatprep.subr.bf16.mxu1 %v3079_v50 }
  0xda   : > { %2190 = vmatprep.subr.bf16.mxu0 %v3082_v51 }
  0xdc   : > { %2019 = vmatpush1.bf16.msra.mxu1 %v3077_v52 }
  0xdd   : > { %2191 = vmatpush1.bf16.msra.mxu0 %v3080_v53  ;;  %2020 = vmatprep.subr.bf16.mxu1 %v3085_v54 }
  0xde   : > { %2192 = vmatprep.subr.bf16.mxu0 %v3088_v55 }
  0xe0   : > { %2021 = vmatpush1.bf16.msra.mxu1 %v3083_v56 }
  0xe1   : > { %2193 = vmatpush1.bf16.msra.mxu0 %v3086_v57  ;;  %2022 = vmatprep.subr.bf16.mxu1 %v3091_v58 }
  0xe2   : > { %2194 = vmatprep.subr.bf16.mxu0 %v3094_v59 }
  0xe4   : > { %2023 = vmatpush1.bf16.msra.mxu1 %v3089_v60 }
  0xe5   : > { %2195 = vmatpush1.bf16.msra.mxu0 %v3092_v61  ;;  %2024 = vmatprep.subr.bf16.mxu1 %v3097_v62 }
  0xe6   : > { %2196 = vmatprep.subr.bf16.mxu0 %v3100_v63 }
  0xe8   : > { %2025 = vmatpush1.bf16.msra.mxu1 %v3095_v0 }
  0xe9   : > { %2197 = vmatpush1.bf16.msra.mxu0 %v3098_v1  ;;  %2026 = vmatprep.subr.bf16.mxu1 %v3103_v2 }
  0xea   : > { %2198 = vmatprep.subr.bf16.mxu0 %v3106_v3 }
  0xec   : > { %2027 = vmatpush1.bf16.msra.mxu1 %v3101_v4 }
  0xed   : > { %2199 = vmatpush1.bf16.msra.mxu0 %v3104_v5  ;;  %2028 = vmatprep.subr.bf16.mxu1 %v3109_v6 }
  0xee   : > { %2200 = vmatprep.subr.bf16.mxu0 %v3112_v7 }
  0xf0   : > { %2029 = vmatpush1.bf16.msra.mxu1 %v3107_v8 }
  0xf1   : > { %2201 = vmatpush1.bf16.msra.mxu0 %v3110_v9  ;;  %2030 = vmatprep.subr.bf16.mxu1 %v3115_v10 }
  0xf2   : > { %2202 = vmatprep.subr.bf16.mxu0 %v3118_v11 }
  0xf4   : > { %2031 = vmatpush1.bf16.msra.mxu1 %v3113_v12 }
  0xf5   : > { %2203 = vmatpush1.bf16.msra.mxu0 %v3116_v13  ;;  %2032 = vmatprep.subr.bf16.mxu1 %v3121_v14 }
  0xf6   : > { %2204 = vmatprep.subr.bf16.mxu0 %v3124_v15 }
  0xf8   : > { %2033 = vmatpush1.bf16.msra.mxu1 %v3119_v16 }
  0xf9   : > { %2205 = vmatpush1.bf16.msra.mxu0 %v3122_v17  ;;  %2034 = vmatprep.subr.bf16.mxu1 %v3127_v18 }
  0xfa   : > { %2206 = vmatprep.subr.bf16.mxu0 %v3130_v19 }
  0xfc   : > { %2035 = vmatpush1.bf16.msra.mxu1 %v3125_v20 }
  0xfd   : > { %2207 = vmatpush1.bf16.msra.mxu0 %v3128_v21  ;;  %2036 = vmatprep.subr.bf16.mxu1 %v3133_v22 }
  0xfe   : > { %2208 = vmatprep.subr.bf16.mxu0 %v3136_v23 }
 0x100   : > { %2037 = vmatpush1.bf16.msra.mxu1 %v3131_v27 }
 0x101   : > { %2209 = vmatpush1.bf16.msra.mxu0 %v3134_v28  ;;  %2038 = vmatprep.subr.bf16.mxu1 %v3139_v34 }
 0x102   : > { %2210 = vmatprep.subr.bf16.mxu0 %v3142_v35 }
 0x104   : > { %2039 = vmatpush1.bf16.msra.mxu1 %v3137_v24 }
 0x105   : > { %2211 = vmatpush1.bf16.msra.mxu0 %v3140_v25 }
 0x107   : > { %2041 = vmatmul.mubr.bf16.vlgmr.msra.gmra.mrb[0].mxu1 %v2429_v29 }
 0x108   : > { %2213 = vmatmul.mubr.bf16.vlgmr.msra.gmra.mrb[0].mxu0 %v2437_v30 }
 0x1da   : > { %v2042_v43 = vpop.f32.mrb[0].mxu1 }
 0x1db   : > { %v2214_v44 = vpop.f32.mrb[0].mxu0  ;;  %v2703_v26 = vadd.f32 %v2042_v43, %v512_v41  ;;  %v2044_v31 = vpop.f32.mrb[1].mxu1 }
 0x1dc   : > { %v2216_v45 = vpop.f32.mrb[1].mxu0  ;;  %v2705_v32 = vadd.f32 %v2044_v31, %v516_v42  ;;  %v2046_v33 = vpop.f32.mrb[2].mxu1 }
 0x1dd   : > { %v2218_v46 = vpop.f32.mrb[2].mxu0  ;;  %v2704_v47 = vadd.f32 %v2703_v26, %v2214_v44  ;;  %v2707_v48 = vadd.f32 %v2046_v33, %v512_v41  ;;  %v2048_v49 = vpop.f32.mrb[3].mxu1 }
 0x1de   : > { %v2220_v50 = vpop.f32.mrb[3].mxu0  ;;  %v2706_v51 = vadd.f32 %v2705_v32, %v2216_v45  ;;  %v2709_v52 = vadd.f32 %v2048_v49, %v516_v42 }
 0x1df   : > { %v2708_v53 = vadd.f32 %v2707_v48, %v2218_v46  ;;  %v2240_v55 = vmul.f32 %v2704_v47, %v2704_v47 }
 0x1e0   : > { %v2710_v54 = vadd.f32 %v2709_v52, %v2220_v50  ;;  %v2241_v58 = vmul.f32 %v2706_v51, %v2706_v51 }
 0x1e1   : > { %v2223_v56 = vadd.f32 %v2708_v53, %v2704_v47  ;;  %v2242_v57 = vmul.f32 %v2708_v53, %v2708_v53 }
 0x1e2   : > { %v2230_v59 = vadd.f32 %v2710_v54, %v2706_v51  ;;  %v2243_v60 = vmul.f32 %v2710_v54, %v2710_v54 }
 0x1e3   : > { %v2224_v61 = vrot.slane %v2223_v56, 4  ;;  %v2244_v62 = vadd.f32 %v2242_v57, %v2240_v55 }
 0x1e4   : > { %v2231_v63 = vrot.slane %v2230_v59, 4  ;;  %v2251_v0 = vadd.f32 %v2243_v60, %v2241_v58 }
 0x1e5   : > { %v2225_v1 = vadd.f32 %v2224_v61, %v2223_v56  ;;  %v2245_v2 = vrot.slane %v2244_v62, 4 }
 0x1e6   : > { %v2232_v3 = vadd.f32 %v2231_v63, %v2230_v59  ;;  %v2252_v4 = vrot.slane %v2251_v0, 4 }
 0x1e7   : > { %v2226_v5 = vrot.slane %v2225_v1, 2  ;;  %v2246_v6 = vadd.f32 %v2245_v2, %v2244_v62 }
 0x1e8   : > { %v2233_v7 = vrot.slane %v2232_v3, 2  ;;  %v2253_v8 = vadd.f32 %v2252_v4, %v2251_v0 }
 0x1e9   : > { %v2227_v9 = vadd.f32 %v2226_v5, %v2225_v1  ;;  %v2247_v10 = vrot.slane %v2246_v6, 2 }
 0x1ea   : > { %v2234_v11 = vadd.f32 %v2233_v7, %v2232_v3  ;;  %v2254_v12 = vrot.slane %v2253_v8, 2 }
 0x1eb   : > { %v2228_v13 = vrot.slane %v2227_v9, 1  ;;  %v2248_v14 = vadd.f32 %v2247_v10, %v2246_v6 }
 0x1ec   : > { %v2235_v15 = vrot.slane %v2234_v11, 1  ;;  %v2255_v16 = vadd.f32 %v2254_v12, %v2253_v8 }
 0x1ed   : > { %v2229_v17 = vadd.f32 %v2228_v13, %v2227_v9  ;;  %v2249_v18 = vrot.slane %v2248_v14, 1 }
 0x1ee   : > { %v2236_v19 = vadd.f32 %v2235_v15, %v2234_v11  ;;  %v2256_v20 = vrot.slane %v2255_v16, 1 }
 0x1ef   : > { %v2238_v21 = vmul.f32 0.0625, %v2229_v17  ;;  %v2250_v22 = vadd.f32 %v2249_v18, %v2248_v14 }
 0x1f0   : > { %v2239_v23 = vmul.f32 0.0625, %v2236_v19  ;;  %v2257_v27 = vadd.f32 %v2256_v20, %v2255_v16 }
 0x1f1   : > { %v2258_v28 = vmul.f32 0.0625, %v2250_v22  ;;  %v2260_v34 = vmul.f32 %v2238_v21, %v2238_v21  ;;  %v2266_v35 = vsub.f32 %v2704_v47, %v2238_v21  ;;  %v2268_v24 = vsub.f32 %v2708_v53, %v2238_v21 }
 0x1f2   : > { %v2259_v25 = vmul.f32 0.0625, %v2257_v27  ;;  %v2261_v29 = vmul.f32 %v2239_v23, %v2239_v23  ;;  %v2267_v30 = vsub.f32 %v2706_v51, %v2239_v23  ;;  %v2269_v36 = vsub.f32 %v2710_v54, %v2239_v23 }
 0x1f3   : > { %v2262_v37 = vsub.f32 %v2258_v28, %v2260_v34 }
 0x1f4   : > { %v2263_v38 = vsub.f32 %v2259_v25, %v2261_v29 }
 0x1f5   : > { %v2264_v39 = vmax.f32 %v2262_v37, 0.0 }
 0x1f6   : > { %v2265_v40 = vmax.f32 %v2263_v38, 0.0 }
 0x1f7   : > { %v2270_v41 = vadd.f32 1e-05, %v2264_v39 }
 0x1f8   : > { %v2271_v42 = vadd.f32 1e-05, %v2265_v40 }
 0x1f9   : > { %3143 = vrsqrt.f32 %v2270_v41 }
 0x1fa   : > { %3145 = vrsqrt.f32 %v2271_v42 }
 0x203   : > { %v3144_v43 = vpop.eup %3143 }
 0x204   : > { %v3146_v44 = vpop.eup %3145  ;;  %v2274_v26 = vmul.f32 %v3144_v43, %v2266_v35  ;;  %v2276_v31 = vmul.f32 %v3144_v43, %v2268_v24 }
 0x205   : > { %v2275_v45 = vmul.f32 %v3146_v44, %v2267_v30  ;;  %v2277_v32 = vmul.f32 %v3146_v44, %v2269_v36 }
 0x206   : > { %vm2278_vm0 = vcmp.gt.f32.partialorder %v2274_v26, 0.0  ;;  %vm2280_vm1 = vcmp.gt.f32.partialorder %v2276_v31, 0.0  ;;  %v2282_v33 = vmul.f32 0.2, %v2274_v26  ;;  %v2284_v46 = vmul.f32 0.2, %v2276_v31 }
 0x207   : > { %vm2279_vm2 = vcmp.gt.f32.partialorder %v2275_v45, 0.0  ;;  %vm2281_vm3 = vcmp.gt.f32.partialorder %v2277_v32, 0.0  ;;  %v2283_v47 = vmul.f32 0.2, %v2275_v45  ;;  %v2285_v48 = vmul.f32 0.2, %v2277_v32 }
 0x208   : > { %v2288_v49 = vsel %vm2280_vm1, %v2276_v31, %v2284_v46  ;;  %v2286_v50 = vsel %vm2278_vm0, %v2274_v26, %v2282_v33 }
 0x209   : > { %v2287_v51 = vsel %vm2279_vm2, %v2275_v45, %v2283_v47  ;;  %v2289_v52 = vsel %vm2281_vm3, %v2277_v32, %v2285_v48 }
 0x20a   : > { %v2701_v53 = vpack.c.bf16 %v2287_v51, %v2286_v50  ;;  %v2702_v54 = vpack.c.bf16 %v2289_v52, %v2288_v49 }
 0x20c   : > { %2302 = vst [vmem:[%s233_s21] sm:$0xff] %v2701_v53  ;;  %2303 = vst [vmem:[%s233_s21 + $0x8] sm:$0xff] %v2702_v54 }
 0x20d PF: > { %s13_s14 = sadd.s32 1, %s3169_s14   ;;  %s4073_s12 = smov %s3165_s13 }
 0x20e   : > { %p10_p5 = scmp.ge.s32.totalorder %s13_s14, 4   ;;  %s4074_s13 = smov %s4076_s15 }
 0x210   :  { %12 = sbr.rel (!%p10_p5) target bundleno = 2 (0x2), region = 68 }

// kernel: discriminator_forward.8
= control target key start
LH: loop header
LB: loop body
LE: loop exit
PB: predicated region body
PF: predicated region fallthrough
CT: control target
= control target key end

     0   :  { %s10164_s12 = smov 0   ;;  %s10166_s13 = smov 0   ;;  %s11995_s0 = inlined_call_operand.vmem [shape: bf16[2,16,4096], index: 0, kind: input, shape index: {}]   ;;  %s11996_s1 = inlined_call_operand.vmem [shape: bf16[4096,512], index: 1, kind: input, shape index: {}]   ;;  %s11997_s2 = inlined_call_operand.vmem [shape: f32[1,512], index: 2, kind: input, shape index: {}]   ;;  %s11998_s3 = inlined_call_operand.vmem [shape: bf16[2,16,512], index: 3, kind: output, shape index: {}]  }
   0x1   :  { %s10168_s14 = smov 0   ;;  %s10170_s15 = smov 0  }
   0x2   :  { %s10172_s16 = smov 0   ;;  %s10174_s17 = smov 0  }
   0x3   :  { %s10176_s18 = smov 0   ;;  %s10178_s19 = smov 0  }
   0x4   :  { %s10180_s20 = smov 0  }
   0x5 LB: > { %s8592_s21 = sadd.s32 4294967295, %s10141_s20   ;;  %s22_s22 = sadd.s32 1, %s10133_s18  ;;  %s10141_s20 = sphi %s10180_s20, %s13_s20   ;;  %s10137_s19 = sphi %s10178_s19, %s12007_s19   ;;  %s10133_s18 = sphi %s10176_s18, %s12006_s18   ;;  %s10129_s17 = sphi %s10174_s17, %s12005_s17   ;;  %s10125_s16 = sphi %s10172_s16, %s12004_s16   ;;  %s10121_s15 = sphi %s10170_s15, %s12003_s15   ;;  %s10117_s14 = sphi %s10168_s14, %s12002_s14   ;;  %s10113_s13 = sphi %s10166_s13, %s12001_s13   ;;  %s10109_s12 = sphi %s10164_s12, %s12000_s12  }
   0x6   : > { %p23_p0 = scmp.ge.s32.totalorder %s22_s22, 2  ;;  %s25_s23 = sadd.s32 1, %s10137_s19 }
   0x7   : > { %s58_s24 = sadd.s32 1, %s10121_s15  ;;  %p65_p1 = scmp.ne.s32.totalorder %s10121_s15, %s10117_s14 }
   0x8   : > { %s12009_s22 = smov (%p23_p0, %s22_s22), 0  ;;  %s12011_s23 = smov (!%p23_p0, %s25_s23), %s10137_s19 }
   0x9   : > { %s55_s25 = ssub.s32 %s10133_s18, %s12009_s22  ;;  %p66_p2 = scmp.eq.s32.totalorder %s10141_s20, 0 }
   0xa   : > { %p27_p3 = scmp.ge.s32.totalorder %s12011_s23, 2  ;;  %p56_p4 = scmp.eq.s32.totalorder %s55_s25, 0 }
   0xb   : > { %p67_p5 = por %p66_p2, %p65_p1  ;;  %s112_s26 = sadd.s32 1, %s10113_s13 }
   0xc   : > { %s12013_s23 = smov (%p27_p3, %s12011_s23), 0  ;;  %p122_p6 = scmp.ne.s32.totalorder %s10113_s13, %s10109_s12 }
   0xd   : > { %s10225_s27 = scalar_select %p56_p4, %s10121_s15, %s58_s24  }
   0xe   : > { %s107_s28 = ssub.s32 %s10137_s19, %s12013_s23  ;;  %p123_p7 = scmp.eq.s32.totalorder %s8592_s21, 3 }
   0xf   : > { %s109_s29 = sor.u32 %s107_s28, %s55_s25  ;;  %p8595_p10 = scmp.ge.s32.totalorder %s10141_s20, 4 }
  0x10   : > { %p110_p8 = scmp.eq.s32.totalorder %s109_s29, 0  ;;  %p10231_p9 = por %p123_p7, %p122_p6 }
  0x11   : > { %145 = sbr.rel (%p8595_p10) target bundleno = 284 (0x11c), region = 16 }
  0x12   : > { %s10236_s4 = scalar_select %p110_p8, %s10113_s13, %s112_s26  }
  0x18   : > { %156 = sbr.rel (!%p67_p5) target bundleno = 284 (0x11c), region = 24  ;;  %s158_s5 = sand.u32 (%p67_p5), 1, %s10121_s15  }
  0x19   : > { %s9158_s6 = sshll.u32 (%p67_p5), %s10133_s18, 3  ;;  %s8596_s7 = sshll.u32 (%p67_p5), %s158_s5, 12 }
  0x1a   : > { %s10244_s10 = scalar_lea.vmem (%p67_p5), %s11996_s1, %s9158_s6  ;;  %s10249_s11 = scalar_lea.vmem (%p67_p5), [#allocation2], %s8596_s7 }
  0x1b   : > { %v1216_v0 = vld [vmem:[%s10244_s10] sm:$0xff] (%p67_p5)  ;;  %v1218_v1 = vld [vmem:[%s10244_s10 + $0x10] sm:$0xff] (%p67_p5) }
  0x1c   : > { %v1220_v2 = vld [vmem:[%s10244_s10 + $0x20] sm:$0xff] (%p67_p5)  ;;  %1217 = vst [vmem:[%s10249_s11] sm:$0xff] (%p67_p5), %v1216_v0  ;;  %1219 = vst [vmem:[%s10249_s11 + $0x8] sm:$0xff] (%p67_p5), %v1218_v1  ;;  %v1222_v3 = vld [vmem:[%s10244_s10 + $0x30] sm:$0xff] (%p67_p5) }
  0x1d   : > { %1221 = vst [vmem:[%s10249_s11 + $0x10] sm:$0xff] (%p67_p5), %v1220_v2  ;;  %v1224_v4 = vld [vmem:[%s10244_s10 + $0x40] sm:$0xff] (%p67_p5)  ;;  %v1226_v5 = vld [vmem:[%s10244_s10 + $0x50] sm:$0xff] (%p67_p5)  ;;  %1223 = vst [vmem:[%s10249_s11 + $0x18] sm:$0xff] (%p67_p5), %v1222_v3 }
  0x1e   : > { %1225 = vst [vmem:[%s10249_s11 + $0x20] sm:$0xff] (%p67_p5), %v1224_v4  ;;  %1227 = vst [vmem:[%s10249_s11 + $0x28] sm:$0xff] (%p67_p5), %v1226_v5  ;;  %v1228_v6 = vld [vmem:[%s10244_s10 + $0x60] sm:$0xff] (%p67_p5)  ;;  %v1230_v7 = vld [vmem:[%s10244_s10 + $0x70] sm:$0xff] (%p67_p5) }
  0x1f   : > { %v1232_v8 = vld [vmem:[%s10244_s10 + $0x80] sm:$0xff]  ;;  %1229 = vst [vmem:[%s10249_s11 + $0x30] sm:$0xff] %v1228_v6  ;;  %1231 = vst [vmem:[%s10249_s11 + $0x38] sm:$0xff] %v1230_v7  ;;  %v1234_v9 = vld [vmem:[%s10244_s10 + $0x90] sm:$0xff] }
  0x20   : > { %1233 = vst [vmem:[%s10249_s11 + $0x40] sm:$0xff] %v1232_v8  ;;  %v1236_v10 = vld [vmem:[%s10244_s10 + $0xa0] sm:$0xff]  ;;  %v1238_v11 = vld [vmem:[%s10244_s10 + $0xb0] sm:$0xff]  ;;  %1235 = vst [vmem:[%s10249_s11 + $0x48] sm:$0xff] %v1234_v9 }
  0x21   : > { %1237 = vst [vmem:[%s10249_s11 + $0x50] sm:$0xff] %v1236_v10  ;;  %1239 = vst [vmem:[%s10249_s11 + $0x58] sm:$0xff] %v1238_v11  ;;  %v1240_v12 = vld [vmem:[%s10244_s10 + $0xc0] sm:$0xff]  ;;  %v1242_v13 = vld [vmem:[%s10244_s10 + $0xd0] sm:$0xff] }
  0x22   : > { %v1244_v14 = vld [vmem:[%s10244_s10 + $0xe0] sm:$0xff]  ;;  %1241 = vst [vmem:[%s10249_s11 + $0x60] sm:$0xff] %v1240_v12  ;;  %1243 = vst [vmem:[%s10249_s11 + $0x68] sm:$0xff] %v1242_v13  ;;  %v1246_v15 = vld [vmem:[%s10244_s10 + $0xf0] sm:$0xff] }
  0x23   : > { %1245 = vst [vmem:[%s10249_s11 + $0x70] sm:$0xff] %v1244_v14  ;;  %v1248_v16 = vld [vmem:[%s10244_s10 + $0x100] sm:$0xff]  ;;  %v1250_v17 = vld [vmem:[%s10244_s10 + $0x110] sm:$0xff]  ;;  %1247 = vst [vmem:[%s10249_s11 + $0x78] sm:$0xff] %v1246_v15 }
  0x24   : > { %1249 = vst [vmem:[%s10249_s11 + $0x80] sm:$0xff] %v1248_v16  ;;  %1251 = vst [vmem:[%s10249_s11 + $0x88] sm:$0xff] %v1250_v17  ;;  %v1252_v18 = vld [vmem:[%s10244_s10 + $0x120] sm:$0xff]  ;;  %v1254_v19 = vld [vmem:[%s10244_s10 + $0x130] sm:$0xff] }
  0x25   : > { %v1256_v20 = vld [vmem:[%s10244_s10 + $0x140] sm:$0xff]  ;;  %1253 = vst [vmem:[%s10249_s11 + $0x90] sm:$0xff] %v1252_v18  ;;  %1255 = vst [vmem:[%s10249_s11 + $0x98] sm:$0xff] %v1254_v19  ;;  %v1258_v21 = vld [vmem:[%s10244_s10 + $0x150] sm:$0xff] }
  0x26   : > { %1257 = vst [vmem:[%s10249_s11 + $0xa0] sm:$0xff] %v1256_v20  ;;  %v1260_v22 = vld [vmem:[%s10244_s10 + $0x160] sm:$0xff]  ;;  %v1262_v23 = vld [vmem:[%s10244_s10 + $0x170] sm:$0xff]  ;;  %1259 = vst [vmem:[%s10249_s11 + $0xa8] sm:$0xff] %v1258_v21 }
  0x27   : > { %1261 = vst [vmem:[%s10249_s11 + $0xb0] sm:$0xff] %v1260_v22  ;;  %1263 = vst [vmem:[%s10249_s11 + $0xb8] sm:$0xff] %v1262_v23  ;;  %v1264_v24 = vld [vmem:[%s10244_s10 + $0x180] sm:$0xff]  ;;  %v1266_v25 = vld [vmem:[%s10244_s10 + $0x190] sm:$0xff] }
  0x28   : > { %v1268_v26 = vld [vmem:[%s10244_s10 + $0x1a0] sm:$0xff]  ;;  %1265 = vst [vmem:[%s10249_s11 + $0xc0] sm:$0xff] %v1264_v24  ;;  %1267 = vst [vmem:[%s10249_s11 + $0xc8] sm:$0xff] %v1266_v25  ;;  %v1270_v27 = vld [vmem:[%s10244_s10 + $0x1b0] sm:$0xff] }
  0x29   : > { %1269 = vst [vmem:[%s10249_s11 + $0xd0] sm:$0xff] %v1268_v26  ;;  %v1272_v28 = vld [vmem:[%s10244_s10 + $0x1c0] sm:$0xff]  ;;  %v1274_v29 = vld [vmem:[%s10244_s10 + $0x1d0] sm:$0xff]  ;;  %1271 = vst [vmem:[%s10249_s11 + $0xd8] sm:$0xff] %v1270_v27 }
  0x2a   : > { %1273 = vst [vmem:[%s10249_s11 + $0xe0] sm:$0xff] %v1272_v28  ;;  %1275 = vst [vmem:[%s10249_s11 + $0xe8] sm:$0xff] %v1274_v29  ;;  %v1276_v30 = vld [vmem:[%s10244_s10 + $0x1e0] sm:$0xff]  ;;  %v1278_v31 = vld [vmem:[%s10244_s10 + $0x1f0] sm:$0xff] }
  0x2b   : > { %v1280_v32 = vld [vmem:[%s10244_s10 + $0x200] sm:$0xff]  ;;  %1277 = vst [vmem:[%s10249_s11 + $0xf0] sm:$0xff] %v1276_v30  ;;  %1279 = vst [vmem:[%s10249_s11 + $0xf8] sm:$0xff] %v1278_v31  ;;  %v1282_v33 = vld [vmem:[%s10244_s10 + $0x210] sm:$0xff] }
  0x2c   : > { %1281 = vst [vmem:[%s10249_s11 + $0x100] sm:$0xff] %v1280_v32  ;;  %v1284_v34 = vld [vmem:[%s10244_s10 + $0x220] sm:$0xff]  ;;  %v1286_v35 = vld [vmem:[%s10244_s10 + $0x230] sm:$0xff]  ;;  %1283 = vst [vmem:[%s10249_s11 + $0x108] sm:$0xff] %v1282_v33 }
  0x2d   : > { %1285 = vst [vmem:[%s10249_s11 + $0x110] sm:$0xff] %v1284_v34  ;;  %1287 = vst [vmem:[%s10249_s11 + $0x118] sm:$0xff] %v1286_v35  ;;  %v1288_v36 = vld [vmem:[%s10244_s10 + $0x240] sm:$0xff]  ;;  %v1290_v37 = vld [vmem:[%s10244_s10 + $0x250] sm:$0xff] }
  0x2e   : > { %v1292_v38 = vld [vmem:[%s10244_s10 + $0x260] sm:$0xff]  ;;  %1289 = vst [vmem:[%s10249_s11 + $0x120] sm:$0xff] %v1288_v36  ;;  %1291 = vst [vmem:[%s10249_s11 + $0x128] sm:$0xff] %v1290_v37  ;;  %v1294_v39 = vld [vmem:[%s10244_s10 + $0x270] sm:$0xff] }
  0x2f   : > { %1293 = vst [vmem:[%s10249_s11 + $0x130] sm:$0xff] %v1292_v38  ;;  %v1296_v40 = vld [vmem:[%s10244_s10 + $0x280] sm:$0xff]  ;;  %v1298_v41 = vld [vmem:[%s10244_s10 + $0x290] sm:$0xff]  ;;  %1295 = vst [vmem:[%s10249_s11 + $0x138] sm:$0xff] %v1294_v39 }
  0x30   : > { %1297 = vst [vmem:[%s10249_s11 + $0x140] sm:$0xff] %v1296_v40  ;;  %1299 = vst [vmem:[%s10249_s11 + $0x148] sm:$0xff] %v1298_v41  ;;  %v1300_v42 = vld [vmem:[%s10244_s10 + $0x2a0] sm:$0xff]  ;;  %v1302_v43 = vld [vmem:[%s10244_s10 + $0x2b0] sm:$0xff] }
  0x31   : > { %v1304_v44 = vld [vmem:[%s10244_s10 + $0x2c0] sm:$0xff]  ;;  %1301 = vst [vmem:[%s10249_s11 + $0x150] sm:$0xff] %v1300_v42  ;;  %1303 = vst [vmem:[%s10249_s11 + $0x158] sm:$0xff] %v1302_v43  ;;  %v1306_v45 = vld [vmem:[%s10244_s10 + $0x2d0] sm:$0xff] }
  0x32   : > { %1305 = vst [vmem:[%s10249_s11 + $0x160] sm:$0xff] %v1304_v44  ;;  %v1308_v46 = vld [vmem:[%s10244_s10 + $0x2e0] sm:$0xff]  ;;  %v1310_v47 = vld [vmem:[%s10244_s10 + $0x2f0] sm:$0xff]  ;;  %1307 = vst [vmem:[%s10249_s11 + $0x168] sm:$0xff] %v1306_v45 }
  0x33   : > { %1309 = vst [vmem:[%s10249_s11 + $0x170] sm:$0xff] %v1308_v46  ;;  %1311 = vst [vmem:[%s10249_s11 + $0x178] sm:$0xff] %v1310_v47  ;;  %v1312_v48 = vld [vmem:[%s10244_s10 + $0x300] sm:$0xff]  ;;  %v1314_v49 = vld [vmem:[%s10244_s10 + $0x310] sm:$0xff] }
  0x34   : > { %v1316_v50 = vld [vmem:[%s10244_s10 + $0x320] sm:$0xff]  ;;  %1313 = vst [vmem:[%s10249_s11 + $0x180] sm:$0xff] %v1312_v48  ;;  %1315 = vst [vmem:[%s10249_s11 + $0x188] sm:$0xff] %v1314_v49  ;;  %v1318_v51 = vld [vmem:[%s10244_s10 + $0x330] sm:$0xff] }
  0x35   : > { %1317 = vst [vmem:[%s10249_s11 + $0x190] sm:$0xff] %v1316_v50  ;;  %v1320_v52 = vld [vmem:[%s10244_s10 + $0x340] sm:$0xff]  ;;  %v1322_v53 = vld [vmem:[%s10244_s10 + $0x350] sm:$0xff]  ;;  %1319 = vst [vmem:[%s10249_s11 + $0x198] sm:$0xff] %v1318_v51 }
  0x36   : > { %1321 = vst [vmem:[%s10249_s11 + $0x1a0] sm:$0xff] %v1320_v52  ;;  %1323 = vst [vmem:[%s10249_s11 + $0x1a8] sm:$0xff] %v1322_v53  ;;  %v1324_v54 = vld [vmem:[%s10244_s10 + $0x360] sm:$0xff]  ;;  %v1326_v55 = vld [vmem:[%s10244_s10 + $0x370] sm:$0xff] }
  0x37   : > { %v1328_v56 = vld [vmem:[%s10244_s10 + $0x380] sm:$0xff]  ;;  %1325 = vst [vmem:[%s10249_s11 + $0x1b0] sm:$0xff] %v1324_v54  ;;  %1327 = vst [vmem:[%s10249_s11 + $0x1b8] sm:$0xff] %v1326_v55  ;;  %v1330_v57 = vld [vmem:[%s10244_s10 + $0x390] sm:$0xff] }
  0x38   : > { %1329 = vst [vmem:[%s10249_s11 + $0x1c0] sm:$0xff] %v1328_v56  ;;  %v1332_v58 = vld [vmem:[%s10244_s10 + $0x3a0] sm:$0xff]  ;;  %v1334_v59 = vld [vmem:[%s10244_s10 + $0x3b0] sm:$0xff]  ;;  %1331 = vst [vmem:[%s10249_s11 + $0x1c8] sm:$0xff] %v1330_v57 }
  0x39   : > { %1333 = vst [vmem:[%s10249_s11 + $0x1d0] sm:$0xff] %v1332_v58  ;;  %1335 = vst [vmem:[%s10249_s11 + $0x1d8] sm:$0xff] %v1334_v59  ;;  %v1336_v60 = vld [vmem:[%s10244_s10 + $0x3c0] sm:$0xff]  ;;  %v1338_v61 = vld [vmem:[%s10244_s10 + $0x3d0] sm:$0xff] }
  0x3a   : > { %v1340_v62 = vld [vmem:[%s10244_s10 + $0x3e0] sm:$0xff]  ;;  %1337 = vst [vmem:[%s10249_s11 + $0x1e0] sm:$0xff] %v1336_v60  ;;  %1339 = vst [vmem:[%s10249_s11 + $0x1e8] sm:$0xff] %v1338_v61  ;;  %v1342_v63 = vld [vmem:[%s10244_s10 + $0x3f0] sm:$0xff] }
  0x3b   : > { %1341 = vst [vmem:[%s10249_s11 + $0x1f0] sm:$0xff] %v1340_v62  ;;  %v1344_v0 = vld [vmem:[%s10244_s10 + $0x400] sm:$0xff]  ;;  %v1346_v1 = vld [vmem:[%s10244_s10 + $0x410] sm:$0xff]  ;;  %1343 = vst [vmem:[%s10249_s11 + $0x1f8] sm:$0xff] %v1342_v63 }
  0x3c   : > { %1345 = vst [vmem:[%s10249_s11 + $0x200] sm:$0xff] %v1344_v0  ;;  %1347 = vst [vmem:[%s10249_s11 + $0x208] sm:$0xff] %v1346_v1  ;;  %v1348_v2 = vld [vmem:[%s10244_s10 + $0x420] sm:$0xff]  ;;  %v1350_v3 = vld [vmem:[%s10244_s10 + $0x430] sm:$0xff] }
  0x3d   : > { %v1352_v4 = vld [vmem:[%s10244_s10 + $0x440] sm:$0xff]  ;;  %1349 = vst [vmem:[%s10249_s11 + $0x210] sm:$0xff] %v1348_v2  ;;  %1351 = vst [vmem:[%s10249_s11 + $0x218] sm:$0xff] %v1350_v3  ;;  %v1354_v5 = vld [vmem:[%s10244_s10 + $0x450] sm:$0xff] }
  0x3e   : > { %1353 = vst [vmem:[%s10249_s11 + $0x220] sm:$0xff] %v1352_v4  ;;  %v1356_v6 = vld [vmem:[%s10244_s10 + $0x460] sm:$0xff]  ;;  %v1358_v7 = vld [vmem:[%s10244_s10 + $0x470] sm:$0xff]  ;;  %1355 = vst [vmem:[%s10249_s11 + $0x228] sm:$0xff] %v1354_v5 }
  0x3f   : > { %1357 = vst [vmem:[%s10249_s11 + $0x230] sm:$0xff] %v1356_v6  ;;  %1359 = vst [vmem:[%s10249_s11 + $0x238] sm:$0xff] %v1358_v7  ;;  %v1360_v8 = vld [vmem:[%s10244_s10 + $0x480] sm:$0xff]  ;;  %v1362_v9 = vld [vmem:[%s10244_s10 + $0x490] sm:$0xff] }
  0x40   : > { %v1364_v10 = vld [vmem:[%s10244_s10 + $0x4a0] sm:$0xff]  ;;  %1361 = vst [vmem:[%s10249_s11 + $0x240] sm:$0xff] %v1360_v8  ;;  %1363 = vst [vmem:[%s10249_s11 + $0x248] sm:$0xff] %v1362_v9  ;;  %v1366_v11 = vld [vmem:[%s10244_s10 + $0x4b0] sm:$0xff] }
  0x41   : > { %1365 = vst [vmem:[%s10249_s11 + $0x250] sm:$0xff] %v1364_v10  ;;  %v1368_v12 = vld [vmem:[%s10244_s10 + $0x4c0] sm:$0xff]  ;;  %v1370_v13 = vld [vmem:[%s10244_s10 + $0x4d0] sm:$0xff]  ;;  %1367 = vst [vmem:[%s10249_s11 + $0x258] sm:$0xff] %v1366_v11 }
  0x42   : > { %1369 = vst [vmem:[%s10249_s11 + $0x260] sm:$0xff] %v1368_v12  ;;  %1371 = vst [vmem:[%s10249_s11 + $0x268] sm:$0xff] %v1370_v13  ;;  %v1372_v14 = vld [vmem:[%s10244_s10 + $0x4e0] sm:$0xff]  ;;  %v1374_v15 = vld [vmem:[%s10244_s10 + $0x4f0] sm:$0xff] }
  0x43   : > { %v1376_v16 = vld [vmem:[%s10244_s10 + $0x500] sm:$0xff]  ;;  %1373 = vst [vmem:[%s10249_s11 + $0x270] sm:$0xff] %v1372_v14  ;;  %1375 = vst [vmem:[%s10249_s11 + $0x278] sm:$0xff] %v1374_v15  ;;  %v1378_v17 = vld [vmem:[%s10244_s10 + $0x510] sm:$0xff] }
  0x44   : > { %1377 = vst [vmem:[%s10249_s11 + $0x280] sm:$0xff] %v1376_v16  ;;  %v1380_v18 = vld [vmem:[%s10244_s10 + $0x520] sm:$0xff]  ;;  %v1382_v19 = vld [vmem:[%s10244_s10 + $0x530] sm:$0xff]  ;;  %1379 = vst [vmem:[%s10249_s11 + $0x288] sm:$0xff] %v1378_v17 }
  0x45   : > { %1381 = vst [vmem:[%s10249_s11 + $0x290] sm:$0xff] %v1380_v18  ;;  %1383 = vst [vmem:[%s10249_s11 + $0x298] sm:$0xff] %v1382_v19  ;;  %v1384_v20 = vld [vmem:[%s10244_s10 + $0x540] sm:$0xff]  ;;  %v1386_v21 = vld [vmem:[%s10244_s10 + $0x550] sm:$0xff] }
  0x46   : > { %v1388_v22 = vld [vmem:[%s10244_s10 + $0x560] sm:$0xff]  ;;  %1385 = vst [vmem:[%s10249_s11 + $0x2a0] sm:$0xff] %v1384_v20  ;;  %1387 = vst [vmem:[%s10249_s11 + $0x2a8] sm:$0xff] %v1386_v21  ;;  %v1390_v23 = vld [vmem:[%s10244_s10 + $0x570] sm:$0xff] }
  0x47   : > { %1389 = vst [vmem:[%s10249_s11 + $0x2b0] sm:$0xff] %v1388_v22  ;;  %v1392_v24 = vld [vmem:[%s10244_s10 + $0x580] sm:$0xff]  ;;  %v1394_v25 = vld [vmem:[%s10244_s10 + $0x590] sm:$0xff]  ;;  %1391 = vst [vmem:[%s10249_s11 + $0x2b8] sm:$0xff] %v1390_v23 }
  0x48   : > { %1393 = vst [vmem:[%s10249_s11 + $0x2c0] sm:$0xff] %v1392_v24  ;;  %1395 = vst [vmem:[%s10249_s11 + $0x2c8] sm:$0xff] %v1394_v25  ;;  %v1396_v26 = vld [vmem:[%s10244_s10 + $0x5a0] sm:$0xff]  ;;  %v1398_v27 = vld [vmem:[%s10244_s10 + $0x5b0] sm:$0xff] }
  0x49   : > { %v1400_v28 = vld [vmem:[%s10244_s10 + $0x5c0] sm:$0xff]  ;;  %1397 = vst [vmem:[%s10249_s11 + $0x2d0] sm:$0xff] %v1396_v26  ;;  %1399 = vst [vmem:[%s10249_s11 + $0x2d8] sm:$0xff] %v1398_v27  ;;  %v1402_v29 = vld [vmem:[%s10244_s10 + $0x5d0] sm:$0xff] }
  0x4a   : > { %1401 = vst [vmem:[%s10249_s11 + $0x2e0] sm:$0xff] %v1400_v28  ;;  %v1404_v30 = vld [vmem:[%s10244_s10 + $0x5e0] sm:$0xff]  ;;  %v1406_v31 = vld [vmem:[%s10244_s10 + $0x5f0] sm:$0xff]  ;;  %1403 = vst [vmem:[%s10249_s11 + $0x2e8] sm:$0xff] %v1402_v29 }
  0x4b   : > { %1405 = vst [vmem:[%s10249_s11 + $0x2f0] sm:$0xff] %v1404_v30  ;;  %1407 = vst [vmem:[%s10249_s11 + $0x2f8] sm:$0xff] %v1406_v31  ;;  %v1408_v32 = vld [vmem:[%s10244_s10 + $0x600] sm:$0xff]  ;;  %v1410_v33 = vld [vmem:[%s10244_s10 + $0x610] sm:$0xff] }
  0x4c   : > { %v1412_v34 = vld [vmem:[%s10244_s10 + $0x620] sm:$0xff]  ;;  %1409 = vst [vmem:[%s10249_s11 + $0x300] sm:$0xff] %v1408_v32  ;;  %1411 = vst [vmem:[%s10249_s11 + $0x308] sm:$0xff] %v1410_v33  ;;  %v1414_v35 = vld [vmem:[%s10244_s10 + $0x630] sm:$0xff] }
  0x4d   : > { %1413 = vst [vmem:[%s10249_s11 + $0x310] sm:$0xff] %v1412_v34  ;;  %v1416_v36 = vld [vmem:[%s10244_s10 + $0x640] sm:$0xff]  ;;  %v1418_v37 = vld [vmem:[%s10244_s10 + $0x650] sm:$0xff]  ;;  %1415 = vst [vmem:[%s10249_s11 + $0x318] sm:$0xff] %v1414_v35 }
  0x4e   : > { %1417 = vst [vmem:[%s10249_s11 + $0x320] sm:$0xff] %v1416_v36  ;;  %1419 = vst [vmem:[%s10249_s11 + $0x328] sm:$0xff] %v1418_v37  ;;  %v1420_v38 = vld [vmem:[%s10244_s10 + $0x660] sm:$0xff]  ;;  %v1422_v39 = vld [vmem:[%s10244_s10 + $0x670] sm:$0xff] }
  0x4f   : > { %v1424_v40 = vld [vmem:[%s10244_s10 + $0x680] sm:$0xff]  ;;  %1421 = vst [vmem:[%s10249_s11 + $0x330] sm:$0xff] %v1420_v38  ;;  %1423 = vst [vmem:[%s10249_s11 + $0x338] sm:$0xff] %v1422_v39  ;;  %v1426_v41 = vld [vmem:[%s10244_s10 + $0x690] sm:$0xff] }
  0x50   : > { %1425 = vst [vmem:[%s10249_s11 + $0x340] sm:$0xff] %v1424_v40  ;;  %v1428_v42 = vld [vmem:[%s10244_s10 + $0x6a0] sm:$0xff]  ;;  %v1430_v43 = vld [vmem:[%s10244_s10 + $0x6b0] sm:$0xff]  ;;  %1427 = vst [vmem:[%s10249_s11 + $0x348] sm:$0xff] %v1426_v41 }
  0x51   : > { %1429 = vst [vmem:[%s10249_s11 + $0x350] sm:$0xff] %v1428_v42  ;;  %1431 = vst [vmem:[%s10249_s11 + $0x358] sm:$0xff] %v1430_v43  ;;  %v1432_v44 = vld [vmem:[%s10244_s10 + $0x6c0] sm:$0xff]  ;;  %v1434_v45 = vld [vmem:[%s10244_s10 + $0x6d0] sm:$0xff] }
  0x52   : > { %v1436_v46 = vld [vmem:[%s10244_s10 + $0x6e0] sm:$0xff]  ;;  %1433 = vst [vmem:[%s10249_s11 + $0x360] sm:$0xff] %v1432_v44  ;;  %1435 = vst [vmem:[%s10249_s11 + $0x368] sm:$0xff] %v1434_v45  ;;  %v1438_v47 = vld [vmem:[%s10244_s10 + $0x6f0] sm:$0xff] }
  0x53   : > { %1437 = vst [vmem:[%s10249_s11 + $0x370] sm:$0xff] %v1436_v46  ;;  %v1440_v48 = vld [vmem:[%s10244_s10 + $0x700] sm:$0xff]  ;;  %v1442_v49 = vld [vmem:[%s10244_s10 + $0x710] sm:$0xff]  ;;  %1439 = vst [vmem:[%s10249_s11 + $0x378] sm:$0xff] %v1438_v47 }
  0x54   : > { %1441 = vst [vmem:[%s10249_s11 + $0x380] sm:$0xff] %v1440_v48  ;;  %1443 = vst [vmem:[%s10249_s11 + $0x388] sm:$0xff] %v1442_v49  ;;  %v1444_v50 = vld [vmem:[%s10244_s10 + $0x720] sm:$0xff]  ;;  %v1446_v51 = vld [vmem:[%s10244_s10 + $0x730] sm:$0xff] }
  0x55   : > { %v1448_v52 = vld [vmem:[%s10244_s10 + $0x740] sm:$0xff]  ;;  %1445 = vst [vmem:[%s10249_s11 + $0x390] sm:$0xff] %v1444_v50  ;;  %1447 = vst [vmem:[%s10249_s11 + $0x398] sm:$0xff] %v1446_v51  ;;  %v1450_v53 = vld [vmem:[%s10244_s10 + $0x750] sm:$0xff] }
  0x56   : > { %1449 = vst [vmem:[%s10249_s11 + $0x3a0] sm:$0xff] %v1448_v52  ;;  %v1452_v54 = vld [vmem:[%s10244_s10 + $0x760] sm:$0xff]  ;;  %v1454_v55 = vld [vmem:[%s10244_s10 + $0x770] sm:$0xff]  ;;  %1451 = vst [vmem:[%s10249_s11 + $0x3a8] sm:$0xff] %v1450_v53 }
  0x57   : > { %1453 = vst [vmem:[%s10249_s11 + $0x3b0] sm:$0xff] %v1452_v54  ;;  %1455 = vst [vmem:[%s10249_s11 + $0x3b8] sm:$0xff] %v1454_v55  ;;  %v1456_v56 = vld [vmem:[%s10244_s10 + $0x780] sm:$0xff]  ;;  %v1458_v57 = vld [vmem:[%s10244_s10 + $0x790] sm:$0xff] }
  0x58   : > { %v1460_v58 = vld [vmem:[%s10244_s10 + $0x7a0] sm:$0xff]  ;;  %1457 = vst [vmem:[%s10249_s11 + $0x3c0] sm:$0xff] %v1456_v56  ;;  %1459 = vst [vmem:[%s10249_s11 + $0x3c8] sm:$0xff] %v1458_v57  ;;  %v1462_v59 = vld [vmem:[%s10244_s10 + $0x7b0] sm:$0xff] }
  0x59   : > { %1461 = vst [vmem:[%s10249_s11 + $0x3d0] sm:$0xff] %v1460_v58  ;;  %v1464_v60 = vld [vmem:[%s10244_s10 + $0x7c0] sm:$0xff]  ;;  %v1466_v61 = vld [vmem:[%s10244_s10 + $0x7d0] sm:$0xff]  ;;  %1463 = vst [vmem:[%s10249_s11 + $0x3d8] sm:$0xff] %v1462_v59 }
  0x5a   : > { %1465 = vst [vmem:[%s10249_s11 + $0x3e0] sm:$0xff] %v1464_v60  ;;  %1467 = vst [vmem:[%s10249_s11 + $0x3e8] sm:$0xff] %v1466_v61  ;;  %v1468_v62 = vld [vmem:[%s10244_s10 + $0x7e0] sm:$0xff]  ;;  %v1470_v63 = vld [vmem:[%s10244_s10 + $0x7f0] sm:$0xff] }
  0x5b   : > { %v1472_v0 = vld [vmem:[%s10244_s10 + $0x800] sm:$0xff]  ;;  %1469 = vst [vmem:[%s10249_s11 + $0x3f0] sm:$0xff] %v1468_v62  ;;  %1471 = vst [vmem:[%s10249_s11 + $0x3f8] sm:$0xff] %v1470_v63  ;;  %v1474_v1 = vld [vmem:[%s10244_s10 + $0x810] sm:$0xff] }
  0x5c   : > { %1473 = vst [vmem:[%s10249_s11 + $0x400] sm:$0xff] %v1472_v0  ;;  %v1476_v2 = vld [vmem:[%s10244_s10 + $0x820] sm:$0xff]  ;;  %v1478_v3 = vld [vmem:[%s10244_s10 + $0x830] sm:$0xff]  ;;  %1475 = vst [vmem:[%s10249_s11 + $0x408] sm:$0xff] %v1474_v1 }
  0x5d   : > { %1477 = vst [vmem:[%s10249_s11 + $0x410] sm:$0xff] %v1476_v2  ;;  %1479 = vst [vmem:[%s10249_s11 + $0x418] sm:$0xff] %v1478_v3  ;;  %v1480_v4 = vld [vmem:[%s10244_s10 + $0x840] sm:$0xff]  ;;  %v1482_v5 = vld [vmem:[%s10244_s10 + $0x850] sm:$0xff] }
  0x5e   : > { %v1484_v6 = vld [vmem:[%s10244_s10 + $0x860] sm:$0xff]  ;;  %1481 = vst [vmem:[%s10249_s11 + $0x420] sm:$0xff] %v1480_v4  ;;  %1483 = vst [vmem:[%s10249_s11 + $0x428] sm:$0xff] %v1482_v5  ;;  %v1486_v7 = vld [vmem:[%s10244_s10 + $0x870] sm:$0xff] }
  0x5f   : > { %1485 = vst [vmem:[%s10249_s11 + $0x430] sm:$0xff] %v1484_v6  ;;  %v1488_v8 = vld [vmem:[%s10244_s10 + $0x880] sm:$0xff]  ;;  %v1490_v9 = vld [vmem:[%s10244_s10 + $0x890] sm:$0xff]  ;;  %1487 = vst [vmem:[%s10249_s11 + $0x438] sm:$0xff] %v1486_v7 }
  0x60   : > { %1489 = vst [vmem:[%s10249_s11 + $0x440] sm:$0xff] %v1488_v8  ;;  %1491 = vst [vmem:[%s10249_s11 + $0x448] sm:$0xff] %v1490_v9  ;;  %v1492_v10 = vld [vmem:[%s10244_s10 + $0x8a0] sm:$0xff]  ;;  %v1494_v11 = vld [vmem:[%s10244_s10 + $0x8b0] sm:$0xff] }
  0x61   : > { %v1496_v12 = vld [vmem:[%s10244_s10 + $0x8c0] sm:$0xff]  ;;  %1493 = vst [vmem:[%s10249_s11 + $0x450] sm:$0xff] %v1492_v10  ;;  %1495 = vst [vmem:[%s10249_s11 + $0x458] sm:$0xff] %v1494_v11  ;;  %v1498_v13 = vld [vmem:[%s10244_s10 + $0x8d0] sm:$0xff] }
  0x62   : > { %1497 = vst [vmem:[%s10249_s11 + $0x460] sm:$0xff] %v1496_v12  ;;  %v1500_v14 = vld [vmem:[%s10244_s10 + $0x8e0] sm:$0xff]  ;;  %v1502_v15 = vld [vmem:[%s10244_s10 + $0x8f0] sm:$0xff]  ;;  %1499 = vst [vmem:[%s10249_s11 + $0x468] sm:$0xff] %v1498_v13 }
  0x63   : > { %1501 = vst [vmem:[%s10249_s11 + $0x470] sm:$0xff] %v1500_v14  ;;  %1503 = vst [vmem:[%s10249_s11 + $0x478] sm:$0xff] %v1502_v15  ;;  %v1504_v16 = vld [vmem:[%s10244_s10 + $0x900] sm:$0xff]  ;;  %v1506_v17 = vld [vmem:[%s10244_s10 + $0x910] sm:$0xff] }
  0x64   : > { %v1508_v18 = vld [vmem:[%s10244_s10 + $0x920] sm:$0xff]  ;;  %1505 = vst [vmem:[%s10249_s11 + $0x480] sm:$0xff] %v1504_v16  ;;  %1507 = vst [vmem:[%s10249_s11 + $0x488] sm:$0xff] %v1506_v17  ;;  %v1510_v19 = vld [vmem:[%s10244_s10 + $0x930] sm:$0xff] }
  0x65   : > { %1509 = vst [vmem:[%s10249_s11 + $0x490] sm:$0xff] %v1508_v18  ;;  %v1512_v20 = vld [vmem:[%s10244_s10 + $0x940] sm:$0xff]  ;;  %v1514_v21 = vld [vmem:[%s10244_s10 + $0x950] sm:$0xff]  ;;  %1511 = vst [vmem:[%s10249_s11 + $0x498] sm:$0xff] %v1510_v19 }
  0x66   : > { %1513 = vst [vmem:[%s10249_s11 + $0x4a0] sm:$0xff] %v1512_v20  ;;  %1515 = vst [vmem:[%s10249_s11 + $0x4a8] sm:$0xff] %v1514_v21  ;;  %v1516_v22 = vld [vmem:[%s10244_s10 + $0x960] sm:$0xff]  ;;  %v1518_v23 = vld [vmem:[%s10244_s10 + $0x970] sm:$0xff] }
  0x67   : > { %v1520_v24 = vld [vmem:[%s10244_s10 + $0x980] sm:$0xff]  ;;  %1517 = vst [vmem:[%s10249_s11 + $0x4b0] sm:$0xff] %v1516_v22  ;;  %1519 = vst [vmem:[%s10249_s11 + $0x4b8] sm:$0xff] %v1518_v23  ;;  %v1522_v25 = vld [vmem:[%s10244_s10 + $0x990] sm:$0xff] }
  0x68   : > { %1521 = vst [vmem:[%s10249_s11 + $0x4c0] sm:$0xff] %v1520_v24  ;;  %v1524_v26 = vld [vmem:[%s10244_s10 + $0x9a0] sm:$0xff]  ;;  %v1526_v27 = vld [vmem:[%s10244_s10 + $0x9b0] sm:$0xff]  ;;  %1523 = vst [vmem:[%s10249_s11 + $0x4c8] sm:$0xff] %v1522_v25 }
  0x69   : > { %1525 = vst [vmem:[%s10249_s11 + $0x4d0] sm:$0xff] %v1524_v26  ;;  %1527 = vst [vmem:[%s10249_s11 + $0x4d8] sm:$0xff] %v1526_v27  ;;  %v1528_v28 = vld [vmem:[%s10244_s10 + $0x9c0] sm:$0xff]  ;;  %v1530_v29 = vld [vmem:[%s10244_s10 + $0x9d0] sm:$0xff] }
  0x6a   : > { %v1532_v30 = vld [vmem:[%s10244_s10 + $0x9e0] sm:$0xff]  ;;  %1529 = vst [vmem:[%s10249_s11 + $0x4e0] sm:$0xff] %v1528_v28  ;;  %1531 = vst [vmem:[%s10249_s11 + $0x4e8] sm:$0xff] %v1530_v29  ;;  %v1534_v31 = vld [vmem:[%s10244_s10 + $0x9f0] sm:$0xff] }
  0x6b   : > { %1533 = vst [vmem:[%s10249_s11 + $0x4f0] sm:$0xff] %v1532_v30  ;;  %v1536_v32 = vld [vmem:[%s10244_s10 + $0xa00] sm:$0xff]  ;;  %v1538_v33 = vld [vmem:[%s10244_s10 + $0xa10] sm:$0xff]  ;;  %1535 = vst [vmem:[%s10249_s11 + $0x4f8] sm:$0xff] %v1534_v31 }
  0x6c   : > { %1537 = vst [vmem:[%s10249_s11 + $0x500] sm:$0xff] %v1536_v32  ;;  %1539 = vst [vmem:[%s10249_s11 + $0x508] sm:$0xff] %v1538_v33  ;;  %v1540_v34 = vld [vmem:[%s10244_s10 + $0xa20] sm:$0xff]  ;;  %v1542_v35 = vld [vmem:[%s10244_s10 + $0xa30] sm:$0xff] }
  0x6d   : > { %v1544_v36 = vld [vmem:[%s10244_s10 + $0xa40] sm:$0xff]  ;;  %1541 = vst [vmem:[%s10249_s11 + $0x510] sm:$0xff] %v1540_v34  ;;  %1543 = vst [vmem:[%s10249_s11 + $0x518] sm:$0xff] %v1542_v35  ;;  %v1546_v37 = vld [vmem:[%s10244_s10 + $0xa50] sm:$0xff] }
  0x6e   : > { %1545 = vst [vmem:[%s10249_s11 + $0x520] sm:$0xff] %v1544_v36  ;;  %v1548_v38 = vld [vmem:[%s10244_s10 + $0xa60] sm:$0xff]  ;;  %v1550_v39 = vld [vmem:[%s10244_s10 + $0xa70] sm:$0xff]  ;;  %1547 = vst [vmem:[%s10249_s11 + $0x528] sm:$0xff] %v1546_v37 }
  0x6f   : > { %1549 = vst [vmem:[%s10249_s11 + $0x530] sm:$0xff] %v1548_v38  ;;  %1551 = vst [vmem:[%s10249_s11 + $0x538] sm:$0xff] %v1550_v39  ;;  %v1552_v40 = vld [vmem:[%s10244_s10 + $0xa80] sm:$0xff]  ;;  %v1554_v41 = vld [vmem:[%s10244_s10 + $0xa90] sm:$0xff] }
  0x70   : > { %v1556_v42 = vld [vmem:[%s10244_s10 + $0xaa0] sm:$0xff]  ;;  %1553 = vst [vmem:[%s10249_s11 + $0x540] sm:$0xff] %v1552_v40  ;;  %1555 = vst [vmem:[%s10249_s11 + $0x548] sm:$0xff] %v1554_v41  ;;  %v1558_v43 = vld [vmem:[%s10244_s10 + $0xab0] sm:$0xff] }
  0x71   : > { %1557 = vst [vmem:[%s10249_s11 + $0x550] sm:$0xff] %v1556_v42  ;;  %v1560_v44 = vld [vmem:[%s10244_s10 + $0xac0] sm:$0xff]  ;;  %v1562_v45 = vld [vmem:[%s10244_s10 + $0xad0] sm:$0xff]  ;;  %1559 = vst [vmem:[%s10249_s11 + $0x558] sm:$0xff] %v1558_v43 }
  0x72   : > { %1561 = vst [vmem:[%s10249_s11 + $0x560] sm:$0xff] %v1560_v44  ;;  %1563 = vst [vmem:[%s10249_s11 + $0x568] sm:$0xff] %v1562_v45  ;;  %v1564_v46 = vld [vmem:[%s10244_s10 + $0xae0] sm:$0xff]  ;;  %v1566_v47 = vld [vmem:[%s10244_s10 + $0xaf0] sm:$0xff] }
  0x73   : > { %v1568_v48 = vld [vmem:[%s10244_s10 + $0xb00] sm:$0xff]  ;;  %1565 = vst [vmem:[%s10249_s11 + $0x570] sm:$0xff] %v1564_v46  ;;  %1567 = vst [vmem:[%s10249_s11 + $0x578] sm:$0xff] %v1566_v47  ;;  %v1570_v49 = vld [vmem:[%s10244_s10 + $0xb10] sm:$0xff] }
  0x74   : > { %1569 = vst [vmem:[%s10249_s11 + $0x580] sm:$0xff] %v1568_v48  ;;  %v1572_v50 = vld [vmem:[%s10244_s10 + $0xb20] sm:$0xff]  ;;  %v1574_v51 = vld [vmem:[%s10244_s10 + $0xb30] sm:$0xff]  ;;  %1571 = vst [vmem:[%s10249_s11 + $0x588] sm:$0xff] %v1570_v49 }
  0x75   : > { %1573 = vst [vmem:[%s10249_s11 + $0x590] sm:$0xff] %v1572_v50  ;;  %1575 = vst [vmem:[%s10249_s11 + $0x598] sm:$0xff] %v1574_v51  ;;  %v1576_v52 = vld [vmem:[%s10244_s10 + $0xb40] sm:$0xff]  ;;  %v1578_v53 = vld [vmem:[%s10244_s10 + $0xb50] sm:$0xff] }
  0x76   : > { %v1580_v54 = vld [vmem:[%s10244_s10 + $0xb60] sm:$0xff]  ;;  %1577 = vst [vmem:[%s10249_s11 + $0x5a0] sm:$0xff] %v1576_v52  ;;  %1579 = vst [vmem:[%s10249_s11 + $0x5a8] sm:$0xff] %v1578_v53  ;;  %v1582_v55 = vld [vmem:[%s10244_s10 + $0xb70] sm:$0xff] }
  0x77   : > { %1581 = vst [vmem:[%s10249_s11 + $0x5b0] sm:$0xff] %v1580_v54  ;;  %v1584_v56 = vld [vmem:[%s10244_s10 + $0xb80] sm:$0xff]  ;;  %v1586_v57 = vld [vmem:[%s10244_s10 + $0xb90] sm:$0xff]  ;;  %1583 = vst [vmem:[%s10249_s11 + $0x5b8] sm:$0xff] %v1582_v55 }
  0x78   : > { %1585 = vst [vmem:[%s10249_s11 + $0x5c0] sm:$0xff] %v1584_v56  ;;  %1587 = vst [vmem:[%s10249_s11 + $0x5c8] sm:$0xff] %v1586_v57  ;;  %v1588_v58 = vld [vmem:[%s10244_s10 + $0xba0] sm:$0xff]  ;;  %v1590_v59 = vld [vmem:[%s10244_s10 + $0xbb0] sm:$0xff] }
  0x79   : > { %v1592_v60 = vld [vmem:[%s10244_s10 + $0xbc0] sm:$0xff]  ;;  %1589 = vst [vmem:[%s10249_s11 + $0x5d0] sm:$0xff] %v1588_v58  ;;  %1591 = vst [vmem:[%s10249_s11 + $0x5d8] sm:$0xff] %v1590_v59  ;;  %v1594_v61 = vld [vmem:[%s10244_s10 + $0xbd0] sm:$0xff] }
  0x7a   : > { %1593 = vst [vmem:[%s10249_s11 + $0x5e0] sm:$0xff] %v1592_v60  ;;  %v1596_v62 = vld [vmem:[%s10244_s10 + $0xbe0] sm:$0xff]  ;;  %v1598_v63 = vld [vmem:[%s10244_s10 + $0xbf0] sm:$0xff]  ;;  %1595 = vst [vmem:[%s10249_s11 + $0x5e8] sm:$0xff] %v1594_v61 }
  0x7b   : > { %1597 = vst [vmem:[%s10249_s11 + $0x5f0] sm:$0xff] %v1596_v62  ;;  %1599 = vst [vmem:[%s10249_s11 + $0x5f8] sm:$0xff] %v1598_v63  ;;  %v1600_v0 = vld [vmem:[%s10244_s10 + $0xc00] sm:$0xff]  ;;  %v1602_v1 = vld [vmem:[%s10244_s10 + $0xc10] sm:$0xff] }
  0x7c   : > { %v1604_v2 = vld [vmem:[%s10244_s10 + $0xc20] sm:$0xff]  ;;  %1601 = vst [vmem:[%s10249_s11 + $0x600] sm:$0xff] %v1600_v0  ;;  %1603 = vst [vmem:[%s10249_s11 + $0x608] sm:$0xff] %v1602_v1  ;;  %v1606_v3 = vld [vmem:[%s10244_s10 + $0xc30] sm:$0xff] }
  0x7d   : > { %1605 = vst [vmem:[%s10249_s11 + $0x610] sm:$0xff] %v1604_v2  ;;  %v1608_v4 = vld [vmem:[%s10244_s10 + $0xc40] sm:$0xff]  ;;  %v1610_v5 = vld [vmem:[%s10244_s10 + $0xc50] sm:$0xff]  ;;  %1607 = vst [vmem:[%s10249_s11 + $0x618] sm:$0xff] %v1606_v3 }
  0x7e   : > { %1609 = vst [vmem:[%s10249_s11 + $0x620] sm:$0xff] %v1608_v4  ;;  %1611 = vst [vmem:[%s10249_s11 + $0x628] sm:$0xff] %v1610_v5  ;;  %v1612_v6 = vld [vmem:[%s10244_s10 + $0xc60] sm:$0xff]  ;;  %v1614_v7 = vld [vmem:[%s10244_s10 + $0xc70] sm:$0xff] }
  0x7f   : > { %v1616_v8 = vld [vmem:[%s10244_s10 + $0xc80] sm:$0xff]  ;;  %1613 = vst [vmem:[%s10249_s11 + $0x630] sm:$0xff] %v1612_v6  ;;  %1615 = vst [vmem:[%s10249_s11 + $0x638] sm:$0xff] %v1614_v7  ;;  %v1618_v9 = vld [vmem:[%s10244_s10 + $0xc90] sm:$0xff] }
  0x80   : > { %1617 = vst [vmem:[%s10249_s11 + $0x640] sm:$0xff] %v1616_v8  ;;  %v1620_v10 = vld [vmem:[%s10244_s10 + $0xca0] sm:$0xff]  ;;  %v1622_v11 = vld [vmem:[%s10244_s10 + $0xcb0] sm:$0xff]  ;;  %1619 = vst [vmem:[%s10249_s11 + $0x648] sm:$0xff] %v1618_v9 }
  0x81   : > { %1621 = vst [vmem:[%s10249_s11 + $0x650] sm:$0xff] %v1620_v10  ;;  %1623 = vst [vmem:[%s10249_s11 + $0x658] sm:$0xff] %v1622_v11  ;;  %v1624_v12 = vld [vmem:[%s10244_s10 + $0xcc0] sm:$0xff]  ;;  %v1626_v13 = vld [vmem:[%s10244_s10 + $0xcd0] sm:$0xff] }
  0x82   : > { %v1628_v14 = vld [vmem:[%s10244_s10 + $0xce0] sm:$0xff]  ;;  %1625 = vst [vmem:[%s10249_s11 + $0x660] sm:$0xff] %v1624_v12  ;;  %1627 = vst [vmem:[%s10249_s11 + $0x668] sm:$0xff] %v1626_v13  ;;  %v1630_v15 = vld [vmem:[%s10244_s10 + $0xcf0] sm:$0xff] }
  0x83   : > { %1629 = vst [vmem:[%s10249_s11 + $0x670] sm:$0xff] %v1628_v14  ;;  %v1632_v16 = vld [vmem:[%s10244_s10 + $0xd00] sm:$0xff]  ;;  %v1634_v17 = vld [vmem:[%s10244_s10 + $0xd10] sm:$0xff]  ;;  %1631 = vst [vmem:[%s10249_s11 + $0x678] sm:$0xff] %v1630_v15 }
  0x84   : > { %1633 = vst [vmem:[%s10249_s11 + $0x680] sm:$0xff] %v1632_v16  ;;  %1635 = vst [vmem:[%s10249_s11 + $0x688] sm:$0xff] %v1634_v17  ;;  %v1636_v18 = vld [vmem:[%s10244_s10 + $0xd20] sm:$0xff]  ;;  %v1638_v19 = vld [vmem:[%s10244_s10 + $0xd30] sm:$0xff] }
  0x85   : > { %v1640_v20 = vld [vmem:[%s10244_s10 + $0xd40] sm:$0xff]  ;;  %1637 = vst [vmem:[%s10249_s11 + $0x690] sm:$0xff] %v1636_v18  ;;  %1639 = vst [vmem:[%s10249_s11 + $0x698] sm:$0xff] %v1638_v19  ;;  %v1642_v21 = vld [vmem:[%s10244_s10 + $0xd50] sm:$0xff] }
  0x86   : > { %1641 = vst [vmem:[%s10249_s11 + $0x6a0] sm:$0xff] %v1640_v20  ;;  %v1644_v22 = vld [vmem:[%s10244_s10 + $0xd60] sm:$0xff]  ;;  %v1646_v23 = vld [vmem:[%s10244_s10 + $0xd70] sm:$0xff]  ;;  %1643 = vst [vmem:[%s10249_s11 + $0x6a8] sm:$0xff] %v1642_v21 }
  0x87   : > { %1645 = vst [vmem:[%s10249_s11 + $0x6b0] sm:$0xff] %v1644_v22  ;;  %1647 = vst [vmem:[%s10249_s11 + $0x6b8] sm:$0xff] %v1646_v23  ;;  %v1648_v24 = vld [vmem:[%s10244_s10 + $0xd80] sm:$0xff]  ;;  %v1650_v25 = vld [vmem:[%s10244_s10 + $0xd90] sm:$0xff] }
  0x88   : > { %v1652_v26 = vld [vmem:[%s10244_s10 + $0xda0] sm:$0xff]  ;;  %1649 = vst [vmem:[%s10249_s11 + $0x6c0] sm:$0xff] %v1648_v24  ;;  %1651 = vst [vmem:[%s10249_s11 + $0x6c8] sm:$0xff] %v1650_v25  ;;  %v1654_v27 = vld [vmem:[%s10244_s10 + $0xdb0] sm:$0xff] }
  0x89   : > { %1653 = vst [vmem:[%s10249_s11 + $0x6d0] sm:$0xff] %v1652_v26  ;;  %v1656_v28 = vld [vmem:[%s10244_s10 + $0xdc0] sm:$0xff]  ;;  %v1658_v29 = vld [vmem:[%s10244_s10 + $0xdd0] sm:$0xff]  ;;  %1655 = vst [vmem:[%s10249_s11 + $0x6d8] sm:$0xff] %v1654_v27 }
  0x8a   : > { %1657 = vst [vmem:[%s10249_s11 + $0x6e0] sm:$0xff] %v1656_v28  ;;  %1659 = vst [vmem:[%s10249_s11 + $0x6e8] sm:$0xff] %v1658_v29  ;;  %v1660_v30 = vld [vmem:[%s10244_s10 + $0xde0] sm:$0xff]  ;;  %v1662_v31 = vld [vmem:[%s10244_s10 + $0xdf0] sm:$0xff] }
  0x8b   : > { %v1664_v32 = vld [vmem:[%s10244_s10 + $0xe00] sm:$0xff]  ;;  %1661 = vst [vmem:[%s10249_s11 + $0x6f0] sm:$0xff] %v1660_v30  ;;  %1663 = vst [vmem:[%s10249_s11 + $0x6f8] sm:$0xff] %v1662_v31  ;;  %v1666_v33 = vld [vmem:[%s10244_s10 + $0xe10] sm:$0xff] }
  0x8c   : > { %1665 = vst [vmem:[%s10249_s11 + $0x700] sm:$0xff] %v1664_v32  ;;  %v1668_v34 = vld [vmem:[%s10244_s10 + $0xe20] sm:$0xff]  ;;  %v1670_v35 = vld [vmem:[%s10244_s10 + $0xe30] sm:$0xff]  ;;  %1667 = vst [vmem:[%s10249_s11 + $0x708] sm:$0xff] %v1666_v33 }
  0x8d   : > { %1669 = vst [vmem:[%s10249_s11 + $0x710] sm:$0xff] %v1668_v34  ;;  %1671 = vst [vmem:[%s10249_s11 + $0x718] sm:$0xff] %v1670_v35  ;;  %v1672_v36 = vld [vmem:[%s10244_s10 + $0xe40] sm:$0xff]  ;;  %v1674_v37 = vld [vmem:[%s10244_s10 + $0xe50] sm:$0xff] }
  0x8e   : > { %v1676_v38 = vld [vmem:[%s10244_s10 + $0xe60] sm:$0xff]  ;;  %1673 = vst [vmem:[%s10249_s11 + $0x720] sm:$0xff] %v1672_v36  ;;  %1675 = vst [vmem:[%s10249_s11 + $0x728] sm:$0xff] %v1674_v37  ;;  %v1678_v39 = vld [vmem:[%s10244_s10 + $0xe70] sm:$0xff] }
  0x8f   : > { %1677 = vst [vmem:[%s10249_s11 + $0x730] sm:$0xff] %v1676_v38  ;;  %v1680_v40 = vld [vmem:[%s10244_s10 + $0xe80] sm:$0xff]  ;;  %v1682_v41 = vld [vmem:[%s10244_s10 + $0xe90] sm:$0xff]  ;;  %1679 = vst [vmem:[%s10249_s11 + $0x738] sm:$0xff] %v1678_v39 }
  0x90   : > { %1681 = vst [vmem:[%s10249_s11 + $0x740] sm:$0xff] %v1680_v40  ;;  %1683 = vst [vmem:[%s10249_s11 + $0x748] sm:$0xff] %v1682_v41  ;;  %v1684_v42 = vld [vmem:[%s10244_s10 + $0xea0] sm:$0xff]  ;;  %v1686_v43 = vld [vmem:[%s10244_s10 + $0xeb0] sm:$0xff] }
  0x91   : > { %v1688_v44 = vld [vmem:[%s10244_s10 + $0xec0] sm:$0xff]  ;;  %1685 = vst [vmem:[%s10249_s11 + $0x750] sm:$0xff] %v1684_v42  ;;  %1687 = vst [vmem:[%s10249_s11 + $0x758] sm:$0xff] %v1686_v43  ;;  %v1690_v45 = vld [vmem:[%s10244_s10 + $0xed0] sm:$0xff] }
  0x92   : > { %1689 = vst [vmem:[%s10249_s11 + $0x760] sm:$0xff] %v1688_v44  ;;  %v1692_v46 = vld [vmem:[%s10244_s10 + $0xee0] sm:$0xff]  ;;  %v1694_v47 = vld [vmem:[%s10244_s10 + $0xef0] sm:$0xff]  ;;  %1691 = vst [vmem:[%s10249_s11 + $0x768] sm:$0xff] %v1690_v45 }
  0x93   : > { %1693 = vst [vmem:[%s10249_s11 + $0x770] sm:$0xff] %v1692_v46  ;;  %1695 = vst [vmem:[%s10249_s11 + $0x778] sm:$0xff] %v1694_v47  ;;  %v1696_v48 = vld [vmem:[%s10244_s10 + $0xf00] sm:$0xff]  ;;  %v1698_v49 = vld [vmem:[%s10244_s10 + $0xf10] sm:$0xff] }
  0x94   : > { %v1700_v50 = vld [vmem:[%s10244_s10 + $0xf20] sm:$0xff]  ;;  %1697 = vst [vmem:[%s10249_s11 + $0x780] sm:$0xff] %v1696_v48  ;;  %1699 = vst [vmem:[%s10249_s11 + $0x788] sm:$0xff] %v1698_v49  ;;  %v1702_v51 = vld [vmem:[%s10244_s10 + $0xf30] sm:$0xff] }
  0x95   : > { %1701 = vst [vmem:[%s10249_s11 + $0x790] sm:$0xff] %v1700_v50  ;;  %v1704_v52 = vld [vmem:[%s10244_s10 + $0xf40] sm:$0xff]  ;;  %v1706_v53 = vld [vmem:[%s10244_s10 + $0xf50] sm:$0xff]  ;;  %1703 = vst [vmem:[%s10249_s11 + $0x798] sm:$0xff] %v1702_v51 }
  0x96   : > { %1705 = vst [vmem:[%s10249_s11 + $0x7a0] sm:$0xff] %v1704_v52  ;;  %1707 = vst [vmem:[%s10249_s11 + $0x7a8] sm:$0xff] %v1706_v53  ;;  %v1708_v54 = vld [vmem:[%s10244_s10 + $0xf60] sm:$0xff]  ;;  %v1710_v55 = vld [vmem:[%s10244_s10 + $0xf70] sm:$0xff] }
  0x97   : > { %v1712_v56 = vld [vmem:[%s10244_s10 + $0xf80] sm:$0xff]  ;;  %1709 = vst [vmem:[%s10249_s11 + $0x7b0] sm:$0xff] %v1708_v54  ;;  %1711 = vst [vmem:[%s10249_s11 + $0x7b8] sm:$0xff] %v1710_v55  ;;  %v1714_v57 = vld [vmem:[%s10244_s10 + $0xf90] sm:$0xff] }
  0x98   : > { %1713 = vst [vmem:[%s10249_s11 + $0x7c0] sm:$0xff] %v1712_v56  ;;  %v1716_v58 = vld [vmem:[%s10244_s10 + $0xfa0] sm:$0xff]  ;;  %v1718_v59 = vld [vmem:[%s10244_s10 + $0xfb0] sm:$0xff]  ;;  %1715 = vst [vmem:[%s10249_s11 + $0x7c8] sm:$0xff] %v1714_v57 }
  0x99   : > { %1717 = vst [vmem:[%s10249_s11 + $0x7d0] sm:$0xff] %v1716_v58  ;;  %1719 = vst [vmem:[%s10249_s11 + $0x7d8] sm:$0xff] %v1718_v59  ;;  %v1720_v60 = vld [vmem:[%s10244_s10 + $0xfc0] sm:$0xff]  ;;  %v1722_v61 = vld [vmem:[%s10244_s10 + $0xfd0] sm:$0xff] }
  0x9a   : > { %v1724_v62 = vld [vmem:[%s10244_s10 + $0xfe0] sm:$0xff]  ;;  %1721 = vst [vmem:[%s10249_s11 + $0x7e0] sm:$0xff] %v1720_v60  ;;  %1723 = vst [vmem:[%s10249_s11 + $0x7e8] sm:$0xff] %v1722_v61  ;;  %v1726_v63 = vld [vmem:[%s10244_s10 + $0xff0] sm:$0xff] }
  0x9b   : > { %1725 = vst [vmem:[%s10249_s11 + $0x7f0] sm:$0xff] %v1724_v62  ;;  %v1728_v0 = vld [vmem:[%s10244_s10 + $0x1000] sm:$0xff]  ;;  %v1730_v1 = vld [vmem:[%s10244_s10 + $0x1010] sm:$0xff]  ;;  %1727 = vst [vmem:[%s10249_s11 + $0x7f8] sm:$0xff] %v1726_v63 }
  0x9c   : > { %1729 = vst [vmem:[%s10249_s11 + $0x800] sm:$0xff] %v1728_v0  ;;  %1731 = vst [vmem:[%s10249_s11 + $0x808] sm:$0xff] %v1730_v1  ;;  %v1732_v2 = vld [vmem:[%s10244_s10 + $0x1020] sm:$0xff]  ;;  %v1734_v3 = vld [vmem:[%s10244_s10 + $0x1030] sm:$0xff] }
  0x9d   : > { %v1736_v4 = vld [vmem:[%s10244_s10 + $0x1040] sm:$0xff]  ;;  %1733 = vst [vmem:[%s10249_s11 + $0x810] sm:$0xff] %v1732_v2  ;;  %1735 = vst [vmem:[%s10249_s11 + $0x818] sm:$0xff] %v1734_v3  ;;  %v1738_v5 = vld [vmem:[%s10244_s10 + $0x1050] sm:$0xff] }
  0x9e   : > { %1737 = vst [vmem:[%s10249_s11 + $0x820] sm:$0xff] %v1736_v4  ;;  %v1740_v6 = vld [vmem:[%s10244_s10 + $0x1060] sm:$0xff]  ;;  %v1742_v7 = vld [vmem:[%s10244_s10 + $0x1070] sm:$0xff]  ;;  %1739 = vst [vmem:[%s10249_s11 + $0x828] sm:$0xff] %v1738_v5 }
  0x9f   : > { %1741 = vst [vmem:[%s10249_s11 + $0x830] sm:$0xff] %v1740_v6  ;;  %1743 = vst [vmem:[%s10249_s11 + $0x838] sm:$0xff] %v1742_v7  ;;  %v1744_v8 = vld [vmem:[%s10244_s10 + $0x1080] sm:$0xff]  ;;  %v1746_v9 = vld [vmem:[%s10244_s10 + $0x1090] sm:$0xff] }
  0xa0   : > { %v1748_v10 = vld [vmem:[%s10244_s10 + $0x10a0] sm:$0xff]  ;;  %1745 = vst [vmem:[%s10249_s11 + $0x840] sm:$0xff] %v1744_v8  ;;  %1747 = vst [vmem:[%s10249_s11 + $0x848] sm:$0xff] %v1746_v9  ;;  %v1750_v11 = vld [vmem:[%s10244_s10 + $0x10b0] sm:$0xff] }
  0xa1   : > { %1749 = vst [vmem:[%s10249_s11 + $0x850] sm:$0xff] %v1748_v10  ;;  %v1752_v12 = vld [vmem:[%s10244_s10 + $0x10c0] sm:$0xff]  ;;  %v1754_v13 = vld [vmem:[%s10244_s10 + $0x10d0] sm:$0xff]  ;;  %1751 = vst [vmem:[%s10249_s11 + $0x858] sm:$0xff] %v1750_v11 }
  0xa2   : > { %1753 = vst [vmem:[%s10249_s11 + $0x860] sm:$0xff] %v1752_v12  ;;  %1755 = vst [vmem:[%s10249_s11 + $0x868] sm:$0xff] %v1754_v13  ;;  %v1756_v14 = vld [vmem:[%s10244_s10 + $0x10e0] sm:$0xff]  ;;  %v1758_v15 = vld [vmem:[%s10244_s10 + $0x10f0] sm:$0xff] }
  0xa3   : > { %v1760_v16 = vld [vmem:[%s10244_s10 + $0x1100] sm:$0xff]  ;;  %1757 = vst [vmem:[%s10249_s11 + $0x870] sm:$0xff] %v1756_v14  ;;  %1759 = vst [vmem:[%s10249_s11 + $0x878] sm:$0xff] %v1758_v15  ;;  %v1762_v17 = vld [vmem:[%s10244_s10 + $0x1110] sm:$0xff] }
  0xa4   : > { %1761 = vst [vmem:[%s10249_s11 + $0x880] sm:$0xff] %v1760_v16  ;;  %v1764_v18 = vld [vmem:[%s10244_s10 + $0x1120] sm:$0xff]  ;;  %v1766_v19 = vld [vmem:[%s10244_s10 + $0x1130] sm:$0xff]  ;;  %1763 = vst [vmem:[%s10249_s11 + $0x888] sm:$0xff] %v1762_v17 }
  0xa5   : > { %1765 = vst [vmem:[%s10249_s11 + $0x890] sm:$0xff] %v1764_v18  ;;  %1767 = vst [vmem:[%s10249_s11 + $0x898] sm:$0xff] %v1766_v19  ;;  %v1768_v20 = vld [vmem:[%s10244_s10 + $0x1140] sm:$0xff]  ;;  %v1770_v21 = vld [vmem:[%s10244_s10 + $0x1150] sm:$0xff] }
  0xa6   : > { %v1772_v22 = vld [vmem:[%s10244_s10 + $0x1160] sm:$0xff]  ;;  %1769 = vst [vmem:[%s10249_s11 + $0x8a0] sm:$0xff] %v1768_v20  ;;  %1771 = vst [vmem:[%s10249_s11 + $0x8a8] sm:$0xff] %v1770_v21  ;;  %v1774_v23 = vld [vmem:[%s10244_s10 + $0x1170] sm:$0xff] }
  0xa7   : > { %1773 = vst [vmem:[%s10249_s11 + $0x8b0] sm:$0xff] %v1772_v22  ;;  %v1776_v24 = vld [vmem:[%s10244_s10 + $0x1180] sm:$0xff]  ;;  %v1778_v25 = vld [vmem:[%s10244_s10 + $0x1190] sm:$0xff]  ;;  %1775 = vst [vmem:[%s10249_s11 + $0x8b8] sm:$0xff] %v1774_v23 }
  0xa8   : > { %1777 = vst [vmem:[%s10249_s11 + $0x8c0] sm:$0xff] %v1776_v24  ;;  %1779 = vst [vmem:[%s10249_s11 + $0x8c8] sm:$0xff] %v1778_v25  ;;  %v1780_v26 = vld [vmem:[%s10244_s10 + $0x11a0] sm:$0xff]  ;;  %v1782_v27 = vld [vmem:[%s10244_s10 + $0x11b0] sm:$0xff] }
  0xa9   : > { %v1784_v28 = vld [vmem:[%s10244_s10 + $0x11c0] sm:$0xff]  ;;  %1781 = vst [vmem:[%s10249_s11 + $0x8d0] sm:$0xff] %v1780_v26  ;;  %1783 = vst [vmem:[%s10249_s11 + $0x8d8] sm:$0xff] %v1782_v27  ;;  %v1786_v29 = vld [vmem:[%s10244_s10 + $0x11d0] sm:$0xff] }
  0xaa   : > { %1785 = vst [vmem:[%s10249_s11 + $0x8e0] sm:$0xff] %v1784_v28  ;;  %v1788_v30 = vld [vmem:[%s10244_s10 + $0x11e0] sm:$0xff]  ;;  %v1790_v31 = vld [vmem:[%s10244_s10 + $0x11f0] sm:$0xff]  ;;  %1787 = vst [vmem:[%s10249_s11 + $0x8e8] sm:$0xff] %v1786_v29 }
  0xab   : > { %1789 = vst [vmem:[%s10249_s11 + $0x8f0] sm:$0xff] %v1788_v30  ;;  %1791 = vst [vmem:[%s10249_s11 + $0x8f8] sm:$0xff] %v1790_v31  ;;  %v1792_v32 = vld [vmem:[%s10244_s10 + $0x1200] sm:$0xff]  ;;  %v1794_v33 = vld [vmem:[%s10244_s10 + $0x1210] sm:$0xff] }
  0xac   : > { %v1796_v34 = vld [vmem:[%s10244_s10 + $0x1220] sm:$0xff]  ;;  %1793 = vst [vmem:[%s10249_s11 + $0x900] sm:$0xff] %v1792_v32  ;;  %1795 = vst [vmem:[%s10249_s11 + $0x908] sm:$0xff] %v1794_v33  ;;  %v1798_v35 = vld [vmem:[%s10244_s10 + $0x1230] sm:$0xff] }
  0xad   : > { %1797 = vst [vmem:[%s10249_s11 + $0x910] sm:$0xff] %v1796_v34  ;;  %v1800_v36 = vld [vmem:[%s10244_s10 + $0x1240] sm:$0xff]  ;;  %v1802_v37 = vld [vmem:[%s10244_s10 + $0x1250] sm:$0xff]  ;;  %1799 = vst [vmem:[%s10249_s11 + $0x918] sm:$0xff] %v1798_v35 }
  0xae   : > { %1801 = vst [vmem:[%s10249_s11 + $0x920] sm:$0xff] %v1800_v36  ;;  %1803 = vst [vmem:[%s10249_s11 + $0x928] sm:$0xff] %v1802_v37  ;;  %v1804_v38 = vld [vmem:[%s10244_s10 + $0x1260] sm:$0xff]  ;;  %v1806_v39 = vld [vmem:[%s10244_s10 + $0x1270] sm:$0xff] }
  0xaf   : > { %v1808_v40 = vld [vmem:[%s10244_s10 + $0x1280] sm:$0xff]  ;;  %1805 = vst [vmem:[%s10249_s11 + $0x930] sm:$0xff] %v1804_v38  ;;  %1807 = vst [vmem:[%s10249_s11 + $0x938] sm:$0xff] %v1806_v39  ;;  %v1810_v41 = vld [vmem:[%s10244_s10 + $0x1290] sm:$0xff] }
  0xb0   : > { %1809 = vst [vmem:[%s10249_s11 + $0x940] sm:$0xff] %v1808_v40  ;;  %v1812_v42 = vld [vmem:[%s10244_s10 + $0x12a0] sm:$0xff]  ;;  %v1814_v43 = vld [vmem:[%s10244_s10 + $0x12b0] sm:$0xff]  ;;  %1811 = vst [vmem:[%s10249_s11 + $0x948] sm:$0xff] %v1810_v41 }
  0xb1   : > { %1813 = vst [vmem:[%s10249_s11 + $0x950] sm:$0xff] %v1812_v42  ;;  %1815 = vst [vmem:[%s10249_s11 + $0x958] sm:$0xff] %v1814_v43  ;;  %v1816_v44 = vld [vmem:[%s10244_s10 + $0x12c0] sm:$0xff]  ;;  %v1818_v45 = vld [vmem:[%s10244_s10 + $0x12d0] sm:$0xff] }
  0xb2   : > { %v1820_v46 = vld [vmem:[%s10244_s10 + $0x12e0] sm:$0xff]  ;;  %1817 = vst [vmem:[%s10249_s11 + $0x960] sm:$0xff] %v1816_v44  ;;  %1819 = vst [vmem:[%s10249_s11 + $0x968] sm:$0xff] %v1818_v45  ;;  %v1822_v47 = vld [vmem:[%s10244_s10 + $0x12f0] sm:$0xff] }
  0xb3   : > { %1821 = vst [vmem:[%s10249_s11 + $0x970] sm:$0xff] %v1820_v46  ;;  %v1824_v48 = vld [vmem:[%s10244_s10 + $0x1300] sm:$0xff]  ;;  %v1826_v49 = vld [vmem:[%s10244_s10 + $0x1310] sm:$0xff]  ;;  %1823 = vst [vmem:[%s10249_s11 + $0x978] sm:$0xff] %v1822_v47 }
  0xb4   : > { %1825 = vst [vmem:[%s10249_s11 + $0x980] sm:$0xff] %v1824_v48  ;;  %1827 = vst [vmem:[%s10249_s11 + $0x988] sm:$0xff] %v1826_v49  ;;  %v1828_v50 = vld [vmem:[%s10244_s10 + $0x1320] sm:$0xff]  ;;  %v1830_v51 = vld [vmem:[%s10244_s10 + $0x1330] sm:$0xff] }
  0xb5   : > { %v1832_v52 = vld [vmem:[%s10244_s10 + $0x1340] sm:$0xff]  ;;  %1829 = vst [vmem:[%s10249_s11 + $0x990] sm:$0xff] %v1828_v50  ;;  %1831 = vst [vmem:[%s10249_s11 + $0x998] sm:$0xff] %v1830_v51  ;;  %v1834_v53 = vld [vmem:[%s10244_s10 + $0x1350] sm:$0xff] }
  0xb6   : > { %1833 = vst [vmem:[%s10249_s11 + $0x9a0] sm:$0xff] %v1832_v52  ;;  %v1836_v54 = vld [vmem:[%s10244_s10 + $0x1360] sm:$0xff]  ;;  %v1838_v55 = vld [vmem:[%s10244_s10 + $0x1370] sm:$0xff]  ;;  %1835 = vst [vmem:[%s10249_s11 + $0x9a8] sm:$0xff] %v1834_v53 }
  0xb7   : > { %1837 = vst [vmem:[%s10249_s11 + $0x9b0] sm:$0xff] %v1836_v54  ;;  %1839 = vst [vmem:[%s10249_s11 + $0x9b8] sm:$0xff] %v1838_v55  ;;  %v1840_v56 = vld [vmem:[%s10244_s10 + $0x1380] sm:$0xff]  ;;  %v1842_v57 = vld [vmem:[%s10244_s10 + $0x1390] sm:$0xff] }
  0xb8   : > { %v1844_v58 = vld [vmem:[%s10244_s10 + $0x13a0] sm:$0xff]  ;;  %1841 = vst [vmem:[%s10249_s11 + $0x9c0] sm:$0xff] %v1840_v56  ;;  %1843 = vst [vmem:[%s10249_s11 + $0x9c8] sm:$0xff] %v1842_v57  ;;  %v1846_v59 = vld [vmem:[%s10244_s10 + $0x13b0] sm:$0xff] }
  0xb9   : > { %1845 = vst [vmem:[%s10249_s11 + $0x9d0] sm:$0xff] %v1844_v58  ;;  %v1848_v60 = vld [vmem:[%s10244_s10 + $0x13c0] sm:$0xff]  ;;  %v1850_v61 = vld [vmem:[%s10244_s10 + $0x13d0] sm:$0xff]  ;;  %1847 = vst [vmem:[%s10249_s11 + $0x9d8] sm:$0xff] %v1846_v59 }
  0xba   : > { %1849 = vst [vmem:[%s10249_s11 + $0x9e0] sm:$0xff] %v1848_v60  ;;  %1851 = vst [vmem:[%s10249_s11 + $0x9e8] sm:$0xff] %v1850_v61  ;;  %v1852_v62 = vld [vmem:[%s10244_s10 + $0x13e0] sm:$0xff]  ;;  %v1854_v63 = vld [vmem:[%s10244_s10 + $0x13f0] sm:$0xff] }
  0xbb   : > { %v1856_v0 = vld [vmem:[%s10244_s10 + $0x1400] sm:$0xff]  ;;  %1853 = vst [vmem:[%s10249_s11 + $0x9f0] sm:$0xff] %v1852_v62  ;;  %1855 = vst [vmem:[%s10249_s11 + $0x9f8] sm:$0xff] %v1854_v63  ;;  %v1858_v1 = vld [vmem:[%s10244_s10 + $0x1410] sm:$0xff] }
  0xbc   : > { %1857 = vst [vmem:[%s10249_s11 + $0xa00] sm:$0xff] %v1856_v0  ;;  %v1860_v2 = vld [vmem:[%s10244_s10 + $0x1420] sm:$0xff]  ;;  %v1862_v3 = vld [vmem:[%s10244_s10 + $0x1430] sm:$0xff]  ;;  %1859 = vst [vmem:[%s10249_s11 + $0xa08] sm:$0xff] %v1858_v1 }
  0xbd   : > { %1861 = vst [vmem:[%s10249_s11 + $0xa10] sm:$0xff] %v1860_v2  ;;  %1863 = vst [vmem:[%s10249_s11 + $0xa18] sm:$0xff] %v1862_v3  ;;  %v1864_v4 = vld [vmem:[%s10244_s10 + $0x1440] sm:$0xff]  ;;  %v1866_v5 = vld [vmem:[%s10244_s10 + $0x1450] sm:$0xff] }
  0xbe   : > { %v1868_v6 = vld [vmem:[%s10244_s10 + $0x1460] sm:$0xff]  ;;  %1865 = vst [vmem:[%s10249_s11 + $0xa20] sm:$0xff] %v1864_v4  ;;  %1867 = vst [vmem:[%s10249_s11 + $0xa28] sm:$0xff] %v1866_v5  ;;  %v1870_v7 = vld [vmem:[%s10244_s10 + $0x1470] sm:$0xff] }
  0xbf   : > { %1869 = vst [vmem:[%s10249_s11 + $0xa30] sm:$0xff] %v1868_v6  ;;  %v1872_v8 = vld [vmem:[%s10244_s10 + $0x1480] sm:$0xff]  ;;  %v1874_v9 = vld [vmem:[%s10244_s10 + $0x1490] sm:$0xff]  ;;  %1871 = vst [vmem:[%s10249_s11 + $0xa38] sm:$0xff] %v1870_v7 }
  0xc0   : > { %1873 = vst [vmem:[%s10249_s11 + $0xa40] sm:$0xff] %v1872_v8  ;;  %1875 = vst [vmem:[%s10249_s11 + $0xa48] sm:$0xff] %v1874_v9  ;;  %v1876_v10 = vld [vmem:[%s10244_s10 + $0x14a0] sm:$0xff]  ;;  %v1878_v11 = vld [vmem:[%s10244_s10 + $0x14b0] sm:$0xff] }
  0xc1   : > { %v1880_v12 = vld [vmem:[%s10244_s10 + $0x14c0] sm:$0xff]  ;;  %1877 = vst [vmem:[%s10249_s11 + $0xa50] sm:$0xff] %v1876_v10  ;;  %1879 = vst [vmem:[%s10249_s11 + $0xa58] sm:$0xff] %v1878_v11  ;;  %v1882_v13 = vld [vmem:[%s10244_s10 + $0x14d0] sm:$0xff] }
  0xc2   : > { %1881 = vst [vmem:[%s10249_s11 + $0xa60] sm:$0xff] %v1880_v12  ;;  %v1884_v14 = vld [vmem:[%s10244_s10 + $0x14e0] sm:$0xff]  ;;  %v1886_v15 = vld [vmem:[%s10244_s10 + $0x14f0] sm:$0xff]  ;;  %1883 = vst [vmem:[%s10249_s11 + $0xa68] sm:$0xff] %v1882_v13 }
  0xc3   : > { %1885 = vst [vmem:[%s10249_s11 + $0xa70] sm:$0xff] %v1884_v14  ;;  %1887 = vst [vmem:[%s10249_s11 + $0xa78] sm:$0xff] %v1886_v15  ;;  %v1888_v16 = vld [vmem:[%s10244_s10 + $0x1500] sm:$0xff]  ;;  %v1890_v17 = vld [vmem:[%s10244_s10 + $0x1510] sm:$0xff] }
  0xc4   : > { %v1892_v18 = vld [vmem:[%s10244_s10 + $0x1520] sm:$0xff]  ;;  %1889 = vst [vmem:[%s10249_s11 + $0xa80] sm:$0xff] %v1888_v16  ;;  %1891 = vst [vmem:[%s10249_s11 + $0xa88] sm:$0xff] %v1890_v17  ;;  %v1894_v19 = vld [vmem:[%s10244_s10 + $0x1530] sm:$0xff] }
  0xc5   : > { %1893 = vst [vmem:[%s10249_s11 + $0xa90] sm:$0xff] %v1892_v18  ;;  %v1896_v20 = vld [vmem:[%s10244_s10 + $0x1540] sm:$0xff]  ;;  %v1898_v21 = vld [vmem:[%s10244_s10 + $0x1550] sm:$0xff]  ;;  %1895 = vst [vmem:[%s10249_s11 + $0xa98] sm:$0xff] %v1894_v19 }
  0xc6   : > { %1897 = vst [vmem:[%s10249_s11 + $0xaa0] sm:$0xff] %v1896_v20  ;;  %1899 = vst [vmem:[%s10249_s11 + $0xaa8] sm:$0xff] %v1898_v21  ;;  %v1900_v22 = vld [vmem:[%s10244_s10 + $0x1560] sm:$0xff]  ;;  %v1902_v23 = vld [vmem:[%s10244_s10 + $0x1570] sm:$0xff] }
  0xc7   : > { %v1904_v24 = vld [vmem:[%s10244_s10 + $0x1580] sm:$0xff]  ;;  %1901 = vst [vmem:[%s10249_s11 + $0xab0] sm:$0xff] %v1900_v22  ;;  %1903 = vst [vmem:[%s10249_s11 + $0xab8] sm:$0xff] %v1902_v23  ;;  %v1906_v25 = vld [vmem:[%s10244_s10 + $0x1590] sm:$0xff] }
  0xc8   : > { %1905 = vst [vmem:[%s10249_s11 + $0xac0] sm:$0xff] %v1904_v24  ;;  %v1908_v26 = vld [vmem:[%s10244_s10 + $0x15a0] sm:$0xff]  ;;  %v1910_v27 = vld [vmem:[%s10244_s10 + $0x15b0] sm:$0xff]  ;;  %1907 = vst [vmem:[%s10249_s11 + $0xac8] sm:$0xff] %v1906_v25 }
  0xc9   : > { %1909 = vst [vmem:[%s10249_s11 + $0xad0] sm:$0xff] %v1908_v26  ;;  %1911 = vst [vmem:[%s10249_s11 + $0xad8] sm:$0xff] %v1910_v27  ;;  %v1912_v28 = vld [vmem:[%s10244_s10 + $0x15c0] sm:$0xff]  ;;  %v1914_v29 = vld [vmem:[%s10244_s10 + $0x15d0] sm:$0xff] }
  0xca   : > { %v1916_v30 = vld [vmem:[%s10244_s10 + $0x15e0] sm:$0xff]  ;;  %1913 = vst [vmem:[%s10249_s11 + $0xae0] sm:$0xff] %v1912_v28  ;;  %1915 = vst [vmem:[%s10249_s11 + $0xae8] sm:$0xff] %v1914_v29  ;;  %v1918_v31 = vld [vmem:[%s10244_s10 + $0x15f0] sm:$0xff] }
  0xcb   : > { %1917 = vst [vmem:[%s10249_s11 + $0xaf0] sm:$0xff] %v1916_v30  ;;  %v1920_v32 = vld [vmem:[%s10244_s10 + $0x1600] sm:$0xff]  ;;  %v1922_v33 = vld [vmem:[%s10244_s10 + $0x1610] sm:$0xff]  ;;  %1919 = vst [vmem:[%s10249_s11 + $0xaf8] sm:$0xff] %v1918_v31 }
  0xcc   : > { %1921 = vst [vmem:[%s10249_s11 + $0xb00] sm:$0xff] %v1920_v32  ;;  %1923 = vst [vmem:[%s10249_s11 + $0xb08] sm:$0xff] %v1922_v33  ;;  %v1924_v34 = vld [vmem:[%s10244_s10 + $0x1620] sm:$0xff]  ;;  %v1926_v35 = vld [vmem:[%s10244_s10 + $0x1630] sm:$0xff] }
  0xcd   : > { %v1928_v36 = vld [vmem:[%s10244_s10 + $0x1640] sm:$0xff]  ;;  %1925 = vst [vmem:[%s10249_s11 + $0xb10] sm:$0xff] %v1924_v34  ;;  %1927 = vst [vmem:[%s10249_s11 + $0xb18] sm:$0xff] %v1926_v35  ;;  %v1930_v37 = vld [vmem:[%s10244_s10 + $0x1650] sm:$0xff] }
  0xce   : > { %1929 = vst [vmem:[%s10249_s11 + $0xb20] sm:$0xff] %v1928_v36  ;;  %v1932_v38 = vld [vmem:[%s10244_s10 + $0x1660] sm:$0xff]  ;;  %v1934_v39 = vld [vmem:[%s10244_s10 + $0x1670] sm:$0xff]  ;;  %1931 = vst [vmem:[%s10249_s11 + $0xb28] sm:$0xff] %v1930_v37 }
  0xcf   : > { %1933 = vst [vmem:[%s10249_s11 + $0xb30] sm:$0xff] %v1932_v38  ;;  %1935 = vst [vmem:[%s10249_s11 + $0xb38] sm:$0xff] %v1934_v39  ;;  %v1936_v40 = vld [vmem:[%s10244_s10 + $0x1680] sm:$0xff]  ;;  %v1938_v41 = vld [vmem:[%s10244_s10 + $0x1690] sm:$0xff] }
  0xd0   : > { %v1940_v42 = vld [vmem:[%s10244_s10 + $0x16a0] sm:$0xff]  ;;  %1937 = vst [vmem:[%s10249_s11 + $0xb40] sm:$0xff] %v1936_v40  ;;  %1939 = vst [vmem:[%s10249_s11 + $0xb48] sm:$0xff] %v1938_v41  ;;  %v1942_v43 = vld [vmem:[%s10244_s10 + $0x16b0] sm:$0xff] }
  0xd1   : > { %1941 = vst [vmem:[%s10249_s11 + $0xb50] sm:$0xff] %v1940_v42  ;;  %v1944_v44 = vld [vmem:[%s10244_s10 + $0x16c0] sm:$0xff]  ;;  %v1946_v45 = vld [vmem:[%s10244_s10 + $0x16d0] sm:$0xff]  ;;  %1943 = vst [vmem:[%s10249_s11 + $0xb58] sm:$0xff] %v1942_v43 }
  0xd2   : > { %1945 = vst [vmem:[%s10249_s11 + $0xb60] sm:$0xff] %v1944_v44  ;;  %1947 = vst [vmem:[%s10249_s11 + $0xb68] sm:$0xff] %v1946_v45  ;;  %v1948_v46 = vld [vmem:[%s10244_s10 + $0x16e0] sm:$0xff]  ;;  %v1950_v47 = vld [vmem:[%s10244_s10 + $0x16f0] sm:$0xff] }
  0xd3   : > { %v1952_v48 = vld [vmem:[%s10244_s10 + $0x1700] sm:$0xff]  ;;  %1949 = vst [vmem:[%s10249_s11 + $0xb70] sm:$0xff] %v1948_v46  ;;  %1951 = vst [vmem:[%s10249_s11 + $0xb78] sm:$0xff] %v1950_v47  ;;  %v1954_v49 = vld [vmem:[%s10244_s10 + $0x1710] sm:$0xff] }
  0xd4   : > { %1953 = vst [vmem:[%s10249_s11 + $0xb80] sm:$0xff] %v1952_v48  ;;  %v1956_v50 = vld [vmem:[%s10244_s10 + $0x1720] sm:$0xff]  ;;  %v1958_v51 = vld [vmem:[%s10244_s10 + $0x1730] sm:$0xff]  ;;  %1955 = vst [vmem:[%s10249_s11 + $0xb88] sm:$0xff] %v1954_v49 }
  0xd5   : > { %1957 = vst [vmem:[%s10249_s11 + $0xb90] sm:$0xff] %v1956_v50  ;;  %1959 = vst [vmem:[%s10249_s11 + $0xb98] sm:$0xff] %v1958_v51  ;;  %v1960_v52 = vld [vmem:[%s10244_s10 + $0x1740] sm:$0xff]  ;;  %v1962_v53 = vld [vmem:[%s10244_s10 + $0x1750] sm:$0xff] }
  0xd6   : > { %v1964_v54 = vld [vmem:[%s10244_s10 + $0x1760] sm:$0xff]  ;;  %1961 = vst [vmem:[%s10249_s11 + $0xba0] sm:$0xff] %v1960_v52  ;;  %1963 = vst [vmem:[%s10249_s11 + $0xba8] sm:$0xff] %v1962_v53  ;;  %v1966_v55 = vld [vmem:[%s10244_s10 + $0x1770] sm:$0xff] }
  0xd7   : > { %1965 = vst [vmem:[%s10249_s11 + $0xbb0] sm:$0xff] %v1964_v54  ;;  %v1968_v56 = vld [vmem:[%s10244_s10 + $0x1780] sm:$0xff]  ;;  %v1970_v57 = vld [vmem:[%s10244_s10 + $0x1790] sm:$0xff]  ;;  %1967 = vst [vmem:[%s10249_s11 + $0xbb8] sm:$0xff] %v1966_v55 }
  0xd8   : > { %1969 = vst [vmem:[%s10249_s11 + $0xbc0] sm:$0xff] %v1968_v56  ;;  %1971 = vst [vmem:[%s10249_s11 + $0xbc8] sm:$0xff] %v1970_v57  ;;  %v1972_v58 = vld [vmem:[%s10244_s10 + $0x17a0] sm:$0xff]  ;;  %v1974_v59 = vld [vmem:[%s10244_s10 + $0x17b0] sm:$0xff] }
  0xd9   : > { %v1976_v60 = vld [vmem:[%s10244_s10 + $0x17c0] sm:$0xff]  ;;  %1973 = vst [vmem:[%s10249_s11 + $0xbd0] sm:$0xff] %v1972_v58  ;;  %1975 = vst [vmem:[%s10249_s11 + $0xbd8] sm:$0xff] %v1974_v59  ;;  %v1978_v61 = vld [vmem:[%s10244_s10 + $0x17d0] sm:$0xff] }
  0xda   : > { %1977 = vst [vmem:[%s10249_s11 + $0xbe0] sm:$0xff] %v1976_v60  ;;  %v1980_v62 = vld [vmem:[%s10244_s10 + $0x17e0] sm:$0xff]  ;;  %v1982_v63 = vld [vmem:[%s10244_s10 + $0x17f0] sm:$0xff]  ;;  %1979 = vst [vmem:[%s10249_s11 + $0xbe8] sm:$0xff] %v1978_v61 }
  0xdb   : > { %1981 = vst [vmem:[%s10249_s11 + $0xbf0] sm:$0xff] %v1980_v62  ;;  %1983 = vst [vmem:[%s10249_s11 + $0xbf8] sm:$0xff] %v1982_v63  ;;  %v1984_v0 = vld [vmem:[%s10244_s10 + $0x1800] sm:$0xff]  ;;  %v1986_v1 = vld [vmem:[%s10244_s10 + $0x1810] sm:$0xff] }
  0xdc   : > { %v1988_v2 = vld [vmem:[%s10244_s10 + $0x1820] sm:$0xff]  ;;  %1985 = vst [vmem:[%s10249_s11 + $0xc00] sm:$0xff] %v1984_v0  ;;  %1987 = vst [vmem:[%s10249_s11 + $0xc08] sm:$0xff] %v1986_v1  ;;  %v1990_v3 = vld [vmem:[%s10244_s10 + $0x1830] sm:$0xff] }
  0xdd   : > { %1989 = vst [vmem:[%s10249_s11 + $0xc10] sm:$0xff] %v1988_v2  ;;  %v1992_v4 = vld [vmem:[%s10244_s10 + $0x1840] sm:$0xff]  ;;  %v1994_v5 = vld [vmem:[%s10244_s10 + $0x1850] sm:$0xff]  ;;  %1991 = vst [vmem:[%s10249_s11 + $0xc18] sm:$0xff] %v1990_v3 }
  0xde   : > { %1993 = vst [vmem:[%s10249_s11 + $0xc20] sm:$0xff] %v1992_v4  ;;  %1995 = vst [vmem:[%s10249_s11 + $0xc28] sm:$0xff] %v1994_v5  ;;  %v1996_v6 = vld [vmem:[%s10244_s10 + $0x1860] sm:$0xff]  ;;  %v1998_v7 = vld [vmem:[%s10244_s10 + $0x1870] sm:$0xff] }
  0xdf   : > { %v2000_v8 = vld [vmem:[%s10244_s10 + $0x1880] sm:$0xff]  ;;  %1997 = vst [vmem:[%s10249_s11 + $0xc30] sm:$0xff] %v1996_v6  ;;  %1999 = vst [vmem:[%s10249_s11 + $0xc38] sm:$0xff] %v1998_v7  ;;  %v2002_v9 = vld [vmem:[%s10244_s10 + $0x1890] sm:$0xff] }
  0xe0   : > { %2001 = vst [vmem:[%s10249_s11 + $0xc40] sm:$0xff] %v2000_v8  ;;  %v2004_v10 = vld [vmem:[%s10244_s10 + $0x18a0] sm:$0xff]  ;;  %v2006_v11 = vld [vmem:[%s10244_s10 + $0x18b0] sm:$0xff]  ;;  %2003 = vst [vmem:[%s10249_s11 + $0xc48] sm:$0xff] %v2002_v9 }
  0xe1   : > { %2005 = vst [vmem:[%s10249_s11 + $0xc50] sm:$0xff] %v2004_v10  ;;  %2007 = vst [vmem:[%s10249_s11 + $0xc58] sm:$0xff] %v2006_v11  ;;  %v2008_v12 = vld [vmem:[%s10244_s10 + $0x18c0] sm:$0xff]  ;;  %v2010_v13 = vld [vmem:[%s10244_s10 + $0x18d0] sm:$0xff] }
  0xe2   : > { %v2012_v14 = vld [vmem:[%s10244_s10 + $0x18e0] sm:$0xff]  ;;  %2009 = vst [vmem:[%s10249_s11 + $0xc60] sm:$0xff] %v2008_v12  ;;  %2011 = vst [vmem:[%s10249_s11 + $0xc68] sm:$0xff] %v2010_v13  ;;  %v2014_v15 = vld [vmem:[%s10244_s10 + $0x18f0] sm:$0xff] }
  0xe3   : > { %2013 = vst [vmem:[%s10249_s11 + $0xc70] sm:$0xff] %v2012_v14  ;;  %v2016_v16 = vld [vmem:[%s10244_s10 + $0x1900] sm:$0xff]  ;;  %v2018_v17 = vld [vmem:[%s10244_s10 + $0x1910] sm:$0xff]  ;;  %2015 = vst [vmem:[%s10249_s11 + $0xc78] sm:$0xff] %v2014_v15 }
  0xe4   : > { %2017 = vst [vmem:[%s10249_s11 + $0xc80] sm:$0xff] %v2016_v16  ;;  %2019 = vst [vmem:[%s10249_s11 + $0xc88] sm:$0xff] %v2018_v17  ;;  %v2020_v18 = vld [vmem:[%s10244_s10 + $0x1920] sm:$0xff]  ;;  %v2022_v19 = vld [vmem:[%s10244_s10 + $0x1930] sm:$0xff] }
  0xe5   : > { %v2024_v20 = vld [vmem:[%s10244_s10 + $0x1940] sm:$0xff]  ;;  %2021 = vst [vmem:[%s10249_s11 + $0xc90] sm:$0xff] %v2020_v18  ;;  %2023 = vst [vmem:[%s10249_s11 + $0xc98] sm:$0xff] %v2022_v19  ;;  %v2026_v21 = vld [vmem:[%s10244_s10 + $0x1950] sm:$0xff] }
  0xe6   : > { %2025 = vst [vmem:[%s10249_s11 + $0xca0] sm:$0xff] %v2024_v20  ;;  %v2028_v22 = vld [vmem:[%s10244_s10 + $0x1960] sm:$0xff]  ;;  %v2030_v23 = vld [vmem:[%s10244_s10 + $0x1970] sm:$0xff]  ;;  %2027 = vst [vmem:[%s10249_s11 + $0xca8] sm:$0xff] %v2026_v21 }
  0xe7   : > { %2029 = vst [vmem:[%s10249_s11 + $0xcb0] sm:$0xff] %v2028_v22  ;;  %2031 = vst [vmem:[%s10249_s11 + $0xcb8] sm:$0xff] %v2030_v23  ;;  %v2032_v24 = vld [vmem:[%s10244_s10 + $0x1980] sm:$0xff]  ;;  %v2034_v25 = vld [vmem:[%s10244_s10 + $0x1990] sm:$0xff] }
  0xe8   : > { %v2036_v26 = vld [vmem:[%s10244_s10 + $0x19a0] sm:$0xff]  ;;  %2033 = vst [vmem:[%s10249_s11 + $0xcc0] sm:$0xff] %v2032_v24  ;;  %2035 = vst [vmem:[%s10249_s11 + $0xcc8] sm:$0xff] %v2034_v25  ;;  %v2038_v27 = vld [vmem:[%s10244_s10 + $0x19b0] sm:$0xff] }
  0xe9   : > { %2037 = vst [vmem:[%s10249_s11 + $0xcd0] sm:$0xff] %v2036_v26  ;;  %v2040_v28 = vld [vmem:[%s10244_s10 + $0x19c0] sm:$0xff]  ;;  %v2042_v29 = vld [vmem:[%s10244_s10 + $0x19d0] sm:$0xff]  ;;  %2039 = vst [vmem:[%s10249_s11 + $0xcd8] sm:$0xff] %v2038_v27 }
  0xea   : > { %2041 = vst [vmem:[%s10249_s11 + $0xce0] sm:$0xff] %v2040_v28  ;;  %2043 = vst [vmem:[%s10249_s11 + $0xce8] sm:$0xff] %v2042_v29  ;;  %v2044_v30 = vld [vmem:[%s10244_s10 + $0x19e0] sm:$0xff]  ;;  %v2046_v31 = vld [vmem:[%s10244_s10 + $0x19f0] sm:$0xff] }
  0xeb   : > { %v2048_v32 = vld [vmem:[%s10244_s10 + $0x1a00] sm:$0xff]  ;;  %2045 = vst [vmem:[%s10249_s11 + $0xcf0] sm:$0xff] %v2044_v30  ;;  %2047 = vst [vmem:[%s10249_s11 + $0xcf8] sm:$0xff] %v2046_v31  ;;  %v2050_v33 = vld [vmem:[%s10244_s10 + $0x1a10] sm:$0xff] }
  0xec   : > { %2049 = vst [vmem:[%s10249_s11 + $0xd00] sm:$0xff] %v2048_v32  ;;  %v2052_v34 = vld [vmem:[%s10244_s10 + $0x1a20] sm:$0xff]  ;;  %v2054_v35 = vld [vmem:[%s10244_s10 + $0x1a30] sm:$0xff]  ;;  %2051 = vst [vmem:[%s10249_s11 + $0xd08] sm:$0xff] %v2050_v33 }
  0xed   : > { %2053 = vst [vmem:[%s10249_s11 + $0xd10] sm:$0xff] %v2052_v34  ;;  %2055 = vst [vmem:[%s10249_s11 + $0xd18] sm:$0xff] %v2054_v35  ;;  %v2056_v36 = vld [vmem:[%s10244_s10 + $0x1a40] sm:$0xff]  ;;  %v2058_v37 = vld [vmem:[%s10244_s10 + $0x1a50] sm:$0xff] }
  0xee   : > { %v2060_v38 = vld [vmem:[%s10244_s10 + $0x1a60] sm:$0xff]  ;;  %2057 = vst [vmem:[%s10249_s11 + $0xd20] sm:$0xff] %v2056_v36  ;;  %2059 = vst [vmem:[%s10249_s11 + $0xd28] sm:$0xff] %v2058_v37  ;;  %v2062_v39 = vld [vmem:[%s10244_s10 + $0x1a70] sm:$0xff] }
  0xef   : > { %2061 = vst [vmem:[%s10249_s11 + $0xd30] sm:$0xff] %v2060_v38  ;;  %v2064_v40 = vld [vmem:[%s10244_s10 + $0x1a80] sm:$0xff]  ;;  %v2066_v41 = vld [vmem:[%s10244_s10 + $0x1a90] sm:$0xff]  ;;  %2063 = vst [vmem:[%s10249_s11 + $0xd38] sm:$0xff] %v2062_v39 }
  0xf0   : > { %2065 = vst [vmem:[%s10249_s11 + $0xd40] sm:$0xff] %v2064_v40  ;;  %2067 = vst [vmem:[%s10249_s11 + $0xd48] sm:$0xff] %v2066_v41  ;;  %v2068_v42 = vld [vmem:[%s10244_s10 + $0x1aa0] sm:$0xff]  ;;  %v2070_v43 = vld [vmem:[%s10244_s10 + $0x1ab0] sm:$0xff] }
  0xf1   : > { %v2072_v44 = vld [vmem:[%s10244_s10 + $0x1ac0] sm:$0xff]  ;;  %2069 = vst [vmem:[%s10249_s11 + $0xd50] sm:$0xff] %v2068_v42  ;;  %2071 = vst [vmem:[%s10249_s11 + $0xd58] sm:$0xff] %v2070_v43  ;;  %v2074_v45 = vld [vmem:[%s10244_s10 + $0x1ad0] sm:$0xff] }
  0xf2   : > { %2073 = vst [vmem:[%s10249_s11 + $0xd60] sm:$0xff] %v2072_v44  ;;  %v2076_v46 = vld [vmem:[%s10244_s10 + $0x1ae0] sm:$0xff]  ;;  %v2078_v47 = vld [vmem:[%s10244_s10 + $0x1af0] sm:$0xff]  ;;  %2075 = vst [vmem:[%s10249_s11 + $0xd68] sm:$0xff] %v2074_v45 }
  0xf3   : > { %2077 = vst [vmem:[%s10249_s11 + $0xd70] sm:$0xff] %v2076_v46  ;;  %2079 = vst [vmem:[%s10249_s11 + $0xd78] sm:$0xff] %v2078_v47  ;;  %v2080_v48 = vld [vmem:[%s10244_s10 + $0x1b00] sm:$0xff]  ;;  %v2082_v49 = vld [vmem:[%s10244_s10 + $0x1b10] sm:$0xff] }
  0xf4   : > { %v2084_v50 = vld [vmem:[%s10244_s10 + $0x1b20] sm:$0xff]  ;;  %2081 = vst [vmem:[%s10249_s11 + $0xd80] sm:$0xff] %v2080_v48  ;;  %2083 = vst [vmem:[%s10249_s11 + $0xd88] sm:$0xff] %v2082_v49  ;;  %v2086_v51 = vld [vmem:[%s10244_s10 + $0x1b30] sm:$0xff] }
  0xf5   : > { %2085 = vst [vmem:[%s10249_s11 + $0xd90] sm:$0xff] %v2084_v50  ;;  %v2088_v52 = vld [vmem:[%s10244_s10 + $0x1b40] sm:$0xff]  ;;  %v2090_v53 = vld [vmem:[%s10244_s10 + $0x1b50] sm:$0xff]  ;;  %2087 = vst [vmem:[%s10249_s11 + $0xd98] sm:$0xff] %v2086_v51 }
  0xf6   : > { %2089 = vst [vmem:[%s10249_s11 + $0xda0] sm:$0xff] %v2088_v52  ;;  %2091 = vst [vmem:[%s10249_s11 + $0xda8] sm:$0xff] %v2090_v53  ;;  %v2092_v54 = vld [vmem:[%s10244_s10 + $0x1b60] sm:$0xff]  ;;  %v2094_v55 = vld [vmem:[%s10244_s10 + $0x1b70] sm:$0xff] }
  0xf7   : > { %v2096_v56 = vld [vmem:[%s10244_s10 + $0x1b80] sm:$0xff]  ;;  %2093 = vst [vmem:[%s10249_s11 + $0xdb0] sm:$0xff] %v2092_v54  ;;  %2095 = vst [vmem:[%s10249_s11 + $0xdb8] sm:$0xff] %v2094_v55  ;;  %v2098_v57 = vld [vmem:[%s10244_s10 + $0x1b90] sm:$0xff] }
  0xf8   : > { %2097 = vst [vmem:[%s10249_s11 + $0xdc0] sm:$0xff] %v2096_v56  ;;  %v2100_v58 = vld [vmem:[%s10244_s10 + $0x1ba0] sm:$0xff]  ;;  %v2102_v59 = vld [vmem:[%s10244_s10 + $0x1bb0] sm:$0xff]  ;;  %2099 = vst [vmem:[%s10249_s11 + $0xdc8] sm:$0xff] %v2098_v57 }
  0xf9   : > { %2101 = vst [vmem:[%s10249_s11 + $0xdd0] sm:$0xff] %v2100_v58  ;;  %2103 = vst [vmem:[%s10249_s11 + $0xdd8] sm:$0xff] %v2102_v59  ;;  %v2104_v60 = vld [vmem:[%s10244_s10 + $0x1bc0] sm:$0xff]  ;;  %v2106_v61 = vld [vmem:[%s10244_s10 + $0x1bd0] sm:$0xff] }
  0xfa   : > { %v2108_v62 = vld [vmem:[%s10244_s10 + $0x1be0] sm:$0xff]  ;;  %2105 = vst [vmem:[%s10249_s11 + $0xde0] sm:$0xff] %v2104_v60  ;;  %2107 = vst [vmem:[%s10249_s11 + $0xde8] sm:$0xff] %v2106_v61  ;;  %v2110_v63 = vld [vmem:[%s10244_s10 + $0x1bf0] sm:$0xff] }
  0xfb   : > { %2109 = vst [vmem:[%s10249_s11 + $0xdf0] sm:$0xff] %v2108_v62  ;;  %v2112_v0 = vld [vmem:[%s10244_s10 + $0x1c00] sm:$0xff]  ;;  %v2114_v1 = vld [vmem:[%s10244_s10 + $0x1c10] sm:$0xff]  ;;  %2111 = vst [vmem:[%s10249_s11 + $0xdf8] sm:$0xff] %v2110_v63 }
  0xfc   : > { %2113 = vst [vmem:[%s10249_s11 + $0xe00] sm:$0xff] %v2112_v0  ;;  %2115 = vst [vmem:[%s10249_s11 + $0xe08] sm:$0xff] %v2114_v1  ;;  %v2116_v2 = vld [vmem:[%s10244_s10 + $0x1c20] sm:$0xff]  ;;  %v2118_v3 = vld [vmem:[%s10244_s10 + $0x1c30] sm:$0xff] }
  0xfd   : > { %v2120_v4 = vld [vmem:[%s10244_s10 + $0x1c40] sm:$0xff]  ;;  %2117 = vst [vmem:[%s10249_s11 + $0xe10] sm:$0xff] %v2116_v2  ;;  %2119 = vst [vmem:[%s10249_s11 + $0xe18] sm:$0xff] %v2118_v3  ;;  %v2122_v5 = vld [vmem:[%s10244_s10 + $0x1c50] sm:$0xff] }
  0xfe   : > { %2121 = vst [vmem:[%s10249_s11 + $0xe20] sm:$0xff] %v2120_v4  ;;  %v2124_v6 = vld [vmem:[%s10244_s10 + $0x1c60] sm:$0xff]  ;;  %v2126_v7 = vld [vmem:[%s10244_s10 + $0x1c70] sm:$0xff]  ;;  %2123 = vst [vmem:[%s10249_s11 + $0xe28] sm:$0xff] %v2122_v5 }
  0xff   : > { %2125 = vst [vmem:[%s10249_s11 + $0xe30] sm:$0xff] %v2124_v6  ;;  %2127 = vst [vmem:[%s10249_s11 + $0xe38] sm:$0xff] %v2126_v7  ;;  %v2128_v8 = vld [vmem:[%s10244_s10 + $0x1c80] sm:$0xff]  ;;  %v2130_v9 = vld [vmem:[%s10244_s10 + $0x1c90] sm:$0xff] }
 0x100   : > { %v2132_v10 = vld [vmem:[%s10244_s10 + $0x1ca0] sm:$0xff]  ;;  %2129 = vst [vmem:[%s10249_s11 + $0xe40] sm:$0xff] %v2128_v8  ;;  %2131 = vst [vmem:[%s10249_s11 + $0xe48] sm:$0xff] %v2130_v9  ;;  %v2134_v11 = vld [vmem:[%s10244_s10 + $0x1cb0] sm:$0xff] }
 0x101   : > { %2133 = vst [vmem:[%s10249_s11 + $0xe50] sm:$0xff] %v2132_v10  ;;  %v2136_v12 = vld [vmem:[%s10244_s10 + $0x1cc0] sm:$0xff]  ;;  %v2138_v13 = vld [vmem:[%s10244_s10 + $0x1cd0] sm:$0xff]  ;;  %2135 = vst [vmem:[%s10249_s11 + $0xe58] sm:$0xff] %v2134_v11 }
 0x102   : > { %2137 = vst [vmem:[%s10249_s11 + $0xe60] sm:$0xff] %v2136_v12  ;;  %2139 = vst [vmem:[%s10249_s11 + $0xe68] sm:$0xff] %v2138_v13  ;;  %v2140_v14 = vld [vmem:[%s10244_s10 + $0x1ce0] sm:$0xff]  ;;  %v2142_v15 = vld [vmem:[%s10244_s10 + $0x1cf0] sm:$0xff] }
 0x103   : > { %v2144_v16 = vld [vmem:[%s10244_s10 + $0x1d00] sm:$0xff]  ;;  %2141 = vst [vmem:[%s10249_s11 + $0xe70] sm:$0xff] %v2140_v14  ;;  %2143 = vst [vmem:[%s10249_s11 + $0xe78] sm:$0xff] %v2142_v15  ;;  %v2146_v17 = vld [vmem:[%s10244_s10 + $0x1d10] sm:$0xff] }
 0x104   : > { %2145 = vst [vmem:[%s10249_s11 + $0xe80] sm:$0xff] %v2144_v16  ;;  %v2148_v18 = vld [vmem:[%s10244_s10 + $0x1d20] sm:$0xff]  ;;  %v2150_v19 = vld [vmem:[%s10244_s10 + $0x1d30] sm:$0xff]  ;;  %2147 = vst [vmem:[%s10249_s11 + $0xe88] sm:$0xff] %v2146_v17 }
 0x105   : > { %2149 = vst [vmem:[%s10249_s11 + $0xe90] sm:$0xff] %v2148_v18  ;;  %2151 = vst [vmem:[%s10249_s11 + $0xe98] sm:$0xff] %v2150_v19  ;;  %v2152_v20 = vld [vmem:[%s10244_s10 + $0x1d40] sm:$0xff]  ;;  %v2154_v21 = vld [vmem:[%s10244_s10 + $0x1d50] sm:$0xff] }
 0x106   : > { %v2156_v22 = vld [vmem:[%s10244_s10 + $0x1d60] sm:$0xff]  ;;  %2153 = vst [vmem:[%s10249_s11 + $0xea0] sm:$0xff] %v2152_v20  ;;  %2155 = vst [vmem:[%s10249_s11 + $0xea8] sm:$0xff] %v2154_v21  ;;  %v2158_v23 = vld [vmem:[%s10244_s10 + $0x1d70] sm:$0xff] }
 0x107   : > { %2157 = vst [vmem:[%s10249_s11 + $0xeb0] sm:$0xff] %v2156_v22  ;;  %v2160_v24 = vld [vmem:[%s10244_s10 + $0x1d80] sm:$0xff]  ;;  %v2162_v25 = vld [vmem:[%s10244_s10 + $0x1d90] sm:$0xff]  ;;  %2159 = vst [vmem:[%s10249_s11 + $0xeb8] sm:$0xff] %v2158_v23 }
 0x108   : > { %2161 = vst [vmem:[%s10249_s11 + $0xec0] sm:$0xff] %v2160_v24  ;;  %2163 = vst [vmem:[%s10249_s11 + $0xec8] sm:$0xff] %v2162_v25  ;;  %v2164_v26 = vld [vmem:[%s10244_s10 + $0x1da0] sm:$0xff]  ;;  %v2166_v27 = vld [vmem:[%s10244_s10 + $0x1db0] sm:$0xff] }
 0x109   : > { %v2168_v28 = vld [vmem:[%s10244_s10 + $0x1dc0] sm:$0xff]  ;;  %2165 = vst [vmem:[%s10249_s11 + $0xed0] sm:$0xff] %v2164_v26  ;;  %2167 = vst [vmem:[%s10249_s11 + $0xed8] sm:$0xff] %v2166_v27  ;;  %v2170_v29 = vld [vmem:[%s10244_s10 + $0x1dd0] sm:$0xff] }
 0x10a   : > { %2169 = vst [vmem:[%s10249_s11 + $0xee0] sm:$0xff] %v2168_v28  ;;  %v2172_v30 = vld [vmem:[%s10244_s10 + $0x1de0] sm:$0xff]  ;;  %v2174_v31 = vld [vmem:[%s10244_s10 + $0x1df0] sm:$0xff]  ;;  %2171 = vst [vmem:[%s10249_s11 + $0xee8] sm:$0xff] %v2170_v29 }
 0x10b   : > { %2173 = vst [vmem:[%s10249_s11 + $0xef0] sm:$0xff] %v2172_v30  ;;  %2175 = vst [vmem:[%s10249_s11 + $0xef8] sm:$0xff] %v2174_v31  ;;  %v2176_v32 = vld [vmem:[%s10244_s10 + $0x1e00] sm:$0xff]  ;;  %v2178_v33 = vld [vmem:[%s10244_s10 + $0x1e10] sm:$0xff] }
 0x10c   : > { %v2180_v34 = vld [vmem:[%s10244_s10 + $0x1e20] sm:$0xff]  ;;  %2177 = vst [vmem:[%s10249_s11 + $0xf00] sm:$0xff] %v2176_v32  ;;  %2179 = vst [vmem:[%s10249_s11 + $0xf08] sm:$0xff] %v2178_v33  ;;  %v2182_v35 = vld [vmem:[%s10244_s10 + $0x1e30] sm:$0xff] }
 0x10d   : > { %2181 = vst [vmem:[%s10249_s11 + $0xf10] sm:$0xff] %v2180_v34  ;;  %v2184_v36 = vld [vmem:[%s10244_s10 + $0x1e40] sm:$0xff]  ;;  %v2186_v37 = vld [vmem:[%s10244_s10 + $0x1e50] sm:$0xff]  ;;  %2183 = vst [vmem:[%s10249_s11 + $0xf18] sm:$0xff] %v2182_v35 }
 0x10e   : > { %2185 = vst [vmem:[%s10249_s11 + $0xf20] sm:$0xff] %v2184_v36  ;;  %2187 = vst [vmem:[%s10249_s11 + $0xf28] sm:$0xff] %v2186_v37  ;;  %v2188_v38 = vld [vmem:[%s10244_s10 + $0x1e60] sm:$0xff]  ;;  %v2190_v39 = vld [vmem:[%s10244_s10 + $0x1e70] sm:$0xff] }
 0x10f   : > { %v2192_v40 = vld [vmem:[%s10244_s10 + $0x1e80] sm:$0xff]  ;;  %2189 = vst [vmem:[%s10249_s11 + $0xf30] sm:$0xff] %v2188_v38  ;;  %2191 = vst [vmem:[%s10249_s11 + $0xf38] sm:$0xff] %v2190_v39  ;;  %v2194_v41 = vld [vmem:[%s10244_s10 + $0x1e90] sm:$0xff] }
 0x110   : > { %2193 = vst [vmem:[%s10249_s11 + $0xf40] sm:$0xff] %v2192_v40  ;;  %v2196_v42 = vld [vmem:[%s10244_s10 + $0x1ea0] sm:$0xff]  ;;  %v2198_v43 = vld [vmem:[%s10244_s10 + $0x1eb0] sm:$0xff]  ;;  %2195 = vst [vmem:[%s10249_s11 + $0xf48] sm:$0xff] %v2194_v41 }
 0x111   : > { %2197 = vst [vmem:[%s10249_s11 + $0xf50] sm:$0xff] %v2196_v42  ;;  %2199 = vst [vmem:[%s10249_s11 + $0xf58] sm:$0xff] %v2198_v43  ;;  %v2200_v44 = vld [vmem:[%s10244_s10 + $0x1ec0] sm:$0xff]  ;;  %v2202_v45 = vld [vmem:[%s10244_s10 + $0x1ed0] sm:$0xff] }
 0x112   : > { %v2204_v46 = vld [vmem:[%s10244_s10 + $0x1ee0] sm:$0xff]  ;;  %2201 = vst [vmem:[%s10249_s11 + $0xf60] sm:$0xff] %v2200_v44  ;;  %2203 = vst [vmem:[%s10249_s11 + $0xf68] sm:$0xff] %v2202_v45  ;;  %v2206_v47 = vld [vmem:[%s10244_s10 + $0x1ef0] sm:$0xff] }
 0x113   : > { %2205 = vst [vmem:[%s10249_s11 + $0xf70] sm:$0xff] %v2204_v46  ;;  %v2208_v48 = vld [vmem:[%s10244_s10 + $0x1f00] sm:$0xff]  ;;  %v2210_v49 = vld [vmem:[%s10244_s10 + $0x1f10] sm:$0xff]  ;;  %2207 = vst [vmem:[%s10249_s11 + $0xf78] sm:$0xff] %v2206_v47 }
 0x114   : > { %2209 = vst [vmem:[%s10249_s11 + $0xf80] sm:$0xff] %v2208_v48  ;;  %2211 = vst [vmem:[%s10249_s11 + $0xf88] sm:$0xff] %v2210_v49  ;;  %v2212_v50 = vld [vmem:[%s10244_s10 + $0x1f20] sm:$0xff]  ;;  %v2214_v51 = vld [vmem:[%s10244_s10 + $0x1f30] sm:$0xff] }
 0x115   : > { %v2216_v52 = vld [vmem:[%s10244_s10 + $0x1f40] sm:$0xff]  ;;  %2213 = vst [vmem:[%s10249_s11 + $0xf90] sm:$0xff] %v2212_v50  ;;  %2215 = vst [vmem:[%s10249_s11 + $0xf98] sm:$0xff] %v2214_v51  ;;  %v2218_v53 = vld [vmem:[%s10244_s10 + $0x1f50] sm:$0xff] }
 0x116   : > { %2217 = vst [vmem:[%s10249_s11 + $0xfa0] sm:$0xff] %v2216_v52  ;;  %v2220_v54 = vld [vmem:[%s10244_s10 + $0x1f60] sm:$0xff]  ;;  %v2222_v55 = vld [vmem:[%s10244_s10 + $0x1f70] sm:$0xff]  ;;  %2219 = vst [vmem:[%s10249_s11 + $0xfa8] sm:$0xff] %v2218_v53 }
 0x117   : > { %2221 = vst [vmem:[%s10249_s11 + $0xfb0] sm:$0xff] %v2220_v54  ;;  %2223 = vst [vmem:[%s10249_s11 + $0xfb8] sm:$0xff] %v2222_v55  ;;  %v2224_v56 = vld [vmem:[%s10244_s10 + $0x1f80] sm:$0xff]  ;;  %v2226_v57 = vld [vmem:[%s10244_s10 + $0x1f90] sm:$0xff] }
 0x118   : > { %v2228_v58 = vld [vmem:[%s10244_s10 + $0x1fa0] sm:$0xff]  ;;  %2225 = vst [vmem:[%s10249_s11 + $0xfc0] sm:$0xff] %v2224_v56  ;;  %2227 = vst [vmem:[%s10249_s11 + $0xfc8] sm:$0xff] %v2226_v57  ;;  %v2230_v59 = vld [vmem:[%s10244_s10 + $0x1fb0] sm:$0xff] }
 0x119   : > { %2229 = vst [vmem:[%s10249_s11 + $0xfd0] sm:$0xff] %v2228_v58  ;;  %v2232_v60 = vld [vmem:[%s10244_s10 + $0x1fc0] sm:$0xff]  ;;  %v2234_v61 = vld [vmem:[%s10244_s10 + $0x1fd0] sm:$0xff]  ;;  %2231 = vst [vmem:[%s10249_s11 + $0xfd8] sm:$0xff] %v2230_v59 }
 0x11a   : > { %2233 = vst [vmem:[%s10249_s11 + $0xfe0] sm:$0xff] %v2232_v60  ;;  %2235 = vst [vmem:[%s10249_s11 + $0xfe8] sm:$0xff] %v2234_v61  ;;  %v2236_v62 = vld [vmem:[%s10244_s10 + $0x1fe0] sm:$0xff]  ;;  %v2238_v63 = vld [vmem:[%s10244_s10 + $0x1ff0] sm:$0xff] }
 0x11b   : > { %2237 = vst [vmem:[%s10249_s11 + $0xff0] sm:$0xff] %v2236_v62  ;;  %2239 = vst [vmem:[%s10249_s11 + $0xff8] sm:$0xff] %v2238_v63 }
 0x11c PF: > { %p8599_p11 = scmp.ge.s32.totalorder %s10141_s20, 1  ;;  %p4336_p12 = scmp.lt.s32.totalorder %s10141_s20, 5 }
 0x11e   : > { %p4337_p13 = pnand %p8599_p11, %p4336_p12 }
 0x11f   : > { %s4343_s21 = sand.u32 (!%p4337_p13), 1, %s10117_s14   ;;  %p4374_p0 = scmp.lt.s32.totalorder (!%p4337_p13), %s10129_s17, 1 }
 0x120   : > { %4340 = sbr.rel (%p4337_p13) target bundleno = 1075 (0x433), region = 80  ;;  %s8600_s24 = sshll.u32 (!%p4337_p13), %s4343_s21, 12 }
 0x121   : > { %s11275_s25 = scalar_lea.vmem (!%p4337_p13), [#allocation2], %s8600_s24  ;;  %s11941_s6 = sshll.u32 (!%p4337_p13), %s10125_s16, 1 }
 0x122   : > { %v9299_v0 = vld [vmem:[%s11275_s25 + $0x4] ss:$8 sps:$4 sm:$0xff] (!%p4337_p13)   ;;  %v9303_v2 = vld [vmem:[%s11275_s25] ss:$8 sps:$4 sm:$0xff] (!%p4337_p13)   ;;  %v9305_v4 = vld [vmem:[%s11275_s25 + $0x14] ss:$8 sps:$4 sm:$0xff] (!%p4337_p13)  }
 0x123   : > { %v9301_v1 = vld [vmem:[%s11275_s25 + $0x804] ss:$8 sps:$4 sm:$0xff] (!%p4337_p13)   ;;  %7662 = vmatprep.subr.bf16.mxu1 (!%p4337_p13), %v9299_v0  ;;  %v9304_v3 = vld [vmem:[%s11275_s25 + $0x800] ss:$8 sps:$4 sm:$0xff] (!%p4337_p13)   ;;  %v9307_v5 = vld [vmem:[%s11275_s25 + $0x814] ss:$8 sps:$4 sm:$0xff] (!%p4337_p13)  }
 0x124   : > { %8006 = vmatprep.subr.bf16.mxu0 (!%p4337_p13), %v9301_v1  ;;  %7663 = vmatpush1.bf16.msra.mxu1 (!%p4337_p13), %v9303_v2  ;;  %v9309_v6 = vld [vmem:[%s11275_s25 + $0x10] ss:$8 sps:$4 sm:$0xff] (!%p4337_p13)   ;;  %v9311_v8 = vld [vmem:[%s11275_s25 + $0x24] ss:$8 sps:$4 sm:$0xff] (!%p4337_p13)   ;;  %v9315_v10 = vld [vmem:[%s11275_s25 + $0x20] ss:$8 sps:$4 sm:$0xff] (!%p4337_p13)  }
 0x125   : > { %8007 = vmatpush1.bf16.msra.mxu0 (!%p4337_p13), %v9304_v3  ;;  %7664 = vmatprep.subr.bf16.mxu1 (!%p4337_p13), %v9305_v4  ;;  %v9310_v7 = vld [vmem:[%s11275_s25 + $0x810] ss:$8 sps:$4 sm:$0xff] (!%p4337_p13)   ;;  %v9313_v9 = vld [vmem:[%s11275_s25 + $0x824] ss:$8 sps:$4 sm:$0xff] (!%p4337_p13)   ;;  %v9316_v11 = vld [vmem:[%s11275_s25 + $0x820] ss:$8 sps:$4 sm:$0xff] (!%p4337_p13)  }
 0x126   : > { %8008 = vmatprep.subr.bf16.mxu0 (!%p4337_p13), %v9307_v5  ;;  %v9317_v12 = vld [vmem:[%s11275_s25 + $0x34] ss:$8 sps:$4 sm:$0xff] (!%p4337_p13)   ;;  %v9321_v14 = vld [vmem:[%s11275_s25 + $0x30] ss:$8 sps:$4 sm:$0xff] (!%p4337_p13)   ;;  %v9323_v16 = vld [vmem:[%s11275_s25 + $0x44] ss:$8 sps:$4 sm:$0xff] (!%p4337_p13)  }
 0x127   : > { %v9319_v13 = vld [vmem:[%s11275_s25 + $0x834] ss:$8 sps:$4 sm:$0xff]   ;;  %v9322_v15 = vld [vmem:[%s11275_s25 + $0x830] ss:$8 sps:$4 sm:$0xff]   ;;  %v9325_v17 = vld [vmem:[%s11275_s25 + $0x844] ss:$8 sps:$4 sm:$0xff]  }
 0x128   : > { %7665 = vmatpush1.bf16.msra.mxu1 %v9309_v6  ;;  %v9327_v18 = vld [vmem:[%s11275_s25 + $0x40] ss:$8 sps:$4 sm:$0xff]   ;;  %v9329_v20 = vld [vmem:[%s11275_s25 + $0x54] ss:$8 sps:$4 sm:$0xff]   ;;  %v9333_v22 = vld [vmem:[%s11275_s25 + $0x50] ss:$8 sps:$4 sm:$0xff]  }
 0x129   : > { %8009 = vmatpush1.bf16.msra.mxu0 %v9310_v7  ;;  %7666 = vmatprep.subr.bf16.mxu1 %v9311_v8  ;;  %v9328_v19 = vld [vmem:[%s11275_s25 + $0x840] ss:$8 sps:$4 sm:$0xff]   ;;  %v9331_v21 = vld [vmem:[%s11275_s25 + $0x854] ss:$8 sps:$4 sm:$0xff]   ;;  %v9334_v23 = vld [vmem:[%s11275_s25 + $0x850] ss:$8 sps:$4 sm:$0xff]  }
 0x12a   : > { %8010 = vmatprep.subr.bf16.mxu0 %v9313_v9  ;;  %v9335_v24 = vld [vmem:[%s11275_s25 + $0x64] ss:$8 sps:$4 sm:$0xff]   ;;  %v9339_v26 = vld [vmem:[%s11275_s25 + $0x60] ss:$8 sps:$4 sm:$0xff]   ;;  %v9341_v28 = vld [vmem:[%s11275_s25 + $0x74] ss:$8 sps:$4 sm:$0xff]  }
 0x12b   : > { %v9337_v25 = vld [vmem:[%s11275_s25 + $0x864] ss:$8 sps:$4 sm:$0xff]   ;;  %v9340_v27 = vld [vmem:[%s11275_s25 + $0x860] ss:$8 sps:$4 sm:$0xff]   ;;  %v9343_v29 = vld [vmem:[%s11275_s25 + $0x874] ss:$8 sps:$4 sm:$0xff]  }
 0x12c   : > { %7667 = vmatpush1.bf16.msra.mxu1 %v9315_v10  ;;  %v9345_v30 = vld [vmem:[%s11275_s25 + $0x70] ss:$8 sps:$4 sm:$0xff]   ;;  %v9347_v32 = vld [vmem:[%s11275_s25 + $0x84] ss:$8 sps:$4 sm:$0xff]   ;;  %v9351_v34 = vld [vmem:[%s11275_s25 + $0x80] ss:$8 sps:$4 sm:$0xff]  }
 0x12d   : > { %8011 = vmatpush1.bf16.msra.mxu0 %v9316_v11  ;;  %7668 = vmatprep.subr.bf16.mxu1 %v9317_v12  ;;  %v9346_v31 = vld [vmem:[%s11275_s25 + $0x870] ss:$8 sps:$4 sm:$0xff]   ;;  %v9349_v33 = vld [vmem:[%s11275_s25 + $0x884] ss:$8 sps:$4 sm:$0xff]   ;;  %v9352_v35 = vld [vmem:[%s11275_s25 + $0x880] ss:$8 sps:$4 sm:$0xff]  }
 0x12e   : > { %8012 = vmatprep.subr.bf16.mxu0 %v9319_v13  ;;  %v9353_v36 = vld [vmem:[%s11275_s25 + $0x94] ss:$8 sps:$4 sm:$0xff]   ;;  %s4375_s14 = scalar_select %p4374_p0, %s10129_s17, 1  ;;  %v9357_v38 = vld [vmem:[%s11275_s25 + $0x90] ss:$8 sps:$4 sm:$0xff]  }
 0x12f   : > { %v9355_v37 = vld [vmem:[%s11275_s25 + $0x894] ss:$8 sps:$4 sm:$0xff]   ;;  %v9358_v39 = vld [vmem:[%s11275_s25 + $0x890] ss:$8 sps:$4 sm:$0xff]   ;;  %v9359_v40 = vld [vmem:[%s11275_s25 + $0xa4] ss:$8 sps:$4 sm:$0xff]  }
 0x130   : > { %7669 = vmatpush1.bf16.msra.mxu1 %v9321_v14  ;;  %s9159_s26 = sshll.u32 %s4375_s14, 8  ;;  %v9361_v41 = vld [vmem:[%s11275_s25 + $0x8a4] ss:$8 sps:$4 sm:$0xff]   ;;  %v9363_v42 = vld [vmem:[%s11275_s25 + $0xa0] ss:$8 sps:$4 sm:$0xff]   ;;  %p4381_p1 = scmp.lt.s32.totalorder %s11941_s6, 3 }
 0x131   : > { %8013 = vmatpush1.bf16.msra.mxu0 %v9322_v15  ;;  %7670 = vmatprep.subr.bf16.mxu1 %v9323_v16  ;;  %v9364_v43 = vld [vmem:[%s11275_s25 + $0x8a0] ss:$8 sps:$4 sm:$0xff]   ;;  %s11326_s5 = scalar_lea.vmem %s11995_s0, %s9159_s26  ;;  %v9365_v44 = vld [vmem:[%s11275_s25 + $0xb4] ss:$8 sps:$4 sm:$0xff]   ;;  %v9369_v46 = vld [vmem:[%s11275_s25 + $0xb0] ss:$8 sps:$4 sm:$0xff]  }
 0x132   : > { %8014 = vmatprep.subr.bf16.mxu0 %v9325_v17  ;;  %v9367_v45 = vld [vmem:[%s11275_s25 + $0x8b4] ss:$8 sps:$4 sm:$0xff]   ;;  %v9370_v47 = vld [vmem:[%s11275_s25 + $0x8b0] ss:$8 sps:$4 sm:$0xff]   ;;  %v4386_v48 = vld [vmem:[%s11326_s5] sm:$0xff]  ;;  %s4382_s7 = scalar_select %p4381_p1, %s11941_s6, 3 }
 0x133   : > { %v4402_v49 = vld [vmem:[%s11326_s5 + $0x80] sm:$0xff]  ;;  %v9377_v58 = vld [vmem:[%s11275_s25 + $0xd4] ss:$8 sps:$4 sm:$0xff]   ;;  %v9381_v60 = vld [vmem:[%s11275_s25 + $0xd0] ss:$8 sps:$4 sm:$0xff]   ;;  %s4371_s16 = sand.u32 1, %s10109_s12  }
 0x134   : > { %7671 = vmatpush1.bf16.msra.mxu1 %v9327_v18  ;;  %v9371_v50 = vld [vmem:[%s11275_s25 + $0xc4] ss:$8 sps:$4 sm:$0xff]   ;;  %v8606_v52 = vcombine.high %v4386_v48, %v4402_v49  ;;  %v9375_v56 = vld [vmem:[%s11275_s25 + $0xc0] ss:$8 sps:$4 sm:$0xff]   ;;  %v9379_v59 = vld [vmem:[%s11275_s25 + $0x8d4] ss:$8 sps:$4 sm:$0xff]   ;;  %v8605_v8 = vcombine.low %v4386_v48, %v4402_v49  ;;  %s4383_s10 = scalar_lea.vmem %s11997_s2, %s4382_s7 }
 0x135   : > { %8015 = vmatpush1.bf16.msra.mxu0 %v9328_v19  ;;  %7672 = vmatprep.subr.bf16.mxu1 %v9329_v20  ;;  %v9373_v51 = vld [vmem:[%s11275_s25 + $0x8c4] ss:$8 sps:$4 sm:$0xff]   ;;  %v9376_v57 = vld [vmem:[%s11275_s25 + $0x8c0] ss:$8 sps:$4 sm:$0xff]   ;;  %v9382_v61 = vld [vmem:[%s11275_s25 + $0x8d0] ss:$8 sps:$4 sm:$0xff]  }
 0x136   : > { %8016 = vmatprep.subr.bf16.mxu0 %v9331_v21  ;;  %v4394_v53 = vld [vmem:[%s11326_s5 + $0x40] sm:$0xff]  ;;  %7694 = vmatprep.mubr.bf16.mxu1 %v8606_v52  ;;  %v9389_v2 = vld [vmem:[%s11275_s25 + $0xf4] ss:$8 sps:$4 sm:$0xff]   ;;  %v9393_v4 = vld [vmem:[%s11275_s25 + $0xf0] ss:$8 sps:$4 sm:$0xff]   ;;  %s8601_s11 = sshll.u32 %s4371_s16, 4 }
 0x137   : > { %v4410_v54 = vld [vmem:[%s11326_s5 + $0xc0] sm:$0xff]  ;;  %v9391_v3 = vld [vmem:[%s11275_s25 + $0x8f4] ss:$8 sps:$4 sm:$0xff]   ;;  %v9394_v5 = vld [vmem:[%s11275_s25 + $0x8f0] ss:$8 sps:$4 sm:$0xff]   ;;  %s4373_s12 = scalar_lea.vmem [#allocation3], %s8601_s11 }
 0x138   : > { %7673 = vmatpush1.bf16.msra.mxu1 %v9333_v22  ;;  %v8622_v55 = vcombine.high %v4394_v53, %v4410_v54  ;;  %v9383_v62 = vld [vmem:[%s11275_s25 + $0xe4] ss:$8 sps:$4 sm:$0xff]   ;;  %v9387_v0 = vld [vmem:[%s11275_s25 + $0xe0] ss:$8 sps:$4 sm:$0xff]   ;;  %v8621_v10 = vcombine.low %v4394_v53, %v4410_v54  ;;  %v9403_v12 = vld [vmem:[%s11275_s25 + $0x114] ss:$8 sps:$4 sm:$0xff]  }
 0x139   : > { %8017 = vmatpush1.bf16.msra.mxu0 %v9334_v23  ;;  %7674 = vmatprep.subr.bf16.mxu1 %v9335_v24  ;;  %v9385_v63 = vld [vmem:[%s11275_s25 + $0x8e4] ss:$8 sps:$4 sm:$0xff]   ;;  %v9388_v1 = vld [vmem:[%s11275_s25 + $0x8e0] ss:$8 sps:$4 sm:$0xff]   ;;  %v9406_v13 = vld [vmem:[%s11275_s25 + $0x914] ss:$8 sps:$4 sm:$0xff]  }
 0x13a   : > { %8018 = vmatprep.subr.bf16.mxu0 %v9337_v25  ;;  %8038 = vmatprep.mubr.bf16.mxu0 %v8622_v55  ;;  %v9397_v6 = vld [vmem:[%s11275_s25 + $0x104] ss:$8 sps:$4 sm:$0xff]   ;;  %v9395_v9 = vld [vmem:[%s11275_s25 + $0x100] ss:$8 sps:$4 sm:$0xff]   ;;  %v9401_v14 = vld [vmem:[%s11275_s25 + $0x110] ss:$8 sps:$4 sm:$0xff]  }
 0x13b   : > { %v9400_v7 = vld [vmem:[%s11275_s25 + $0x904] ss:$8 sps:$4 sm:$0xff]   ;;  %v9398_v11 = vld [vmem:[%s11275_s25 + $0x900] ss:$8 sps:$4 sm:$0xff]   ;;  %v9404_v15 = vld [vmem:[%s11275_s25 + $0x910] ss:$8 sps:$4 sm:$0xff]  }
 0x13c   : > { %7675 = vmatpush1.bf16.msra.mxu1 %v9339_v26  ;;  %v9409_v16 = vld [vmem:[%s11275_s25 + $0x124] ss:$8 sps:$4 sm:$0xff]   ;;  %v9407_v18 = vld [vmem:[%s11275_s25 + $0x120] ss:$8 sps:$4 sm:$0xff]   ;;  %v9415_v20 = vld [vmem:[%s11275_s25 + $0x134] ss:$8 sps:$4 sm:$0xff]  }
 0x13d   : > { %8019 = vmatpush1.bf16.msra.mxu0 %v9340_v27  ;;  %7676 = vmatprep.subr.bf16.mxu1 %v9341_v28  ;;  %v9412_v17 = vld [vmem:[%s11275_s25 + $0x924] ss:$8 sps:$4 sm:$0xff]   ;;  %v9410_v19 = vld [vmem:[%s11275_s25 + $0x920] ss:$8 sps:$4 sm:$0xff]   ;;  %v9418_v21 = vld [vmem:[%s11275_s25 + $0x934] ss:$8 sps:$4 sm:$0xff]  }
 0x13e   : > { %8020 = vmatprep.subr.bf16.mxu0 %v9343_v29  ;;  %v9413_v22 = vld [vmem:[%s11275_s25 + $0x130] ss:$8 sps:$4 sm:$0xff]   ;;  %v9421_v24 = vld [vmem:[%s11275_s25 + $0x144] ss:$8 sps:$4 sm:$0xff]   ;;  %v9419_v26 = vld [vmem:[%s11275_s25 + $0x140] ss:$8 sps:$4 sm:$0xff]  }
 0x13f   : > { %v9416_v23 = vld [vmem:[%s11275_s25 + $0x930] ss:$8 sps:$4 sm:$0xff]   ;;  %v9424_v25 = vld [vmem:[%s11275_s25 + $0x944] ss:$8 sps:$4 sm:$0xff]   ;;  %v9422_v27 = vld [vmem:[%s11275_s25 + $0x940] ss:$8 sps:$4 sm:$0xff]  }
 0x140   : > { %7677 = vmatpush1.bf16.msra.mxu1 %v9345_v30  ;;  %v9427_v28 = vld [vmem:[%s11275_s25 + $0x154] ss:$8 sps:$4 sm:$0xff]   ;;  %v9425_v30 = vld [vmem:[%s11275_s25 + $0x150] ss:$8 sps:$4 sm:$0xff]   ;;  %v9443_v48 = vld [vmem:[%s11275_s25 + $0x180] ss:$8 sps:$4 sm:$0xff]  }
 0x141   : > { %8021 = vmatpush1.bf16.msra.mxu0 %v9346_v31  ;;  %7678 = vmatprep.subr.bf16.mxu1 %v9347_v32  ;;  %v9430_v29 = vld [vmem:[%s11275_s25 + $0x954] ss:$8 sps:$4 sm:$0xff]   ;;  %v9428_v31 = vld [vmem:[%s11275_s25 + $0x950] ss:$8 sps:$4 sm:$0xff]   ;;  %v9433_v32 = vld [vmem:[%s11275_s25 + $0x164] ss:$8 sps:$4 sm:$0xff]  }
 0x142   : > { %8022 = vmatprep.subr.bf16.mxu0 %v9349_v33  ;;  %v9436_v33 = vld [vmem:[%s11275_s25 + $0x964] ss:$8 sps:$4 sm:$0xff]   ;;  %v9446_v49 = vld [vmem:[%s11275_s25 + $0x980] ss:$8 sps:$4 sm:$0xff]   ;;  %v9449_v52 = vld [vmem:[%s11275_s25 + $0x190] ss:$8 sps:$4 sm:$0xff]  }
 0x143   : > { %v9452_v53 = vld [vmem:[%s11275_s25 + $0x990] ss:$8 sps:$4 sm:$0xff]   ;;  %v9457_v54 = vld [vmem:[%s11275_s25 + $0x1a4] ss:$8 sps:$4 sm:$0xff]   ;;  %s9154_s21 = sshll.u32 (%p10231_p9), %s10129_s17, 3 }
 0x144   : > { %7679 = vmatpush1.bf16.msra.mxu1 %v9351_v34  ;;  %v9431_v34 = vld [vmem:[%s11275_s25 + $0x160] ss:$8 sps:$4 sm:$0xff]   ;;  %v9460_v55 = vld [vmem:[%s11275_s25 + $0x9a4] ss:$8 sps:$4 sm:$0xff]   ;;  %s8452_s24 = sadd.s32 (%p10231_p9), %s9154_s21, %s11941_s6 }
 0x145   : > { %8023 = vmatpush1.bf16.msra.mxu0 %v9352_v35  ;;  %7680 = vmatprep.subr.bf16.mxu1 %v9353_v36  ;;  %v9434_v35 = vld [vmem:[%s11275_s25 + $0x960] ss:$8 sps:$4 sm:$0xff]  }
 0x146   : > { %8024 = vmatprep.subr.bf16.mxu0 %v9355_v37  ;;  %v11381_v36 = vld [vmem:[%s11326_s5 + $0x8] sm:$0xff] }
 0x147   : > { %v11384_v37 = vld [vmem:[%s11326_s5 + $0x88] sm:$0xff] }
 0x148   : > { %7681 = vmatpush1.bf16.msra.mxu1 %v9357_v38  ;;  %v9439_v38 = vld [vmem:[%s11275_s25 + $0x174] ss:$8 sps:$4 sm:$0xff]  }
 0x149   : > { %8025 = vmatpush1.bf16.msra.mxu0 %v9358_v39  ;;  %7682 = vmatprep.subr.bf16.mxu1 %v9359_v40  ;;  %v9442_v39 = vld [vmem:[%s11275_s25 + $0x974] ss:$8 sps:$4 sm:$0xff]   ;;  %v8608_v40 = vcombine.high %v11381_v36, %v11384_v37 }
 0x14a   : > { %8026 = vmatprep.subr.bf16.mxu0 %v9361_v41  ;;  %v11391_v41 = vld [vmem:[%s11326_s5 + $0x48] sm:$0xff] }
 0x14c   : > { %7683 = vmatpush1.bf16.msra.mxu1 %v9363_v42  ;;  %v11394_v42 = vld [vmem:[%s11326_s5 + $0xc8] sm:$0xff] }
 0x14d   : > { %8027 = vmatpush1.bf16.msra.mxu0 %v9364_v43  ;;  %7684 = vmatprep.subr.bf16.mxu1 %v9365_v44  ;;  %v8624_v43 = vcombine.high %v11391_v41, %v11394_v42  ;;  %v9437_v44 = vld [vmem:[%s11275_s25 + $0x170] ss:$8 sps:$4 sm:$0xff]  }
 0x14e   : > { %8028 = vmatprep.subr.bf16.mxu0 %v9367_v45  ;;  %v9440_v45 = vld [vmem:[%s11275_s25 + $0x970] ss:$8 sps:$4 sm:$0xff]  }
 0x150   : > { %7685 = vmatpush1.bf16.msra.mxu1 %v9369_v46  ;;  %v9445_v46 = vld [vmem:[%s11275_s25 + $0x184] ss:$8 sps:$4 sm:$0xff]  }
 0x151   : > { %8029 = vmatpush1.bf16.msra.mxu0 %v9370_v47  ;;  %7686 = vmatprep.subr.bf16.mxu1 %v9371_v50  ;;  %v9448_v47 = vld [vmem:[%s11275_s25 + $0x984] ss:$8 sps:$4 sm:$0xff]   ;;  %v9451_v50 = vld [vmem:[%s11275_s25 + $0x194] ss:$8 sps:$4 sm:$0xff]  }
 0x152   : > { %8030 = vmatprep.subr.bf16.mxu0 %v9373_v51  ;;  %v9454_v51 = vld [vmem:[%s11275_s25 + $0x994] ss:$8 sps:$4 sm:$0xff]  }
 0x154   : > { %7687 = vmatpush1.bf16.msra.mxu1 %v9375_v56  ;;  %v9455_v56 = vld [vmem:[%s11275_s25 + $0x1a0] ss:$8 sps:$4 sm:$0xff]  }
 0x155   : > { %8031 = vmatpush1.bf16.msra.mxu0 %v9376_v57  ;;  %7688 = vmatprep.subr.bf16.mxu1 %v9377_v58  ;;  %v9458_v57 = vld [vmem:[%s11275_s25 + $0x9a0] ss:$8 sps:$4 sm:$0xff]   ;;  %v9463_v58 = vld [vmem:[%s11275_s25 + $0x1b4] ss:$8 sps:$4 sm:$0xff]  }
 0x156   : > { %8032 = vmatprep.subr.bf16.mxu0 %v9379_v59  ;;  %v9466_v59 = vld [vmem:[%s11275_s25 + $0x9b4] ss:$8 sps:$4 sm:$0xff]  }
 0x158   : > { %7689 = vmatpush1.bf16.msra.mxu1 %v9381_v60  ;;  %v9461_v60 = vld [vmem:[%s11275_s25 + $0x1b0] ss:$8 sps:$4 sm:$0xff]  }
 0x159   : > { %8033 = vmatpush1.bf16.msra.mxu0 %v9382_v61  ;;  %7690 = vmatprep.subr.bf16.mxu1 %v9383_v62  ;;  %v9464_v61 = vld [vmem:[%s11275_s25 + $0x9b0] ss:$8 sps:$4 sm:$0xff]   ;;  %v9469_v62 = vld [vmem:[%s11275_s25 + $0x1c4] ss:$8 sps:$4 sm:$0xff]  }
 0x15a   : > { %8034 = vmatprep.subr.bf16.mxu0 %v9385_v63  ;;  %v9472_v63 = vld [vmem:[%s11275_s25 + $0x9c4] ss:$8 sps:$4 sm:$0xff]  }
 0x15c   : > { %7691 = vmatpush1.bf16.msra.mxu1 %v9387_v0  ;;  %v9467_v0 = vld [vmem:[%s11275_s25 + $0x1c0] ss:$8 sps:$4 sm:$0xff]  }
 0x15d   : > { %8035 = vmatpush1.bf16.msra.mxu0 %v9388_v1  ;;  %7692 = vmatprep.subr.bf16.mxu1 %v9389_v2  ;;  %v9470_v1 = vld [vmem:[%s11275_s25 + $0x9c0] ss:$8 sps:$4 sm:$0xff]   ;;  %v9475_v2 = vld [vmem:[%s11275_s25 + $0x1d4] ss:$8 sps:$4 sm:$0xff]  }
 0x15e   : > { %8036 = vmatprep.subr.bf16.mxu0 %v9391_v3  ;;  %v9478_v3 = vld [vmem:[%s11275_s25 + $0x9d4] ss:$8 sps:$4 sm:$0xff]  }
 0x160   : > { %7693 = vmatpush1.bf16.msra.mxu1 %v9393_v4  ;;  %v9473_v4 = vld [vmem:[%s11275_s25 + $0x1d0] ss:$8 sps:$4 sm:$0xff]  }
 0x161   : > { %8037 = vmatpush1.bf16.msra.mxu0 %v9394_v5  ;;  %7705 = vmatprep.subr.bf16.mxu1 %v9397_v6  ;;  %v9476_v5 = vld [vmem:[%s11275_s25 + $0x9d0] ss:$8 sps:$4 sm:$0xff]   ;;  %v9481_v6 = vld [vmem:[%s11275_s25 + $0x1e4] ss:$8 sps:$4 sm:$0xff]  }
 0x162   : > { %8049 = vmatprep.subr.bf16.mxu0 %v9400_v7  ;;  %v9484_v7 = vld [vmem:[%s11275_s25 + $0x9e4] ss:$8 sps:$4 sm:$0xff]  }
 0x163   : > { %7695 = vmatmul.mubr.bf16.vlgmr.msra.gmra.mrb[0].mxu1 %v8605_v8  ;;  %v9479_v8 = vld [vmem:[%s11275_s25 + $0x1e0] ss:$8 sps:$4 sm:$0xff]  }
 0x164   : > { %8039 = vmatmul.mubr.bf16.vlgmr.msra.gmra.mrb[0].mxu0 %v8621_v10  ;;  %7706 = vmatpush1.bf16.msra.mxu1 %v9395_v9  ;;  %v9482_v9 = vld [vmem:[%s11275_s25 + $0x9e0] ss:$8 sps:$4 sm:$0xff]   ;;  %v9487_v10 = vld [vmem:[%s11275_s25 + $0x1f4] ss:$8 sps:$4 sm:$0xff]  }
 0x165   : > { %8050 = vmatpush1.bf16.msra.mxu0 %v9398_v11  ;;  %7707 = vmatprep.subr.bf16.mxu1 %v9403_v12  ;;  %v9490_v11 = vld [vmem:[%s11275_s25 + $0x9f4] ss:$8 sps:$4 sm:$0xff]   ;;  %v9485_v12 = vld [vmem:[%s11275_s25 + $0x1f0] ss:$8 sps:$4 sm:$0xff]  }
 0x166   : > { %8051 = vmatprep.subr.bf16.mxu0 %v9406_v13  ;;  %7737 = vmatprep.mubr.bf16.mxu1 %v8608_v40  ;;  %v9488_v13 = vld [vmem:[%s11275_s25 + $0x9f0] ss:$8 sps:$4 sm:$0xff]   ;;  %v9515_v40 = vld [vmem:[%s11275_s25 + $0x240] ss:$8 sps:$4 sm:$0xff]  }
 0x167   : > { %8081 = vmatprep.mubr.bf16.mxu0 %v8624_v43  ;;  %v9526_v43 = vld [vmem:[%s11275_s25 + $0xa54] ss:$8 sps:$4 sm:$0xff]  }
 0x168   : > { %7708 = vmatpush1.bf16.msra.mxu1 %v9401_v14  ;;  %v9493_v14 = vld [vmem:[%s11275_s25 + $0x204] ss:$8 sps:$4 sm:$0xff]  }
 0x169   : > { %8052 = vmatpush1.bf16.msra.mxu0 %v9404_v15  ;;  %7709 = vmatprep.subr.bf16.mxu1 %v9409_v16  ;;  %v9496_v15 = vld [vmem:[%s11275_s25 + $0xa04] ss:$8 sps:$4 sm:$0xff]   ;;  %v8607_v16 = vcombine.low %v11381_v36, %v11384_v37  ;;  %v9509_v36 = vld [vmem:[%s11275_s25 + $0x230] ss:$8 sps:$4 sm:$0xff]  }
 0x16a   : > { %8053 = vmatprep.subr.bf16.mxu0 %v9412_v17  ;;  %v9491_v17 = vld [vmem:[%s11275_s25 + $0x200] ss:$8 sps:$4 sm:$0xff]   ;;  %v9512_v37 = vld [vmem:[%s11275_s25 + $0xa30] ss:$8 sps:$4 sm:$0xff]  }
 0x16c   : > { %7710 = vmatpush1.bf16.msra.mxu1 %v9407_v18  ;;  %v8623_v18 = vcombine.low %v11391_v41, %v11394_v42  ;;  %v9518_v41 = vld [vmem:[%s11275_s25 + $0xa40] ss:$8 sps:$4 sm:$0xff]   ;;  %v9523_v42 = vld [vmem:[%s11275_s25 + $0x254] ss:$8 sps:$4 sm:$0xff]  }
 0x16d   : > { %8054 = vmatpush1.bf16.msra.mxu0 %v9410_v19  ;;  %7711 = vmatprep.subr.bf16.mxu1 %v9415_v20  ;;  %v9494_v19 = vld [vmem:[%s11275_s25 + $0xa00] ss:$8 sps:$4 sm:$0xff]   ;;  %v9499_v20 = vld [vmem:[%s11275_s25 + $0x214] ss:$8 sps:$4 sm:$0xff]  }
 0x16e   : > { %8055 = vmatprep.subr.bf16.mxu0 %v9418_v21  ;;  %v9502_v21 = vld [vmem:[%s11275_s25 + $0xa14] ss:$8 sps:$4 sm:$0xff]  }
 0x170   : > { %7712 = vmatpush1.bf16.msra.mxu1 %v9413_v22  ;;  %v9497_v22 = vld [vmem:[%s11275_s25 + $0x210] ss:$8 sps:$4 sm:$0xff]  }
 0x171   : > { %8056 = vmatpush1.bf16.msra.mxu0 %v9416_v23  ;;  %7713 = vmatprep.subr.bf16.mxu1 %v9421_v24  ;;  %v9500_v23 = vld [vmem:[%s11275_s25 + $0xa10] ss:$8 sps:$4 sm:$0xff]  }
 0x172   : > { %8057 = vmatprep.subr.bf16.mxu0 %v9424_v25  ;;  %v11445_v24 = vld [vmem:[%s11326_s5 + $0x10] sm:$0xff] }
 0x173   : > { %v11448_v25 = vld [vmem:[%s11326_s5 + $0x90] sm:$0xff] }
 0x174   : > { %7714 = vmatpush1.bf16.msra.mxu1 %v9419_v26  ;;  %v9505_v26 = vld [vmem:[%s11275_s25 + $0x224] ss:$8 sps:$4 sm:$0xff]  }
 0x175   : > { %8058 = vmatpush1.bf16.msra.mxu0 %v9422_v27  ;;  %7715 = vmatprep.subr.bf16.mxu1 %v9427_v28  ;;  %v9508_v27 = vld [vmem:[%s11275_s25 + $0xa24] ss:$8 sps:$4 sm:$0xff]   ;;  %v8610_v28 = vcombine.high %v11445_v24, %v11448_v25 }
 0x176   : > { %8059 = vmatprep.subr.bf16.mxu0 %v9430_v29  ;;  %v11455_v29 = vld [vmem:[%s11326_s5 + $0x50] sm:$0xff] }
 0x178   : > { %7716 = vmatpush1.bf16.msra.mxu1 %v9425_v30  ;;  %v11458_v30 = vld [vmem:[%s11326_s5 + $0xd0] sm:$0xff] }
 0x179   : > { %8060 = vmatpush1.bf16.msra.mxu0 %v9428_v31  ;;  %7717 = vmatprep.subr.bf16.mxu1 %v9433_v32  ;;  %v8626_v31 = vcombine.high %v11455_v29, %v11458_v30  ;;  %v9503_v32 = vld [vmem:[%s11275_s25 + $0x220] ss:$8 sps:$4 sm:$0xff]  }
 0x17a   : > { %8061 = vmatprep.subr.bf16.mxu0 %v9436_v33  ;;  %v9506_v33 = vld [vmem:[%s11275_s25 + $0xa20] ss:$8 sps:$4 sm:$0xff]  }
 0x17c   : > { %7718 = vmatpush1.bf16.msra.mxu1 %v9431_v34  ;;  %v9511_v34 = vld [vmem:[%s11275_s25 + $0x234] ss:$8 sps:$4 sm:$0xff]  }
 0x17d   : > { %8062 = vmatpush1.bf16.msra.mxu0 %v9434_v35  ;;  %7719 = vmatprep.subr.bf16.mxu1 %v9439_v38  ;;  %v9514_v35 = vld [vmem:[%s11275_s25 + $0xa34] ss:$8 sps:$4 sm:$0xff]   ;;  %v9517_v38 = vld [vmem:[%s11275_s25 + $0x244] ss:$8 sps:$4 sm:$0xff]  }
 0x17e   : > { %8063 = vmatprep.subr.bf16.mxu0 %v9442_v39  ;;  %v9520_v39 = vld [vmem:[%s11275_s25 + $0xa44] ss:$8 sps:$4 sm:$0xff]  }
 0x180   : > { %7720 = vmatpush1.bf16.msra.mxu1 %v9437_v44  ;;  %v9521_v44 = vld [vmem:[%s11275_s25 + $0x250] ss:$8 sps:$4 sm:$0xff]  }
 0x181   : > { %8064 = vmatpush1.bf16.msra.mxu0 %v9440_v45  ;;  %7721 = vmatprep.subr.bf16.mxu1 %v9445_v46  ;;  %v9524_v45 = vld [vmem:[%s11275_s25 + $0xa50] ss:$8 sps:$4 sm:$0xff]   ;;  %v9529_v46 = vld [vmem:[%s11275_s25 + $0x264] ss:$8 sps:$4 sm:$0xff]  }
 0x182   : > { %8065 = vmatprep.subr.bf16.mxu0 %v9448_v47  ;;  %v9532_v47 = vld [vmem:[%s11275_s25 + $0xa64] ss:$8 sps:$4 sm:$0xff]  }
 0x184   : > { %7722 = vmatpush1.bf16.msra.mxu1 %v9443_v48  ;;  %v9527_v48 = vld [vmem:[%s11275_s25 + $0x260] ss:$8 sps:$4 sm:$0xff]  }
 0x185   : > { %8066 = vmatpush1.bf16.msra.mxu0 %v9446_v49  ;;  %7723 = vmatprep.subr.bf16.mxu1 %v9451_v50  ;;  %v9530_v49 = vld [vmem:[%s11275_s25 + $0xa60] ss:$8 sps:$4 sm:$0xff]   ;;  %v9535_v50 = vld [vmem:[%s11275_s25 + $0x274] ss:$8 sps:$4 sm:$0xff]  }
 0x186   : > { %8067 = vmatprep.subr.bf16.mxu0 %v9454_v51  ;;  %v9538_v51 = vld [vmem:[%s11275_s25 + $0xa74] ss:$8 sps:$4 sm:$0xff]  }
 0x188   : > { %7724 = vmatpush1.bf16.msra.mxu1 %v9449_v52  ;;  %v9533_v52 = vld [vmem:[%s11275_s25 + $0x270] ss:$8 sps:$4 sm:$0xff]  }
 0x189   : > { %8068 = vmatpush1.bf16.msra.mxu0 %v9452_v53  ;;  %7725 = vmatprep.subr.bf16.mxu1 %v9457_v54  ;;  %v9536_v53 = vld [vmem:[%s11275_s25 + $0xa70] ss:$8 sps:$4 sm:$0xff]   ;;  %v9541_v54 = vld [vmem:[%s11275_s25 + $0x284] ss:$8 sps:$4 sm:$0xff]  }
 0x18a   : > { %8069 = vmatprep.subr.bf16.mxu0 %v9460_v55  ;;  %v9544_v55 = vld [vmem:[%s11275_s25 + $0xa84] ss:$8 sps:$4 sm:$0xff]  }
 0x18c   : > { %7726 = vmatpush1.bf16.msra.mxu1 %v9455_v56  ;;  %v9539_v56 = vld [vmem:[%s11275_s25 + $0x280] ss:$8 sps:$4 sm:$0xff]  }
 0x18d   : > { %8070 = vmatpush1.bf16.msra.mxu0 %v9458_v57  ;;  %7727 = vmatprep.subr.bf16.mxu1 %v9463_v58  ;;  %v9542_v57 = vld [vmem:[%s11275_s25 + $0xa80] ss:$8 sps:$4 sm:$0xff]   ;;  %v9547_v58 = vld [vmem:[%s11275_s25 + $0x294] ss:$8 sps:$4 sm:$0xff]  }
 0x18e   : > { %8071 = vmatprep.subr.bf16.mxu0 %v9466_v59  ;;  %v9550_v59 = vld [vmem:[%s11275_s25 + $0xa94] ss:$8 sps:$4 sm:$0xff]  }
 0x190   : > { %7728 = vmatpush1.bf16.msra.mxu1 %v9461_v60  ;;  %v9545_v60 = vld [vmem:[%s11275_s25 + $0x290] ss:$8 sps:$4 sm:$0xff]  }
 0x191   : > { %8072 = vmatpush1.bf16.msra.mxu0 %v9464_v61  ;;  %7729 = vmatprep.subr.bf16.mxu1 %v9469_v62  ;;  %v9548_v61 = vld [vmem:[%s11275_s25 + $0xa90] ss:$8 sps:$4 sm:$0xff]   ;;  %v9553_v62 = vld [vmem:[%s11275_s25 + $0x2a4] ss:$8 sps:$4 sm:$0xff]  }
 0x192   : > { %8073 = vmatprep.subr.bf16.mxu0 %v9472_v63  ;;  %v9556_v63 = vld [vmem:[%s11275_s25 + $0xaa4] ss:$8 sps:$4 sm:$0xff]  }
 0x194   : > { %7730 = vmatpush1.bf16.msra.mxu1 %v9467_v0  ;;  %v9551_v0 = vld [vmem:[%s11275_s25 + $0x2a0] ss:$8 sps:$4 sm:$0xff]  }
 0x195   : > { %8074 = vmatpush1.bf16.msra.mxu0 %v9470_v1  ;;  %7731 = vmatprep.subr.bf16.mxu1 %v9475_v2  ;;  %v9554_v1 = vld [vmem:[%s11275_s25 + $0xaa0] ss:$8 sps:$4 sm:$0xff]   ;;  %v9559_v2 = vld [vmem:[%s11275_s25 + $0x2b4] ss:$8 sps:$4 sm:$0xff]  }
 0x196   : > { %8075 = vmatprep.subr.bf16.mxu0 %v9478_v3  ;;  %v9562_v3 = vld [vmem:[%s11275_s25 + $0xab4] ss:$8 sps:$4 sm:$0xff]  }
 0x198   : > { %7732 = vmatpush1.bf16.msra.mxu1 %v9473_v4  ;;  %v9557_v4 = vld [vmem:[%s11275_s25 + $0x2b0] ss:$8 sps:$4 sm:$0xff]  }
 0x199   : > { %8076 = vmatpush1.bf16.msra.mxu0 %v9476_v5  ;;  %7733 = vmatprep.subr.bf16.mxu1 %v9481_v6  ;;  %v9560_v5 = vld [vmem:[%s11275_s25 + $0xab0] ss:$8 sps:$4 sm:$0xff]   ;;  %v9565_v6 = vld [vmem:[%s11275_s25 + $0x2c4] ss:$8 sps:$4 sm:$0xff]  }
 0x19a   : > { %8077 = vmatprep.subr.bf16.mxu0 %v9484_v7  ;;  %v9568_v7 = vld [vmem:[%s11275_s25 + $0xac4] ss:$8 sps:$4 sm:$0xff]  }
 0x19c   : > { %7734 = vmatpush1.bf16.msra.mxu1 %v9479_v8  ;;  %v9563_v8 = vld [vmem:[%s11275_s25 + $0x2c0] ss:$8 sps:$4 sm:$0xff]  }
 0x19d   : > { %8078 = vmatpush1.bf16.msra.mxu0 %v9482_v9  ;;  %7735 = vmatprep.subr.bf16.mxu1 %v9487_v10  ;;  %v9566_v9 = vld [vmem:[%s11275_s25 + $0xac0] ss:$8 sps:$4 sm:$0xff]   ;;  %v9571_v10 = vld [vmem:[%s11275_s25 + $0x2d4] ss:$8 sps:$4 sm:$0xff]  }
 0x19e   : > { %8079 = vmatprep.subr.bf16.mxu0 %v9490_v11  ;;  %v9574_v11 = vld [vmem:[%s11275_s25 + $0xad4] ss:$8 sps:$4 sm:$0xff]  }
 0x1a0   : > { %7736 = vmatpush1.bf16.msra.mxu1 %v9485_v12  ;;  %v9569_v12 = vld [vmem:[%s11275_s25 + $0x2d0] ss:$8 sps:$4 sm:$0xff]  }
 0x1a1   : > { %8080 = vmatpush1.bf16.msra.mxu0 %v9488_v13  ;;  %7748 = vmatprep.subr.bf16.mxu1 %v9493_v14  ;;  %v9572_v13 = vld [vmem:[%s11275_s25 + $0xad0] ss:$8 sps:$4 sm:$0xff]   ;;  %v9577_v14 = vld [vmem:[%s11275_s25 + $0x2e4] ss:$8 sps:$4 sm:$0xff]  }
 0x1a2   : > { %8092 = vmatprep.subr.bf16.mxu0 %v9496_v15  ;;  %v9580_v15 = vld [vmem:[%s11275_s25 + $0xae4] ss:$8 sps:$4 sm:$0xff]  }
 0x1a3   : > { %7738 = vmatmul.mubr.bf16.vlgmr.msra.gmra.mrb[0].mxu1 %v8607_v16  ;;  %v9575_v16 = vld [vmem:[%s11275_s25 + $0x2e0] ss:$8 sps:$4 sm:$0xff]  }
 0x1a4   : > { %8082 = vmatmul.mubr.bf16.vlgmr.msra.gmra.mrb[0].mxu0 %v8623_v18  ;;  %7749 = vmatpush1.bf16.msra.mxu1 %v9491_v17  ;;  %v9578_v17 = vld [vmem:[%s11275_s25 + $0xae0] ss:$8 sps:$4 sm:$0xff]   ;;  %v9583_v18 = vld [vmem:[%s11275_s25 + $0x2f4] ss:$8 sps:$4 sm:$0xff]  }
 0x1a5   : > { %8093 = vmatpush1.bf16.msra.mxu0 %v9494_v19  ;;  %7750 = vmatprep.subr.bf16.mxu1 %v9499_v20  ;;  %v9586_v19 = vld [vmem:[%s11275_s25 + $0xaf4] ss:$8 sps:$4 sm:$0xff]   ;;  %v9581_v20 = vld [vmem:[%s11275_s25 + $0x2f0] ss:$8 sps:$4 sm:$0xff]  }
 0x1a6   : > { %8094 = vmatprep.subr.bf16.mxu0 %v9502_v21  ;;  %7780 = vmatprep.mubr.bf16.mxu1 %v8610_v28  ;;  %v9584_v21 = vld [vmem:[%s11275_s25 + $0xaf0] ss:$8 sps:$4 sm:$0xff]  }
 0x1a7   : > { %8124 = vmatprep.mubr.bf16.mxu0 %v8626_v31  ;;  %v11521_v28 = vld [vmem:[%s11326_s5 + $0x18] sm:$0xff] }
 0x1a8   : > { %7751 = vmatpush1.bf16.msra.mxu1 %v9497_v22  ;;  %v9589_v22 = vld [vmem:[%s11275_s25 + $0x304] ss:$8 sps:$4 sm:$0xff]   ;;  %v11524_v31 = vld [vmem:[%s11326_s5 + $0x98] sm:$0xff] }
 0x1a9   : > { %8095 = vmatpush1.bf16.msra.mxu0 %v9500_v23  ;;  %7752 = vmatprep.subr.bf16.mxu1 %v9505_v26  ;;  %v9592_v23 = vld [vmem:[%s11275_s25 + $0xb04] ss:$8 sps:$4 sm:$0xff]   ;;  %v9587_v26 = vld [vmem:[%s11275_s25 + $0x300] ss:$8 sps:$4 sm:$0xff]  }
 0x1aa   : > { %8096 = vmatprep.subr.bf16.mxu0 %v9508_v27  ;;  %v9590_v27 = vld [vmem:[%s11275_s25 + $0xb00] ss:$8 sps:$4 sm:$0xff]  }
 0x1ac   : > { %7753 = vmatpush1.bf16.msra.mxu1 %v9503_v32  ;;  %v8609_v32 = vcombine.low %v11445_v24, %v11448_v25  ;;  %v8612_v24 = vcombine.high %v11521_v28, %v11524_v31 }
 0x1ad   : > { %8097 = vmatpush1.bf16.msra.mxu0 %v9506_v33  ;;  %7754 = vmatprep.subr.bf16.mxu1 %v9511_v34  ;;  %v8625_v33 = vcombine.low %v11455_v29, %v11458_v30  ;;  %v11531_v34 = vld [vmem:[%s11326_s5 + $0x58] sm:$0xff] }
 0x1ae   : > { %8098 = vmatprep.subr.bf16.mxu0 %v9514_v35  ;;  %v11534_v35 = vld [vmem:[%s11326_s5 + $0xd8] sm:$0xff] }
 0x1af   : > { %v8628_v25 = vcombine.high %v11531_v34, %v11534_v35  ;;  %v9593_v29 = vld [vmem:[%s11275_s25 + $0x310] ss:$8 sps:$4 sm:$0xff]  }
 0x1b0   : > { %7755 = vmatpush1.bf16.msra.mxu1 %v9509_v36  ;;  %v9595_v36 = vld [vmem:[%s11275_s25 + $0x314] ss:$8 sps:$4 sm:$0xff]   ;;  %v9596_v30 = vld [vmem:[%s11275_s25 + $0xb10] ss:$8 sps:$4 sm:$0xff]  }
 0x1b1   : > { %8099 = vmatpush1.bf16.msra.mxu0 %v9512_v37  ;;  %7756 = vmatprep.subr.bf16.mxu1 %v9517_v38  ;;  %v9598_v37 = vld [vmem:[%s11275_s25 + $0xb14] ss:$8 sps:$4 sm:$0xff]   ;;  %v9601_v38 = vld [vmem:[%s11275_s25 + $0x324] ss:$8 sps:$4 sm:$0xff]  }
 0x1b2   : > { %8100 = vmatprep.subr.bf16.mxu0 %v9520_v39  ;;  %v9604_v39 = vld [vmem:[%s11275_s25 + $0xb24] ss:$8 sps:$4 sm:$0xff]  }
 0x1b4   : > { %7757 = vmatpush1.bf16.msra.mxu1 %v9515_v40  ;;  %v9599_v40 = vld [vmem:[%s11275_s25 + $0x320] ss:$8 sps:$4 sm:$0xff]  }
 0x1b5   : > { %8101 = vmatpush1.bf16.msra.mxu0 %v9518_v41  ;;  %7758 = vmatprep.subr.bf16.mxu1 %v9523_v42  ;;  %v9602_v41 = vld [vmem:[%s11275_s25 + $0xb20] ss:$8 sps:$4 sm:$0xff]   ;;  %v9607_v42 = vld [vmem:[%s11275_s25 + $0x334] ss:$8 sps:$4 sm:$0xff]  }
 0x1b6   : > { %8102 = vmatprep.subr.bf16.mxu0 %v9526_v43  ;;  %v9610_v43 = vld [vmem:[%s11275_s25 + $0xb34] ss:$8 sps:$4 sm:$0xff]  }
 0x1b8   : > { %7759 = vmatpush1.bf16.msra.mxu1 %v9521_v44  ;;  %v9605_v44 = vld [vmem:[%s11275_s25 + $0x330] ss:$8 sps:$4 sm:$0xff]  }
 0x1b9   : > { %8103 = vmatpush1.bf16.msra.mxu0 %v9524_v45  ;;  %7760 = vmatprep.subr.bf16.mxu1 %v9529_v46  ;;  %v9608_v45 = vld [vmem:[%s11275_s25 + $0xb30] ss:$8 sps:$4 sm:$0xff]   ;;  %v9613_v46 = vld [vmem:[%s11275_s25 + $0x344] ss:$8 sps:$4 sm:$0xff]  }
 0x1ba   : > { %8104 = vmatprep.subr.bf16.mxu0 %v9532_v47  ;;  %v9616_v47 = vld [vmem:[%s11275_s25 + $0xb44] ss:$8 sps:$4 sm:$0xff]  }
 0x1bc   : > { %7761 = vmatpush1.bf16.msra.mxu1 %v9527_v48  ;;  %v9611_v48 = vld [vmem:[%s11275_s25 + $0x340] ss:$8 sps:$4 sm:$0xff]  }
 0x1bd   : > { %8105 = vmatpush1.bf16.msra.mxu0 %v9530_v49  ;;  %7762 = vmatprep.subr.bf16.mxu1 %v9535_v50  ;;  %v9614_v49 = vld [vmem:[%s11275_s25 + $0xb40] ss:$8 sps:$4 sm:$0xff]   ;;  %v9619_v50 = vld [vmem:[%s11275_s25 + $0x354] ss:$8 sps:$4 sm:$0xff]  }
 0x1be   : > { %8106 = vmatprep.subr.bf16.mxu0 %v9538_v51  ;;  %v9622_v51 = vld [vmem:[%s11275_s25 + $0xb54] ss:$8 sps:$4 sm:$0xff]  }
 0x1c0   : > { %7763 = vmatpush1.bf16.msra.mxu1 %v9533_v52  ;;  %v9617_v52 = vld [vmem:[%s11275_s25 + $0x350] ss:$8 sps:$4 sm:$0xff]  }
 0x1c1   : > { %8107 = vmatpush1.bf16.msra.mxu0 %v9536_v53  ;;  %7764 = vmatprep.subr.bf16.mxu1 %v9541_v54  ;;  %v9620_v53 = vld [vmem:[%s11275_s25 + $0xb50] ss:$8 sps:$4 sm:$0xff]   ;;  %v9625_v54 = vld [vmem:[%s11275_s25 + $0x364] ss:$8 sps:$4 sm:$0xff]  }
 0x1c2   : > { %8108 = vmatprep.subr.bf16.mxu0 %v9544_v55  ;;  %v9628_v55 = vld [vmem:[%s11275_s25 + $0xb64] ss:$8 sps:$4 sm:$0xff]  }
 0x1c4   : > { %7765 = vmatpush1.bf16.msra.mxu1 %v9539_v56  ;;  %v9623_v56 = vld [vmem:[%s11275_s25 + $0x360] ss:$8 sps:$4 sm:$0xff]  }
 0x1c5   : > { %8109 = vmatpush1.bf16.msra.mxu0 %v9542_v57  ;;  %7766 = vmatprep.subr.bf16.mxu1 %v9547_v58  ;;  %v9626_v57 = vld [vmem:[%s11275_s25 + $0xb60] ss:$8 sps:$4 sm:$0xff]   ;;  %v9631_v58 = vld [vmem:[%s11275_s25 + $0x374] ss:$8 sps:$4 sm:$0xff]  }
 0x1c6   : > { %8110 = vmatprep.subr.bf16.mxu0 %v9550_v59  ;;  %v9634_v59 = vld [vmem:[%s11275_s25 + $0xb74] ss:$8 sps:$4 sm:$0xff]  }
 0x1c8   : > { %7767 = vmatpush1.bf16.msra.mxu1 %v9545_v60  ;;  %v9629_v60 = vld [vmem:[%s11275_s25 + $0x370] ss:$8 sps:$4 sm:$0xff]  }
 0x1c9   : > { %8111 = vmatpush1.bf16.msra.mxu0 %v9548_v61  ;;  %7768 = vmatprep.subr.bf16.mxu1 %v9553_v62  ;;  %v9632_v61 = vld [vmem:[%s11275_s25 + $0xb70] ss:$8 sps:$4 sm:$0xff]   ;;  %v9637_v62 = vld [vmem:[%s11275_s25 + $0x384] ss:$8 sps:$4 sm:$0xff]  }
 0x1ca   : > { %8112 = vmatprep.subr.bf16.mxu0 %v9556_v63  ;;  %v9640_v63 = vld [vmem:[%s11275_s25 + $0xb84] ss:$8 sps:$4 sm:$0xff]  }
 0x1cc   : > { %7769 = vmatpush1.bf16.msra.mxu1 %v9551_v0  ;;  %v9635_v0 = vld [vmem:[%s11275_s25 + $0x380] ss:$8 sps:$4 sm:$0xff]  }
 0x1cd   : > { %8113 = vmatpush1.bf16.msra.mxu0 %v9554_v1  ;;  %7770 = vmatprep.subr.bf16.mxu1 %v9559_v2  ;;  %v9638_v1 = vld [vmem:[%s11275_s25 + $0xb80] ss:$8 sps:$4 sm:$0xff]   ;;  %v9643_v2 = vld [vmem:[%s11275_s25 + $0x394] ss:$8 sps:$4 sm:$0xff]  }
 0x1ce   : > { %8114 = vmatprep.subr.bf16.mxu0 %v9562_v3  ;;  %v9646_v3 = vld [vmem:[%s11275_s25 + $0xb94] ss:$8 sps:$4 sm:$0xff]  }
 0x1d0   : > { %7771 = vmatpush1.bf16.msra.mxu1 %v9557_v4  ;;  %v9641_v4 = vld [vmem:[%s11275_s25 + $0x390] ss:$8 sps:$4 sm:$0xff]  }
 0x1d1   : > { %8115 = vmatpush1.bf16.msra.mxu0 %v9560_v5  ;;  %7772 = vmatprep.subr.bf16.mxu1 %v9565_v6  ;;  %v9644_v5 = vld [vmem:[%s11275_s25 + $0xb90] ss:$8 sps:$4 sm:$0xff]   ;;  %v9649_v6 = vld [vmem:[%s11275_s25 + $0x3a4] ss:$8 sps:$4 sm:$0xff]  }
 0x1d2   : > { %8116 = vmatprep.subr.bf16.mxu0 %v9568_v7  ;;  %v9652_v7 = vld [vmem:[%s11275_s25 + $0xba4] ss:$8 sps:$4 sm:$0xff]  }
 0x1d4   : > { %7773 = vmatpush1.bf16.msra.mxu1 %v9563_v8  ;;  %v9647_v8 = vld [vmem:[%s11275_s25 + $0x3a0] ss:$8 sps:$4 sm:$0xff]  }
 0x1d5   : > { %8117 = vmatpush1.bf16.msra.mxu0 %v9566_v9  ;;  %7774 = vmatprep.subr.bf16.mxu1 %v9571_v10  ;;  %v9650_v9 = vld [vmem:[%s11275_s25 + $0xba0] ss:$8 sps:$4 sm:$0xff]   ;;  %v9655_v10 = vld [vmem:[%s11275_s25 + $0x3b4] ss:$8 sps:$4 sm:$0xff]  }
 0x1d6   : > { %8118 = vmatprep.subr.bf16.mxu0 %v9574_v11  ;;  %v9658_v11 = vld [vmem:[%s11275_s25 + $0xbb4] ss:$8 sps:$4 sm:$0xff]  }
 0x1d8   : > { %7775 = vmatpush1.bf16.msra.mxu1 %v9569_v12  ;;  %v9653_v12 = vld [vmem:[%s11275_s25 + $0x3b0] ss:$8 sps:$4 sm:$0xff]  }
 0x1d9   : > { %8119 = vmatpush1.bf16.msra.mxu0 %v9572_v13  ;;  %7776 = vmatprep.subr.bf16.mxu1 %v9577_v14  ;;  %v9656_v13 = vld [vmem:[%s11275_s25 + $0xbb0] ss:$8 sps:$4 sm:$0xff]   ;;  %v9661_v14 = vld [vmem:[%s11275_s25 + $0x3c4] ss:$8 sps:$4 sm:$0xff]  }
 0x1da   : > { %8120 = vmatprep.subr.bf16.mxu0 %v9580_v15  ;;  %v9664_v15 = vld [vmem:[%s11275_s25 + $0xbc4] ss:$8 sps:$4 sm:$0xff]  }
 0x1dc   : > { %7777 = vmatpush1.bf16.msra.mxu1 %v9575_v16  ;;  %v9659_v16 = vld [vmem:[%s11275_s25 + $0x3c0] ss:$8 sps:$4 sm:$0xff]  }
 0x1dd   : > { %8121 = vmatpush1.bf16.msra.mxu0 %v9578_v17  ;;  %7778 = vmatprep.subr.bf16.mxu1 %v9583_v18  ;;  %v9662_v17 = vld [vmem:[%s11275_s25 + $0xbc0] ss:$8 sps:$4 sm:$0xff]   ;;  %v9667_v18 = vld [vmem:[%s11275_s25 + $0x3d4] ss:$8 sps:$4 sm:$0xff]  }
 0x1de   : > { %8122 = vmatprep.subr.bf16.mxu0 %v9586_v19  ;;  %v9670_v19 = vld [vmem:[%s11275_s25 + $0xbd4] ss:$8 sps:$4 sm:$0xff]  }
 0x1e0   : > { %7779 = vmatpush1.bf16.msra.mxu1 %v9581_v20  ;;  %v9665_v20 = vld [vmem:[%s11275_s25 + $0x3d0] ss:$8 sps:$4 sm:$0xff]  }
 0x1e1   : > { %8123 = vmatpush1.bf16.msra.mxu0 %v9584_v21  ;;  %7791 = vmatprep.subr.bf16.mxu1 %v9589_v22  ;;  %v9668_v21 = vld [vmem:[%s11275_s25 + $0xbd0] ss:$8 sps:$4 sm:$0xff]   ;;  %v9673_v22 = vld [vmem:[%s11275_s25 + $0x3e4] ss:$8 sps:$4 sm:$0xff]  }
 0x1e2   : > { %8135 = vmatprep.subr.bf16.mxu0 %v9592_v23  ;;  %v9676_v23 = vld [vmem:[%s11275_s25 + $0xbe4] ss:$8 sps:$4 sm:$0xff]  }
 0x1e3   : > { %7781 = vmatmul.mubr.bf16.vlgmr.msra.gmra.mrb[0].mxu1 %v8609_v32  ;;  %v9679_v32 = vld [vmem:[%s11275_s25 + $0x3f4] ss:$8 sps:$4 sm:$0xff]  }
 0x1e4   : > { %8125 = vmatmul.mubr.bf16.vlgmr.msra.gmra.mrb[0].mxu0 %v8625_v33  ;;  %7792 = vmatpush1.bf16.msra.mxu1 %v9587_v26  ;;  %v9671_v26 = vld [vmem:[%s11275_s25 + $0x3e0] ss:$8 sps:$4 sm:$0xff]   ;;  %v9682_v33 = vld [vmem:[%s11275_s25 + $0xbf4] ss:$8 sps:$4 sm:$0xff]  }
 0x1e5   : > { %8136 = vmatpush1.bf16.msra.mxu0 %v9590_v27  ;;  %7793 = vmatprep.subr.bf16.mxu1 %v9595_v36  ;;  %v9674_v27 = vld [vmem:[%s11275_s25 + $0xbe0] ss:$8 sps:$4 sm:$0xff]   ;;  %v9677_v36 = vld [vmem:[%s11275_s25 + $0x3f0] ss:$8 sps:$4 sm:$0xff]  }
 0x1e6   : > { %8137 = vmatprep.subr.bf16.mxu0 %v9598_v37  ;;  %7823 = vmatprep.mubr.bf16.mxu1 %v8612_v24  ;;  %v9680_v37 = vld [vmem:[%s11275_s25 + $0xbf0] ss:$8 sps:$4 sm:$0xff]   ;;  %v9685_v24 = vld [vmem:[%s11275_s25 + $0x404] ss:$8 sps:$4 sm:$0xff]  }
 0x1e7   : > { %8167 = vmatprep.mubr.bf16.mxu0 %v8628_v25  ;;  %v9688_v25 = vld [vmem:[%s11275_s25 + $0xc04] ss:$8 sps:$4 sm:$0xff]  }
 0x1e8   : > { %7794 = vmatpush1.bf16.msra.mxu1 %v9593_v29  ;;  %v9683_v29 = vld [vmem:[%s11275_s25 + $0x400] ss:$8 sps:$4 sm:$0xff]  }
 0x1e9   : > { %8138 = vmatpush1.bf16.msra.mxu0 %v9596_v30  ;;  %7795 = vmatprep.subr.bf16.mxu1 %v9601_v38  ;;  %v9686_v30 = vld [vmem:[%s11275_s25 + $0xc00] ss:$8 sps:$4 sm:$0xff]  }
 0x1ea   : > { %8139 = vmatprep.subr.bf16.mxu0 %v9604_v39  ;;  %v11605_v38 = vld [vmem:[%s11326_s5 + $0x20] sm:$0xff] }
 0x1eb   : > { %v11608_v39 = vld [vmem:[%s11326_s5 + $0xa0] sm:$0xff] }
 0x1ec   : > { %7796 = vmatpush1.bf16.msra.mxu1 %v9599_v40  ;;  %v8611_v40 = vcombine.low %v11521_v28, %v11524_v31  ;;  %v9689_v31 = vld [vmem:[%s11275_s25 + $0x410] ss:$8 sps:$4 sm:$0xff]  }
 0x1ed   : > { %8140 = vmatpush1.bf16.msra.mxu0 %v9602_v41  ;;  %7797 = vmatprep.subr.bf16.mxu1 %v9607_v42  ;;  %v8627_v41 = vcombine.low %v11531_v34, %v11534_v35  ;;  %v11615_v42 = vld [vmem:[%s11326_s5 + $0x60] sm:$0xff]  ;;  %v9692_v34 = vld [vmem:[%s11275_s25 + $0xc10] ss:$8 sps:$4 sm:$0xff]  }
 0x1ee   : > { %8141 = vmatprep.subr.bf16.mxu0 %v9610_v43  ;;  %v11618_v43 = vld [vmem:[%s11326_s5 + $0xe0] sm:$0xff] }
 0x1ef   : > { %v8630_v28 = vcombine.high %v11615_v42, %v11618_v43  ;;  %v9697_v35 = vld [vmem:[%s11275_s25 + $0x424] ss:$8 sps:$4 sm:$0xff]  }
 0x1f0   : > { %7798 = vmatpush1.bf16.msra.mxu1 %v9605_v44  ;;  %v9691_v44 = vld [vmem:[%s11275_s25 + $0x414] ss:$8 sps:$4 sm:$0xff]  }
 0x1f1   : > { %8142 = vmatpush1.bf16.msra.mxu0 %v9608_v45  ;;  %7799 = vmatprep.subr.bf16.mxu1 %v9613_v46  ;;  %v9694_v45 = vld [vmem:[%s11275_s25 + $0xc14] ss:$8 sps:$4 sm:$0xff]   ;;  %v8614_v46 = vcombine.high %v11605_v38, %v11608_v39 }
 0x1f2   : > { %8143 = vmatprep.subr.bf16.mxu0 %v9616_v47  ;;  %v9700_v47 = vld [vmem:[%s11275_s25 + $0xc24] ss:$8 sps:$4 sm:$0xff]  }
 0x1f4   : > { %7800 = vmatpush1.bf16.msra.mxu1 %v9611_v48  ;;  %v9695_v48 = vld [vmem:[%s11275_s25 + $0x420] ss:$8 sps:$4 sm:$0xff]  }
 0x1f5   : > { %8144 = vmatpush1.bf16.msra.mxu0 %v9614_v49  ;;  %7801 = vmatprep.subr.bf16.mxu1 %v9619_v50  ;;  %v9698_v49 = vld [vmem:[%s11275_s25 + $0xc20] ss:$8 sps:$4 sm:$0xff]   ;;  %v9703_v50 = vld [vmem:[%s11275_s25 + $0x434] ss:$8 sps:$4 sm:$0xff]  }
 0x1f6   : > { %8145 = vmatprep.subr.bf16.mxu0 %v9622_v51  ;;  %v9706_v51 = vld [vmem:[%s11275_s25 + $0xc34] ss:$8 sps:$4 sm:$0xff]  }
 0x1f8   : > { %7802 = vmatpush1.bf16.msra.mxu1 %v9617_v52  ;;  %v9701_v52 = vld [vmem:[%s11275_s25 + $0x430] ss:$8 sps:$4 sm:$0xff]  }
 0x1f9   : > { %8146 = vmatpush1.bf16.msra.mxu0 %v9620_v53  ;;  %7803 = vmatprep.subr.bf16.mxu1 %v9625_v54  ;;  %v9704_v53 = vld [vmem:[%s11275_s25 + $0xc30] ss:$8 sps:$4 sm:$0xff]   ;;  %v9709_v54 = vld [vmem:[%s11275_s25 + $0x444] ss:$8 sps:$4 sm:$0xff]  }
 0x1fa   : > { %8147 = vmatprep.subr.bf16.mxu0 %v9628_v55  ;;  %v9712_v55 = vld [vmem:[%s11275_s25 + $0xc44] ss:$8 sps:$4 sm:$0xff]  }
 0x1fc   : > { %7804 = vmatpush1.bf16.msra.mxu1 %v9623_v56  ;;  %v9707_v56 = vld [vmem:[%s11275_s25 + $0x440] ss:$8 sps:$4 sm:$0xff]  }
 0x1fd   : > { %8148 = vmatpush1.bf16.msra.mxu0 %v9626_v57  ;;  %7805 = vmatprep.subr.bf16.mxu1 %v9631_v58  ;;  %v9710_v57 = vld [vmem:[%s11275_s25 + $0xc40] ss:$8 sps:$4 sm:$0xff]   ;;  %v9715_v58 = vld [vmem:[%s11275_s25 + $0x454] ss:$8 sps:$4 sm:$0xff]  }
 0x1fe   : > { %8149 = vmatprep.subr.bf16.mxu0 %v9634_v59  ;;  %v9718_v59 = vld [vmem:[%s11275_s25 + $0xc54] ss:$8 sps:$4 sm:$0xff]  }
 0x200   : > { %7806 = vmatpush1.bf16.msra.mxu1 %v9629_v60  ;;  %v9713_v60 = vld [vmem:[%s11275_s25 + $0x450] ss:$8 sps:$4 sm:$0xff]  }
 0x201   : > { %8150 = vmatpush1.bf16.msra.mxu0 %v9632_v61  ;;  %7807 = vmatprep.subr.bf16.mxu1 %v9637_v62  ;;  %v9716_v61 = vld [vmem:[%s11275_s25 + $0xc50] ss:$8 sps:$4 sm:$0xff]   ;;  %v9721_v62 = vld [vmem:[%s11275_s25 + $0x464] ss:$8 sps:$4 sm:$0xff]  }
 0x202   : > { %8151 = vmatprep.subr.bf16.mxu0 %v9640_v63  ;;  %v9724_v63 = vld [vmem:[%s11275_s25 + $0xc64] ss:$8 sps:$4 sm:$0xff]  }
 0x204   : > { %7808 = vmatpush1.bf16.msra.mxu1 %v9635_v0  ;;  %v9719_v0 = vld [vmem:[%s11275_s25 + $0x460] ss:$8 sps:$4 sm:$0xff]  }
 0x205   : > { %8152 = vmatpush1.bf16.msra.mxu0 %v9638_v1  ;;  %7809 = vmatprep.subr.bf16.mxu1 %v9643_v2  ;;  %v9722_v1 = vld [vmem:[%s11275_s25 + $0xc60] ss:$8 sps:$4 sm:$0xff]   ;;  %v9727_v2 = vld [vmem:[%s11275_s25 + $0x474] ss:$8 sps:$4 sm:$0xff]  }
 0x206   : > { %8153 = vmatprep.subr.bf16.mxu0 %v9646_v3  ;;  %v9730_v3 = vld [vmem:[%s11275_s25 + $0xc74] ss:$8 sps:$4 sm:$0xff]  }
 0x208   : > { %7810 = vmatpush1.bf16.msra.mxu1 %v9641_v4  ;;  %v9725_v4 = vld [vmem:[%s11275_s25 + $0x470] ss:$8 sps:$4 sm:$0xff]  }
 0x209   : > { %8154 = vmatpush1.bf16.msra.mxu0 %v9644_v5  ;;  %7811 = vmatprep.subr.bf16.mxu1 %v9649_v6  ;;  %v9728_v5 = vld [vmem:[%s11275_s25 + $0xc70] ss:$8 sps:$4 sm:$0xff]   ;;  %v9733_v6 = vld [vmem:[%s11275_s25 + $0x484] ss:$8 sps:$4 sm:$0xff]  }
 0x20a   : > { %8155 = vmatprep.subr.bf16.mxu0 %v9652_v7  ;;  %v9736_v7 = vld [vmem:[%s11275_s25 + $0xc84] ss:$8 sps:$4 sm:$0xff]  }
 0x20c   : > { %7812 = vmatpush1.bf16.msra.mxu1 %v9647_v8  ;;  %v9731_v8 = vld [vmem:[%s11275_s25 + $0x480] ss:$8 sps:$4 sm:$0xff]  }
 0x20d   : > { %8156 = vmatpush1.bf16.msra.mxu0 %v9650_v9  ;;  %7813 = vmatprep.subr.bf16.mxu1 %v9655_v10  ;;  %v9734_v9 = vld [vmem:[%s11275_s25 + $0xc80] ss:$8 sps:$4 sm:$0xff]   ;;  %v9739_v10 = vld [vmem:[%s11275_s25 + $0x494] ss:$8 sps:$4 sm:$0xff]  }
 0x20e   : > { %8157 = vmatprep.subr.bf16.mxu0 %v9658_v11  ;;  %v9742_v11 = vld [vmem:[%s11275_s25 + $0xc94] ss:$8 sps:$4 sm:$0xff]  }
 0x210   : > { %7814 = vmatpush1.bf16.msra.mxu1 %v9653_v12  ;;  %v9737_v12 = vld [vmem:[%s11275_s25 + $0x490] ss:$8 sps:$4 sm:$0xff]  }
 0x211   : > { %8158 = vmatpush1.bf16.msra.mxu0 %v9656_v13  ;;  %7815 = vmatprep.subr.bf16.mxu1 %v9661_v14  ;;  %v9740_v13 = vld [vmem:[%s11275_s25 + $0xc90] ss:$8 sps:$4 sm:$0xff]   ;;  %v9745_v14 = vld [vmem:[%s11275_s25 + $0x4a4] ss:$8 sps:$4 sm:$0xff]  }
 0x212   : > { %8159 = vmatprep.subr.bf16.mxu0 %v9664_v15  ;;  %v9748_v15 = vld [vmem:[%s11275_s25 + $0xca4] ss:$8 sps:$4 sm:$0xff]  }
 0x214   : > { %7816 = vmatpush1.bf16.msra.mxu1 %v9659_v16  ;;  %v9743_v16 = vld [vmem:[%s11275_s25 + $0x4a0] ss:$8 sps:$4 sm:$0xff]  }
 0x215   : > { %8160 = vmatpush1.bf16.msra.mxu0 %v9662_v17  ;;  %7817 = vmatprep.subr.bf16.mxu1 %v9667_v18  ;;  %v9746_v17 = vld [vmem:[%s11275_s25 + $0xca0] ss:$8 sps:$4 sm:$0xff]   ;;  %v9751_v18 = vld [vmem:[%s11275_s25 + $0x4b4] ss:$8 sps:$4 sm:$0xff]  }
 0x216   : > { %8161 = vmatprep.subr.bf16.mxu0 %v9670_v19  ;;  %v9754_v19 = vld [vmem:[%s11275_s25 + $0xcb4] ss:$8 sps:$4 sm:$0xff]  }
 0x218   : > { %7818 = vmatpush1.bf16.msra.mxu1 %v9665_v20  ;;  %v9749_v20 = vld [vmem:[%s11275_s25 + $0x4b0] ss:$8 sps:$4 sm:$0xff]  }
 0x219   : > { %8162 = vmatpush1.bf16.msra.mxu0 %v9668_v21  ;;  %7819 = vmatprep.subr.bf16.mxu1 %v9673_v22  ;;  %v9752_v21 = vld [vmem:[%s11275_s25 + $0xcb0] ss:$8 sps:$4 sm:$0xff]   ;;  %v9757_v22 = vld [vmem:[%s11275_s25 + $0x4c4] ss:$8 sps:$4 sm:$0xff]  }
 0x21a   : > { %8163 = vmatprep.subr.bf16.mxu0 %v9676_v23  ;;  %v9760_v23 = vld [vmem:[%s11275_s25 + $0xcc4] ss:$8 sps:$4 sm:$0xff]  }
 0x21c   : > { %7820 = vmatpush1.bf16.msra.mxu1 %v9671_v26  ;;  %v9755_v26 = vld [vmem:[%s11275_s25 + $0x4c0] ss:$8 sps:$4 sm:$0xff]  }
 0x21d   : > { %8164 = vmatpush1.bf16.msra.mxu0 %v9674_v27  ;;  %7821 = vmatprep.subr.bf16.mxu1 %v9679_v32  ;;  %v9758_v27 = vld [vmem:[%s11275_s25 + $0xcc0] ss:$8 sps:$4 sm:$0xff]   ;;  %v9763_v32 = vld [vmem:[%s11275_s25 + $0x4d4] ss:$8 sps:$4 sm:$0xff]  }
 0x21e   : > { %8165 = vmatprep.subr.bf16.mxu0 %v9682_v33  ;;  %v9766_v33 = vld [vmem:[%s11275_s25 + $0xcd4] ss:$8 sps:$4 sm:$0xff]  }
 0x220   : > { %7822 = vmatpush1.bf16.msra.mxu1 %v9677_v36  ;;  %v9761_v36 = vld [vmem:[%s11275_s25 + $0x4d0] ss:$8 sps:$4 sm:$0xff]  }
 0x221   : > { %8166 = vmatpush1.bf16.msra.mxu0 %v9680_v37  ;;  %7834 = vmatprep.subr.bf16.mxu1 %v9685_v24  ;;  %v9764_v37 = vld [vmem:[%s11275_s25 + $0xcd0] ss:$8 sps:$4 sm:$0xff]   ;;  %v9769_v24 = vld [vmem:[%s11275_s25 + $0x4e4] ss:$8 sps:$4 sm:$0xff]  }
 0x222   : > { %8178 = vmatprep.subr.bf16.mxu0 %v9688_v25  ;;  %v9772_v25 = vld [vmem:[%s11275_s25 + $0xce4] ss:$8 sps:$4 sm:$0xff]  }
 0x223   : > { %7824 = vmatmul.mubr.bf16.vlgmr.msra.gmra.mrb[0].mxu1 %v8611_v40  ;;  %v9775_v40 = vld [vmem:[%s11275_s25 + $0x4f4] ss:$8 sps:$4 sm:$0xff]  }
 0x224   : > { %8168 = vmatmul.mubr.bf16.vlgmr.msra.gmra.mrb[0].mxu0 %v8627_v41  ;;  %7835 = vmatpush1.bf16.msra.mxu1 %v9683_v29  ;;  %v9767_v29 = vld [vmem:[%s11275_s25 + $0x4e0] ss:$8 sps:$4 sm:$0xff]   ;;  %v9778_v41 = vld [vmem:[%s11275_s25 + $0xcf4] ss:$8 sps:$4 sm:$0xff]  }
 0x225   : > { %8179 = vmatpush1.bf16.msra.mxu0 %v9686_v30  ;;  %7836 = vmatprep.subr.bf16.mxu1 %v9691_v44  ;;  %v9770_v30 = vld [vmem:[%s11275_s25 + $0xce0] ss:$8 sps:$4 sm:$0xff]   ;;  %v9773_v44 = vld [vmem:[%s11275_s25 + $0x4f0] ss:$8 sps:$4 sm:$0xff]  }
 0x226   : > { %8180 = vmatprep.subr.bf16.mxu0 %v9694_v45  ;;  %7866 = vmatprep.mubr.bf16.mxu1 %v8614_v46  ;;  %v9776_v45 = vld [vmem:[%s11275_s25 + $0xcf0] ss:$8 sps:$4 sm:$0xff]   ;;  %v9781_v46 = vld [vmem:[%s11275_s25 + $0x504] ss:$8 sps:$4 sm:$0xff]  }
 0x227   : > { %8210 = vmatprep.mubr.bf16.mxu0 %v8630_v28  ;;  %v9784_v28 = vld [vmem:[%s11275_s25 + $0xd04] ss:$8 sps:$4 sm:$0xff]  }
 0x228   : > { %7837 = vmatpush1.bf16.msra.mxu1 %v9689_v31  ;;  %v11687_v31 = vld [vmem:[%s11326_s5 + $0x28] sm:$0xff] }
 0x229   : > { %8181 = vmatpush1.bf16.msra.mxu0 %v9692_v34  ;;  %7838 = vmatprep.subr.bf16.mxu1 %v9697_v35  ;;  %v11690_v34 = vld [vmem:[%s11326_s5 + $0xa8] sm:$0xff] }
 0x22a   : > { %8182 = vmatprep.subr.bf16.mxu0 %v9700_v47  ;;  %v11693_v35 = vld [vmem:[%s11326_s5 + $0x68] sm:$0xff] }
 0x22b   : > { %v11696_v47 = vld [vmem:[%s11326_s5 + $0xe8] sm:$0xff] }
 0x22c   : > { %7839 = vmatpush1.bf16.msra.mxu1 %v9695_v48  ;;  %v8613_v48 = vcombine.low %v11605_v38, %v11608_v39  ;;  %v8632_v38 = vcombine.high %v11693_v35, %v11696_v47  ;;  %v9785_v39 = vld [vmem:[%s11275_s25 + $0x510] ss:$8 sps:$4 sm:$0xff]  }
 0x22d   : > { %8183 = vmatpush1.bf16.msra.mxu0 %v9698_v49  ;;  %7840 = vmatprep.subr.bf16.mxu1 %v9703_v50  ;;  %v8629_v49 = vcombine.low %v11615_v42, %v11618_v43  ;;  %v9779_v50 = vld [vmem:[%s11275_s25 + $0x500] ss:$8 sps:$4 sm:$0xff]   ;;  %v9788_v42 = vld [vmem:[%s11275_s25 + $0xd10] ss:$8 sps:$4 sm:$0xff]   ;;  %v9793_v43 = vld [vmem:[%s11275_s25 + $0x524] ss:$8 sps:$4 sm:$0xff]  }
 0x22e   : > { %8184 = vmatprep.subr.bf16.mxu0 %v9706_v51  ;;  %v9782_v51 = vld [vmem:[%s11275_s25 + $0xd00] ss:$8 sps:$4 sm:$0xff]  }
 0x230   : > { %7841 = vmatpush1.bf16.msra.mxu1 %v9701_v52  ;;  %v9787_v52 = vld [vmem:[%s11275_s25 + $0x514] ss:$8 sps:$4 sm:$0xff]  }
 0x231   : > { %8185 = vmatpush1.bf16.msra.mxu0 %v9704_v53  ;;  %7842 = vmatprep.subr.bf16.mxu1 %v9709_v54  ;;  %v9790_v53 = vld [vmem:[%s11275_s25 + $0xd14] ss:$8 sps:$4 sm:$0xff]   ;;  %v8616_v54 = vcombine.high %v11687_v31, %v11690_v34 }
 0x232   : > { %8186 = vmatprep.subr.bf16.mxu0 %v9712_v55  ;;  %v9796_v55 = vld [vmem:[%s11275_s25 + $0xd24] ss:$8 sps:$4 sm:$0xff]  }
 0x234   : > { %7843 = vmatpush1.bf16.msra.mxu1 %v9707_v56  ;;  %v9791_v56 = vld [vmem:[%s11275_s25 + $0x520] ss:$8 sps:$4 sm:$0xff]  }
 0x235   : > { %8187 = vmatpush1.bf16.msra.mxu0 %v9710_v57  ;;  %7844 = vmatprep.subr.bf16.mxu1 %v9715_v58  ;;  %v9794_v57 = vld [vmem:[%s11275_s25 + $0xd20] ss:$8 sps:$4 sm:$0xff]   ;;  %v9799_v58 = vld [vmem:[%s11275_s25 + $0x534] ss:$8 sps:$4 sm:$0xff]  }
 0x236   : > { %8188 = vmatprep.subr.bf16.mxu0 %v9718_v59  ;;  %v9802_v59 = vld [vmem:[%s11275_s25 + $0xd34] ss:$8 sps:$4 sm:$0xff]  }
 0x238   : > { %7845 = vmatpush1.bf16.msra.mxu1 %v9713_v60  ;;  %v9797_v60 = vld [vmem:[%s11275_s25 + $0x530] ss:$8 sps:$4 sm:$0xff]  }
 0x239   : > { %8189 = vmatpush1.bf16.msra.mxu0 %v9716_v61  ;;  %7846 = vmatprep.subr.bf16.mxu1 %v9721_v62  ;;  %v9800_v61 = vld [vmem:[%s11275_s25 + $0xd30] ss:$8 sps:$4 sm:$0xff]   ;;  %v9805_v62 = vld [vmem:[%s11275_s25 + $0x544] ss:$8 sps:$4 sm:$0xff]  }
 0x23a   : > { %8190 = vmatprep.subr.bf16.mxu0 %v9724_v63  ;;  %v9808_v63 = vld [vmem:[%s11275_s25 + $0xd44] ss:$8 sps:$4 sm:$0xff]  }
 0x23c   : > { %7847 = vmatpush1.bf16.msra.mxu1 %v9719_v0  ;;  %v9803_v0 = vld [vmem:[%s11275_s25 + $0x540] ss:$8 sps:$4 sm:$0xff]  }
 0x23d   : > { %8191 = vmatpush1.bf16.msra.mxu0 %v9722_v1  ;;  %7848 = vmatprep.subr.bf16.mxu1 %v9727_v2  ;;  %v9806_v1 = vld [vmem:[%s11275_s25 + $0xd40] ss:$8 sps:$4 sm:$0xff]   ;;  %v9811_v2 = vld [vmem:[%s11275_s25 + $0x554] ss:$8 sps:$4 sm:$0xff]  }
 0x23e   : > { %8192 = vmatprep.subr.bf16.mxu0 %v9730_v3  ;;  %v9814_v3 = vld [vmem:[%s11275_s25 + $0xd54] ss:$8 sps:$4 sm:$0xff]  }
 0x240   : > { %7849 = vmatpush1.bf16.msra.mxu1 %v9725_v4  ;;  %v9809_v4 = vld [vmem:[%s11275_s25 + $0x550] ss:$8 sps:$4 sm:$0xff]  }
 0x241   : > { %8193 = vmatpush1.bf16.msra.mxu0 %v9728_v5  ;;  %7850 = vmatprep.subr.bf16.mxu1 %v9733_v6  ;;  %v9812_v5 = vld [vmem:[%s11275_s25 + $0xd50] ss:$8 sps:$4 sm:$0xff]   ;;  %v9817_v6 = vld [vmem:[%s11275_s25 + $0x564] ss:$8 sps:$4 sm:$0xff]  }
 0x242   : > { %8194 = vmatprep.subr.bf16.mxu0 %v9736_v7  ;;  %v9820_v7 = vld [vmem:[%s11275_s25 + $0xd64] ss:$8 sps:$4 sm:$0xff]  }
 0x244   : > { %7851 = vmatpush1.bf16.msra.mxu1 %v9731_v8  ;;  %v9815_v8 = vld [vmem:[%s11275_s25 + $0x560] ss:$8 sps:$4 sm:$0xff]  }
 0x245   : > { %8195 = vmatpush1.bf16.msra.mxu0 %v9734_v9  ;;  %7852 = vmatprep.subr.bf16.mxu1 %v9739_v10  ;;  %v9818_v9 = vld [vmem:[%s11275_s25 + $0xd60] ss:$8 sps:$4 sm:$0xff]   ;;  %v9823_v10 = vld [vmem:[%s11275_s25 + $0x574] ss:$8 sps:$4 sm:$0xff]  }
 0x246   : > { %8196 = vmatprep.subr.bf16.mxu0 %v9742_v11  ;;  %v9826_v11 = vld [vmem:[%s11275_s25 + $0xd74] ss:$8 sps:$4 sm:$0xff]  }
 0x248   : > { %7853 = vmatpush1.bf16.msra.mxu1 %v9737_v12  ;;  %v9821_v12 = vld [vmem:[%s11275_s25 + $0x570] ss:$8 sps:$4 sm:$0xff]  }
 0x249   : > { %8197 = vmatpush1.bf16.msra.mxu0 %v9740_v13  ;;  %7854 = vmatprep.subr.bf16.mxu1 %v9745_v14  ;;  %v9824_v13 = vld [vmem:[%s11275_s25 + $0xd70] ss:$8 sps:$4 sm:$0xff]   ;;  %v9829_v14 = vld [vmem:[%s11275_s25 + $0x584] ss:$8 sps:$4 sm:$0xff]  }
 0x24a   : > { %8198 = vmatprep.subr.bf16.mxu0 %v9748_v15  ;;  %v9832_v15 = vld [vmem:[%s11275_s25 + $0xd84] ss:$8 sps:$4 sm:$0xff]  }
 0x24c   : > { %7855 = vmatpush1.bf16.msra.mxu1 %v9743_v16  ;;  %v9827_v16 = vld [vmem:[%s11275_s25 + $0x580] ss:$8 sps:$4 sm:$0xff]  }
 0x24d   : > { %8199 = vmatpush1.bf16.msra.mxu0 %v9746_v17  ;;  %7856 = vmatprep.subr.bf16.mxu1 %v9751_v18  ;;  %v9830_v17 = vld [vmem:[%s11275_s25 + $0xd80] ss:$8 sps:$4 sm:$0xff]   ;;  %v9835_v18 = vld [vmem:[%s11275_s25 + $0x594] ss:$8 sps:$4 sm:$0xff]  }
 0x24e   : > { %8200 = vmatprep.subr.bf16.mxu0 %v9754_v19  ;;  %v9838_v19 = vld [vmem:[%s11275_s25 + $0xd94] ss:$8 sps:$4 sm:$0xff]  }
 0x250   : > { %7857 = vmatpush1.bf16.msra.mxu1 %v9749_v20  ;;  %v9833_v20 = vld [vmem:[%s11275_s25 + $0x590] ss:$8 sps:$4 sm:$0xff]  }
 0x251   : > { %8201 = vmatpush1.bf16.msra.mxu0 %v9752_v21  ;;  %7858 = vmatprep.subr.bf16.mxu1 %v9757_v22  ;;  %v9836_v21 = vld [vmem:[%s11275_s25 + $0xd90] ss:$8 sps:$4 sm:$0xff]   ;;  %v9841_v22 = vld [vmem:[%s11275_s25 + $0x5a4] ss:$8 sps:$4 sm:$0xff]  }
 0x252   : > { %8202 = vmatprep.subr.bf16.mxu0 %v9760_v23  ;;  %v9844_v23 = vld [vmem:[%s11275_s25 + $0xda4] ss:$8 sps:$4 sm:$0xff]  }
 0x254   : > { %7859 = vmatpush1.bf16.msra.mxu1 %v9755_v26  ;;  %v9839_v26 = vld [vmem:[%s11275_s25 + $0x5a0] ss:$8 sps:$4 sm:$0xff]  }
 0x255   : > { %8203 = vmatpush1.bf16.msra.mxu0 %v9758_v27  ;;  %7860 = vmatprep.subr.bf16.mxu1 %v9763_v32  ;;  %v9842_v27 = vld [vmem:[%s11275_s25 + $0xda0] ss:$8 sps:$4 sm:$0xff]   ;;  %v9847_v32 = vld [vmem:[%s11275_s25 + $0x5b4] ss:$8 sps:$4 sm:$0xff]  }
 0x256   : > { %8204 = vmatprep.subr.bf16.mxu0 %v9766_v33  ;;  %v9850_v33 = vld [vmem:[%s11275_s25 + $0xdb4] ss:$8 sps:$4 sm:$0xff]  }
 0x258   : > { %7861 = vmatpush1.bf16.msra.mxu1 %v9761_v36  ;;  %v9845_v36 = vld [vmem:[%s11275_s25 + $0x5b0] ss:$8 sps:$4 sm:$0xff]  }
 0x259   : > { %8205 = vmatpush1.bf16.msra.mxu0 %v9764_v37  ;;  %7862 = vmatprep.subr.bf16.mxu1 %v9769_v24  ;;  %v9848_v37 = vld [vmem:[%s11275_s25 + $0xdb0] ss:$8 sps:$4 sm:$0xff]   ;;  %v9853_v24 = vld [vmem:[%s11275_s25 + $0x5c4] ss:$8 sps:$4 sm:$0xff]  }
 0x25a   : > { %8206 = vmatprep.subr.bf16.mxu0 %v9772_v25  ;;  %v9856_v25 = vld [vmem:[%s11275_s25 + $0xdc4] ss:$8 sps:$4 sm:$0xff]  }
 0x25c   : > { %7863 = vmatpush1.bf16.msra.mxu1 %v9767_v29  ;;  %v9851_v29 = vld [vmem:[%s11275_s25 + $0x5c0] ss:$8 sps:$4 sm:$0xff]  }
 0x25d   : > { %8207 = vmatpush1.bf16.msra.mxu0 %v9770_v30  ;;  %7864 = vmatprep.subr.bf16.mxu1 %v9775_v40  ;;  %v9854_v30 = vld [vmem:[%s11275_s25 + $0xdc0] ss:$8 sps:$4 sm:$0xff]   ;;  %v9859_v40 = vld [vmem:[%s11275_s25 + $0x5d4] ss:$8 sps:$4 sm:$0xff]  }
 0x25e   : > { %8208 = vmatprep.subr.bf16.mxu0 %v9778_v41  ;;  %v9862_v41 = vld [vmem:[%s11275_s25 + $0xdd4] ss:$8 sps:$4 sm:$0xff]  }
 0x260   : > { %7865 = vmatpush1.bf16.msra.mxu1 %v9773_v44  ;;  %v9857_v44 = vld [vmem:[%s11275_s25 + $0x5d0] ss:$8 sps:$4 sm:$0xff]  }
 0x261   : > { %8209 = vmatpush1.bf16.msra.mxu0 %v9776_v45  ;;  %7877 = vmatprep.subr.bf16.mxu1 %v9781_v46  ;;  %v9860_v45 = vld [vmem:[%s11275_s25 + $0xdd0] ss:$8 sps:$4 sm:$0xff]   ;;  %v9865_v46 = vld [vmem:[%s11275_s25 + $0x5e4] ss:$8 sps:$4 sm:$0xff]  }
 0x262   : > { %8221 = vmatprep.subr.bf16.mxu0 %v9784_v28  ;;  %v9868_v28 = vld [vmem:[%s11275_s25 + $0xde4] ss:$8 sps:$4 sm:$0xff]  }
 0x263   : > { %7867 = vmatmul.mubr.bf16.vlgmr.msra.gmra.mrb[0].mxu1 %v8613_v48  ;;  %v9863_v48 = vld [vmem:[%s11275_s25 + $0x5e0] ss:$8 sps:$4 sm:$0xff]  }
 0x264   : > { %8211 = vmatmul.mubr.bf16.vlgmr.msra.gmra.mrb[0].mxu0 %v8629_v49  ;;  %7878 = vmatpush1.bf16.msra.mxu1 %v9779_v50  ;;  %v9866_v49 = vld [vmem:[%s11275_s25 + $0xde0] ss:$8 sps:$4 sm:$0xff]   ;;  %v9871_v50 = vld [vmem:[%s11275_s25 + $0x5f4] ss:$8 sps:$4 sm:$0xff]  }
 0x265   : > { %8222 = vmatpush1.bf16.msra.mxu0 %v9782_v51  ;;  %7879 = vmatprep.subr.bf16.mxu1 %v9787_v52  ;;  %v9874_v51 = vld [vmem:[%s11275_s25 + $0xdf4] ss:$8 sps:$4 sm:$0xff]   ;;  %v9869_v52 = vld [vmem:[%s11275_s25 + $0x5f0] ss:$8 sps:$4 sm:$0xff]  }
 0x266   : > { %8223 = vmatprep.subr.bf16.mxu0 %v9790_v53  ;;  %7909 = vmatprep.mubr.bf16.mxu1 %v8616_v54  ;;  %v9872_v53 = vld [vmem:[%s11275_s25 + $0xdf0] ss:$8 sps:$4 sm:$0xff]   ;;  %v9877_v54 = vld [vmem:[%s11275_s25 + $0x604] ss:$8 sps:$4 sm:$0xff]  }
 0x267   : > { %8253 = vmatprep.mubr.bf16.mxu0 %v8632_v38  ;;  %v9880_v38 = vld [vmem:[%s11275_s25 + $0xe04] ss:$8 sps:$4 sm:$0xff]  }
 0x268   : > { %7880 = vmatpush1.bf16.msra.mxu1 %v9785_v39  ;;  %v11771_v39 = vld [vmem:[%s11326_s5 + $0x30] sm:$0xff] }
 0x269   : > { %8224 = vmatpush1.bf16.msra.mxu0 %v9788_v42  ;;  %7881 = vmatprep.subr.bf16.mxu1 %v9793_v43  ;;  %v8615_v42 = vcombine.low %v11687_v31, %v11690_v34  ;;  %v8631_v43 = vcombine.low %v11693_v35, %v11696_v47  ;;  %v9883_v31 = vld [vmem:[%s11275_s25 + $0x614] ss:$8 sps:$4 sm:$0xff]  }
 0x26a   : > { %8225 = vmatprep.subr.bf16.mxu0 %v9796_v55  ;;  %v11778_v55 = vld [vmem:[%s11326_s5 + $0xb0] sm:$0xff] }
 0x26b   : > { %v9886_v34 = vld [vmem:[%s11275_s25 + $0xe14] ss:$8 sps:$4 sm:$0xff]   ;;  %v8618_v35 = vcombine.high %v11771_v39, %v11778_v55 }
 0x26c   : > { %7882 = vmatpush1.bf16.msra.mxu1 %v9791_v56  ;;  %v11781_v56 = vld [vmem:[%s11326_s5 + $0x70] sm:$0xff] }
 0x26d   : > { %8226 = vmatpush1.bf16.msra.mxu0 %v9794_v57  ;;  %7883 = vmatprep.subr.bf16.mxu1 %v9799_v58  ;;  %v11784_v57 = vld [vmem:[%s11326_s5 + $0xf0] sm:$0xff]  ;;  %v9875_v58 = vld [vmem:[%s11275_s25 + $0x600] ss:$8 sps:$4 sm:$0xff]  }
 0x26e   : > { %8227 = vmatprep.subr.bf16.mxu0 %v9802_v59  ;;  %v9878_v59 = vld [vmem:[%s11275_s25 + $0xe00] ss:$8 sps:$4 sm:$0xff]   ;;  %v8634_v47 = vcombine.high %v11781_v56, %v11784_v57 }
 0x270   : > { %7884 = vmatpush1.bf16.msra.mxu1 %v9797_v60  ;;  %v9881_v60 = vld [vmem:[%s11275_s25 + $0x610] ss:$8 sps:$4 sm:$0xff]  }
 0x271   : > { %8228 = vmatpush1.bf16.msra.mxu0 %v9800_v61  ;;  %7885 = vmatprep.subr.bf16.mxu1 %v9805_v62  ;;  %v9884_v61 = vld [vmem:[%s11275_s25 + $0xe10] ss:$8 sps:$4 sm:$0xff]   ;;  %v9889_v62 = vld [vmem:[%s11275_s25 + $0x624] ss:$8 sps:$4 sm:$0xff]  }
 0x272   : > { %8229 = vmatprep.subr.bf16.mxu0 %v9808_v63  ;;  %v9892_v63 = vld [vmem:[%s11275_s25 + $0xe24] ss:$8 sps:$4 sm:$0xff]  }
 0x274   : > { %7886 = vmatpush1.bf16.msra.mxu1 %v9803_v0  ;;  %v9887_v0 = vld [vmem:[%s11275_s25 + $0x620] ss:$8 sps:$4 sm:$0xff]  }
 0x275   : > { %8230 = vmatpush1.bf16.msra.mxu0 %v9806_v1  ;;  %7887 = vmatprep.subr.bf16.mxu1 %v9811_v2  ;;  %v9890_v1 = vld [vmem:[%s11275_s25 + $0xe20] ss:$8 sps:$4 sm:$0xff]   ;;  %v9895_v2 = vld [vmem:[%s11275_s25 + $0x634] ss:$8 sps:$4 sm:$0xff]  }
 0x276   : > { %8231 = vmatprep.subr.bf16.mxu0 %v9814_v3  ;;  %v9898_v3 = vld [vmem:[%s11275_s25 + $0xe34] ss:$8 sps:$4 sm:$0xff]  }
 0x278   : > { %7888 = vmatpush1.bf16.msra.mxu1 %v9809_v4  ;;  %v9893_v4 = vld [vmem:[%s11275_s25 + $0x630] ss:$8 sps:$4 sm:$0xff]  }
 0x279   : > { %8232 = vmatpush1.bf16.msra.mxu0 %v9812_v5  ;;  %7889 = vmatprep.subr.bf16.mxu1 %v9817_v6  ;;  %v9896_v5 = vld [vmem:[%s11275_s25 + $0xe30] ss:$8 sps:$4 sm:$0xff]   ;;  %v9901_v6 = vld [vmem:[%s11275_s25 + $0x644] ss:$8 sps:$4 sm:$0xff]  }
 0x27a   : > { %8233 = vmatprep.subr.bf16.mxu0 %v9820_v7  ;;  %v9904_v7 = vld [vmem:[%s11275_s25 + $0xe44] ss:$8 sps:$4 sm:$0xff]  }
 0x27c   : > { %7890 = vmatpush1.bf16.msra.mxu1 %v9815_v8  ;;  %v9899_v8 = vld [vmem:[%s11275_s25 + $0x640] ss:$8 sps:$4 sm:$0xff]  }
 0x27d   : > { %8234 = vmatpush1.bf16.msra.mxu0 %v9818_v9  ;;  %7891 = vmatprep.subr.bf16.mxu1 %v9823_v10  ;;  %v9902_v9 = vld [vmem:[%s11275_s25 + $0xe40] ss:$8 sps:$4 sm:$0xff]   ;;  %v9907_v10 = vld [vmem:[%s11275_s25 + $0x654] ss:$8 sps:$4 sm:$0xff]  }
 0x27e   : > { %8235 = vmatprep.subr.bf16.mxu0 %v9826_v11  ;;  %v9910_v11 = vld [vmem:[%s11275_s25 + $0xe54] ss:$8 sps:$4 sm:$0xff]  }
 0x280   : > { %7892 = vmatpush1.bf16.msra.mxu1 %v9821_v12  ;;  %v9905_v12 = vld [vmem:[%s11275_s25 + $0x650] ss:$8 sps:$4 sm:$0xff]  }
 0x281   : > { %8236 = vmatpush1.bf16.msra.mxu0 %v9824_v13  ;;  %7893 = vmatprep.subr.bf16.mxu1 %v9829_v14  ;;  %v9908_v13 = vld [vmem:[%s11275_s25 + $0xe50] ss:$8 sps:$4 sm:$0xff]   ;;  %v9913_v14 = vld [vmem:[%s11275_s25 + $0x664] ss:$8 sps:$4 sm:$0xff]  }
 0x282   : > { %8237 = vmatprep.subr.bf16.mxu0 %v9832_v15  ;;  %v9916_v15 = vld [vmem:[%s11275_s25 + $0xe64] ss:$8 sps:$4 sm:$0xff]  }
 0x284   : > { %7894 = vmatpush1.bf16.msra.mxu1 %v9827_v16  ;;  %v9911_v16 = vld [vmem:[%s11275_s25 + $0x660] ss:$8 sps:$4 sm:$0xff]  }
 0x285   : > { %8238 = vmatpush1.bf16.msra.mxu0 %v9830_v17  ;;  %7895 = vmatprep.subr.bf16.mxu1 %v9835_v18  ;;  %v9914_v17 = vld [vmem:[%s11275_s25 + $0xe60] ss:$8 sps:$4 sm:$0xff]   ;;  %v9919_v18 = vld [vmem:[%s11275_s25 + $0x674] ss:$8 sps:$4 sm:$0xff]  }
 0x286   : > { %8239 = vmatprep.subr.bf16.mxu0 %v9838_v19  ;;  %v9922_v19 = vld [vmem:[%s11275_s25 + $0xe74] ss:$8 sps:$4 sm:$0xff]  }
 0x288   : > { %7896 = vmatpush1.bf16.msra.mxu1 %v9833_v20  ;;  %v9917_v20 = vld [vmem:[%s11275_s25 + $0x670] ss:$8 sps:$4 sm:$0xff]  }
 0x289   : > { %8240 = vmatpush1.bf16.msra.mxu0 %v9836_v21  ;;  %7897 = vmatprep.subr.bf16.mxu1 %v9841_v22  ;;  %v9920_v21 = vld [vmem:[%s11275_s25 + $0xe70] ss:$8 sps:$4 sm:$0xff]   ;;  %v9925_v22 = vld [vmem:[%s11275_s25 + $0x684] ss:$8 sps:$4 sm:$0xff]  }
 0x28a   : > { %8241 = vmatprep.subr.bf16.mxu0 %v9844_v23  ;;  %v9928_v23 = vld [vmem:[%s11275_s25 + $0xe84] ss:$8 sps:$4 sm:$0xff]  }
 0x28c   : > { %7898 = vmatpush1.bf16.msra.mxu1 %v9839_v26  ;;  %v9923_v26 = vld [vmem:[%s11275_s25 + $0x680] ss:$8 sps:$4 sm:$0xff]  }
 0x28d   : > { %8242 = vmatpush1.bf16.msra.mxu0 %v9842_v27  ;;  %7899 = vmatprep.subr.bf16.mxu1 %v9847_v32  ;;  %v9926_v27 = vld [vmem:[%s11275_s25 + $0xe80] ss:$8 sps:$4 sm:$0xff]   ;;  %v9931_v32 = vld [vmem:[%s11275_s25 + $0x694] ss:$8 sps:$4 sm:$0xff]  }
 0x28e   : > { %8243 = vmatprep.subr.bf16.mxu0 %v9850_v33  ;;  %v9934_v33 = vld [vmem:[%s11275_s25 + $0xe94] ss:$8 sps:$4 sm:$0xff]  }
 0x290   : > { %7900 = vmatpush1.bf16.msra.mxu1 %v9845_v36  ;;  %v9929_v36 = vld [vmem:[%s11275_s25 + $0x690] ss:$8 sps:$4 sm:$0xff]  }
 0x291   : > { %8244 = vmatpush1.bf16.msra.mxu0 %v9848_v37  ;;  %7901 = vmatprep.subr.bf16.mxu1 %v9853_v24  ;;  %v9932_v37 = vld [vmem:[%s11275_s25 + $0xe90] ss:$8 sps:$4 sm:$0xff]   ;;  %v9937_v24 = vld [vmem:[%s11275_s25 + $0x6a4] ss:$8 sps:$4 sm:$0xff]  }
 0x292   : > { %8245 = vmatprep.subr.bf16.mxu0 %v9856_v25  ;;  %v9940_v25 = vld [vmem:[%s11275_s25 + $0xea4] ss:$8 sps:$4 sm:$0xff]  }
 0x294   : > { %7902 = vmatpush1.bf16.msra.mxu1 %v9851_v29  ;;  %v9935_v29 = vld [vmem:[%s11275_s25 + $0x6a0] ss:$8 sps:$4 sm:$0xff]  }
 0x295   : > { %8246 = vmatpush1.bf16.msra.mxu0 %v9854_v30  ;;  %7903 = vmatprep.subr.bf16.mxu1 %v9859_v40  ;;  %v9938_v30 = vld [vmem:[%s11275_s25 + $0xea0] ss:$8 sps:$4 sm:$0xff]   ;;  %v9943_v40 = vld [vmem:[%s11275_s25 + $0x6b4] ss:$8 sps:$4 sm:$0xff]  }
 0x296   : > { %8247 = vmatprep.subr.bf16.mxu0 %v9862_v41  ;;  %v9946_v41 = vld [vmem:[%s11275_s25 + $0xeb4] ss:$8 sps:$4 sm:$0xff]  }
 0x298   : > { %7904 = vmatpush1.bf16.msra.mxu1 %v9857_v44  ;;  %v9941_v44 = vld [vmem:[%s11275_s25 + $0x6b0] ss:$8 sps:$4 sm:$0xff]  }
 0x299   : > { %8248 = vmatpush1.bf16.msra.mxu0 %v9860_v45  ;;  %7905 = vmatprep.subr.bf16.mxu1 %v9865_v46  ;;  %v9944_v45 = vld [vmem:[%s11275_s25 + $0xeb0] ss:$8 sps:$4 sm:$0xff]   ;;  %v9949_v46 = vld [vmem:[%s11275_s25 + $0x6c4] ss:$8 sps:$4 sm:$0xff]  }
 0x29a   : > { %8249 = vmatprep.subr.bf16.mxu0 %v9868_v28  ;;  %v9952_v28 = vld [vmem:[%s11275_s25 + $0xec4] ss:$8 sps:$4 sm:$0xff]  }
 0x29c   : > { %7906 = vmatpush1.bf16.msra.mxu1 %v9863_v48  ;;  %v9947_v48 = vld [vmem:[%s11275_s25 + $0x6c0] ss:$8 sps:$4 sm:$0xff]  }
 0x29d   : > { %8250 = vmatpush1.bf16.msra.mxu0 %v9866_v49  ;;  %7907 = vmatprep.subr.bf16.mxu1 %v9871_v50  ;;  %v9950_v49 = vld [vmem:[%s11275_s25 + $0xec0] ss:$8 sps:$4 sm:$0xff]   ;;  %v9955_v50 = vld [vmem:[%s11275_s25 + $0x6d4] ss:$8 sps:$4 sm:$0xff]  }
 0x29e   : > { %8251 = vmatprep.subr.bf16.mxu0 %v9874_v51  ;;  %v9958_v51 = vld [vmem:[%s11275_s25 + $0xed4] ss:$8 sps:$4 sm:$0xff]  }
 0x2a0   : > { %7908 = vmatpush1.bf16.msra.mxu1 %v9869_v52  ;;  %v9953_v52 = vld [vmem:[%s11275_s25 + $0x6d0] ss:$8 sps:$4 sm:$0xff]  }
 0x2a1   : > { %8252 = vmatpush1.bf16.msra.mxu0 %v9872_v53  ;;  %7920 = vmatprep.subr.bf16.mxu1 %v9877_v54  ;;  %v9956_v53 = vld [vmem:[%s11275_s25 + $0xed0] ss:$8 sps:$4 sm:$0xff]   ;;  %v9961_v54 = vld [vmem:[%s11275_s25 + $0x6e4] ss:$8 sps:$4 sm:$0xff]  }
 0x2a2   : > { %8264 = vmatprep.subr.bf16.mxu0 %v9880_v38  ;;  %v9964_v38 = vld [vmem:[%s11275_s25 + $0xee4] ss:$8 sps:$4 sm:$0xff]  }
 0x2a3   : > { %7910 = vmatmul.mubr.bf16.vlgmr.msra.gmra.mrb[0].mxu1 %v8615_v42  ;;  %v9959_v42 = vld [vmem:[%s11275_s25 + $0x6e0] ss:$8 sps:$4 sm:$0xff]  }
 0x2a4   : > { %8254 = vmatmul.mubr.bf16.vlgmr.msra.gmra.mrb[0].mxu0 %v8631_v43  ;;  %7921 = vmatpush1.bf16.msra.mxu1 %v9875_v58  ;;  %v9962_v43 = vld [vmem:[%s11275_s25 + $0xee0] ss:$8 sps:$4 sm:$0xff]   ;;  %v9967_v58 = vld [vmem:[%s11275_s25 + $0x6f4] ss:$8 sps:$4 sm:$0xff]  }
 0x2a5   : > { %8265 = vmatpush1.bf16.msra.mxu0 %v9878_v59  ;;  %7922 = vmatprep.subr.bf16.mxu1 %v9883_v31  ;;  %v9970_v59 = vld [vmem:[%s11275_s25 + $0xef4] ss:$8 sps:$4 sm:$0xff]   ;;  %v9965_v31 = vld [vmem:[%s11275_s25 + $0x6f0] ss:$8 sps:$4 sm:$0xff]  }
 0x2a6   : > { %8266 = vmatprep.subr.bf16.mxu0 %v9886_v34  ;;  %7952 = vmatprep.mubr.bf16.mxu1 %v8618_v35  ;;  %v9968_v34 = vld [vmem:[%s11275_s25 + $0xef0] ss:$8 sps:$4 sm:$0xff]   ;;  %v9973_v35 = vld [vmem:[%s11275_s25 + $0x704] ss:$8 sps:$4 sm:$0xff]  }
 0x2a7   : > { %8296 = vmatprep.mubr.bf16.mxu0 %v8634_v47  ;;  %v9976_v47 = vld [vmem:[%s11275_s25 + $0xf04] ss:$8 sps:$4 sm:$0xff]  }
 0x2a8   : > { %7923 = vmatpush1.bf16.msra.mxu1 %v9881_v60  ;;  %v11855_v60 = vld [vmem:[%s11326_s5 + $0x38] sm:$0xff] }
 0x2a9   : > { %8267 = vmatpush1.bf16.msra.mxu0 %v9884_v61  ;;  %7924 = vmatprep.subr.bf16.mxu1 %v9889_v62  ;;  %v8617_v61 = vcombine.low %v11771_v39, %v11778_v55  ;;  %v8633_v62 = vcombine.low %v11781_v56, %v11784_v57  ;;  %v9979_v39 = vld [vmem:[%s11275_s25 + $0x714] ss:$8 sps:$4 sm:$0xff]  }
 0x2aa   : > { %8268 = vmatprep.subr.bf16.mxu0 %v9892_v63  ;;  %v11862_v63 = vld [vmem:[%s11326_s5 + $0xb8] sm:$0xff] }
 0x2ab   : > { %v9982_v55 = vld [vmem:[%s11275_s25 + $0xf14] ss:$8 sps:$4 sm:$0xff]   ;;  %v8620_v56 = vcombine.high %v11855_v60, %v11862_v63 }
 0x2ac   : > { %7925 = vmatpush1.bf16.msra.mxu1 %v9887_v0  ;;  %v11865_v0 = vld [vmem:[%s11326_s5 + $0x78] sm:$0xff] }
 0x2ad   : > { %8269 = vmatpush1.bf16.msra.mxu0 %v9890_v1  ;;  %7926 = vmatprep.subr.bf16.mxu1 %v9895_v2  ;;  %v11868_v1 = vld [vmem:[%s11326_s5 + $0xf8] sm:$0xff]  ;;  %v9971_v2 = vld [vmem:[%s11275_s25 + $0x700] ss:$8 sps:$4 sm:$0xff]  }
 0x2ae   : > { %8270 = vmatprep.subr.bf16.mxu0 %v9898_v3  ;;  %v9974_v3 = vld [vmem:[%s11275_s25 + $0xf00] ss:$8 sps:$4 sm:$0xff]   ;;  %v8636_v57 = vcombine.high %v11865_v0, %v11868_v1 }
 0x2b0   : > { %7927 = vmatpush1.bf16.msra.mxu1 %v9893_v4  ;;  %v9977_v4 = vld [vmem:[%s11275_s25 + $0x710] ss:$8 sps:$4 sm:$0xff]  }
 0x2b1   : > { %8271 = vmatpush1.bf16.msra.mxu0 %v9896_v5  ;;  %7928 = vmatprep.subr.bf16.mxu1 %v9901_v6  ;;  %v9980_v5 = vld [vmem:[%s11275_s25 + $0xf10] ss:$8 sps:$4 sm:$0xff]   ;;  %v9985_v6 = vld [vmem:[%s11275_s25 + $0x724] ss:$8 sps:$4 sm:$0xff]  }
 0x2b2   : > { %8272 = vmatprep.subr.bf16.mxu0 %v9904_v7  ;;  %v9988_v7 = vld [vmem:[%s11275_s25 + $0xf24] ss:$8 sps:$4 sm:$0xff]  }
 0x2b4   : > { %7929 = vmatpush1.bf16.msra.mxu1 %v9899_v8  ;;  %v9983_v8 = vld [vmem:[%s11275_s25 + $0x720] ss:$8 sps:$4 sm:$0xff]  }
 0x2b5   : > { %8273 = vmatpush1.bf16.msra.mxu0 %v9902_v9  ;;  %7930 = vmatprep.subr.bf16.mxu1 %v9907_v10  ;;  %v9986_v9 = vld [vmem:[%s11275_s25 + $0xf20] ss:$8 sps:$4 sm:$0xff]   ;;  %v9991_v10 = vld [vmem:[%s11275_s25 + $0x734] ss:$8 sps:$4 sm:$0xff]  }
 0x2b6   : > { %8274 = vmatprep.subr.bf16.mxu0 %v9910_v11  ;;  %v9994_v11 = vld [vmem:[%s11275_s25 + $0xf34] ss:$8 sps:$4 sm:$0xff]  }
 0x2b8   : > { %7931 = vmatpush1.bf16.msra.mxu1 %v9905_v12  ;;  %v9989_v12 = vld [vmem:[%s11275_s25 + $0x730] ss:$8 sps:$4 sm:$0xff]  }
 0x2b9   : > { %8275 = vmatpush1.bf16.msra.mxu0 %v9908_v13  ;;  %7932 = vmatprep.subr.bf16.mxu1 %v9913_v14  ;;  %v9992_v13 = vld [vmem:[%s11275_s25 + $0xf30] ss:$8 sps:$4 sm:$0xff]   ;;  %v9997_v14 = vld [vmem:[%s11275_s25 + $0x744] ss:$8 sps:$4 sm:$0xff]  }
 0x2ba   : > { %8276 = vmatprep.subr.bf16.mxu0 %v9916_v15  ;;  %v10000_v15 = vld [vmem:[%s11275_s25 + $0xf44] ss:$8 sps:$4 sm:$0xff]  }
 0x2bc   : > { %7933 = vmatpush1.bf16.msra.mxu1 %v9911_v16  ;;  %v9995_v16 = vld [vmem:[%s11275_s25 + $0x740] ss:$8 sps:$4 sm:$0xff]  }
 0x2bd   : > { %8277 = vmatpush1.bf16.msra.mxu0 %v9914_v17  ;;  %7934 = vmatprep.subr.bf16.mxu1 %v9919_v18  ;;  %v9998_v17 = vld [vmem:[%s11275_s25 + $0xf40] ss:$8 sps:$4 sm:$0xff]   ;;  %v10003_v18 = vld [vmem:[%s11275_s25 + $0x754] ss:$8 sps:$4 sm:$0xff]  }
 0x2be   : > { %8278 = vmatprep.subr.bf16.mxu0 %v9922_v19  ;;  %v10006_v19 = vld [vmem:[%s11275_s25 + $0xf54] ss:$8 sps:$4 sm:$0xff]  }
 0x2c0   : > { %7935 = vmatpush1.bf16.msra.mxu1 %v9917_v20  ;;  %v10001_v20 = vld [vmem:[%s11275_s25 + $0x750] ss:$8 sps:$4 sm:$0xff]  }
 0x2c1   : > { %8279 = vmatpush1.bf16.msra.mxu0 %v9920_v21  ;;  %7936 = vmatprep.subr.bf16.mxu1 %v9925_v22  ;;  %v10004_v21 = vld [vmem:[%s11275_s25 + $0xf50] ss:$8 sps:$4 sm:$0xff]   ;;  %v10009_v22 = vld [vmem:[%s11275_s25 + $0x764] ss:$8 sps:$4 sm:$0xff]  }
 0x2c2   : > { %8280 = vmatprep.subr.bf16.mxu0 %v9928_v23  ;;  %v10012_v23 = vld [vmem:[%s11275_s25 + $0xf64] ss:$8 sps:$4 sm:$0xff]  }
 0x2c4   : > { %7937 = vmatpush1.bf16.msra.mxu1 %v9923_v26  ;;  %v10007_v26 = vld [vmem:[%s11275_s25 + $0x760] ss:$8 sps:$4 sm:$0xff]  }
 0x2c5   : > { %8281 = vmatpush1.bf16.msra.mxu0 %v9926_v27  ;;  %7938 = vmatprep.subr.bf16.mxu1 %v9931_v32  ;;  %v10010_v27 = vld [vmem:[%s11275_s25 + $0xf60] ss:$8 sps:$4 sm:$0xff]   ;;  %v10015_v32 = vld [vmem:[%s11275_s25 + $0x774] ss:$8 sps:$4 sm:$0xff]  }
 0x2c6   : > { %8282 = vmatprep.subr.bf16.mxu0 %v9934_v33  ;;  %v10018_v33 = vld [vmem:[%s11275_s25 + $0xf74] ss:$8 sps:$4 sm:$0xff]  }
 0x2c8   : > { %7939 = vmatpush1.bf16.msra.mxu1 %v9929_v36  ;;  %v10013_v36 = vld [vmem:[%s11275_s25 + $0x770] ss:$8 sps:$4 sm:$0xff]  }
 0x2c9   : > { %8283 = vmatpush1.bf16.msra.mxu0 %v9932_v37  ;;  %7940 = vmatprep.subr.bf16.mxu1 %v9937_v24  ;;  %v10016_v37 = vld [vmem:[%s11275_s25 + $0xf70] ss:$8 sps:$4 sm:$0xff]   ;;  %v10021_v24 = vld [vmem:[%s11275_s25 + $0x784] ss:$8 sps:$4 sm:$0xff]  }
 0x2ca   : > { %8284 = vmatprep.subr.bf16.mxu0 %v9940_v25  ;;  %v10024_v25 = vld [vmem:[%s11275_s25 + $0xf84] ss:$8 sps:$4 sm:$0xff]  }
 0x2cc   : > { %7941 = vmatpush1.bf16.msra.mxu1 %v9935_v29  ;;  %v10019_v29 = vld [vmem:[%s11275_s25 + $0x780] ss:$8 sps:$4 sm:$0xff]  }
 0x2cd   : > { %8285 = vmatpush1.bf16.msra.mxu0 %v9938_v30  ;;  %7942 = vmatprep.subr.bf16.mxu1 %v9943_v40  ;;  %v10022_v30 = vld [vmem:[%s11275_s25 + $0xf80] ss:$8 sps:$4 sm:$0xff]   ;;  %v10027_v40 = vld [vmem:[%s11275_s25 + $0x794] ss:$8 sps:$4 sm:$0xff]  }
 0x2ce   : > { %8286 = vmatprep.subr.bf16.mxu0 %v9946_v41  ;;  %v10030_v41 = vld [vmem:[%s11275_s25 + $0xf94] ss:$8 sps:$4 sm:$0xff]  }
 0x2d0   : > { %7943 = vmatpush1.bf16.msra.mxu1 %v9941_v44  ;;  %v10025_v44 = vld [vmem:[%s11275_s25 + $0x790] ss:$8 sps:$4 sm:$0xff]  }
 0x2d1   : > { %8287 = vmatpush1.bf16.msra.mxu0 %v9944_v45  ;;  %7944 = vmatprep.subr.bf16.mxu1 %v9949_v46  ;;  %v10028_v45 = vld [vmem:[%s11275_s25 + $0xf90] ss:$8 sps:$4 sm:$0xff]   ;;  %v10033_v46 = vld [vmem:[%s11275_s25 + $0x7a4] ss:$8 sps:$4 sm:$0xff]  }
 0x2d2   : > { %8288 = vmatprep.subr.bf16.mxu0 %v9952_v28  ;;  %v10036_v28 = vld [vmem:[%s11275_s25 + $0xfa4] ss:$8 sps:$4 sm:$0xff]  }
 0x2d4   : > { %7945 = vmatpush1.bf16.msra.mxu1 %v9947_v48  ;;  %v10031_v48 = vld [vmem:[%s11275_s25 + $0x7a0] ss:$8 sps:$4 sm:$0xff]  }
 0x2d5   : > { %8289 = vmatpush1.bf16.msra.mxu0 %v9950_v49  ;;  %7946 = vmatprep.subr.bf16.mxu1 %v9955_v50  ;;  %v10034_v49 = vld [vmem:[%s11275_s25 + $0xfa0] ss:$8 sps:$4 sm:$0xff]   ;;  %v10039_v50 = vld [vmem:[%s11275_s25 + $0x7b4] ss:$8 sps:$4 sm:$0xff]  }
 0x2d6   : > { %8290 = vmatprep.subr.bf16.mxu0 %v9958_v51  ;;  %v10042_v51 = vld [vmem:[%s11275_s25 + $0xfb4] ss:$8 sps:$4 sm:$0xff]  }
 0x2d8   : > { %7947 = vmatpush1.bf16.msra.mxu1 %v9953_v52  ;;  %v10037_v52 = vld [vmem:[%s11275_s25 + $0x7b0] ss:$8 sps:$4 sm:$0xff]  }
 0x2d9   : > { %8291 = vmatpush1.bf16.msra.mxu0 %v9956_v53  ;;  %7948 = vmatprep.subr.bf16.mxu1 %v9961_v54  ;;  %v10040_v53 = vld [vmem:[%s11275_s25 + $0xfb0] ss:$8 sps:$4 sm:$0xff]   ;;  %v10045_v54 = vld [vmem:[%s11275_s25 + $0x7c4] ss:$8 sps:$4 sm:$0xff]  }
 0x2da   : > { %8292 = vmatprep.subr.bf16.mxu0 %v9964_v38  ;;  %v10048_v38 = vld [vmem:[%s11275_s25 + $0xfc4] ss:$8 sps:$4 sm:$0xff]  }
 0x2dc   : > { %7949 = vmatpush1.bf16.msra.mxu1 %v9959_v42  ;;  %v10043_v42 = vld [vmem:[%s11275_s25 + $0x7c0] ss:$8 sps:$4 sm:$0xff]  }
 0x2dd   : > { %8293 = vmatpush1.bf16.msra.mxu0 %v9962_v43  ;;  %7950 = vmatprep.subr.bf16.mxu1 %v9967_v58  ;;  %v10046_v43 = vld [vmem:[%s11275_s25 + $0xfc0] ss:$8 sps:$4 sm:$0xff]   ;;  %v10051_v58 = vld [vmem:[%s11275_s25 + $0x7d4] ss:$8 sps:$4 sm:$0xff]  }
 0x2de   : > { %8294 = vmatprep.subr.bf16.mxu0 %v9970_v59  ;;  %v10054_v59 = vld [vmem:[%s11275_s25 + $0xfd4] ss:$8 sps:$4 sm:$0xff]  }
 0x2e0   : > { %7951 = vmatpush1.bf16.msra.mxu1 %v9965_v31  ;;  %v10049_v31 = vld [vmem:[%s11275_s25 + $0x7d0] ss:$8 sps:$4 sm:$0xff]  }
 0x2e1   : > { %8295 = vmatpush1.bf16.msra.mxu0 %v9968_v34  ;;  %7963 = vmatprep.subr.bf16.mxu1 %v9973_v35  ;;  %v10052_v34 = vld [vmem:[%s11275_s25 + $0xfd0] ss:$8 sps:$4 sm:$0xff]   ;;  %v10057_v35 = vld [vmem:[%s11275_s25 + $0x7e4] ss:$8 sps:$4 sm:$0xff]  }
 0x2e2   : > { %8307 = vmatprep.subr.bf16.mxu0 %v9976_v47  ;;  %v10060_v47 = vld [vmem:[%s11275_s25 + $0xfe4] ss:$8 sps:$4 sm:$0xff]  }
 0x2e3   : > { %7953 = vmatmul.mubr.bf16.vlgmr.msra.gmra.mrb[0].mxu1 %v8617_v61  ;;  %v10055_v61 = vld [vmem:[%s11275_s25 + $0x7e0] ss:$8 sps:$4 sm:$0xff]  }
 0x2e4   : > { %8297 = vmatmul.mubr.bf16.vlgmr.msra.gmra.mrb[0].mxu0 %v8633_v62  ;;  %7964 = vmatpush1.bf16.msra.mxu1 %v9971_v2  ;;  %v10058_v62 = vld [vmem:[%s11275_s25 + $0xfe0] ss:$8 sps:$4 sm:$0xff]   ;;  %v10063_v2 = vld [vmem:[%s11275_s25 + $0x7f4] ss:$8 sps:$4 sm:$0xff]  }
 0x2e5   : > { %8308 = vmatpush1.bf16.msra.mxu0 %v9974_v3  ;;  %7965 = vmatprep.subr.bf16.mxu1 %v9979_v39  ;;  %v10066_v3 = vld [vmem:[%s11275_s25 + $0xff4] ss:$8 sps:$4 sm:$0xff]   ;;  %v10061_v39 = vld [vmem:[%s11275_s25 + $0x7f0] ss:$8 sps:$4 sm:$0xff]  }
 0x2e6   : > { %8309 = vmatprep.subr.bf16.mxu0 %v9982_v55  ;;  %7995 = vmatprep.mubr.bf16.mxu1 %v8620_v56  ;;  %v10064_v55 = vld [vmem:[%s11275_s25 + $0xff0] ss:$8 sps:$4 sm:$0xff]   ;;  %v8619_v56 = vcombine.low %v11855_v60, %v11862_v63  ;;  %v4930_v63 = vld [vmem:[%s4383_s10] sm:$0x3]  ;;  %s9155_s25 = sshll.u32 (%p10231_p9), %s8452_s24, 2 }
 0x2e7   : > { %8339 = vmatprep.mubr.bf16.mxu0 %v8636_v57  ;;  %v8635_v57 = vcombine.low %v11865_v0, %v11868_v1  ;;  %s8454_s28 = scalar_lea.vmem (%p10231_p9), %s11998_s3, %s9155_s25 }
 0x2e8   : > { %7966 = vmatpush1.bf16.msra.mxu1 %v9977_v4  ;;  %v4932_v4 = vlaneseq }
 0x2e9   : > { %8310 = vmatpush1.bf16.msra.mxu0 %v9980_v5  ;;  %7967 = vmatprep.subr.bf16.mxu1 %v9985_v6 }
 0x2ea   : > { %8311 = vmatprep.subr.bf16.mxu0 %v9988_v7  ;;  %v4933_v5 = vshrl.u32 %v4932_v4, 7 }
 0x2ec   : > { %7968 = vmatpush1.bf16.msra.mxu1 %v9983_v8  ;;  %v4934_v60 = vsub.s32 0, %v4933_v5  ;;  %v4938_v6 = vsub.s32 1, %v4933_v5  ;;  %v8352_v1 = vadd.s32 8, %v4933_v5 }
 0x2ed   : > { %8312 = vmatpush1.bf16.msra.mxu0 %v9986_v9  ;;  %7969 = vmatprep.subr.bf16.mxu1 %v9991_v10 }
 0x2ee   : > { %8313 = vmatprep.subr.bf16.mxu0 %v9994_v11  ;;  %v4935_v0 = vrot.slane %v4930_v63, %v4934_v60  ;;  %v4939_v7 = vrot.slane %v4930_v63, %v4938_v6  ;;  %vm8354_vm0 = vcmp.lt.s32.totalorder %v8352_v1, 9 }
 0x2f0   : > { %7970 = vmatpush1.bf16.msra.mxu1 %v9989_v12 }
 0x2f1   : > { %8314 = vmatpush1.bf16.msra.mxu0 %v9992_v13  ;;  %7971 = vmatprep.subr.bf16.mxu1 %v9997_v14 }
 0x2f2   : > { %8315 = vmatprep.subr.bf16.mxu0 %v10000_v15 }
 0x2f4   : > { %7972 = vmatpush1.bf16.msra.mxu1 %v9995_v16 }
 0x2f5   : > { %8316 = vmatpush1.bf16.msra.mxu0 %v9998_v17  ;;  %7973 = vmatprep.subr.bf16.mxu1 %v10003_v18 }
 0x2f6   : > { %8317 = vmatprep.subr.bf16.mxu0 %v10006_v19 }
 0x2f8   : > { %7974 = vmatpush1.bf16.msra.mxu1 %v10001_v20 }
 0x2f9   : > { %8318 = vmatpush1.bf16.msra.mxu0 %v10004_v21  ;;  %7975 = vmatprep.subr.bf16.mxu1 %v10009_v22  ;;  %v10143_v21 = vmov 0.0  }
 0x2fa   : > { %8319 = vmatprep.subr.bf16.mxu0 %v10012_v23  ;;  %v9149_v22 = vsel %vm8354_vm0, 1.0, %v10143_v21 }
 0x2fc   : > { %7976 = vmatpush1.bf16.msra.mxu1 %v10007_v26 }
 0x2fd   : > { %8320 = vmatpush1.bf16.msra.mxu0 %v10010_v27  ;;  %7977 = vmatprep.subr.bf16.mxu1 %v10015_v32 }
 0x2fe   : > { %8321 = vmatprep.subr.bf16.mxu0 %v10018_v33 }
 0x300   : > { %7978 = vmatpush1.bf16.msra.mxu1 %v10013_v36 }
 0x301   : > { %8322 = vmatpush1.bf16.msra.mxu0 %v10016_v37  ;;  %7979 = vmatprep.subr.bf16.mxu1 %v10021_v24 }
 0x302   : > { %8323 = vmatprep.subr.bf16.mxu0 %v10024_v25 }
 0x304   : > { %7980 = vmatpush1.bf16.msra.mxu1 %v10019_v29 }
 0x305   : > { %8324 = vmatpush1.bf16.msra.mxu0 %v10022_v30  ;;  %7981 = vmatprep.subr.bf16.mxu1 %v10027_v40 }
 0x306   : > { %8325 = vmatprep.subr.bf16.mxu0 %v10030_v41 }
 0x308   : > { %7982 = vmatpush1.bf16.msra.mxu1 %v10025_v44 }
 0x309   : > { %8326 = vmatpush1.bf16.msra.mxu0 %v10028_v45  ;;  %7983 = vmatprep.subr.bf16.mxu1 %v10033_v46 }
 0x30a   : > { %8327 = vmatprep.subr.bf16.mxu0 %v10036_v28 }
 0x30c   : > { %7984 = vmatpush1.bf16.msra.mxu1 %v10031_v48 }
 0x30d   : > { %8328 = vmatpush1.bf16.msra.mxu0 %v10034_v49  ;;  %7985 = vmatprep.subr.bf16.mxu1 %v10039_v50 }
 0x30e   : > { %8329 = vmatprep.subr.bf16.mxu0 %v10042_v51 }
 0x310   : > { %7986 = vmatpush1.bf16.msra.mxu1 %v10037_v52 }
 0x311   : > { %8330 = vmatpush1.bf16.msra.mxu0 %v10040_v53  ;;  %7987 = vmatprep.subr.bf16.mxu1 %v10045_v54 }
 0x312   : > { %8331 = vmatprep.subr.bf16.mxu0 %v10048_v38 }
 0x314   : > { %7988 = vmatpush1.bf16.msra.mxu1 %v10043_v42 }
 0x315   : > { %8332 = vmatpush1.bf16.msra.mxu0 %v10046_v43  ;;  %7989 = vmatprep.subr.bf16.mxu1 %v10051_v58 }
 0x316   : > { %8333 = vmatprep.subr.bf16.mxu0 %v10054_v59 }
 0x318   : > { %7990 = vmatpush1.bf16.msra.mxu1 %v10049_v31 }
 0x319   : > { %8334 = vmatpush1.bf16.msra.mxu0 %v10052_v34  ;;  %7991 = vmatprep.subr.bf16.mxu1 %v10057_v35 }
 0x31a   : > { %8335 = vmatprep.subr.bf16.mxu0 %v10060_v47 }
 0x31c   : > { %7992 = vmatpush1.bf16.msra.mxu1 %v10055_v61 }
 0x31d   : > { %8336 = vmatpush1.bf16.msra.mxu0 %v10058_v62  ;;  %7993 = vmatprep.subr.bf16.mxu1 %v10063_v2 }
 0x31e   : > { %8337 = vmatprep.subr.bf16.mxu0 %v10066_v3 }
 0x320   : > { %7994 = vmatpush1.bf16.msra.mxu1 %v10061_v39 }
 0x321   : > { %8338 = vmatpush1.bf16.msra.mxu0 %v10064_v55 }
 0x323   : > { %7996 = vmatmul.mubr.bf16.vlgmr.msra.gmra.mrb[0].mxu1 %v8619_v56 }
 0x324   : > { %8340 = vmatmul.mubr.bf16.vlgmr.msra.gmra.mrb[0].mxu0 %v8635_v57 }
 0x3f6   : > { %v7997_v8 = vpop.f32.mrb[0].mxu1 }
 0x3f7   : > { %v8341_v9 = vpop.f32.mrb[0].mxu0  ;;  %v9162_v10 = vadd.f32 %v7997_v8, %v4935_v0  ;;  %v7999_v11 = vpop.f32.mrb[1].mxu1 }
 0x3f8   : > { %v8343_v12 = vpop.f32.mrb[1].mxu0  ;;  %v9164_v13 = vadd.f32 %v7999_v11, %v4939_v7  ;;  %v8001_v14 = vpop.f32.mrb[2].mxu1 }
 0x3f9   : > { %v8345_v15 = vpop.f32.mrb[2].mxu0  ;;  %v11948_v16 = vadd.f32 %v9162_v10, %v8341_v9  ;;  %v9166_v17 = vadd.f32 %v8001_v14, %v4935_v0  ;;  %v8003_v18 = vpop.f32.mrb[3].mxu1 }
 0x3fa   : > { %v8347_v19 = vpop.f32.mrb[3].mxu0  ;;  %v11950_v20 = vadd.f32 %v9164_v13, %v8343_v12  ;;  %v9168_v23 = vadd.f32 %v8003_v18, %v4939_v7 }
 0x3fb   : > { %v9167_v26 = vadd.f32 %v9166_v17, %v8345_v15  ;;  %v8379_v36 = vmul.f32 %v11948_v16, %v11948_v16 }
 0x3fc   : > { %v9169_v27 = vadd.f32 %v9168_v23, %v8347_v19  ;;  %v8380_v25 = vmul.f32 %v11950_v20, %v11950_v20 }
 0x3fd   : > { %v8361_v32 = vmul.f32 %v9167_v26, %v9149_v22 }
 0x3fe   : > { %v8362_v33 = vmul.f32 %v9169_v27, %v9149_v22 }
 0x3ff   : > { %v8363_v37 = vadd.f32 %v11948_v16, %v8361_v32  ;;  %v8381_v24 = vmul.f32 %v9167_v26, %v8361_v32 }
 0x400   : > { %v8370_v29 = vadd.f32 %v11950_v20, %v8362_v33  ;;  %v8382_v30 = vmul.f32 %v9169_v27, %v8362_v33 }
 0x401   : > { %v8364_v40 = vrot.slane %v8363_v37, 4  ;;  %v8383_v41 = vadd.f32 %v8381_v24, %v8379_v36 }
 0x402   : > { %v8371_v44 = vrot.slane %v8370_v29, 4  ;;  %v8390_v45 = vadd.f32 %v8382_v30, %v8380_v25 }
 0x403   : > { %v8365_v46 = vadd.f32 %v8364_v40, %v8363_v37  ;;  %v8384_v28 = vrot.slane %v8383_v41, 4 }
 0x404   : > { %v8372_v48 = vadd.f32 %v8371_v44, %v8370_v29  ;;  %v8391_v49 = vrot.slane %v8390_v45, 4 }
 0x405   : > { %v8366_v50 = vrot.slane %v8365_v46, 2  ;;  %v8385_v51 = vadd.f32 %v8384_v28, %v8383_v41 }
 0x406   : > { %v8373_v52 = vrot.slane %v8372_v48, 2  ;;  %v8392_v53 = vadd.f32 %v8391_v49, %v8390_v45 }
 0x407   : > { %v8367_v54 = vadd.f32 %v8366_v50, %v8365_v46  ;;  %v8386_v38 = vrot.slane %v8385_v51, 2 }
 0x408   : > { %v8374_v42 = vadd.f32 %v8373_v52, %v8372_v48  ;;  %v8393_v43 = vrot.slane %v8392_v53, 2 }
 0x409   : > { %v8368_v58 = vrot.slane %v8367_v54, 1  ;;  %v8387_v59 = vadd.f32 %v8386_v38, %v8385_v51 }
 0x40a   : > { %v8375_v31 = vrot.slane %v8374_v42, 1  ;;  %v8394_v34 = vadd.f32 %v8393_v43, %v8392_v53 }
 0x40b   : > { %v8369_v35 = vadd.f32 %v8368_v58, %v8367_v54  ;;  %v8388_v47 = vrot.slane %v8387_v59, 1 }
 0x40c   : > { %v8376_v61 = vadd.f32 %v8375_v31, %v8374_v42  ;;  %v8395_v62 = vrot.slane %v8394_v34, 1 }
 0x40d   : > { %v8377_v2 = vmul.f32 0.11111111, %v8369_v35  ;;  %v8389_v3 = vadd.f32 %v8388_v47, %v8387_v59 }
 0x40e   : > { %v8378_v39 = vmul.f32 0.11111111, %v8376_v61  ;;  %v8396_v55 = vadd.f32 %v8395_v62, %v8394_v34 }
 0x40f   : > { %v8397_v56 = vmul.f32 0.11111111, %v8389_v3  ;;  %v8399_v57 = vmul.f32 %v8377_v2, %v8377_v2  ;;  %v8405_v4 = vsub.f32 %v11948_v16, %v8377_v2  ;;  %v8407_v5 = vsub.f32 %v9167_v26, %v8377_v2 }
 0x410   : > { %v8398_v60 = vmul.f32 0.11111111, %v8396_v55  ;;  %v8400_v63 = vmul.f32 %v8378_v39, %v8378_v39  ;;  %v8406_v6 = vsub.f32 %v11950_v20, %v8378_v39  ;;  %v8408_v0 = vsub.f32 %v9169_v27, %v8378_v39 }
 0x411   : > { %v8401_v1 = vsub.f32 %v8397_v56, %v8399_v57 }
 0x412   : > { %v8402_v7 = vsub.f32 %v8398_v60, %v8400_v63 }
 0x413   : > { %v8403_v8 = vmax.f32 %v8401_v1, 0.0 }
 0x414   : > { %v8404_v9 = vmax.f32 %v8402_v7, 0.0 }
 0x415   : > { %v8409_v10 = vadd.f32 1e-05, %v8403_v8 }
 0x416   : > { %v8410_v11 = vadd.f32 1e-05, %v8404_v9 }
 0x417   : > { %10067 = vrsqrt.f32 %v8409_v10 }
 0x418   : > { %10069 = vrsqrt.f32 %v8410_v11 }
 0x421   : > { %v10068_v12 = vpop.eup %10067 }
 0x422   : > { %v10070_v13 = vpop.eup %10069  ;;  %v8413_v14 = vmul.f32 %v10068_v12, %v8405_v4  ;;  %v8415_v15 = vmul.f32 %v10068_v12, %v8407_v5 }
 0x423   : > { %v8414_v16 = vmul.f32 %v10070_v13, %v8406_v6  ;;  %v8416_v17 = vmul.f32 %v10070_v13, %v8408_v0 }
 0x424   : > { %vm8417_vm1 = vcmp.gt.f32.partialorder %v8413_v14, 0.0  ;;  %vm8419_vm2 = vcmp.gt.f32.partialorder %v8415_v15, 0.0  ;;  %v8421_v18 = vmul.f32 0.2, %v8413_v14  ;;  %v8423_v19 = vmul.f32 0.2, %v8415_v15 }
 0x425   : > { %vm8418_vm3 = vcmp.gt.f32.partialorder %v8414_v16, 0.0  ;;  %vm8420_vm4 = vcmp.gt.f32.partialorder %v8416_v17, 0.0  ;;  %v8422_v20 = vmul.f32 0.2, %v8414_v16  ;;  %v8424_v21 = vmul.f32 0.2, %v8416_v17 }
 0x426   : > { %v8427_v22 = vsel %vm8419_vm2, %v8415_v15, %v8423_v19  ;;  %v8425_v23 = vsel %vm8417_vm1, %v8413_v14, %v8421_v18  ;;  %8449 = sbr.rel (!%p10231_p9) target bundleno = 1075 (0x433), region = 88 }
 0x427   : > { %v8426_v26 = vsel %vm8418_vm3, %v8414_v16, %v8422_v20  ;;  %v8428_v27 = vsel %vm8420_vm4, %v8416_v17, %v8424_v21 }
 0x428   : > { %v9160_v32 = vpack.c.bf16 %v8426_v26, %v8425_v23  ;;  %v9161_v33 = vpack.c.bf16 %v8428_v27, %v8427_v22 }
 0x42a   : > { %8441 = vst [vmem:[%s4373_s12] sm:$0xff] %v9160_v32  ;;  %8442 = vst [vmem:[%s4373_s12 + $0x8] sm:$0xff] %v9161_v33 }
 0x431   : > { %v8484_v36 = vld [vmem:[%s4373_s12] sm:$0xff]  ;;  %v8486_v37 = vld [vmem:[%s4373_s12 + $0x8] sm:$0xff] }
 0x432   : > { %8485 = vst [vmem:[%s8454_s28] sm:$0xff] %v8484_v36  ;;  %8487 = vst [vmem:[%s8454_s28 + $0x10] sm:$0xff] %v8486_v37 }
 0x433 PF: > { %s13_s20 = sadd.s32 1, %s10141_s20   ;;  %s12000_s12 = smov %s10113_s13 }
 0x434   : > { %p10_p2 = scmp.ge.s32.totalorder %s13_s20, 6   ;;  %s12001_s13 = smov %s10236_s4 }
 0x435   : > { %s12002_s14 = smov %s10121_s15  ;;  %s12003_s15 = smov %s10225_s27 }
 0x436   : > { %s12004_s16 = smov %s10133_s18  ;;  %s12005_s17 = smov %s10137_s19 }
 0x437   : > { %s12006_s18 = smov %s12009_s22  ;;  %s12007_s19 = smov %s12013_s23 }
 0x438   :  { %12 = sbr.rel (!%p10_p2) target bundleno = 5 (0x5), region = 169 }

// kernel: discriminator_forward.9
= control target key start
LH: loop header
LB: loop body
LE: loop exit
PB: predicated region body
PF: predicated region fallthrough
CT: control target
= control target key end

     0   :  { %s7898_s12 = smov 0   ;;  %s7900_s13 = smov 0   ;;  %s9536_s0 = inlined_call_operand.vmem [shape: bf16[2,8,8192], index: 0, kind: input, shape index: {}]   ;;  %s9537_s1 = inlined_call_operand.vmem [shape: bf16[8192,128], index: 1, kind: input, shape index: {}]   ;;  %s9538_s2 = inlined_call_operand.vmem [shape: f32[1,128], index: 2, kind: input, shape index: {}]   ;;  %s9539_s3 = inlined_call_operand.vmem [shape: f32[2,8,128], index: 3, kind: output, shape index: {}]  }
   0x1   :  { %s7902_s14 = smov 0  }
   0x2 LB: > { %s25_s15 = sadd.s32 1, %s7872_s13  ;;  %p5966_p0 = scmp.ge.s32.totalorder %s7876_s14, 1  ;;  %s7876_s14 = sphi %s7902_s14, %s13_s14   ;;  %s7872_s13 = sphi %s7900_s13, %s9541_s13   ;;  %s7868_s12 = sphi %s7898_s12, %s9540_s12  }
   0x3   : > { %p27_p1 = scmp.ge.s32.totalorder %s25_s15, 2  ;;  %p168_p2 = scmp.lt.s32.totalorder %s7876_s14, 3 }
   0x5   : > { %s9543_s15 = smov (%p27_p1, %s25_s15), 0  ;;  %p169_p3 = pnand %p5966_p0, %p168_p2 }
   0x6   : > { %v7278_v0 = vld [vmem:[%s9537_s1 + $0x40] sm:$0xff] (!%p169_p3)   ;;  %v7282_v4 = vld [vmem:[%s9537_s1 + $0x48] sm:$0xff] (!%p169_p3)   ;;  %v7286_v8 = vld [vmem:[%s9537_s1 + $0x50] sm:$0xff] (!%p169_p3)   ;;  %p201_p4 = scmp.lt.s32.totalorder (!%p169_p3), %s7868_s12, 1 }
   0x7   : > { %172 = sbr.rel (%p169_p3) target bundleno = 740 (0x2e4), region = 32  ;;  %v7279_v1 = vld [vmem:[%s9537_s1 + $0xc0] sm:$0xff] (!%p169_p3)   ;;  %6550 = vmatprep.subr.bf16.mxu0 (!%p169_p3), %v7278_v0  ;;  %v7283_v5 = vld [vmem:[%s9537_s1 + $0xc8] sm:$0xff] (!%p169_p3)   ;;  %v7287_v9 = vld [vmem:[%s9537_s1 + $0xd0] sm:$0xff] (!%p169_p3)  }
   0x8   : > { %v7280_v2 = vld [vmem:[%s9537_s1] sm:$0xff] (!%p169_p3)   ;;  %6572 = vmatprep.subr.bf16.mxu1 (!%p169_p3), %v7279_v1  ;;  %v7284_v6 = vld [vmem:[%s9537_s1 + $0x8] sm:$0xff] (!%p169_p3)   ;;  %v7288_v10 = vld [vmem:[%s9537_s1 + $0x10] sm:$0xff] (!%p169_p3)  }
   0x9   : > { %v7281_v3 = vld [vmem:[%s9537_s1 + $0x80] sm:$0xff] (!%p169_p3)   ;;  %6551 = vmatpush3.bf16.msra.mxu0 (!%p169_p3), %v7280_v2  ;;  %v7285_v7 = vld [vmem:[%s9537_s1 + $0x88] sm:$0xff] (!%p169_p3)   ;;  %v7289_v11 = vld [vmem:[%s9537_s1 + $0x90] sm:$0xff] (!%p169_p3)  }
   0xa   : > { %6573 = vmatpush3.bf16.msra.mxu1 (!%p169_p3), %v7281_v3  ;;  %6552 = vmatprep.subr.bf16.mxu0 (!%p169_p3), %v7282_v4  ;;  %v7290_v12 = vld [vmem:[%s9537_s1 + $0x58] sm:$0xff] (!%p169_p3)   ;;  %v7294_v16 = vld [vmem:[%s9537_s1 + $0x60] sm:$0xff] (!%p169_p3)   ;;  %v7298_v20 = vld [vmem:[%s9537_s1 + $0x68] sm:$0xff] (!%p169_p3)  }
   0xb   : > { %6574 = vmatprep.subr.bf16.mxu1 (!%p169_p3), %v7283_v5  ;;  %v7291_v13 = vld [vmem:[%s9537_s1 + $0xd8] sm:$0xff] (!%p169_p3)   ;;  %v7295_v17 = vld [vmem:[%s9537_s1 + $0xe0] sm:$0xff] (!%p169_p3)   ;;  %v7299_v21 = vld [vmem:[%s9537_s1 + $0xe8] sm:$0xff] (!%p169_p3)  }
   0xc   : > { %v7292_v14 = vld [vmem:[%s9537_s1 + $0x18] sm:$0xff] (!%p169_p3)   ;;  %v7296_v18 = vld [vmem:[%s9537_s1 + $0x20] sm:$0xff] (!%p169_p3)   ;;  %v7300_v22 = vld [vmem:[%s9537_s1 + $0x28] sm:$0xff] (!%p169_p3)  }
   0xd   : > { %6553 = vmatpush3.bf16.msra.mxu0 (!%p169_p3), %v7284_v6  ;;  %v7293_v15 = vld [vmem:[%s9537_s1 + $0x98] sm:$0xff] (!%p169_p3)   ;;  %v7297_v19 = vld [vmem:[%s9537_s1 + $0xa0] sm:$0xff] (!%p169_p3)   ;;  %v7301_v23 = vld [vmem:[%s9537_s1 + $0xa8] sm:$0xff] (!%p169_p3)  }
   0xe   : > { %6575 = vmatpush3.bf16.msra.mxu1 %v7285_v7  ;;  %6554 = vmatprep.subr.bf16.mxu0 %v7286_v8  ;;  %s9545_s12 = smov (!%p201_p4, %s7868_s12), 1  ;;  %v7302_v24 = vld [vmem:[%s9537_s1 + $0x70] sm:$0xff]   ;;  %v7306_v28 = vld [vmem:[%s9537_s1 + $0x78] sm:$0xff]   ;;  %v7314_v38 = vld [vmem:[%s9537_s1 + $0x140] sm:$0xff]  }
   0xf   : > { %6576 = vmatprep.subr.bf16.mxu1 %v7287_v9  ;;  %v7303_v25 = vld [vmem:[%s9537_s1 + $0xf0] sm:$0xff]   ;;  %s6549_s24 = sshll.u32 %s9545_s12, 8  ;;  %v7307_v29 = vld [vmem:[%s9537_s1 + $0xf8] sm:$0xff]   ;;  %v7315_v39 = vld [vmem:[%s9537_s1 + $0x1c0] sm:$0xff]  }
  0x10   : > { %v7304_v26 = vld [vmem:[%s9537_s1 + $0x30] sm:$0xff]   ;;  %s8016_s6 = scalar_lea.vmem %s9536_s0, %s6549_s24  ;;  %v7308_v30 = vld [vmem:[%s9537_s1 + $0x38] sm:$0xff]   ;;  %v7316_v40 = vld [vmem:[%s9537_s1 + $0x100] sm:$0xff]  }
  0x11   : > { %6555 = vmatpush3.bf16.msra.mxu0 %v7288_v10  ;;  %v7305_v27 = vld [vmem:[%s9537_s1 + $0xb0] sm:$0xff]   ;;  %v7309_v31 = vld [vmem:[%s9537_s1 + $0xb8] sm:$0xff]   ;;  %v221_v32 = vld [vmem:[%s8016_s6] sm:$0xff] }
  0x12   : > { %6577 = vmatpush3.bf16.msra.mxu1 %v7289_v11  ;;  %6556 = vmatprep.subr.bf16.mxu0 %v7290_v12  ;;  %v222_v33 = vld [vmem:[%s8016_s6 + $0x8] sm:$0xff]  ;;  %v5971_v34 = vcombine.low %v221_v32, %v221_v32  ;;  %v5972_v35 = vcombine.high %v221_v32, %v221_v32  ;;  %v7317_v41 = vld [vmem:[%s9537_s1 + $0x180] sm:$0xff]   ;;  %v7322_v46 = vld [vmem:[%s9537_s1 + $0x150] sm:$0xff]  }
  0x13   : > { %6578 = vmatprep.subr.bf16.mxu1 %v7291_v13  ;;  %v5973_v36 = vcombine.low %v222_v33, %v222_v33  ;;  %v5974_v37 = vcombine.high %v222_v33, %v222_v33  ;;  %v7318_v42 = vld [vmem:[%s9537_s1 + $0x148] sm:$0xff]   ;;  %v7323_v47 = vld [vmem:[%s9537_s1 + $0x1d0] sm:$0xff]   ;;  %v7326_v50 = vld [vmem:[%s9537_s1 + $0x158] sm:$0xff]  }
  0x14   : > { %4612 = vmatprep.mubr.bf16.mxu0 %v5972_v35  ;;  %v7319_v43 = vld [vmem:[%s9537_s1 + $0x1c8] sm:$0xff]   ;;  %v7324_v48 = vld [vmem:[%s9537_s1 + $0x110] sm:$0xff]   ;;  %v7327_v51 = vld [vmem:[%s9537_s1 + $0x1d8] sm:$0xff]  }
  0x15   : > { %6557 = vmatpush3.bf16.msra.mxu0 %v7292_v14  ;;  %4652 = vmatprep.mubr.bf16.mxu1 %v5974_v37  ;;  %v7320_v44 = vld [vmem:[%s9537_s1 + $0x108] sm:$0xff]   ;;  %v7325_v49 = vld [vmem:[%s9537_s1 + $0x190] sm:$0xff]   ;;  %v7328_v52 = vld [vmem:[%s9537_s1 + $0x118] sm:$0xff]  }
  0x16   : > { %6579 = vmatpush3.bf16.msra.mxu1 %v7293_v15  ;;  %6558 = vmatprep.subr.bf16.mxu0 %v7294_v16  ;;  %v7321_v45 = vld [vmem:[%s9537_s1 + $0x188] sm:$0xff]   ;;  %v7329_v53 = vld [vmem:[%s9537_s1 + $0x198] sm:$0xff]   ;;  %v7330_v54 = vld [vmem:[%s9537_s1 + $0x160] sm:$0xff]  }
  0x17   : > { %6580 = vmatprep.subr.bf16.mxu1 %v7295_v17  ;;  %v7331_v55 = vld [vmem:[%s9537_s1 + $0x1e0] sm:$0xff]   ;;  %v7334_v58 = vld [vmem:[%s9537_s1 + $0x168] sm:$0xff]   ;;  %v7338_v62 = vld [vmem:[%s9537_s1 + $0x170] sm:$0xff]  }
  0x18   : > { %v7332_v56 = vld [vmem:[%s9537_s1 + $0x120] sm:$0xff]   ;;  %v7335_v59 = vld [vmem:[%s9537_s1 + $0x1e8] sm:$0xff]   ;;  %v7339_v63 = vld [vmem:[%s9537_s1 + $0x1f0] sm:$0xff]  }
  0x19   : > { %6559 = vmatpush3.bf16.msra.mxu0 %v7296_v18  ;;  %v7333_v57 = vld [vmem:[%s9537_s1 + $0x1a0] sm:$0xff]   ;;  %v7336_v60 = vld [vmem:[%s9537_s1 + $0x128] sm:$0xff]   ;;  %v7340_v0 = vld [vmem:[%s9537_s1 + $0x130] sm:$0xff]  }
  0x1a   : > { %6581 = vmatpush3.bf16.msra.mxu1 %v7297_v19  ;;  %6560 = vmatprep.subr.bf16.mxu0 %v7298_v20  ;;  %v7337_v61 = vld [vmem:[%s9537_s1 + $0x1a8] sm:$0xff]   ;;  %v7341_v1 = vld [vmem:[%s9537_s1 + $0x1b0] sm:$0xff]   ;;  %v7342_v2 = vld [vmem:[%s9537_s1 + $0x178] sm:$0xff]  }
  0x1b   : > { %6582 = vmatprep.subr.bf16.mxu1 %v7299_v21  ;;  %v7343_v3 = vld [vmem:[%s9537_s1 + $0x1f8] sm:$0xff]   ;;  %v223_v6 = vld [vmem:[%s8016_s6 + $0x10] sm:$0xff]  ;;  %v7350_v12 = vld [vmem:[%s9537_s1 + $0x240] sm:$0xff]  }
  0x1c   : > { %v7344_v4 = vld [vmem:[%s9537_s1 + $0x138] sm:$0xff]   ;;  %v5975_v7 = vcombine.low %v223_v6, %v223_v6  ;;  %v5976_v8 = vcombine.high %v223_v6, %v223_v6  ;;  %v7351_v13 = vld [vmem:[%s9537_s1 + $0x2c0] sm:$0xff]   ;;  %v7354_v16 = vld [vmem:[%s9537_s1 + $0x248] sm:$0xff]  }
  0x1d   : > { %6561 = vmatpush3.bf16.msra.mxu0 %v7300_v22  ;;  %v7345_v5 = vld [vmem:[%s9537_s1 + $0x1b8] sm:$0xff]   ;;  %v7352_v14 = vld [vmem:[%s9537_s1 + $0x200] sm:$0xff]   ;;  %v7355_v17 = vld [vmem:[%s9537_s1 + $0x2c8] sm:$0xff]  }
  0x1e   : > { %6583 = vmatpush3.bf16.msra.mxu1 %v7301_v23  ;;  %6562 = vmatprep.subr.bf16.mxu0 %v7302_v24  ;;  %v224_v9 = vld [vmem:[%s8016_s6 + $0x18] sm:$0xff]  ;;  %v7353_v15 = vld [vmem:[%s9537_s1 + $0x280] sm:$0xff]   ;;  %v7356_v18 = vld [vmem:[%s9537_s1 + $0x208] sm:$0xff]  }
  0x1f   : > { %6584 = vmatprep.subr.bf16.mxu1 %v7303_v25  ;;  %v5977_v10 = vcombine.low %v224_v9, %v224_v9  ;;  %v5978_v11 = vcombine.high %v224_v9, %v224_v9  ;;  %v7357_v19 = vld [vmem:[%s9537_s1 + $0x288] sm:$0xff]   ;;  %v7358_v20 = vld [vmem:[%s9537_s1 + $0x250] sm:$0xff]   ;;  %v7362_v24 = vld [vmem:[%s9537_s1 + $0x258] sm:$0xff]  }
  0x20   : > { %v7359_v21 = vld [vmem:[%s9537_s1 + $0x2d0] sm:$0xff]   ;;  %v7363_v25 = vld [vmem:[%s9537_s1 + $0x2d8] sm:$0xff]   ;;  %v7370_v32 = vld [vmem:[%s9537_s1 + $0x268] sm:$0xff]  }
  0x21   : > { %6563 = vmatpush3.bf16.msra.mxu0 %v7304_v26  ;;  %v7360_v22 = vld [vmem:[%s9537_s1 + $0x210] sm:$0xff]   ;;  %v7364_v26 = vld [vmem:[%s9537_s1 + $0x218] sm:$0xff]   ;;  %v7371_v33 = vld [vmem:[%s9537_s1 + $0x2e8] sm:$0xff]  }
  0x22   : > { %6585 = vmatpush3.bf16.msra.mxu1 %v7305_v27  ;;  %6564 = vmatprep.subr.bf16.mxu0 %v7306_v28  ;;  %v7361_v23 = vld [vmem:[%s9537_s1 + $0x290] sm:$0xff]   ;;  %v7365_v27 = vld [vmem:[%s9537_s1 + $0x298] sm:$0xff]   ;;  %v7366_v28 = vld [vmem:[%s9537_s1 + $0x260] sm:$0xff]  }
  0x23   : > { %6586 = vmatprep.subr.bf16.mxu1 %v7307_v29  ;;  %v7367_v29 = vld [vmem:[%s9537_s1 + $0x2e0] sm:$0xff]   ;;  %v7373_v35 = vld [vmem:[%s9537_s1 + $0x2a8] sm:$0xff]   ;;  %v7375_v37 = vld [vmem:[%s9537_s1 + $0x2f0] sm:$0xff]  }
  0x24   : > { %v7406_v6 = vld [vmem:[%s9537_s1 + $0x368] sm:$0xff]  }
  0x25   : > { %6565 = vmatpush3.bf16.msra.mxu0 %v7308_v30  ;;  %v7368_v30 = vld [vmem:[%s9537_s1 + $0x220] sm:$0xff]   ;;  %v7409_v9 = vld [vmem:[%s9537_s1 + $0x3a8] sm:$0xff]  }
  0x26   : > { %6587 = vmatpush3.bf16.msra.mxu1 %v7309_v31  ;;  %6594 = vmatprep.subr.bf16.mxu0 %v7314_v38  ;;  %v7369_v31 = vld [vmem:[%s9537_s1 + $0x2a0] sm:$0xff]   ;;  %v7376_v38 = vld [vmem:[%s9537_s1 + $0x230] sm:$0xff]  }
  0x27   : > { %6616 = vmatprep.subr.bf16.mxu1 %v7315_v39  ;;  %v7377_v39 = vld [vmem:[%s9537_s1 + $0x2b0] sm:$0xff]  }
  0x28   : > { %4613 = vmatmul.mubr.bf16.vlgmr.msra.gmra.mrb[0].mxu0 %v5971_v34  ;;  %v7372_v34 = vld [vmem:[%s9537_s1 + $0x228] sm:$0xff]  }
  0x29   : > { %4653 = vmatmul.mubr.bf16.vlgmr.msra.gmra.mrb[0].mxu1 %v5973_v36  ;;  %6595 = vmatpush3.bf16.msra.mxu0 %v7316_v40  ;;  %v7374_v36 = vld [vmem:[%s9537_s1 + $0x270] sm:$0xff]   ;;  %v7378_v40 = vld [vmem:[%s9537_s1 + $0x278] sm:$0xff]  }
  0x2a   : > { %6617 = vmatpush3.bf16.msra.mxu1 %v7317_v41  ;;  %6596 = vmatprep.subr.bf16.mxu0 %v7318_v42  ;;  %v7379_v41 = vld [vmem:[%s9537_s1 + $0x2f8] sm:$0xff]  }
  0x2b   : > { %6618 = vmatprep.subr.bf16.mxu1 %v7319_v43  ;;  %4692 = vmatprep.mubr.bf16.mxu0 %v5976_v8  ;;  %v7380_v42 = vld [vmem:[%s9537_s1 + $0x238] sm:$0xff]   ;;  %v7408_v8 = vld [vmem:[%s9537_s1 + $0x328] sm:$0xff]  }
  0x2c   : > { %4732 = vmatprep.mubr.bf16.mxu1 %v5978_v11  ;;  %v7381_v43 = vld [vmem:[%s9537_s1 + $0x2b8] sm:$0xff]   ;;  %v7411_v11 = vld [vmem:[%s9537_s1 + $0x3f0] sm:$0xff]  }
  0x2d   : > { %6597 = vmatpush3.bf16.msra.mxu0 %v7320_v44  ;;  %v225_v44 = vld [vmem:[%s8016_s6 + $0x20] sm:$0xff] }
  0x2e   : > { %6619 = vmatpush3.bf16.msra.mxu1 %v7321_v45  ;;  %6598 = vmatprep.subr.bf16.mxu0 %v7322_v46  ;;  %v226_v45 = vld [vmem:[%s8016_s6 + $0x28] sm:$0xff]  ;;  %v5979_v46 = vcombine.low %v225_v44, %v225_v44 }
  0x2f   : > { %6620 = vmatprep.subr.bf16.mxu1 %v7323_v47  ;;  %v5980_v47 = vcombine.high %v225_v44, %v225_v44  ;;  %v7442_v44 = vld [vmem:[%s9537_s1 + $0x468] sm:$0xff]  }
  0x31   : > { %6599 = vmatpush3.bf16.msra.mxu0 %v7324_v48  ;;  %v5981_v48 = vcombine.low %v226_v45, %v226_v45 }
  0x32   : > { %6621 = vmatpush3.bf16.msra.mxu1 %v7325_v49  ;;  %6600 = vmatprep.subr.bf16.mxu0 %v7326_v50  ;;  %v5982_v49 = vcombine.high %v226_v45, %v226_v45  ;;  %v7386_v50 = vld [vmem:[%s9537_s1 + $0x340] sm:$0xff]   ;;  %v7443_v45 = vld [vmem:[%s9537_s1 + $0x4e8] sm:$0xff]  }
  0x33   : > { %6622 = vmatprep.subr.bf16.mxu1 %v7327_v51  ;;  %v7387_v51 = vld [vmem:[%s9537_s1 + $0x3c0] sm:$0xff]  }
  0x35   : > { %6601 = vmatpush3.bf16.msra.mxu0 %v7328_v52  ;;  %v7388_v52 = vld [vmem:[%s9537_s1 + $0x300] sm:$0xff]  }
  0x36   : > { %6623 = vmatpush3.bf16.msra.mxu1 %v7329_v53  ;;  %6602 = vmatprep.subr.bf16.mxu0 %v7330_v54  ;;  %v7389_v53 = vld [vmem:[%s9537_s1 + $0x380] sm:$0xff]   ;;  %v7390_v54 = vld [vmem:[%s9537_s1 + $0x348] sm:$0xff]  }
  0x37   : > { %6624 = vmatprep.subr.bf16.mxu1 %v7331_v55  ;;  %v7391_v55 = vld [vmem:[%s9537_s1 + $0x3c8] sm:$0xff]  }
  0x39   : > { %6603 = vmatpush3.bf16.msra.mxu0 %v7332_v56  ;;  %v7392_v56 = vld [vmem:[%s9537_s1 + $0x308] sm:$0xff]  }
  0x3a   : > { %6625 = vmatpush3.bf16.msra.mxu1 %v7333_v57  ;;  %6604 = vmatprep.subr.bf16.mxu0 %v7334_v58  ;;  %v7393_v57 = vld [vmem:[%s9537_s1 + $0x388] sm:$0xff]   ;;  %v7394_v58 = vld [vmem:[%s9537_s1 + $0x350] sm:$0xff]  }
  0x3b   : > { %6626 = vmatprep.subr.bf16.mxu1 %v7335_v59  ;;  %v7395_v59 = vld [vmem:[%s9537_s1 + $0x3d0] sm:$0xff]  }
  0x3d   : > { %6605 = vmatpush3.bf16.msra.mxu0 %v7336_v60  ;;  %v7396_v60 = vld [vmem:[%s9537_s1 + $0x310] sm:$0xff]  }
  0x3e   : > { %6627 = vmatpush3.bf16.msra.mxu1 %v7337_v61  ;;  %6606 = vmatprep.subr.bf16.mxu0 %v7338_v62  ;;  %v7397_v61 = vld [vmem:[%s9537_s1 + $0x390] sm:$0xff]   ;;  %v7398_v62 = vld [vmem:[%s9537_s1 + $0x358] sm:$0xff]  }
  0x3f   : > { %6628 = vmatprep.subr.bf16.mxu1 %v7339_v63  ;;  %v7399_v63 = vld [vmem:[%s9537_s1 + $0x3d8] sm:$0xff]  }
  0x41   : > { %6607 = vmatpush3.bf16.msra.mxu0 %v7340_v0  ;;  %v7400_v0 = vld [vmem:[%s9537_s1 + $0x318] sm:$0xff]  }
  0x42   : > { %6629 = vmatpush3.bf16.msra.mxu1 %v7341_v1  ;;  %6608 = vmatprep.subr.bf16.mxu0 %v7342_v2  ;;  %v7401_v1 = vld [vmem:[%s9537_s1 + $0x398] sm:$0xff]   ;;  %v7402_v2 = vld [vmem:[%s9537_s1 + $0x360] sm:$0xff]  }
  0x43   : > { %6630 = vmatprep.subr.bf16.mxu1 %v7343_v3  ;;  %v7403_v3 = vld [vmem:[%s9537_s1 + $0x3e0] sm:$0xff]  }
  0x45   : > { %6609 = vmatpush3.bf16.msra.mxu0 %v7344_v4  ;;  %v7404_v4 = vld [vmem:[%s9537_s1 + $0x320] sm:$0xff]  }
  0x46   : > { %6631 = vmatpush3.bf16.msra.mxu1 %v7345_v5  ;;  %6638 = vmatprep.subr.bf16.mxu0 %v7350_v12  ;;  %v7405_v5 = vld [vmem:[%s9537_s1 + $0x3a0] sm:$0xff]   ;;  %v7412_v12 = vld [vmem:[%s9537_s1 + $0x330] sm:$0xff]  }
  0x47   : > { %6660 = vmatprep.subr.bf16.mxu1 %v7351_v13  ;;  %v7413_v13 = vld [vmem:[%s9537_s1 + $0x3b0] sm:$0xff]  }
  0x48   : > { %4693 = vmatmul.mubr.bf16.vlgmr.msra.gmra.mrb[4].mxu0 %v5975_v7  ;;  %v7407_v7 = vld [vmem:[%s9537_s1 + $0x3e8] sm:$0xff]  }
  0x49   : > { %4733 = vmatmul.mubr.bf16.vlgmr.msra.gmra.mrb[4].mxu1 %v5977_v10  ;;  %6639 = vmatpush3.bf16.msra.mxu0 %v7352_v14  ;;  %v7410_v10 = vld [vmem:[%s9537_s1 + $0x370] sm:$0xff]   ;;  %v7414_v14 = vld [vmem:[%s9537_s1 + $0x378] sm:$0xff]  }
  0x4a   : > { %6661 = vmatpush3.bf16.msra.mxu1 %v7353_v15  ;;  %6640 = vmatprep.subr.bf16.mxu0 %v7354_v16  ;;  %v7415_v15 = vld [vmem:[%s9537_s1 + $0x3f8] sm:$0xff]  }
  0x4b   : > { %6662 = vmatprep.subr.bf16.mxu1 %v7355_v17  ;;  %4772 = vmatprep.mubr.bf16.mxu0 %v5980_v47  ;;  %v7416_v16 = vld [vmem:[%s9537_s1 + $0x338] sm:$0xff]   ;;  %v7445_v47 = vld [vmem:[%s9537_s1 + $0x4a8] sm:$0xff]  }
  0x4c   : > { %4812 = vmatprep.mubr.bf16.mxu1 %v5982_v49  ;;  %v7417_v17 = vld [vmem:[%s9537_s1 + $0x3b8] sm:$0xff]   ;;  %v7447_v49 = vld [vmem:[%s9537_s1 + $0x4f0] sm:$0xff]  }
  0x4d   : > { %6641 = vmatpush3.bf16.msra.mxu0 %v7356_v18  ;;  %v227_v18 = vld [vmem:[%s8016_s6 + $0x30] sm:$0xff] }
  0x4e   : > { %6663 = vmatpush3.bf16.msra.mxu1 %v7357_v19  ;;  %6642 = vmatprep.subr.bf16.mxu0 %v7358_v20  ;;  %v228_v19 = vld [vmem:[%s8016_s6 + $0x38] sm:$0xff]  ;;  %v5983_v20 = vcombine.low %v227_v18, %v227_v18 }
  0x4f   : > { %6664 = vmatprep.subr.bf16.mxu1 %v7359_v21  ;;  %v5984_v21 = vcombine.high %v227_v18, %v227_v18  ;;  %v7478_v18 = vld [vmem:[%s9537_s1 + $0x568] sm:$0xff]  }
  0x51   : > { %6643 = vmatpush3.bf16.msra.mxu0 %v7360_v22  ;;  %v5985_v22 = vcombine.low %v228_v19, %v228_v19 }
  0x52   : > { %6665 = vmatpush3.bf16.msra.mxu1 %v7361_v23  ;;  %6644 = vmatprep.subr.bf16.mxu0 %v7362_v24  ;;  %v7422_v23 = vld [vmem:[%s9537_s1 + $0x440] sm:$0xff]   ;;  %v5986_v24 = vcombine.high %v228_v19, %v228_v19  ;;  %v7479_v19 = vld [vmem:[%s9537_s1 + $0x5e8] sm:$0xff]  }
  0x53   : > { %6666 = vmatprep.subr.bf16.mxu1 %v7363_v25  ;;  %v7423_v25 = vld [vmem:[%s9537_s1 + $0x4c0] sm:$0xff]  }
  0x55   : > { %6645 = vmatpush3.bf16.msra.mxu0 %v7364_v26  ;;  %v7424_v26 = vld [vmem:[%s9537_s1 + $0x400] sm:$0xff]  }
  0x56   : > { %6667 = vmatpush3.bf16.msra.mxu1 %v7365_v27  ;;  %6646 = vmatprep.subr.bf16.mxu0 %v7366_v28  ;;  %v7425_v27 = vld [vmem:[%s9537_s1 + $0x480] sm:$0xff]   ;;  %v7426_v28 = vld [vmem:[%s9537_s1 + $0x448] sm:$0xff]  }
  0x57   : > { %6668 = vmatprep.subr.bf16.mxu1 %v7367_v29  ;;  %v7427_v29 = vld [vmem:[%s9537_s1 + $0x4c8] sm:$0xff]  }
  0x59   : > { %6647 = vmatpush3.bf16.msra.mxu0 %v7368_v30  ;;  %v7428_v30 = vld [vmem:[%s9537_s1 + $0x408] sm:$0xff]  }
  0x5a   : > { %6669 = vmatpush3.bf16.msra.mxu1 %v7369_v31  ;;  %6648 = vmatprep.subr.bf16.mxu0 %v7370_v32  ;;  %v7429_v31 = vld [vmem:[%s9537_s1 + $0x488] sm:$0xff]   ;;  %v7430_v32 = vld [vmem:[%s9537_s1 + $0x450] sm:$0xff]  }
  0x5b   : > { %6670 = vmatprep.subr.bf16.mxu1 %v7371_v33  ;;  %v7431_v33 = vld [vmem:[%s9537_s1 + $0x4d0] sm:$0xff]  }
  0x5d   : > { %6649 = vmatpush3.bf16.msra.mxu0 %v7372_v34  ;;  %v7432_v34 = vld [vmem:[%s9537_s1 + $0x410] sm:$0xff]  }
  0x5e   : > { %6671 = vmatpush3.bf16.msra.mxu1 %v7373_v35  ;;  %6650 = vmatprep.subr.bf16.mxu0 %v7374_v36  ;;  %v7433_v35 = vld [vmem:[%s9537_s1 + $0x490] sm:$0xff]   ;;  %v7434_v36 = vld [vmem:[%s9537_s1 + $0x458] sm:$0xff]  }
  0x5f   : > { %6672 = vmatprep.subr.bf16.mxu1 %v7375_v37  ;;  %v7435_v37 = vld [vmem:[%s9537_s1 + $0x4d8] sm:$0xff]  }
  0x61   : > { %6651 = vmatpush3.bf16.msra.mxu0 %v7376_v38  ;;  %v7436_v38 = vld [vmem:[%s9537_s1 + $0x418] sm:$0xff]  }
  0x62   : > { %6673 = vmatpush3.bf16.msra.mxu1 %v7377_v39  ;;  %6652 = vmatprep.subr.bf16.mxu0 %v7378_v40  ;;  %v7437_v39 = vld [vmem:[%s9537_s1 + $0x498] sm:$0xff]   ;;  %v7438_v40 = vld [vmem:[%s9537_s1 + $0x460] sm:$0xff]  }
  0x63   : > { %6674 = vmatprep.subr.bf16.mxu1 %v7379_v41  ;;  %v7439_v41 = vld [vmem:[%s9537_s1 + $0x4e0] sm:$0xff]  }
  0x65   : > { %6653 = vmatpush3.bf16.msra.mxu0 %v7380_v42  ;;  %v7440_v42 = vld [vmem:[%s9537_s1 + $0x420] sm:$0xff]  }
  0x66   : > { %6675 = vmatpush3.bf16.msra.mxu1 %v7381_v43  ;;  %6682 = vmatprep.subr.bf16.mxu0 %v7386_v50  ;;  %v7441_v43 = vld [vmem:[%s9537_s1 + $0x4a0] sm:$0xff]   ;;  %v7448_v50 = vld [vmem:[%s9537_s1 + $0x430] sm:$0xff]  }
  0x67   : > { %6704 = vmatprep.subr.bf16.mxu1 %v7387_v51  ;;  %v7449_v51 = vld [vmem:[%s9537_s1 + $0x4b0] sm:$0xff]  }
  0x68   : > { %4773 = vmatmul.mubr.bf16.vlgmr.msra.gmra.mrb[8].mxu0 %v5979_v46  ;;  %v7444_v46 = vld [vmem:[%s9537_s1 + $0x428] sm:$0xff]  }
  0x69   : > { %4813 = vmatmul.mubr.bf16.vlgmr.msra.gmra.mrb[8].mxu1 %v5981_v48  ;;  %6683 = vmatpush3.bf16.msra.mxu0 %v7388_v52  ;;  %v7446_v48 = vld [vmem:[%s9537_s1 + $0x470] sm:$0xff]   ;;  %v7450_v52 = vld [vmem:[%s9537_s1 + $0x478] sm:$0xff]  }
  0x6a   : > { %6705 = vmatpush3.bf16.msra.mxu1 %v7389_v53  ;;  %6684 = vmatprep.subr.bf16.mxu0 %v7390_v54  ;;  %v7451_v53 = vld [vmem:[%s9537_s1 + $0x4f8] sm:$0xff]  }
  0x6b   : > { %6706 = vmatprep.subr.bf16.mxu1 %v7391_v55  ;;  %4852 = vmatprep.mubr.bf16.mxu0 %v5984_v21  ;;  %v7452_v54 = vld [vmem:[%s9537_s1 + $0x438] sm:$0xff]   ;;  %v7481_v21 = vld [vmem:[%s9537_s1 + $0x5a8] sm:$0xff]  }
  0x6c   : > { %4892 = vmatprep.mubr.bf16.mxu1 %v5986_v24  ;;  %v7453_v55 = vld [vmem:[%s9537_s1 + $0x4b8] sm:$0xff]   ;;  %v7484_v24 = vld [vmem:[%s9537_s1 + $0x530] sm:$0xff]  }
  0x6d   : > { %6685 = vmatpush3.bf16.msra.mxu0 %v7392_v56  ;;  %v229_v56 = vld [vmem:[%s8016_s6 + $0x40] sm:$0xff] }
  0x6e   : > { %6707 = vmatpush3.bf16.msra.mxu1 %v7393_v57  ;;  %6686 = vmatprep.subr.bf16.mxu0 %v7394_v58  ;;  %v5987_v57 = vcombine.low %v229_v56, %v229_v56  ;;  %v5988_v58 = vcombine.high %v229_v56, %v229_v56  ;;  %v7514_v56 = vld [vmem:[%s9537_s1 + $0x668] sm:$0xff]  }
  0x6f   : > { %6708 = vmatprep.subr.bf16.mxu1 %v7395_v59  ;;  %v230_v59 = vld [vmem:[%s8016_s6 + $0x48] sm:$0xff] }
  0x71   : > { %6687 = vmatpush3.bf16.msra.mxu0 %v7396_v60  ;;  %v5989_v60 = vcombine.low %v230_v59, %v230_v59 }
  0x72   : > { %6709 = vmatpush3.bf16.msra.mxu1 %v7397_v61  ;;  %6688 = vmatprep.subr.bf16.mxu0 %v7398_v62  ;;  %v5990_v61 = vcombine.high %v230_v59, %v230_v59  ;;  %v7458_v62 = vld [vmem:[%s9537_s1 + $0x540] sm:$0xff]   ;;  %v7517_v59 = vld [vmem:[%s9537_s1 + $0x6a8] sm:$0xff]  }
  0x73   : > { %6710 = vmatprep.subr.bf16.mxu1 %v7399_v63  ;;  %v7459_v63 = vld [vmem:[%s9537_s1 + $0x5c0] sm:$0xff]  }
  0x75   : > { %6689 = vmatpush3.bf16.msra.mxu0 %v7400_v0  ;;  %v7460_v0 = vld [vmem:[%s9537_s1 + $0x500] sm:$0xff]  }
  0x76   : > { %6711 = vmatpush3.bf16.msra.mxu1 %v7401_v1  ;;  %6690 = vmatprep.subr.bf16.mxu0 %v7402_v2  ;;  %v7461_v1 = vld [vmem:[%s9537_s1 + $0x580] sm:$0xff]   ;;  %v7462_v2 = vld [vmem:[%s9537_s1 + $0x548] sm:$0xff]  }
  0x77   : > { %6712 = vmatprep.subr.bf16.mxu1 %v7403_v3  ;;  %v7463_v3 = vld [vmem:[%s9537_s1 + $0x5c8] sm:$0xff]  }
  0x79   : > { %6691 = vmatpush3.bf16.msra.mxu0 %v7404_v4  ;;  %v7464_v4 = vld [vmem:[%s9537_s1 + $0x508] sm:$0xff]  }
  0x7a   : > { %6713 = vmatpush3.bf16.msra.mxu1 %v7405_v5  ;;  %6692 = vmatprep.subr.bf16.mxu0 %v7406_v6  ;;  %v7465_v5 = vld [vmem:[%s9537_s1 + $0x588] sm:$0xff]   ;;  %v7466_v6 = vld [vmem:[%s9537_s1 + $0x550] sm:$0xff]  }
  0x7b   : > { %6714 = vmatprep.subr.bf16.mxu1 %v7407_v7  ;;  %v7467_v7 = vld [vmem:[%s9537_s1 + $0x5d0] sm:$0xff]  }
  0x7d   : > { %6693 = vmatpush3.bf16.msra.mxu0 %v7408_v8  ;;  %v7468_v8 = vld [vmem:[%s9537_s1 + $0x510] sm:$0xff]  }
  0x7e   : > { %6715 = vmatpush3.bf16.msra.mxu1 %v7409_v9  ;;  %6694 = vmatprep.subr.bf16.mxu0 %v7410_v10  ;;  %v7469_v9 = vld [vmem:[%s9537_s1 + $0x590] sm:$0xff]   ;;  %v7470_v10 = vld [vmem:[%s9537_s1 + $0x558] sm:$0xff]  }
  0x7f   : > { %6716 = vmatprep.subr.bf16.mxu1 %v7411_v11  ;;  %v7471_v11 = vld [vmem:[%s9537_s1 + $0x5d8] sm:$0xff]  }
  0x81   : > { %6695 = vmatpush3.bf16.msra.mxu0 %v7412_v12  ;;  %v7472_v12 = vld [vmem:[%s9537_s1 + $0x518] sm:$0xff]  }
  0x82   : > { %6717 = vmatpush3.bf16.msra.mxu1 %v7413_v13  ;;  %6696 = vmatprep.subr.bf16.mxu0 %v7414_v14  ;;  %v7473_v13 = vld [vmem:[%s9537_s1 + $0x598] sm:$0xff]   ;;  %v7474_v14 = vld [vmem:[%s9537_s1 + $0x560] sm:$0xff]  }
  0x83   : > { %6718 = vmatprep.subr.bf16.mxu1 %v7415_v15  ;;  %v7475_v15 = vld [vmem:[%s9537_s1 + $0x5e0] sm:$0xff]  }
  0x85   : > { %6697 = vmatpush3.bf16.msra.mxu0 %v7416_v16  ;;  %v7476_v16 = vld [vmem:[%s9537_s1 + $0x520] sm:$0xff]  }
  0x86   : > { %6719 = vmatpush3.bf16.msra.mxu1 %v7417_v17  ;;  %6726 = vmatprep.subr.bf16.mxu0 %v7422_v23  ;;  %v7477_v17 = vld [vmem:[%s9537_s1 + $0x5a0] sm:$0xff]   ;;  %v7483_v23 = vld [vmem:[%s9537_s1 + $0x5f0] sm:$0xff]  }
  0x87   : > { %6748 = vmatprep.subr.bf16.mxu1 %v7423_v25  ;;  %v7485_v25 = vld [vmem:[%s9537_s1 + $0x5b0] sm:$0xff]  }
  0x88   : > { %4853 = vmatmul.mubr.bf16.vlgmr.msra.gmra.mrb[12].mxu0 %v5983_v20  ;;  %v7480_v20 = vld [vmem:[%s9537_s1 + $0x528] sm:$0xff]  }
  0x89   : > { %4893 = vmatmul.mubr.bf16.vlgmr.msra.gmra.mrb[12].mxu1 %v5985_v22  ;;  %6727 = vmatpush3.bf16.msra.mxu0 %v7424_v26  ;;  %v7482_v22 = vld [vmem:[%s9537_s1 + $0x570] sm:$0xff]   ;;  %v7486_v26 = vld [vmem:[%s9537_s1 + $0x578] sm:$0xff]  }
  0x8a   : > { %6749 = vmatpush3.bf16.msra.mxu1 %v7425_v27  ;;  %6728 = vmatprep.subr.bf16.mxu0 %v7426_v28  ;;  %v7487_v27 = vld [vmem:[%s9537_s1 + $0x5f8] sm:$0xff]  }
  0x8b   : > { %6750 = vmatprep.subr.bf16.mxu1 %v7427_v29  ;;  %4932 = vmatprep.mubr.bf16.mxu0 %v5988_v58  ;;  %v7488_v28 = vld [vmem:[%s9537_s1 + $0x538] sm:$0xff]   ;;  %v7516_v58 = vld [vmem:[%s9537_s1 + $0x628] sm:$0xff]  }
  0x8c   : > { %4972 = vmatprep.mubr.bf16.mxu1 %v5990_v61  ;;  %v7489_v29 = vld [vmem:[%s9537_s1 + $0x5b8] sm:$0xff]   ;;  %v7519_v61 = vld [vmem:[%s9537_s1 + $0x6f0] sm:$0xff]  }
  0x8d   : > { %6729 = vmatpush3.bf16.msra.mxu0 %v7428_v30  ;;  %v231_v30 = vld [vmem:[%s8016_s6 + $0x50] sm:$0xff] }
  0x8e   : > { %6751 = vmatpush3.bf16.msra.mxu1 %v7429_v31  ;;  %6730 = vmatprep.subr.bf16.mxu0 %v7430_v32  ;;  %v232_v31 = vld [vmem:[%s8016_s6 + $0x58] sm:$0xff]  ;;  %v5991_v32 = vcombine.low %v231_v30, %v231_v30 }
  0x8f   : > { %6752 = vmatprep.subr.bf16.mxu1 %v7431_v33  ;;  %v5992_v33 = vcombine.high %v231_v30, %v231_v30  ;;  %v7549_v30 = vld [vmem:[%s9537_s1 + $0x7a0] sm:$0xff]  }
  0x91   : > { %6731 = vmatpush3.bf16.msra.mxu0 %v7432_v34  ;;  %v5993_v34 = vcombine.low %v232_v31, %v232_v31 }
  0x92   : > { %6753 = vmatpush3.bf16.msra.mxu1 %v7433_v35  ;;  %6732 = vmatprep.subr.bf16.mxu0 %v7434_v36  ;;  %v5994_v35 = vcombine.high %v232_v31, %v232_v31  ;;  %v7494_v36 = vld [vmem:[%s9537_s1 + $0x640] sm:$0xff]  }
  0x93   : > { %6754 = vmatprep.subr.bf16.mxu1 %v7435_v37  ;;  %v7495_v37 = vld [vmem:[%s9537_s1 + $0x6c0] sm:$0xff]  }
  0x95   : > { %6733 = vmatpush3.bf16.msra.mxu0 %v7436_v38  ;;  %v7496_v38 = vld [vmem:[%s9537_s1 + $0x600] sm:$0xff]  }
  0x96   : > { %6755 = vmatpush3.bf16.msra.mxu1 %v7437_v39  ;;  %6734 = vmatprep.subr.bf16.mxu0 %v7438_v40  ;;  %v7497_v39 = vld [vmem:[%s9537_s1 + $0x680] sm:$0xff]   ;;  %v7498_v40 = vld [vmem:[%s9537_s1 + $0x648] sm:$0xff]  }
  0x97   : > { %6756 = vmatprep.subr.bf16.mxu1 %v7439_v41  ;;  %v7499_v41 = vld [vmem:[%s9537_s1 + $0x6c8] sm:$0xff]  }
  0x99   : > { %6735 = vmatpush3.bf16.msra.mxu0 %v7440_v42  ;;  %v7500_v42 = vld [vmem:[%s9537_s1 + $0x608] sm:$0xff]  }
  0x9a   : > { %6757 = vmatpush3.bf16.msra.mxu1 %v7441_v43  ;;  %6736 = vmatprep.subr.bf16.mxu0 %v7442_v44  ;;  %v7501_v43 = vld [vmem:[%s9537_s1 + $0x688] sm:$0xff]   ;;  %v7502_v44 = vld [vmem:[%s9537_s1 + $0x650] sm:$0xff]  }
  0x9b   : > { %6758 = vmatprep.subr.bf16.mxu1 %v7443_v45  ;;  %v7503_v45 = vld [vmem:[%s9537_s1 + $0x6d0] sm:$0xff]  }
  0x9d   : > { %6737 = vmatpush3.bf16.msra.mxu0 %v7444_v46  ;;  %v7504_v46 = vld [vmem:[%s9537_s1 + $0x610] sm:$0xff]  }
  0x9e   : > { %6759 = vmatpush3.bf16.msra.mxu1 %v7445_v47  ;;  %6738 = vmatprep.subr.bf16.mxu0 %v7446_v48  ;;  %v7505_v47 = vld [vmem:[%s9537_s1 + $0x690] sm:$0xff]   ;;  %v7506_v48 = vld [vmem:[%s9537_s1 + $0x658] sm:$0xff]  }
  0x9f   : > { %6760 = vmatprep.subr.bf16.mxu1 %v7447_v49  ;;  %v7507_v49 = vld [vmem:[%s9537_s1 + $0x6d8] sm:$0xff]  }
  0xa1   : > { %6739 = vmatpush3.bf16.msra.mxu0 %v7448_v50  ;;  %v7508_v50 = vld [vmem:[%s9537_s1 + $0x618] sm:$0xff]  }
  0xa2   : > { %6761 = vmatpush3.bf16.msra.mxu1 %v7449_v51  ;;  %6740 = vmatprep.subr.bf16.mxu0 %v7450_v52  ;;  %v7509_v51 = vld [vmem:[%s9537_s1 + $0x698] sm:$0xff]   ;;  %v7510_v52 = vld [vmem:[%s9537_s1 + $0x660] sm:$0xff]  }
  0xa3   : > { %6762 = vmatprep.subr.bf16.mxu1 %v7451_v53  ;;  %v7511_v53 = vld [vmem:[%s9537_s1 + $0x6e0] sm:$0xff]  }
  0xa5   : > { %6741 = vmatpush3.bf16.msra.mxu0 %v7452_v54  ;;  %v7512_v54 = vld [vmem:[%s9537_s1 + $0x620] sm:$0xff]  }
  0xa6   : > { %6763 = vmatpush3.bf16.msra.mxu1 %v7453_v55  ;;  %6770 = vmatprep.subr.bf16.mxu0 %v7458_v62  ;;  %v7513_v55 = vld [vmem:[%s9537_s1 + $0x6a0] sm:$0xff]   ;;  %v7520_v62 = vld [vmem:[%s9537_s1 + $0x630] sm:$0xff]  }
  0xa7   : > { %6792 = vmatprep.subr.bf16.mxu1 %v7459_v63  ;;  %v7521_v63 = vld [vmem:[%s9537_s1 + $0x6b0] sm:$0xff]  }
  0xa8   : > { %4933 = vmatmul.mubr.bf16.vlgmr.msra.gmra.mrb[16].mxu0 %v5987_v57  ;;  %v7515_v57 = vld [vmem:[%s9537_s1 + $0x6e8] sm:$0xff]  }
  0xa9   : > { %4973 = vmatmul.mubr.bf16.vlgmr.msra.gmra.mrb[16].mxu1 %v5989_v60  ;;  %6771 = vmatpush3.bf16.msra.mxu0 %v7460_v0  ;;  %v7518_v60 = vld [vmem:[%s9537_s1 + $0x670] sm:$0xff]   ;;  %v7522_v0 = vld [vmem:[%s9537_s1 + $0x678] sm:$0xff]  }
  0xaa   : > { %6793 = vmatpush3.bf16.msra.mxu1 %v7461_v1  ;;  %6772 = vmatprep.subr.bf16.mxu0 %v7462_v2  ;;  %v7523_v1 = vld [vmem:[%s9537_s1 + $0x6f8] sm:$0xff]  }
  0xab   : > { %6794 = vmatprep.subr.bf16.mxu1 %v7463_v3  ;;  %5012 = vmatprep.mubr.bf16.mxu0 %v5992_v33  ;;  %v7524_v2 = vld [vmem:[%s9537_s1 + $0x638] sm:$0xff]  }
  0xac   : > { %5052 = vmatprep.mubr.bf16.mxu1 %v5994_v35  ;;  %v7525_v3 = vld [vmem:[%s9537_s1 + $0x6b8] sm:$0xff]  }
  0xad   : > { %6773 = vmatpush3.bf16.msra.mxu0 %v7464_v4  ;;  %v233_v4 = vld [vmem:[%s8016_s6 + $0x60] sm:$0xff] }
  0xae   : > { %6795 = vmatpush3.bf16.msra.mxu1 %v7465_v5  ;;  %6774 = vmatprep.subr.bf16.mxu0 %v7466_v6  ;;  %v234_v5 = vld [vmem:[%s8016_s6 + $0x68] sm:$0xff]  ;;  %v5995_v6 = vcombine.low %v233_v4, %v233_v4 }
  0xaf   : > { %6796 = vmatprep.subr.bf16.mxu1 %v7467_v7  ;;  %v5996_v7 = vcombine.high %v233_v4, %v233_v4  ;;  %v7573_v4 = vld [vmem:[%s9537_s1 + $0x888] sm:$0xff]  }
  0xb1   : > { %6775 = vmatpush3.bf16.msra.mxu0 %v7468_v8  ;;  %v5997_v8 = vcombine.low %v234_v5, %v234_v5 }
  0xb2   : > { %6797 = vmatpush3.bf16.msra.mxu1 %v7469_v9  ;;  %6776 = vmatprep.subr.bf16.mxu0 %v7470_v10  ;;  %v7530_v9 = vld [vmem:[%s9537_s1 + $0x740] sm:$0xff]   ;;  %v5998_v10 = vcombine.high %v234_v5, %v234_v5  ;;  %v7574_v5 = vld [vmem:[%s9537_s1 + $0x850] sm:$0xff]  }
  0xb3   : > { %6798 = vmatprep.subr.bf16.mxu1 %v7471_v11  ;;  %v7531_v11 = vld [vmem:[%s9537_s1 + $0x7c0] sm:$0xff]  }
  0xb5   : > { %6777 = vmatpush3.bf16.msra.mxu0 %v7472_v12  ;;  %v7532_v12 = vld [vmem:[%s9537_s1 + $0x700] sm:$0xff]  }
  0xb6   : > { %6799 = vmatpush3.bf16.msra.mxu1 %v7473_v13  ;;  %6778 = vmatprep.subr.bf16.mxu0 %v7474_v14  ;;  %v7533_v13 = vld [vmem:[%s9537_s1 + $0x780] sm:$0xff]   ;;  %v7534_v14 = vld [vmem:[%s9537_s1 + $0x748] sm:$0xff]  }
  0xb7   : > { %6800 = vmatprep.subr.bf16.mxu1 %v7475_v15  ;;  %v7535_v15 = vld [vmem:[%s9537_s1 + $0x7c8] sm:$0xff]  }
  0xb9   : > { %6779 = vmatpush3.bf16.msra.mxu0 %v7476_v16  ;;  %v7536_v16 = vld [vmem:[%s9537_s1 + $0x708] sm:$0xff]  }
  0xba   : > { %6801 = vmatpush3.bf16.msra.mxu1 %v7477_v17  ;;  %6780 = vmatprep.subr.bf16.mxu0 %v7478_v18  ;;  %v7537_v17 = vld [vmem:[%s9537_s1 + $0x788] sm:$0xff]   ;;  %v7538_v18 = vld [vmem:[%s9537_s1 + $0x750] sm:$0xff]  }
  0xbb   : > { %6802 = vmatprep.subr.bf16.mxu1 %v7479_v19  ;;  %v7539_v19 = vld [vmem:[%s9537_s1 + $0x7d0] sm:$0xff]  }
  0xbd   : > { %6781 = vmatpush3.bf16.msra.mxu0 %v7480_v20  ;;  %v7540_v20 = vld [vmem:[%s9537_s1 + $0x710] sm:$0xff]  }
  0xbe   : > { %6803 = vmatpush3.bf16.msra.mxu1 %v7481_v21  ;;  %6782 = vmatprep.subr.bf16.mxu0 %v7482_v22  ;;  %v7541_v21 = vld [vmem:[%s9537_s1 + $0x790] sm:$0xff]   ;;  %v7542_v22 = vld [vmem:[%s9537_s1 + $0x758] sm:$0xff]  }
  0xbf   : > { %6804 = vmatprep.subr.bf16.mxu1 %v7483_v23  ;;  %v7543_v23 = vld [vmem:[%s9537_s1 + $0x7d8] sm:$0xff]  }
  0xc1   : > { %6783 = vmatpush3.bf16.msra.mxu0 %v7484_v24  ;;  %v7544_v24 = vld [vmem:[%s9537_s1 + $0x718] sm:$0xff]  }
  0xc2   : > { %6805 = vmatpush3.bf16.msra.mxu1 %v7485_v25  ;;  %6784 = vmatprep.subr.bf16.mxu0 %v7486_v26  ;;  %v7545_v25 = vld [vmem:[%s9537_s1 + $0x798] sm:$0xff]   ;;  %v7546_v26 = vld [vmem:[%s9537_s1 + $0x760] sm:$0xff]  }
  0xc3   : > { %6806 = vmatprep.subr.bf16.mxu1 %v7487_v27  ;;  %v7547_v27 = vld [vmem:[%s9537_s1 + $0x7e0] sm:$0xff]  }
  0xc5   : > { %6785 = vmatpush3.bf16.msra.mxu0 %v7488_v28  ;;  %v7548_v28 = vld [vmem:[%s9537_s1 + $0x720] sm:$0xff]  }
  0xc6   : > { %6807 = vmatpush3.bf16.msra.mxu1 %v7489_v29  ;;  %6814 = vmatprep.subr.bf16.mxu0 %v7494_v36 }
  0xc7   : > { %6836 = vmatprep.subr.bf16.mxu1 %v7495_v37  ;;  %v7550_v37 = vld [vmem:[%s9537_s1 + $0x768] sm:$0xff]  }
  0xc8   : > { %5013 = vmatmul.mubr.bf16.vlgmr.msra.gmra.mrb[20].mxu0 %v5991_v32  ;;  %v5970_v32 = vld [vmem:[%s9538_s2] ss:$0 sm:$0xff] }
  0xc9   : > { %5053 = vmatmul.mubr.bf16.vlgmr.msra.gmra.mrb[20].mxu1 %v5993_v34  ;;  %6815 = vmatpush3.bf16.msra.mxu0 %v7496_v38 }
  0xca   : > { %6837 = vmatpush3.bf16.msra.mxu1 %v7497_v39  ;;  %6816 = vmatprep.subr.bf16.mxu0 %v7498_v40  ;;  %v7551_v39 = vld [vmem:[%s9537_s1 + $0x7e8] sm:$0xff]  }
  0xcb   : > { %6838 = vmatprep.subr.bf16.mxu1 %v7499_v41  ;;  %5092 = vmatprep.mubr.bf16.mxu0 %v5996_v7  ;;  %v7576_v7 = vld [vmem:[%s9537_s1 + $0x810] sm:$0xff]  }
  0xcc   : > { %5132 = vmatprep.mubr.bf16.mxu1 %v5998_v10  ;;  %v7579_v10 = vld [vmem:[%s9537_s1 + $0x8d8] sm:$0xff]  }
  0xcd   : > { %6817 = vmatpush3.bf16.msra.mxu0 %v7500_v42  ;;  %v7552_v42 = vld [vmem:[%s9537_s1 + $0x728] sm:$0xff]  }
  0xce   : > { %6839 = vmatpush3.bf16.msra.mxu1 %v7501_v43  ;;  %6818 = vmatprep.subr.bf16.mxu0 %v7502_v44  ;;  %v7553_v44 = vld [vmem:[%s9537_s1 + $0x7a8] sm:$0xff]  }
  0xcf   : > { %6840 = vmatprep.subr.bf16.mxu1 %v7503_v45 }
  0xd1   : > { %6819 = vmatpush3.bf16.msra.mxu0 %v7504_v46 }
  0xd2   : > { %6841 = vmatpush3.bf16.msra.mxu1 %v7505_v47  ;;  %6820 = vmatprep.subr.bf16.mxu0 %v7506_v48  ;;  %v7554_v47 = vld [vmem:[%s9537_s1 + $0x770] sm:$0xff]  }
  0xd3   : > { %6842 = vmatprep.subr.bf16.mxu1 %v7507_v49  ;;  %v7555_v48 = vld [vmem:[%s9537_s1 + $0x7f0] sm:$0xff]  }
  0xd4   : > { %v7556_v49 = vld [vmem:[%s9537_s1 + $0x730] sm:$0xff]  }
  0xd5   : > { %6821 = vmatpush3.bf16.msra.mxu0 %v7508_v50  ;;  %v7557_v50 = vld [vmem:[%s9537_s1 + $0x7b0] sm:$0xff]  }
  0xd6   : > { %6843 = vmatpush3.bf16.msra.mxu1 %v7509_v51  ;;  %6822 = vmatprep.subr.bf16.mxu0 %v7510_v52  ;;  %v7558_v51 = vld [vmem:[%s9537_s1 + $0x778] sm:$0xff]  }
  0xd7   : > { %6844 = vmatprep.subr.bf16.mxu1 %v7511_v53  ;;  %v7559_v52 = vld [vmem:[%s9537_s1 + $0x7f8] sm:$0xff]  }
  0xd8   : > { %v7560_v53 = vld [vmem:[%s9537_s1 + $0x738] sm:$0xff]  }
  0xd9   : > { %6823 = vmatpush3.bf16.msra.mxu0 %v7512_v54  ;;  %v7561_v54 = vld [vmem:[%s9537_s1 + $0x7b8] sm:$0xff]  }
  0xda   : > { %6845 = vmatpush3.bf16.msra.mxu1 %v7513_v55  ;;  %6824 = vmatprep.subr.bf16.mxu0 %v7514_v56  ;;  %v235_v55 = vld [vmem:[%s8016_s6 + $0x70] sm:$0xff]  ;;  %v236_v56 = vld [vmem:[%s8016_s6 + $0x78] sm:$0xff] }
  0xdb   : > { %6846 = vmatprep.subr.bf16.mxu1 %v7515_v57  ;;  %v5999_v57 = vcombine.low %v235_v55, %v235_v55 }
  0xdd   : > { %6825 = vmatpush3.bf16.msra.mxu0 %v7516_v58  ;;  %v6000_v58 = vcombine.high %v235_v55, %v235_v55  ;;  %v7610_v55 = vld [vmem:[%s9537_s1 + $0x950] sm:$0xff]  }
  0xde   : > { %6847 = vmatpush3.bf16.msra.mxu1 %v7517_v59  ;;  %6826 = vmatprep.subr.bf16.mxu0 %v7518_v60  ;;  %v6001_v59 = vcombine.low %v236_v56, %v236_v56  ;;  %v6002_v60 = vcombine.high %v236_v56, %v236_v56  ;;  %v7611_v56 = vld [vmem:[%s9537_s1 + $0x9d0] sm:$0xff]  }
  0xdf   : > { %6848 = vmatprep.subr.bf16.mxu1 %v7519_v61  ;;  %v7566_v61 = vld [vmem:[%s9537_s1 + $0x840] sm:$0xff]  }
  0xe1   : > { %6827 = vmatpush3.bf16.msra.mxu0 %v7520_v62  ;;  %v7567_v62 = vld [vmem:[%s9537_s1 + $0x8c0] sm:$0xff]  }
  0xe2   : > { %6849 = vmatpush3.bf16.msra.mxu1 %v7521_v63  ;;  %6828 = vmatprep.subr.bf16.mxu0 %v7522_v0  ;;  %v7568_v63 = vld [vmem:[%s9537_s1 + $0x800] sm:$0xff]  }
  0xe3   : > { %6850 = vmatprep.subr.bf16.mxu1 %v7523_v1  ;;  %v7569_v0 = vld [vmem:[%s9537_s1 + $0x880] sm:$0xff]   ;;  %v7570_v1 = vld [vmem:[%s9537_s1 + $0x848] sm:$0xff]  }
  0xe5   : > { %6829 = vmatpush3.bf16.msra.mxu0 %v7524_v2  ;;  %v7571_v2 = vld [vmem:[%s9537_s1 + $0x8c8] sm:$0xff]  }
  0xe6   : > { %6851 = vmatpush3.bf16.msra.mxu1 %v7525_v3  ;;  %6858 = vmatprep.subr.bf16.mxu0 %v7530_v9  ;;  %v7572_v3 = vld [vmem:[%s9537_s1 + $0x808] sm:$0xff]   ;;  %v7578_v9 = vld [vmem:[%s9537_s1 + $0x858] sm:$0xff]  }
  0xe7   : > { %6880 = vmatprep.subr.bf16.mxu1 %v7531_v11  ;;  %v7580_v11 = vld [vmem:[%s9537_s1 + $0x818] sm:$0xff]  }
  0xe8   : > { %5093 = vmatmul.mubr.bf16.vlgmr.msra.gmra.mrb[24].mxu0 %v5995_v6  ;;  %v7575_v6 = vld [vmem:[%s9537_s1 + $0x8d0] sm:$0xff]  }
  0xe9   : > { %5133 = vmatmul.mubr.bf16.vlgmr.msra.gmra.mrb[24].mxu1 %v5997_v8  ;;  %6859 = vmatpush3.bf16.msra.mxu0 %v7532_v12  ;;  %v7577_v8 = vld [vmem:[%s9537_s1 + $0x890] sm:$0xff]   ;;  %v7581_v12 = vld [vmem:[%s9537_s1 + $0x898] sm:$0xff]  }
  0xea   : > { %6881 = vmatpush3.bf16.msra.mxu1 %v7533_v13  ;;  %6860 = vmatprep.subr.bf16.mxu0 %v7534_v14  ;;  %v7582_v13 = vld [vmem:[%s9537_s1 + $0x860] sm:$0xff]  }
  0xeb   : > { %6882 = vmatprep.subr.bf16.mxu1 %v7535_v15  ;;  %5172 = vmatprep.mubr.bf16.mxu0 %v6000_v58  ;;  %v7583_v14 = vld [vmem:[%s9537_s1 + $0x8e0] sm:$0xff]   ;;  %v7613_v58 = vld [vmem:[%s9537_s1 + $0x990] sm:$0xff]  }
  0xec   : > { %5212 = vmatprep.mubr.bf16.mxu1 %v6002_v60  ;;  %v7584_v15 = vld [vmem:[%s9537_s1 + $0x820] sm:$0xff]   ;;  %v7615_v60 = vld [vmem:[%s9537_s1 + $0x9d8] sm:$0xff]  }
  0xed   : > { %6861 = vmatpush3.bf16.msra.mxu0 %v7536_v16 }
  0xee   : > { %6883 = vmatpush3.bf16.msra.mxu1 %v7537_v17  ;;  %6862 = vmatprep.subr.bf16.mxu0 %v7538_v18  ;;  %v7585_v17 = vld [vmem:[%s9537_s1 + $0x8a0] sm:$0xff]  }
  0xef   : > { %6884 = vmatprep.subr.bf16.mxu1 %v7539_v19 }
  0xf1   : > { %6863 = vmatpush3.bf16.msra.mxu0 %v7540_v20 }
  0xf2   : > { %6885 = vmatpush3.bf16.msra.mxu1 %v7541_v21  ;;  %6864 = vmatprep.subr.bf16.mxu0 %v7542_v22 }
  0xf3   : > { %6886 = vmatprep.subr.bf16.mxu1 %v7543_v23  ;;  %v7586_v23 = vld [vmem:[%s9537_s1 + $0x868] sm:$0xff]  }
  0xf5   : > { %6865 = vmatpush3.bf16.msra.mxu0 %v7544_v24 }
  0xf6   : > { %6887 = vmatpush3.bf16.msra.mxu1 %v7545_v25  ;;  %6866 = vmatprep.subr.bf16.mxu0 %v7546_v26  ;;  %v7587_v25 = vld [vmem:[%s9537_s1 + $0x8e8] sm:$0xff]  }
  0xf7   : > { %6888 = vmatprep.subr.bf16.mxu1 %v7547_v27 }
  0xf9   : > { %6867 = vmatpush3.bf16.msra.mxu0 %v7548_v28  ;;  %v7588_v28 = vld [vmem:[%s9537_s1 + $0x828] sm:$0xff]  }
  0xfa   : > { %6889 = vmatpush3.bf16.msra.mxu1 %v7549_v30  ;;  %6868 = vmatprep.subr.bf16.mxu0 %v7550_v37  ;;  %v7589_v30 = vld [vmem:[%s9537_s1 + $0x8a8] sm:$0xff]   ;;  %v7594_v37 = vld [vmem:[%s9537_s1 + $0x878] sm:$0xff]  }
  0xfb   : > { %v6566_v29 = vpop.f32.mrb[0].mxu0  ;;  %6890 = vmatprep.subr.bf16.mxu1 %v7551_v39  ;;  %v7596_v39 = vld [vmem:[%s9537_s1 + $0x838] sm:$0xff]  }
  0xfc   : > { %v6588_v31 = vpop.f32.mrb[0].mxu1  ;;  %v6567_v33 = vpop.f32.mrb[1].mxu0 }
  0xfd   : > { %v6589_v34 = vpop.f32.mrb[1].mxu1  ;;  %v6568_v35 = vadd.f32 %v6567_v33, %v6566_v29  ;;  %v6569_v38 = vpop.f32.mrb[2].mxu0  ;;  %6869 = vmatpush3.bf16.msra.mxu0 %v7552_v42  ;;  %v7590_v33 = vld [vmem:[%s9537_s1 + $0x870] sm:$0xff]   ;;  %v238_v42 = vld [vmem:[%s8016_s6 + $0x88] sm:$0xff] }
  0xfe   : > { %v6590_v36 = vadd.f32 %v6589_v34, %v6588_v31  ;;  %v6591_v40 = vpop.f32.mrb[2].mxu1  ;;  %v6570_v43 = vpop.f32.mrb[3].mxu0  ;;  %6891 = vmatpush3.bf16.msra.mxu1 %v7553_v44  ;;  %6870 = vmatprep.subr.bf16.mxu0 %v7554_v47  ;;  %v7591_v34 = vld [vmem:[%s9537_s1 + $0x8f0] sm:$0xff]   ;;  %v7595_v38 = vld [vmem:[%s9537_s1 + $0x8f8] sm:$0xff]   ;;  %v7602_v47 = vld [vmem:[%s9537_s1 + $0x940] sm:$0xff]  }
  0xff   : > { %v4615_v41 = vadd.f32 %v6568_v35, %v5970_v32  ;;  %v6592_v45 = vpop.f32.mrb[3].mxu1  ;;  %6892 = vmatprep.subr.bf16.mxu1 %v7555_v48  ;;  %v7592_v35 = vld [vmem:[%s9537_s1 + $0x830] sm:$0xff]   ;;  %v7597_v40 = vld [vmem:[%s9537_s1 + $0x8b8] sm:$0xff]   ;;  %v7603_v48 = vld [vmem:[%s9537_s1 + $0x9c0] sm:$0xff]  }
 0x100   : > { %v6005_v45 = vcombine.low %v238_v42, %v238_v42 }
 0x101   : > { %v8689_v46 = vadd.f32 %v6590_v36, %v4615_v41  ;;  %6871 = vmatpush3.bf16.msra.mxu0 %v7556_v49  ;;  %v7593_v36 = vld [vmem:[%s9537_s1 + $0x8b0] sm:$0xff]   ;;  %v237_v41 = vld [vmem:[%s8016_s6 + $0x80] sm:$0xff] }
 0x102   : > { %6893 = vmatpush3.bf16.msra.mxu1 %v7557_v50  ;;  %6872 = vmatprep.subr.bf16.mxu0 %v7558_v51  ;;  %v6003_v43 = vcombine.low %v237_v41, %v237_v41  ;;  %v6004_v44 = vcombine.high %v237_v41, %v237_v41  ;;  %v7604_v49 = vld [vmem:[%s9537_s1 + $0x900] sm:$0xff]   ;;  %v7606_v51 = vld [vmem:[%s9537_s1 + $0x948] sm:$0xff]   ;;  %v7646_v41 = vld [vmem:[%s9537_s1 + $0xa50] sm:$0xff]  }
 0x103   : > { %6894 = vmatprep.subr.bf16.mxu1 %v7559_v52  ;;  %v7605_v50 = vld [vmem:[%s9537_s1 + $0x980] sm:$0xff]   ;;  %v7607_v52 = vld [vmem:[%s9537_s1 + $0x9c8] sm:$0xff]  }
 0x105   : > { %6873 = vmatpush3.bf16.msra.mxu0 %v7560_v53  ;;  %v7608_v53 = vld [vmem:[%s9537_s1 + $0x908] sm:$0xff]  }
 0x106   : > { %6895 = vmatpush3.bf16.msra.mxu1 %v7561_v54  ;;  %6902 = vmatprep.subr.bf16.mxu0 %v7566_v61  ;;  %v7609_v54 = vld [vmem:[%s9537_s1 + $0x988] sm:$0xff]   ;;  %v7616_v61 = vld [vmem:[%s9537_s1 + $0x918] sm:$0xff]  }
 0x107   : > { %6924 = vmatprep.subr.bf16.mxu1 %v7567_v62  ;;  %v7617_v62 = vld [vmem:[%s9537_s1 + $0x998] sm:$0xff]  }
 0x108   : > { %5173 = vmatmul.mubr.bf16.vlgmr.msra.gmra.mrb[28].mxu0 %v5999_v57  ;;  %v7612_v57 = vld [vmem:[%s9537_s1 + $0x910] sm:$0xff]  }
 0x109   : > { %5213 = vmatmul.mubr.bf16.vlgmr.msra.gmra.mrb[28].mxu1 %v6001_v59  ;;  %6903 = vmatpush3.bf16.msra.mxu0 %v7568_v63  ;;  %v7614_v59 = vld [vmem:[%s9537_s1 + $0x958] sm:$0xff]   ;;  %v7618_v63 = vld [vmem:[%s9537_s1 + $0x960] sm:$0xff]  }
 0x10a   : > { %6925 = vmatpush3.bf16.msra.mxu1 %v7569_v0  ;;  %6904 = vmatprep.subr.bf16.mxu0 %v7570_v1  ;;  %v7619_v0 = vld [vmem:[%s9537_s1 + $0x9e0] sm:$0xff]  }
 0x10b   : > { %6926 = vmatprep.subr.bf16.mxu1 %v7571_v2  ;;  %5252 = vmatprep.mubr.bf16.mxu0 %v6004_v44  ;;  %v7620_v2 = vld [vmem:[%s9537_s1 + $0x920] sm:$0xff]   ;;  %v7649_v44 = vld [vmem:[%s9537_s1 + $0xa90] sm:$0xff]  }
 0x10d   : > { %6905 = vmatpush3.bf16.msra.mxu0 %v7572_v3 }
 0x10e   : > { %6927 = vmatpush3.bf16.msra.mxu1 %v7573_v4  ;;  %6906 = vmatprep.subr.bf16.mxu0 %v7574_v5  ;;  %v7621_v4 = vld [vmem:[%s9537_s1 + $0x9a0] sm:$0xff]  }
 0x10f   : > { %6928 = vmatprep.subr.bf16.mxu1 %v7575_v6 }
 0x111   : > { %6907 = vmatpush3.bf16.msra.mxu0 %v7576_v7 }
 0x112   : > { %6929 = vmatpush3.bf16.msra.mxu1 %v7577_v8  ;;  %6908 = vmatprep.subr.bf16.mxu0 %v7578_v9  ;;  %v7622_v8 = vld [vmem:[%s9537_s1 + $0x968] sm:$0xff]  }
 0x113   : > { %6930 = vmatprep.subr.bf16.mxu1 %v7579_v10  ;;  %v7623_v10 = vld [vmem:[%s9537_s1 + $0x9e8] sm:$0xff]  }
 0x115   : > { %6909 = vmatpush3.bf16.msra.mxu0 %v7580_v11 }
 0x116   : > { %6931 = vmatpush3.bf16.msra.mxu1 %v7581_v12  ;;  %6910 = vmatprep.subr.bf16.mxu0 %v7582_v13 }
 0x117   : > { %6932 = vmatprep.subr.bf16.mxu1 %v7583_v14  ;;  %v7624_v14 = vld [vmem:[%s9537_s1 + $0x928] sm:$0xff]  }
 0x119   : > { %6911 = vmatpush3.bf16.msra.mxu0 %v7584_v15  ;;  %v7625_v15 = vld [vmem:[%s9537_s1 + $0x9a8] sm:$0xff]  }
 0x11a   : > { %6933 = vmatpush3.bf16.msra.mxu1 %v7585_v17  ;;  %6912 = vmatprep.subr.bf16.mxu0 %v7586_v23  ;;  %v7630_v23 = vld [vmem:[%s9537_s1 + $0x978] sm:$0xff]  }
 0x11b   : > { %v6610_v16 = vpop.f32.mrb[4].mxu0  ;;  %6934 = vmatprep.subr.bf16.mxu1 %v7587_v25  ;;  %v7632_v25 = vld [vmem:[%s9537_s1 + $0x938] sm:$0xff]  }
 0x11c   : > { %v6632_v18 = vpop.f32.mrb[4].mxu1  ;;  %v6611_v19 = vpop.f32.mrb[5].mxu0 }
 0x11d   : > { %v6633_v20 = vpop.f32.mrb[5].mxu1  ;;  %v6612_v21 = vadd.f32 %v6611_v19, %v6610_v16  ;;  %v6613_v24 = vpop.f32.mrb[6].mxu0  ;;  %6913 = vmatpush3.bf16.msra.mxu0 %v7588_v28  ;;  %v7626_v19 = vld [vmem:[%s9537_s1 + $0x970] sm:$0xff]   ;;  %v240_v28 = vld [vmem:[%s8016_s6 + $0x98] sm:$0xff] }
 0x11e   : > { %v6634_v22 = vadd.f32 %v6633_v20, %v6632_v18  ;;  %v6635_v26 = vpop.f32.mrb[6].mxu1  ;;  %v6614_v29 = vpop.f32.mrb[7].mxu0  ;;  %6935 = vmatpush3.bf16.msra.mxu1 %v7589_v30  ;;  %6914 = vmatprep.subr.bf16.mxu0 %v7590_v33  ;;  %v7627_v20 = vld [vmem:[%s9537_s1 + $0x9f0] sm:$0xff]   ;;  %v7631_v24 = vld [vmem:[%s9537_s1 + $0x9f8] sm:$0xff]   ;;  %v6010_v33 = vcombine.high %v240_v28, %v240_v28 }
 0x11f   : > { %v4695_v27 = vadd.f32 %v6612_v21, %v8689_v46  ;;  %v6636_v31 = vpop.f32.mrb[7].mxu1  ;;  %6936 = vmatprep.subr.bf16.mxu1 %v7591_v34  ;;  %v6006_v46 = vcombine.high %v238_v42, %v238_v42  ;;  %v7628_v21 = vld [vmem:[%s9537_s1 + $0x930] sm:$0xff]   ;;  %v7633_v26 = vld [vmem:[%s9537_s1 + $0x9b8] sm:$0xff]   ;;  %v7639_v34 = vld [vmem:[%s9537_s1 + $0xac0] sm:$0xff]  }
 0x120   : > { %v6009_v31 = vcombine.low %v240_v28, %v240_v28  ;;  %v7647_v42 = vld [vmem:[%s9537_s1 + $0xad0] sm:$0xff]  }
 0x121   : > { %v8790_v32 = vadd.f32 %v6634_v22, %v4695_v27  ;;  %6915 = vmatpush3.bf16.msra.mxu0 %v7592_v35  ;;  %5292 = vmatprep.mubr.bf16.mxu1 %v6006_v46  ;;  %v7629_v22 = vld [vmem:[%s9537_s1 + $0x9b0] sm:$0xff]   ;;  %v7640_v35 = vld [vmem:[%s9537_s1 + $0xa00] sm:$0xff]   ;;  %v7651_v46 = vld [vmem:[%s9537_s1 + $0xad8] sm:$0xff]  }
 0x122   : > { %6937 = vmatpush3.bf16.msra.mxu1 %v7593_v36  ;;  %6916 = vmatprep.subr.bf16.mxu0 %v7594_v37  ;;  %v239_v27 = vld [vmem:[%s8016_s6 + $0x90] sm:$0xff]  ;;  %v7641_v36 = vld [vmem:[%s9537_s1 + $0xa80] sm:$0xff]   ;;  %v7642_v37 = vld [vmem:[%s9537_s1 + $0xa48] sm:$0xff]  }
 0x123   : > { %6938 = vmatprep.subr.bf16.mxu1 %v7595_v38  ;;  %v6007_v29 = vcombine.low %v239_v27, %v239_v27  ;;  %v6008_v30 = vcombine.high %v239_v27, %v239_v27  ;;  %v7643_v38 = vld [vmem:[%s9537_s1 + $0xac8] sm:$0xff]   ;;  %v7682_v27 = vld [vmem:[%s9537_s1 + $0xb50] sm:$0xff]  }
 0x124   : > { %v7683_v28 = vld [vmem:[%s9537_s1 + $0xbd0] sm:$0xff]  }
 0x125   : > { %6917 = vmatpush3.bf16.msra.mxu0 %v7596_v39  ;;  %v7644_v39 = vld [vmem:[%s9537_s1 + $0xa08] sm:$0xff]  }
 0x126   : > { %6939 = vmatpush3.bf16.msra.mxu1 %v7597_v40  ;;  %6946 = vmatprep.subr.bf16.mxu0 %v7602_v47  ;;  %v7645_v40 = vld [vmem:[%s9537_s1 + $0xa88] sm:$0xff]   ;;  %v7652_v47 = vld [vmem:[%s9537_s1 + $0xa18] sm:$0xff]  }
 0x127   : > { %6968 = vmatprep.subr.bf16.mxu1 %v7603_v48  ;;  %v7653_v48 = vld [vmem:[%s9537_s1 + $0xa98] sm:$0xff]  }
 0x128   : > { %5253 = vmatmul.mubr.bf16.vlgmr.msra.gmra.mrb[32].mxu0 %v6003_v43  ;;  %v7648_v43 = vld [vmem:[%s9537_s1 + $0xa10] sm:$0xff]  }
 0x129   : > { %5293 = vmatmul.mubr.bf16.vlgmr.msra.gmra.mrb[32].mxu1 %v6005_v45  ;;  %6947 = vmatpush3.bf16.msra.mxu0 %v7604_v49  ;;  %v7650_v45 = vld [vmem:[%s9537_s1 + $0xa58] sm:$0xff]   ;;  %v7654_v49 = vld [vmem:[%s9537_s1 + $0xa60] sm:$0xff]  }
 0x12a   : > { %6969 = vmatpush3.bf16.msra.mxu1 %v7605_v50  ;;  %6948 = vmatprep.subr.bf16.mxu0 %v7606_v51  ;;  %v7655_v50 = vld [vmem:[%s9537_s1 + $0xae0] sm:$0xff]  }
 0x12b   : > { %6970 = vmatprep.subr.bf16.mxu1 %v7607_v52  ;;  %5332 = vmatprep.mubr.bf16.mxu0 %v6008_v30  ;;  %v7656_v52 = vld [vmem:[%s9537_s1 + $0xa20] sm:$0xff]   ;;  %v7685_v30 = vld [vmem:[%s9537_s1 + $0xb90] sm:$0xff]  }
 0x12c   : > { %5372 = vmatprep.mubr.bf16.mxu1 %v6010_v33  ;;  %v7688_v33 = vld [vmem:[%s9537_s1 + $0xb18] sm:$0xff]  }
 0x12d   : > { %6949 = vmatpush3.bf16.msra.mxu0 %v7608_v53 }
 0x12e   : > { %6971 = vmatpush3.bf16.msra.mxu1 %v7609_v54  ;;  %6950 = vmatprep.subr.bf16.mxu0 %v7610_v55  ;;  %v7657_v54 = vld [vmem:[%s9537_s1 + $0xaa0] sm:$0xff]  }
 0x12f   : > { %6972 = vmatprep.subr.bf16.mxu1 %v7611_v56 }
 0x131   : > { %6951 = vmatpush3.bf16.msra.mxu0 %v7612_v57  ;;  %v7658_v57 = vld [vmem:[%s9537_s1 + $0xa68] sm:$0xff]  }
 0x132   : > { %6973 = vmatpush3.bf16.msra.mxu1 %v7613_v58  ;;  %6952 = vmatprep.subr.bf16.mxu0 %v7614_v59 }
 0x133   : > { %6974 = vmatprep.subr.bf16.mxu1 %v7615_v60  ;;  %v7659_v60 = vld [vmem:[%s9537_s1 + $0xae8] sm:$0xff]  }
 0x135   : > { %6953 = vmatpush3.bf16.msra.mxu0 %v7616_v61 }
 0x136   : > { %6975 = vmatpush3.bf16.msra.mxu1 %v7617_v62  ;;  %6954 = vmatprep.subr.bf16.mxu0 %v7618_v63  ;;  %v7660_v63 = vld [vmem:[%s9537_s1 + $0xa28] sm:$0xff]  }
 0x137   : > { %6976 = vmatprep.subr.bf16.mxu1 %v7619_v0 }
 0x139   : > { %6955 = vmatpush3.bf16.msra.mxu0 %v7620_v2 }
 0x13a   : > { %6977 = vmatpush3.bf16.msra.mxu1 %v7621_v4  ;;  %6956 = vmatprep.subr.bf16.mxu0 %v7622_v8  ;;  %v7662_v4 = vld [vmem:[%s9537_s1 + $0xa70] sm:$0xff]  }
 0x13b   : > { %v6654_v1 = vpop.f32.mrb[8].mxu0  ;;  %6978 = vmatprep.subr.bf16.mxu1 %v7623_v10  ;;  %v7665_v8 = vld [vmem:[%s9537_s1 + $0xab0] sm:$0xff]   ;;  %v7667_v10 = vld [vmem:[%s9537_s1 + $0xaf8] sm:$0xff]  }
 0x13c   : > { %v6676_v3 = vpop.f32.mrb[8].mxu1  ;;  %v6655_v5 = vpop.f32.mrb[9].mxu0 }
 0x13d   : > { %v6656_v6 = vadd.f32 %v6655_v5, %v6654_v1  ;;  %v6677_v7 = vpop.f32.mrb[9].mxu1  ;;  %v6657_v11 = vpop.f32.mrb[10].mxu0  ;;  %6957 = vmatpush3.bf16.msra.mxu0 %v7624_v14  ;;  %v7661_v1 = vld [vmem:[%s9537_s1 + $0xaa8] sm:$0xff]  }
 0x13e   : > { %v6678_v9 = vadd.f32 %v6677_v7, %v6676_v3  ;;  %v6679_v13 = vpop.f32.mrb[10].mxu1  ;;  %v6658_v16 = vpop.f32.mrb[11].mxu0  ;;  %6979 = vmatpush3.bf16.msra.mxu1 %v7625_v15  ;;  %6958 = vmatprep.subr.bf16.mxu0 %v7626_v19  ;;  %v7664_v7 = vld [vmem:[%s9537_s1 + $0xa30] sm:$0xff]   ;;  %v7668_v11 = vld [vmem:[%s9537_s1 + $0xa38] sm:$0xff]   ;;  %v7674_v19 = vld [vmem:[%s9537_s1 + $0xb40] sm:$0xff]  }
 0x13f   : > { %v4775_v12 = vadd.f32 %v6656_v6, %v8790_v32  ;;  %v6680_v18 = vpop.f32.mrb[11].mxu1  ;;  %6980 = vmatprep.subr.bf16.mxu1 %v7627_v20  ;;  %v7638_v32 = vld [vmem:[%s9537_s1 + $0xa40] sm:$0xff]   ;;  %v7663_v6 = vld [vmem:[%s9537_s1 + $0xaf0] sm:$0xff]   ;;  %v242_v16 = vld [vmem:[%s8016_s6 + $0xa8] sm:$0xff] }
 0x140   : > { %v241_v13 = vld [vmem:[%s8016_s6 + $0xa0] sm:$0xff]  ;;  %v6014_v18 = vcombine.high %v242_v16, %v242_v16 }
 0x141   : > { %v8891_v17 = vadd.f32 %v6678_v9, %v4775_v12  ;;  %6959 = vmatpush3.bf16.msra.mxu0 %v7628_v21  ;;  %v7666_v9 = vld [vmem:[%s9537_s1 + $0xa78] sm:$0xff]   ;;  %v6011_v14 = vcombine.low %v241_v13, %v241_v13  ;;  %v6012_v15 = vcombine.high %v241_v13, %v241_v13  ;;  %v7675_v20 = vld [vmem:[%s9537_s1 + $0xbc0] sm:$0xff]   ;;  %v7718_v13 = vld [vmem:[%s9537_s1 + $0xc50] sm:$0xff]  }
 0x142   : > { %6981 = vmatpush3.bf16.msra.mxu1 %v7629_v22  ;;  %6960 = vmatprep.subr.bf16.mxu0 %v7630_v23  ;;  %v7669_v12 = vld [vmem:[%s9537_s1 + $0xab8] sm:$0xff]   ;;  %v7676_v21 = vld [vmem:[%s9537_s1 + $0xb00] sm:$0xff]   ;;  %v7678_v23 = vld [vmem:[%s9537_s1 + $0xb48] sm:$0xff]  }
 0x143   : > { %6982 = vmatprep.subr.bf16.mxu1 %v7631_v24  ;;  %v7677_v22 = vld [vmem:[%s9537_s1 + $0xb80] sm:$0xff]   ;;  %v7679_v24 = vld [vmem:[%s9537_s1 + $0xbc8] sm:$0xff]  }
 0x145   : > { %6961 = vmatpush3.bf16.msra.mxu0 %v7632_v25  ;;  %v7680_v25 = vld [vmem:[%s9537_s1 + $0xb08] sm:$0xff]  }
 0x146   : > { %6983 = vmatpush3.bf16.msra.mxu1 %v7633_v26  ;;  %6990 = vmatprep.subr.bf16.mxu0 %v7638_v32  ;;  %v7681_v26 = vld [vmem:[%s9537_s1 + $0xb88] sm:$0xff]   ;;  %v7687_v32 = vld [vmem:[%s9537_s1 + $0xbd8] sm:$0xff]  }
 0x147   : > { %7012 = vmatprep.subr.bf16.mxu1 %v7639_v34  ;;  %v7689_v34 = vld [vmem:[%s9537_s1 + $0xb98] sm:$0xff]  }
 0x148   : > { %5333 = vmatmul.mubr.bf16.vlgmr.msra.gmra.mrb[36].mxu0 %v6007_v29  ;;  %v7684_v29 = vld [vmem:[%s9537_s1 + $0xb10] sm:$0xff]  }
 0x149   : > { %5373 = vmatmul.mubr.bf16.vlgmr.msra.gmra.mrb[36].mxu1 %v6009_v31  ;;  %6991 = vmatpush3.bf16.msra.mxu0 %v7640_v35  ;;  %v7686_v31 = vld [vmem:[%s9537_s1 + $0xb58] sm:$0xff]   ;;  %v7690_v35 = vld [vmem:[%s9537_s1 + $0xb60] sm:$0xff]  }
 0x14a   : > { %7013 = vmatpush3.bf16.msra.mxu1 %v7641_v36  ;;  %6992 = vmatprep.subr.bf16.mxu0 %v7642_v37  ;;  %v7691_v36 = vld [vmem:[%s9537_s1 + $0xbe0] sm:$0xff]  }
 0x14b   : > { %7014 = vmatprep.subr.bf16.mxu1 %v7643_v38  ;;  %5412 = vmatprep.mubr.bf16.mxu0 %v6012_v15  ;;  %v7692_v38 = vld [vmem:[%s9537_s1 + $0xb20] sm:$0xff]   ;;  %v7720_v15 = vld [vmem:[%s9537_s1 + $0xc10] sm:$0xff]  }
 0x14c   : > { %5452 = vmatprep.mubr.bf16.mxu1 %v6014_v18  ;;  %v7723_v18 = vld [vmem:[%s9537_s1 + $0xcd8] sm:$0xff]  }
 0x14d   : > { %6993 = vmatpush3.bf16.msra.mxu0 %v7644_v39 }
 0x14e   : > { %7015 = vmatpush3.bf16.msra.mxu1 %v7645_v40  ;;  %6994 = vmatprep.subr.bf16.mxu0 %v7646_v41  ;;  %v7693_v40 = vld [vmem:[%s9537_s1 + $0xba0] sm:$0xff]  }
 0x14f   : > { %7016 = vmatprep.subr.bf16.mxu1 %v7647_v42 }
 0x151   : > { %6995 = vmatpush3.bf16.msra.mxu0 %v7648_v43  ;;  %v7694_v43 = vld [vmem:[%s9537_s1 + $0xb68] sm:$0xff]  }
 0x152   : > { %7017 = vmatpush3.bf16.msra.mxu1 %v7649_v44  ;;  %6996 = vmatprep.subr.bf16.mxu0 %v7650_v45 }
 0x153   : > { %7018 = vmatprep.subr.bf16.mxu1 %v7651_v46  ;;  %v7695_v46 = vld [vmem:[%s9537_s1 + $0xbe8] sm:$0xff]  }
 0x155   : > { %6997 = vmatpush3.bf16.msra.mxu0 %v7652_v47 }
 0x156   : > { %7019 = vmatpush3.bf16.msra.mxu1 %v7653_v48  ;;  %6998 = vmatprep.subr.bf16.mxu0 %v7654_v49  ;;  %v7696_v49 = vld [vmem:[%s9537_s1 + $0xb28] sm:$0xff]  }
 0x157   : > { %7020 = vmatprep.subr.bf16.mxu1 %v7655_v50 }
 0x159   : > { %6999 = vmatpush3.bf16.msra.mxu0 %v7656_v52 }
 0x15a   : > { %7021 = vmatpush3.bf16.msra.mxu1 %v7657_v54  ;;  %7000 = vmatprep.subr.bf16.mxu0 %v7658_v57  ;;  %v7698_v54 = vld [vmem:[%s9537_s1 + $0xb70] sm:$0xff]  }
 0x15b   : > { %v6698_v51 = vpop.f32.mrb[12].mxu0  ;;  %7022 = vmatprep.subr.bf16.mxu1 %v7659_v60  ;;  %v7700_v57 = vld [vmem:[%s9537_s1 + $0xb30] sm:$0xff]   ;;  %v7703_v60 = vld [vmem:[%s9537_s1 + $0xbf8] sm:$0xff]  }
 0x15c   : > { %v6720_v53 = vpop.f32.mrb[12].mxu1  ;;  %v6699_v55 = vpop.f32.mrb[13].mxu0 }
 0x15d   : > { %v6721_v56 = vpop.f32.mrb[13].mxu1  ;;  %v6700_v58 = vadd.f32 %v6699_v55, %v6698_v51  ;;  %v6701_v61 = vpop.f32.mrb[14].mxu0  ;;  %7001 = vmatpush3.bf16.msra.mxu0 %v7660_v63  ;;  %v7697_v51 = vld [vmem:[%s9537_s1 + $0xba8] sm:$0xff]   ;;  %v243_v63 = vld [vmem:[%s8016_s6 + $0xb0] sm:$0xff] }
 0x15e   : > { %v6722_v59 = vadd.f32 %v6721_v56, %v6720_v53  ;;  %v6723_v62 = vpop.f32.mrb[14].mxu1  ;;  %v6702_v2 = vpop.f32.mrb[15].mxu0  ;;  %7023 = vmatpush3.bf16.msra.mxu1 %v7661_v1  ;;  %7002 = vmatprep.subr.bf16.mxu0 %v7662_v4  ;;  %v7699_v56 = vld [vmem:[%s9537_s1 + $0xbf0] sm:$0xff]   ;;  %v7704_v61 = vld [vmem:[%s9537_s1 + $0xb38] sm:$0xff]   ;;  %v6015_v1 = vcombine.low %v243_v63, %v243_v63 }
 0x15f   : > { %v4855_v0 = vadd.f32 %v6700_v58, %v8891_v17  ;;  %v6724_v3 = vpop.f32.mrb[15].mxu1  ;;  %7024 = vmatprep.subr.bf16.mxu1 %v7663_v6  ;;  %v6013_v17 = vcombine.low %v242_v16, %v242_v16  ;;  %v7701_v58 = vld [vmem:[%s9537_s1 + $0xbb0] sm:$0xff]   ;;  %v7705_v62 = vld [vmem:[%s9537_s1 + $0xbb8] sm:$0xff]   ;;  %v6016_v2 = vcombine.high %v243_v63, %v243_v63  ;;  %v7711_v6 = vld [vmem:[%s9537_s1 + $0xcc0] sm:$0xff]  }
 0x160   : > { %v7721_v16 = vld [vmem:[%s9537_s1 + $0xc90] sm:$0xff]  }
 0x161   : > { %v8995_v5 = vadd.f32 %v6722_v59, %v4855_v0  ;;  %7003 = vmatpush3.bf16.msra.mxu0 %v7664_v7  ;;  %v7702_v59 = vld [vmem:[%s9537_s1 + $0xb78] sm:$0xff]   ;;  %v7712_v7 = vld [vmem:[%s9537_s1 + $0xc00] sm:$0xff]   ;;  %v7754_v63 = vld [vmem:[%s9537_s1 + $0xd50] sm:$0xff]  }
 0x162   : > { %7025 = vmatpush3.bf16.msra.mxu1 %v7665_v8  ;;  %7004 = vmatprep.subr.bf16.mxu0 %v7666_v9  ;;  %v244_v0 = vld [vmem:[%s8016_s6 + $0xb8] sm:$0xff]  ;;  %v7713_v8 = vld [vmem:[%s9537_s1 + $0xc80] sm:$0xff]   ;;  %v7714_v9 = vld [vmem:[%s9537_s1 + $0xc48] sm:$0xff]  }
 0x163   : > { %7026 = vmatprep.subr.bf16.mxu1 %v7667_v10  ;;  %v6017_v3 = vcombine.low %v244_v0, %v244_v0  ;;  %v6018_v4 = vcombine.high %v244_v0, %v244_v0  ;;  %v7715_v10 = vld [vmem:[%s9537_s1 + $0xcc8] sm:$0xff]   ;;  %v7755_v0 = vld [vmem:[%s9537_s1 + $0xdd0] sm:$0xff]  }
 0x165   : > { %7005 = vmatpush3.bf16.msra.mxu0 %v7668_v11  ;;  %v7716_v11 = vld [vmem:[%s9537_s1 + $0xc08] sm:$0xff]  }
 0x166   : > { %7027 = vmatpush3.bf16.msra.mxu1 %v7669_v12  ;;  %7034 = vmatprep.subr.bf16.mxu0 %v7674_v19  ;;  %v7717_v12 = vld [vmem:[%s9537_s1 + $0xc88] sm:$0xff]   ;;  %v7724_v19 = vld [vmem:[%s9537_s1 + $0xc18] sm:$0xff]  }
 0x167   : > { %7056 = vmatprep.subr.bf16.mxu1 %v7675_v20  ;;  %v7725_v20 = vld [vmem:[%s9537_s1 + $0xc98] sm:$0xff]  }
 0x168   : > { %5413 = vmatmul.mubr.bf16.vlgmr.msra.gmra.mrb[40].mxu0 %v6011_v14  ;;  %v7719_v14 = vld [vmem:[%s9537_s1 + $0xcd0] sm:$0xff]  }
 0x169   : > { %5453 = vmatmul.mubr.bf16.vlgmr.msra.gmra.mrb[40].mxu1 %v6013_v17  ;;  %7035 = vmatpush3.bf16.msra.mxu0 %v7676_v21  ;;  %v7722_v17 = vld [vmem:[%s9537_s1 + $0xc58] sm:$0xff]   ;;  %v7726_v21 = vld [vmem:[%s9537_s1 + $0xc60] sm:$0xff]  }
 0x16a   : > { %7057 = vmatpush3.bf16.msra.mxu1 %v7677_v22  ;;  %7036 = vmatprep.subr.bf16.mxu0 %v7678_v23  ;;  %v7727_v22 = vld [vmem:[%s9537_s1 + $0xce0] sm:$0xff]  }
 0x16b   : > { %7058 = vmatprep.subr.bf16.mxu1 %v7679_v24  ;;  %5492 = vmatprep.mubr.bf16.mxu0 %v6016_v2  ;;  %v7728_v24 = vld [vmem:[%s9537_s1 + $0xc20] sm:$0xff]   ;;  %v7757_v2 = vld [vmem:[%s9537_s1 + $0xd90] sm:$0xff]  }
 0x16c   : > { %5532 = vmatprep.mubr.bf16.mxu1 %v6018_v4  ;;  %v7759_v4 = vld [vmem:[%s9537_s1 + $0xdd8] sm:$0xff]  }
 0x16d   : > { %7037 = vmatpush3.bf16.msra.mxu0 %v7680_v25 }
 0x16e   : > { %7059 = vmatpush3.bf16.msra.mxu1 %v7681_v26  ;;  %7038 = vmatprep.subr.bf16.mxu0 %v7682_v27  ;;  %v7729_v26 = vld [vmem:[%s9537_s1 + $0xca0] sm:$0xff]  }
 0x16f   : > { %7060 = vmatprep.subr.bf16.mxu1 %v7683_v28 }
 0x171   : > { %7039 = vmatpush3.bf16.msra.mxu0 %v7684_v29 }
 0x172   : > { %7061 = vmatpush3.bf16.msra.mxu1 %v7685_v30  ;;  %7040 = vmatprep.subr.bf16.mxu0 %v7686_v31  ;;  %v7730_v30 = vld [vmem:[%s9537_s1 + $0xc68] sm:$0xff]  }
 0x173   : > { %7062 = vmatprep.subr.bf16.mxu1 %v7687_v32  ;;  %v7731_v32 = vld [vmem:[%s9537_s1 + $0xce8] sm:$0xff]  }
 0x175   : > { %7041 = vmatpush3.bf16.msra.mxu0 %v7688_v33 }
 0x176   : > { %7063 = vmatpush3.bf16.msra.mxu1 %v7689_v34  ;;  %7042 = vmatprep.subr.bf16.mxu0 %v7690_v35 }
 0x177   : > { %7064 = vmatprep.subr.bf16.mxu1 %v7691_v36  ;;  %v7732_v36 = vld [vmem:[%s9537_s1 + $0xc28] sm:$0xff]  }
 0x179   : > { %7043 = vmatpush3.bf16.msra.mxu0 %v7692_v38 }
 0x17a   : > { %7065 = vmatpush3.bf16.msra.mxu1 %v7693_v40  ;;  %7044 = vmatprep.subr.bf16.mxu0 %v7694_v43  ;;  %v7736_v43 = vld [vmem:[%s9537_s1 + $0xc30] sm:$0xff]  }
 0x17b   : > { %v6742_v37 = vpop.f32.mrb[16].mxu0  ;;  %7066 = vmatprep.subr.bf16.mxu1 %v7695_v46  ;;  %v7739_v46 = vld [vmem:[%s9537_s1 + $0xcf8] sm:$0xff]  }
 0x17c   : > { %v6764_v39 = vpop.f32.mrb[16].mxu1  ;;  %v6743_v41 = vpop.f32.mrb[17].mxu0 }
 0x17d   : > { %v6765_v42 = vpop.f32.mrb[17].mxu1  ;;  %v6744_v44 = vadd.f32 %v6743_v41, %v6742_v37  ;;  %v6745_v47 = vpop.f32.mrb[18].mxu0  ;;  %7045 = vmatpush3.bf16.msra.mxu0 %v7696_v49  ;;  %v7733_v37 = vld [vmem:[%s9537_s1 + $0xca8] sm:$0xff]   ;;  %v7734_v41 = vld [vmem:[%s9537_s1 + $0xc70] sm:$0xff]   ;;  %v245_v49 = vld [vmem:[%s8016_s6 + $0xc0] sm:$0xff] }
 0x17e   : > { %v6766_v45 = vadd.f32 %v6765_v42, %v6764_v39  ;;  %v6767_v48 = vpop.f32.mrb[18].mxu1  ;;  %v6746_v52 = vpop.f32.mrb[19].mxu0  ;;  %7067 = vmatpush3.bf16.msra.mxu1 %v7697_v51  ;;  %7046 = vmatprep.subr.bf16.mxu0 %v7698_v54  ;;  %v7735_v42 = vld [vmem:[%s9537_s1 + $0xcf0] sm:$0xff]   ;;  %v7740_v47 = vld [vmem:[%s9537_s1 + $0xc38] sm:$0xff]   ;;  %v6019_v51 = vcombine.low %v245_v49, %v245_v49  ;;  %v7746_v54 = vld [vmem:[%s9537_s1 + $0xd40] sm:$0xff]  }
 0x17f   : > { %v4935_v50 = vadd.f32 %v6744_v44, %v8995_v5  ;;  %v6768_v53 = vpop.f32.mrb[19].mxu1  ;;  %7068 = vmatprep.subr.bf16.mxu1 %v7699_v56  ;;  %v7710_v5 = vld [vmem:[%s9537_s1 + $0xc40] sm:$0xff]   ;;  %v7737_v44 = vld [vmem:[%s9537_s1 + $0xcb0] sm:$0xff]   ;;  %v7741_v48 = vld [vmem:[%s9537_s1 + $0xcb8] sm:$0xff]   ;;  %v6020_v52 = vcombine.high %v245_v49, %v245_v49 }
 0x180   : > { %v7747_v56 = vld [vmem:[%s9537_s1 + $0xdc0] sm:$0xff]   ;;  %v7790_v49 = vld [vmem:[%s9537_s1 + $0xe50] sm:$0xff]  }
 0x181   : > { %v9096_v55 = vadd.f32 %v6766_v45, %v4935_v50  ;;  %7047 = vmatpush3.bf16.msra.mxu0 %v7700_v57  ;;  %v7738_v45 = vld [vmem:[%s9537_s1 + $0xc78] sm:$0xff]   ;;  %v246_v50 = vld [vmem:[%s8016_s6 + $0xc8] sm:$0xff]  ;;  %v7748_v57 = vld [vmem:[%s9537_s1 + $0xd00] sm:$0xff]  }
 0x182   : > { %7069 = vmatpush3.bf16.msra.mxu1 %v7701_v58  ;;  %7048 = vmatprep.subr.bf16.mxu0 %v7702_v59  ;;  %v6021_v53 = vcombine.low %v246_v50, %v246_v50  ;;  %v7749_v58 = vld [vmem:[%s9537_s1 + $0xd80] sm:$0xff]   ;;  %v7750_v59 = vld [vmem:[%s9537_s1 + $0xd48] sm:$0xff]  }
 0x183   : > { %7070 = vmatprep.subr.bf16.mxu1 %v7703_v60  ;;  %v7751_v60 = vld [vmem:[%s9537_s1 + $0xdc8] sm:$0xff]  }
 0x185   : > { %7049 = vmatpush3.bf16.msra.mxu0 %v7704_v61  ;;  %v7752_v61 = vld [vmem:[%s9537_s1 + $0xd08] sm:$0xff]  }
 0x186   : > { %7071 = vmatpush3.bf16.msra.mxu1 %v7705_v62  ;;  %7078 = vmatprep.subr.bf16.mxu0 %v7710_v5  ;;  %v7753_v62 = vld [vmem:[%s9537_s1 + $0xd88] sm:$0xff]   ;;  %v7760_v5 = vld [vmem:[%s9537_s1 + $0xd18] sm:$0xff]  }
 0x187   : > { %7100 = vmatprep.subr.bf16.mxu1 %v7711_v6  ;;  %v7761_v6 = vld [vmem:[%s9537_s1 + $0xd98] sm:$0xff]  }
 0x188   : > { %5493 = vmatmul.mubr.bf16.vlgmr.msra.gmra.mrb[44].mxu0 %v6015_v1  ;;  %v7756_v1 = vld [vmem:[%s9537_s1 + $0xd10] sm:$0xff]  }
 0x189   : > { %5533 = vmatmul.mubr.bf16.vlgmr.msra.gmra.mrb[44].mxu1 %v6017_v3  ;;  %7079 = vmatpush3.bf16.msra.mxu0 %v7712_v7  ;;  %v7758_v3 = vld [vmem:[%s9537_s1 + $0xd58] sm:$0xff]   ;;  %v7762_v7 = vld [vmem:[%s9537_s1 + $0xd60] sm:$0xff]  }
 0x18a   : > { %7101 = vmatpush3.bf16.msra.mxu1 %v7713_v8  ;;  %7080 = vmatprep.subr.bf16.mxu0 %v7714_v9  ;;  %v7763_v8 = vld [vmem:[%s9537_s1 + $0xde0] sm:$0xff]  }
 0x18b   : > { %7102 = vmatprep.subr.bf16.mxu1 %v7715_v10  ;;  %5572 = vmatprep.mubr.bf16.mxu0 %v6020_v52  ;;  %v7764_v10 = vld [vmem:[%s9537_s1 + $0xd20] sm:$0xff]   ;;  %v7793_v52 = vld [vmem:[%s9537_s1 + $0xe90] sm:$0xff]  }
 0x18d   : > { %7081 = vmatpush3.bf16.msra.mxu0 %v7716_v11 }
 0x18e   : > { %7103 = vmatpush3.bf16.msra.mxu1 %v7717_v12  ;;  %7082 = vmatprep.subr.bf16.mxu0 %v7718_v13  ;;  %v7765_v12 = vld [vmem:[%s9537_s1 + $0xda0] sm:$0xff]  }
 0x18f   : > { %7104 = vmatprep.subr.bf16.mxu1 %v7719_v14 }
 0x191   : > { %7083 = vmatpush3.bf16.msra.mxu0 %v7720_v15  ;;  %v7766_v15 = vld [vmem:[%s9537_s1 + $0xd68] sm:$0xff]  }
 0x192   : > { %7105 = vmatpush3.bf16.msra.mxu1 %v7721_v16  ;;  %7084 = vmatprep.subr.bf16.mxu0 %v7722_v17 }
 0x193   : > { %7106 = vmatprep.subr.bf16.mxu1 %v7723_v18  ;;  %v7767_v18 = vld [vmem:[%s9537_s1 + $0xde8] sm:$0xff]  }
 0x195   : > { %7085 = vmatpush3.bf16.msra.mxu0 %v7724_v19 }
 0x196   : > { %7107 = vmatpush3.bf16.msra.mxu1 %v7725_v20  ;;  %7086 = vmatprep.subr.bf16.mxu0 %v7726_v21  ;;  %v7768_v21 = vld [vmem:[%s9537_s1 + $0xd28] sm:$0xff]  }
 0x197   : > { %7108 = vmatprep.subr.bf16.mxu1 %v7727_v22 }
 0x199   : > { %7087 = vmatpush3.bf16.msra.mxu0 %v7728_v24 }
 0x19a   : > { %7109 = vmatpush3.bf16.msra.mxu1 %v7729_v26  ;;  %7088 = vmatprep.subr.bf16.mxu0 %v7730_v30  ;;  %v7770_v26 = vld [vmem:[%s9537_s1 + $0xd70] sm:$0xff]  }
 0x19b   : > { %v6786_v23 = vpop.f32.mrb[20].mxu0  ;;  %7110 = vmatprep.subr.bf16.mxu1 %v7731_v32  ;;  %v7773_v30 = vld [vmem:[%s9537_s1 + $0xdb0] sm:$0xff]   ;;  %v7775_v32 = vld [vmem:[%s9537_s1 + $0xdf8] sm:$0xff]  }
 0x19c   : > { %v6808_v25 = vpop.f32.mrb[20].mxu1  ;;  %v6787_v27 = vpop.f32.mrb[21].mxu0 }
 0x19d   : > { %v6788_v28 = vadd.f32 %v6787_v27, %v6786_v23  ;;  %v6809_v29 = vpop.f32.mrb[21].mxu1  ;;  %v6789_v33 = vpop.f32.mrb[22].mxu0  ;;  %7089 = vmatpush3.bf16.msra.mxu0 %v7732_v36  ;;  %v7769_v23 = vld [vmem:[%s9537_s1 + $0xda8] sm:$0xff]  }
 0x19e   : > { %v6810_v31 = vadd.f32 %v6809_v29, %v6808_v25  ;;  %v6811_v35 = vpop.f32.mrb[22].mxu1  ;;  %v6790_v38 = vpop.f32.mrb[23].mxu0  ;;  %7111 = vmatpush3.bf16.msra.mxu1 %v7733_v37  ;;  %7090 = vmatprep.subr.bf16.mxu0 %v7734_v41  ;;  %v7772_v29 = vld [vmem:[%s9537_s1 + $0xd30] sm:$0xff]   ;;  %v7776_v33 = vld [vmem:[%s9537_s1 + $0xd38] sm:$0xff]   ;;  %v7782_v41 = vld [vmem:[%s9537_s1 + $0xe40] sm:$0xff]  }
 0x19f   : > { %v5015_v34 = vadd.f32 %v6788_v28, %v9096_v55  ;;  %v6812_v40 = vpop.f32.mrb[23].mxu1  ;;  %7112 = vmatprep.subr.bf16.mxu1 %v7735_v42  ;;  %v6022_v55 = vcombine.high %v246_v50, %v246_v50  ;;  %v7771_v28 = vld [vmem:[%s9537_s1 + $0xdf0] sm:$0xff]   ;;  %v248_v38 = vld [vmem:[%s8016_s6 + $0xd8] sm:$0xff]  ;;  %v7783_v42 = vld [vmem:[%s9537_s1 + $0xec0] sm:$0xff]  }
 0x1a0   : > { %v247_v35 = vld [vmem:[%s8016_s6 + $0xd0] sm:$0xff]  ;;  %v6026_v40 = vcombine.high %v248_v38, %v248_v38 }
 0x1a1   : > { %v9194_v39 = vadd.f32 %v6810_v31, %v5015_v34  ;;  %7091 = vmatpush3.bf16.msra.mxu0 %v7736_v43  ;;  %5612 = vmatprep.mubr.bf16.mxu1 %v6022_v55  ;;  %v7774_v31 = vld [vmem:[%s9537_s1 + $0xd78] sm:$0xff]   ;;  %v6023_v36 = vcombine.low %v247_v35, %v247_v35  ;;  %v6024_v37 = vcombine.high %v247_v35, %v247_v35  ;;  %v7784_v43 = vld [vmem:[%s9537_s1 + $0xe00] sm:$0xff]   ;;  %v7791_v50 = vld [vmem:[%s9537_s1 + $0xed0] sm:$0xff]  }
 0x1a2   : > { %7113 = vmatpush3.bf16.msra.mxu1 %v7737_v44  ;;  %7092 = vmatprep.subr.bf16.mxu0 %v7738_v45  ;;  %v7777_v34 = vld [vmem:[%s9537_s1 + $0xdb8] sm:$0xff]   ;;  %v7785_v44 = vld [vmem:[%s9537_s1 + $0xe80] sm:$0xff]   ;;  %v7786_v45 = vld [vmem:[%s9537_s1 + $0xe48] sm:$0xff]  }
 0x1a3   : > { %7114 = vmatprep.subr.bf16.mxu1 %v7739_v46  ;;  %v7787_v46 = vld [vmem:[%s9537_s1 + $0xec8] sm:$0xff]   ;;  %v7796_v55 = vld [vmem:[%s9537_s1 + $0xe18] sm:$0xff]   ;;  %v7826_v35 = vld [vmem:[%s9537_s1 + $0xf50] sm:$0xff]  }
 0x1a5   : > { %7093 = vmatpush3.bf16.msra.mxu0 %v7740_v47  ;;  %v7788_v47 = vld [vmem:[%s9537_s1 + $0xe08] sm:$0xff]  }
 0x1a6   : > { %7115 = vmatpush3.bf16.msra.mxu1 %v7741_v48  ;;  %7122 = vmatprep.subr.bf16.mxu0 %v7746_v54  ;;  %v7789_v48 = vld [vmem:[%s9537_s1 + $0xe88] sm:$0xff]   ;;  %v7795_v54 = vld [vmem:[%s9537_s1 + $0xed8] sm:$0xff]  }
 0x1a7   : > { %7144 = vmatprep.subr.bf16.mxu1 %v7747_v56  ;;  %v7797_v56 = vld [vmem:[%s9537_s1 + $0xe98] sm:$0xff]  }
 0x1a8   : > { %5573 = vmatmul.mubr.bf16.vlgmr.msra.gmra.mrb[48].mxu0 %v6019_v51  ;;  %v7792_v51 = vld [vmem:[%s9537_s1 + $0xe10] sm:$0xff]  }
 0x1a9   : > { %5613 = vmatmul.mubr.bf16.vlgmr.msra.gmra.mrb[48].mxu1 %v6021_v53  ;;  %7123 = vmatpush3.bf16.msra.mxu0 %v7748_v57  ;;  %v7794_v53 = vld [vmem:[%s9537_s1 + $0xe58] sm:$0xff]   ;;  %v7798_v57 = vld [vmem:[%s9537_s1 + $0xe60] sm:$0xff]  }
 0x1aa   : > { %7145 = vmatpush3.bf16.msra.mxu1 %v7749_v58  ;;  %7124 = vmatprep.subr.bf16.mxu0 %v7750_v59  ;;  %v7799_v58 = vld [vmem:[%s9537_s1 + $0xee0] sm:$0xff]  }
 0x1ab   : > { %7146 = vmatprep.subr.bf16.mxu1 %v7751_v60  ;;  %5652 = vmatprep.mubr.bf16.mxu0 %v6024_v37  ;;  %v7800_v60 = vld [vmem:[%s9537_s1 + $0xe20] sm:$0xff]   ;;  %v7828_v37 = vld [vmem:[%s9537_s1 + $0xf10] sm:$0xff]  }
 0x1ac   : > { %5692 = vmatprep.mubr.bf16.mxu1 %v6026_v40  ;;  %v7831_v40 = vld [vmem:[%s9537_s1 + $0xfd8] sm:$0xff]  }
 0x1ad   : > { %7125 = vmatpush3.bf16.msra.mxu0 %v7752_v61 }
 0x1ae   : > { %7147 = vmatpush3.bf16.msra.mxu1 %v7753_v62  ;;  %7126 = vmatprep.subr.bf16.mxu0 %v7754_v63  ;;  %v7801_v62 = vld [vmem:[%s9537_s1 + $0xea0] sm:$0xff]  }
 0x1af   : > { %7148 = vmatprep.subr.bf16.mxu1 %v7755_v0 }
 0x1b1   : > { %7127 = vmatpush3.bf16.msra.mxu0 %v7756_v1  ;;  %v7802_v1 = vld [vmem:[%s9537_s1 + $0xe68] sm:$0xff]  }
 0x1b2   : > { %7149 = vmatpush3.bf16.msra.mxu1 %v7757_v2  ;;  %7128 = vmatprep.subr.bf16.mxu0 %v7758_v3 }
 0x1b3   : > { %7150 = vmatprep.subr.bf16.mxu1 %v7759_v4  ;;  %v7803_v4 = vld [vmem:[%s9537_s1 + $0xee8] sm:$0xff]  }
 0x1b5   : > { %7129 = vmatpush3.bf16.msra.mxu0 %v7760_v5 }
 0x1b6   : > { %7151 = vmatpush3.bf16.msra.mxu1 %v7761_v6  ;;  %7130 = vmatprep.subr.bf16.mxu0 %v7762_v7  ;;  %v7804_v7 = vld [vmem:[%s9537_s1 + $0xe28] sm:$0xff]  }
 0x1b7   : > { %7152 = vmatprep.subr.bf16.mxu1 %v7763_v8 }
 0x1b9   : > { %7131 = vmatpush3.bf16.msra.mxu0 %v7764_v10 }
 0x1ba   : > { %7153 = vmatpush3.bf16.msra.mxu1 %v7765_v12  ;;  %7132 = vmatprep.subr.bf16.mxu0 %v7766_v15  ;;  %v7806_v12 = vld [vmem:[%s9537_s1 + $0xe70] sm:$0xff]  }
 0x1bb   : > { %v6830_v9 = vpop.f32.mrb[24].mxu0  ;;  %7154 = vmatprep.subr.bf16.mxu1 %v7767_v18  ;;  %v7808_v15 = vld [vmem:[%s9537_s1 + $0xe30] sm:$0xff]   ;;  %v7811_v18 = vld [vmem:[%s9537_s1 + $0xef8] sm:$0xff]  }
 0x1bc   : > { %v6852_v11 = vpop.f32.mrb[24].mxu1  ;;  %v6831_v13 = vpop.f32.mrb[25].mxu0 }
 0x1bd   : > { %v6853_v14 = vpop.f32.mrb[25].mxu1  ;;  %v6832_v16 = vadd.f32 %v6831_v13, %v6830_v9  ;;  %v6833_v19 = vpop.f32.mrb[26].mxu0  ;;  %7133 = vmatpush3.bf16.msra.mxu0 %v7768_v21  ;;  %v7805_v9 = vld [vmem:[%s9537_s1 + $0xea8] sm:$0xff]   ;;  %v249_v21 = vld [vmem:[%s8016_s6 + $0xe0] sm:$0xff] }
 0x1be   : > { %v6854_v17 = vadd.f32 %v6853_v14, %v6852_v11  ;;  %v6855_v20 = vpop.f32.mrb[26].mxu1  ;;  %v6834_v24 = vpop.f32.mrb[27].mxu0  ;;  %7155 = vmatpush3.bf16.msra.mxu1 %v7769_v23  ;;  %7134 = vmatprep.subr.bf16.mxu0 %v7770_v26  ;;  %v7807_v14 = vld [vmem:[%s9537_s1 + $0xef0] sm:$0xff]   ;;  %v7812_v19 = vld [vmem:[%s9537_s1 + $0xe38] sm:$0xff]   ;;  %v6027_v23 = vcombine.low %v249_v21, %v249_v21 }
 0x1bf   : > { %v5095_v22 = vadd.f32 %v6832_v16, %v9194_v39  ;;  %v6856_v25 = vpop.f32.mrb[27].mxu1  ;;  %7156 = vmatprep.subr.bf16.mxu1 %v7771_v28  ;;  %v6025_v39 = vcombine.low %v248_v38, %v248_v38  ;;  %v7809_v16 = vld [vmem:[%s9537_s1 + $0xeb0] sm:$0xff]   ;;  %v7813_v20 = vld [vmem:[%s9537_s1 + $0xeb8] sm:$0xff]   ;;  %v6028_v24 = vcombine.high %v249_v21, %v249_v21  ;;  %v7819_v28 = vld [vmem:[%s9537_s1 + $0xfc0] sm:$0xff]  }
 0x1c0   : > { %v7829_v38 = vld [vmem:[%s9537_s1 + $0xf90] sm:$0xff]  }
 0x1c1   : > { %v9298_v27 = vadd.f32 %v6854_v17, %v5095_v22  ;;  %7135 = vmatpush3.bf16.msra.mxu0 %v7772_v29  ;;  %v7810_v17 = vld [vmem:[%s9537_s1 + $0xe78] sm:$0xff]   ;;  %v250_v22 = vld [vmem:[%s8016_s6 + $0xe8] sm:$0xff]  ;;  %v7820_v29 = vld [vmem:[%s9537_s1 + $0xf00] sm:$0xff]  }
 0x1c2   : > { %7157 = vmatpush3.bf16.msra.mxu1 %v7773_v30  ;;  %7136 = vmatprep.subr.bf16.mxu0 %v7774_v31  ;;  %v6029_v25 = vcombine.low %v250_v22, %v250_v22  ;;  %v6030_v26 = vcombine.high %v250_v22, %v250_v22  ;;  %v7821_v30 = vld [vmem:[%s9537_s1 + $0xf80] sm:$0xff]   ;;  %v7822_v31 = vld [vmem:[%s9537_s1 + $0xf48] sm:$0xff]  }
 0x1c3   : > { %7158 = vmatprep.subr.bf16.mxu1 %v7775_v32  ;;  %v7823_v32 = vld [vmem:[%s9537_s1 + $0xfc8] sm:$0xff]  }
 0x1c5   : > { %7137 = vmatpush3.bf16.msra.mxu0 %v7776_v33  ;;  %v7824_v33 = vld [vmem:[%s9537_s1 + $0xf08] sm:$0xff]  }
 0x1c6   : > { %7159 = vmatpush3.bf16.msra.mxu1 %v7777_v34  ;;  %7166 = vmatprep.subr.bf16.mxu0 %v7782_v41  ;;  %v7825_v34 = vld [vmem:[%s9537_s1 + $0xf88] sm:$0xff]   ;;  %v7832_v41 = vld [vmem:[%s9537_s1 + $0xf18] sm:$0xff]  }
 0x1c7   : > { %7188 = vmatprep.subr.bf16.mxu1 %v7783_v42  ;;  %v7833_v42 = vld [vmem:[%s9537_s1 + $0xf98] sm:$0xff]  }
 0x1c8   : > { %5653 = vmatmul.mubr.bf16.vlgmr.msra.gmra.mrb[52].mxu0 %v6023_v36  ;;  %v7827_v36 = vld [vmem:[%s9537_s1 + $0xfd0] sm:$0xff]  }
 0x1c9   : > { %5693 = vmatmul.mubr.bf16.vlgmr.msra.gmra.mrb[52].mxu1 %v6025_v39  ;;  %7167 = vmatpush3.bf16.msra.mxu0 %v7784_v43  ;;  %v7830_v39 = vld [vmem:[%s9537_s1 + $0xf58] sm:$0xff]   ;;  %v7834_v43 = vld [vmem:[%s9537_s1 + $0xf60] sm:$0xff]  }
 0x1ca   : > { %7189 = vmatpush3.bf16.msra.mxu1 %v7785_v44  ;;  %7168 = vmatprep.subr.bf16.mxu0 %v7786_v45  ;;  %v7835_v44 = vld [vmem:[%s9537_s1 + $0xfe0] sm:$0xff]  }
 0x1cb   : > { %7190 = vmatprep.subr.bf16.mxu1 %v7787_v46  ;;  %5732 = vmatprep.mubr.bf16.mxu0 %v6028_v24  ;;  %v7836_v45 = vld [vmem:[%s9537_s1 + $0xf20] sm:$0xff]  }
 0x1cc   : > { %5772 = vmatprep.mubr.bf16.mxu1 %v6030_v26 }
 0x1cd   : > { %7169 = vmatpush3.bf16.msra.mxu0 %v7788_v47  ;;  %v7837_v47 = vld [vmem:[%s9537_s1 + $0xfa0] sm:$0xff]  }
 0x1ce   : > { %7191 = vmatpush3.bf16.msra.mxu1 %v7789_v48  ;;  %7170 = vmatprep.subr.bf16.mxu0 %v7790_v49 }
 0x1cf   : > { %7192 = vmatprep.subr.bf16.mxu1 %v7791_v50 }
 0x1d1   : > { %7171 = vmatpush3.bf16.msra.mxu0 %v7792_v51 }
 0x1d2   : > { %7193 = vmatpush3.bf16.msra.mxu1 %v7793_v52  ;;  %7172 = vmatprep.subr.bf16.mxu0 %v7794_v53  ;;  %v7838_v53 = vld [vmem:[%s9537_s1 + $0xf68] sm:$0xff]  }
 0x1d3   : > { %7194 = vmatprep.subr.bf16.mxu1 %v7795_v54 }
 0x1d5   : > { %7173 = vmatpush3.bf16.msra.mxu0 %v7796_v55  ;;  %v7839_v55 = vld [vmem:[%s9537_s1 + $0xfe8] sm:$0xff]  }
 0x1d6   : > { %7195 = vmatpush3.bf16.msra.mxu1 %v7797_v56  ;;  %7174 = vmatprep.subr.bf16.mxu0 %v7798_v57 }
 0x1d7   : > { %7196 = vmatprep.subr.bf16.mxu1 %v7799_v58  ;;  %v7840_v58 = vld [vmem:[%s9537_s1 + $0xf28] sm:$0xff]  }
 0x1d9   : > { %7175 = vmatpush3.bf16.msra.mxu0 %v7800_v60  ;;  %v7841_v60 = vld [vmem:[%s9537_s1 + $0xfa8] sm:$0xff]  }
 0x1da   : > { %7197 = vmatpush3.bf16.msra.mxu1 %v7801_v62  ;;  %7176 = vmatprep.subr.bf16.mxu0 %v7802_v1  ;;  %v7844_v1 = vld [vmem:[%s9537_s1 + $0xf30] sm:$0xff]  }
 0x1db   : > { %v6874_v59 = vpop.f32.mrb[28].mxu0  ;;  %7198 = vmatprep.subr.bf16.mxu1 %v7803_v4  ;;  %v7847_v4 = vld [vmem:[%s9537_s1 + $0xff8] sm:$0xff]  }
 0x1dc   : > { %v6896_v61 = vpop.f32.mrb[28].mxu1  ;;  %v6875_v63 = vpop.f32.mrb[29].mxu0 }
 0x1dd   : > { %v6897_v0 = vpop.f32.mrb[29].mxu1  ;;  %v6876_v2 = vadd.f32 %v6875_v63, %v6874_v59  ;;  %v6877_v5 = vpop.f32.mrb[30].mxu0  ;;  %7177 = vmatpush3.bf16.msra.mxu0 %v7804_v7  ;;  %v7842_v63 = vld [vmem:[%s9537_s1 + $0xf70] sm:$0xff]  }
 0x1de   : > { %v6898_v3 = vadd.f32 %v6897_v0, %v6896_v61  ;;  %v6899_v6 = vpop.f32.mrb[30].mxu1  ;;  %v6878_v10 = vpop.f32.mrb[31].mxu0  ;;  %7199 = vmatpush3.bf16.msra.mxu1 %v7805_v9  ;;  %7178 = vmatprep.subr.bf16.mxu0 %v7806_v12  ;;  %v7843_v0 = vld [vmem:[%s9537_s1 + $0xff0] sm:$0xff]   ;;  %v7848_v5 = vld [vmem:[%s9537_s1 + $0xf38] sm:$0xff]  }
 0x1df   : > { %v5175_v8 = vadd.f32 %v6876_v2, %v9298_v27  ;;  %v6900_v11 = vpop.f32.mrb[31].mxu1  ;;  %7200 = vmatprep.subr.bf16.mxu1 %v7807_v14  ;;  %v7818_v27 = vld [vmem:[%s9537_s1 + $0xf40] sm:$0xff]   ;;  %v7845_v2 = vld [vmem:[%s9537_s1 + $0xfb0] sm:$0xff]   ;;  %v7849_v6 = vld [vmem:[%s9537_s1 + $0xfb8] sm:$0xff]  }
 0x1e0   : > { %v251_v7 = vld [vmem:[%s8016_s6 + $0xf0] sm:$0xff] }
 0x1e1   : > { %v9399_v13 = vadd.f32 %v6898_v3, %v5175_v8  ;;  %7179 = vmatpush3.bf16.msra.mxu0 %v7808_v15  ;;  %v7846_v3 = vld [vmem:[%s9537_s1 + $0xf78] sm:$0xff]   ;;  %v6031_v9 = vcombine.low %v251_v7, %v251_v7  ;;  %v6032_v10 = vcombine.high %v251_v7, %v251_v7 }
 0x1e2   : > { %7201 = vmatpush3.bf16.msra.mxu1 %v7809_v16  ;;  %7180 = vmatprep.subr.bf16.mxu0 %v7810_v17  ;;  %v252_v8 = vld [vmem:[%s8016_s6 + $0xf8] sm:$0xff]  ;;  %s5969_s6 = sshll.u32 %s9545_s12, 3 }
 0x1e3   : > { %7202 = vmatprep.subr.bf16.mxu1 %v7811_v18  ;;  %v6033_v11 = vcombine.low %v252_v8, %v252_v8  ;;  %v6034_v12 = vcombine.high %v252_v8, %v252_v8  ;;  %s219_s7 = scalar_lea.vmem %s9539_s3, %s5969_s6 }
 0x1e5   : > { %7181 = vmatpush3.bf16.msra.mxu0 %v7812_v19 }
 0x1e6   : > { %7203 = vmatpush3.bf16.msra.mxu1 %v7813_v20  ;;  %7210 = vmatprep.subr.bf16.mxu0 %v7818_v27 }
 0x1e7   : > { %7232 = vmatprep.subr.bf16.mxu1 %v7819_v28 }
 0x1e8   : > { %5733 = vmatmul.mubr.bf16.vlgmr.msra.gmra.mrb[56].mxu0 %v6027_v23 }
 0x1e9   : > { %5773 = vmatmul.mubr.bf16.vlgmr.msra.gmra.mrb[56].mxu1 %v6029_v25  ;;  %7211 = vmatpush3.bf16.msra.mxu0 %v7820_v29 }
 0x1ea   : > { %7233 = vmatpush3.bf16.msra.mxu1 %v7821_v30  ;;  %7212 = vmatprep.subr.bf16.mxu0 %v7822_v31 }
 0x1eb   : > { %7234 = vmatprep.subr.bf16.mxu1 %v7823_v32  ;;  %5812 = vmatprep.mubr.bf16.mxu0 %v6032_v10 }
 0x1ec   : > { %5852 = vmatprep.mubr.bf16.mxu1 %v6034_v12 }
 0x1ed   : > { %7213 = vmatpush3.bf16.msra.mxu0 %v7824_v33 }
 0x1ee   : > { %7235 = vmatpush3.bf16.msra.mxu1 %v7825_v34  ;;  %7214 = vmatprep.subr.bf16.mxu0 %v7826_v35 }
 0x1ef   : > { %7236 = vmatprep.subr.bf16.mxu1 %v7827_v36 }
 0x1f1   : > { %7215 = vmatpush3.bf16.msra.mxu0 %v7828_v37 }
 0x1f2   : > { %7237 = vmatpush3.bf16.msra.mxu1 %v7829_v38  ;;  %7216 = vmatprep.subr.bf16.mxu0 %v7830_v39 }
 0x1f3   : > { %7238 = vmatprep.subr.bf16.mxu1 %v7831_v40 }
 0x1f5   : > { %7217 = vmatpush3.bf16.msra.mxu0 %v7832_v41 }
 0x1f6   : > { %7239 = vmatpush3.bf16.msra.mxu1 %v7833_v42  ;;  %7218 = vmatprep.subr.bf16.mxu0 %v7834_v43 }
 0x1f7   : > { %7240 = vmatprep.subr.bf16.mxu1 %v7835_v44 }
 0x1f9   : > { %7219 = vmatpush3.bf16.msra.mxu0 %v7836_v45 }
 0x1fa   : > { %7241 = vmatpush3.bf16.msra.mxu1 %v7837_v47  ;;  %7220 = vmatprep.subr.bf16.mxu0 %v7838_v53 }
 0x1fb   : > { %v6918_v46 = vpop.f32.mrb[32].mxu0  ;;  %7242 = vmatprep.subr.bf16.mxu1 %v7839_v55 }
 0x1fc   : > { %v6940_v48 = vpop.f32.mrb[32].mxu1  ;;  %v6919_v49 = vpop.f32.mrb[33].mxu0 }
 0x1fd   : > { %v6941_v50 = vpop.f32.mrb[33].mxu1  ;;  %v6920_v51 = vadd.f32 %v6919_v49, %v6918_v46  ;;  %v6921_v54 = vpop.f32.mrb[34].mxu0  ;;  %7221 = vmatpush3.bf16.msra.mxu0 %v7840_v58 }
 0x1fe   : > { %v6942_v52 = vadd.f32 %v6941_v50, %v6940_v48  ;;  %v6943_v56 = vpop.f32.mrb[34].mxu1  ;;  %v6922_v59 = vpop.f32.mrb[35].mxu0  ;;  %7243 = vmatpush3.bf16.msra.mxu1 %v7841_v60  ;;  %7222 = vmatprep.subr.bf16.mxu0 %v7842_v63 }
 0x1ff   : > { %v5255_v57 = vadd.f32 %v6920_v51, %v9399_v13  ;;  %v6944_v61 = vpop.f32.mrb[35].mxu1  ;;  %7244 = vmatprep.subr.bf16.mxu1 %v7843_v0 }
 0x201   : > { %v5295_v62 = vadd.f32 %v6942_v52, %v5255_v57  ;;  %7223 = vmatpush3.bf16.msra.mxu0 %v7844_v1 }
 0x202   : > { %7245 = vmatpush3.bf16.msra.mxu1 %v7845_v2  ;;  %7224 = vmatprep.subr.bf16.mxu0 %v7846_v3 }
 0x203   : > { %7246 = vmatprep.subr.bf16.mxu1 %v7847_v4 }
 0x205   : > { %7225 = vmatpush3.bf16.msra.mxu0 %v7848_v5 }
 0x206   : > { %7247 = vmatpush3.bf16.msra.mxu1 %v7849_v6 }
 0x208   : > { %5813 = vmatmul.mubr.bf16.vlgmr.msra.gmra.mrb[60].mxu0 %v6031_v9 }
 0x209   : > { %5853 = vmatmul.mubr.bf16.vlgmr.msra.gmra.mrb[60].mxu1 %v6033_v11 }
 0x21b   : > { %v6962_v13 = vpop.f32.mrb[36].mxu0 }
 0x21c   : > { %v6984_v14 = vpop.f32.mrb[36].mxu1  ;;  %v6963_v15 = vpop.f32.mrb[37].mxu0 }
 0x21d   : > { %v6964_v16 = vadd.f32 %v6963_v15, %v6962_v13  ;;  %v6985_v17 = vpop.f32.mrb[37].mxu1  ;;  %v6965_v18 = vpop.f32.mrb[38].mxu0 }
 0x21e   : > { %v6986_v19 = vadd.f32 %v6985_v17, %v6984_v14  ;;  %v6987_v20 = vpop.f32.mrb[38].mxu1  ;;  %v6966_v21 = vpop.f32.mrb[39].mxu0 }
 0x21f   : > { %v5335_v22 = vadd.f32 %v6964_v16, %v5295_v62  ;;  %v6988_v23 = vpop.f32.mrb[39].mxu1 }
 0x221   : > { %v5375_v24 = vadd.f32 %v6986_v19, %v5335_v22 }
 0x23b   : > { %v7006_v25 = vpop.f32.mrb[40].mxu0 }
 0x23c   : > { %v7028_v26 = vpop.f32.mrb[40].mxu1  ;;  %v7007_v27 = vpop.f32.mrb[41].mxu0 }
 0x23d   : > { %v7029_v28 = vpop.f32.mrb[41].mxu1  ;;  %v7008_v29 = vadd.f32 %v7007_v27, %v7006_v25  ;;  %v7009_v31 = vpop.f32.mrb[42].mxu0 }
 0x23e   : > { %v7030_v30 = vadd.f32 %v7029_v28, %v7028_v26  ;;  %v7031_v32 = vpop.f32.mrb[42].mxu1  ;;  %v7010_v33 = vpop.f32.mrb[43].mxu0 }
 0x23f   : > { %v7032_v34 = vpop.f32.mrb[43].mxu1  ;;  %v5415_v35 = vadd.f32 %v7008_v29, %v5375_v24 }
 0x241   : > { %v5455_v36 = vadd.f32 %v7030_v30, %v5415_v35 }
 0x25b   : > { %v7050_v37 = vpop.f32.mrb[44].mxu0 }
 0x25c   : > { %v7072_v38 = vpop.f32.mrb[44].mxu1  ;;  %v7051_v39 = vpop.f32.mrb[45].mxu0 }
 0x25d   : > { %v7052_v40 = vadd.f32 %v7051_v39, %v7050_v37  ;;  %v7073_v41 = vpop.f32.mrb[45].mxu1  ;;  %v7053_v42 = vpop.f32.mrb[46].mxu0 }
 0x25e   : > { %v7074_v43 = vadd.f32 %v7073_v41, %v7072_v38  ;;  %v7075_v44 = vpop.f32.mrb[46].mxu1  ;;  %v7054_v45 = vpop.f32.mrb[47].mxu0 }
 0x25f   : > { %v5495_v46 = vadd.f32 %v7052_v40, %v5455_v36  ;;  %v7076_v47 = vpop.f32.mrb[47].mxu1 }
 0x261   : > { %v5535_v48 = vadd.f32 %v7074_v43, %v5495_v46 }
 0x27b   : > { %v7094_v49 = vpop.f32.mrb[48].mxu0 }
 0x27c   : > { %v7116_v50 = vpop.f32.mrb[48].mxu1  ;;  %v7095_v51 = vpop.f32.mrb[49].mxu0 }
 0x27d   : > { %v7096_v52 = vadd.f32 %v7095_v51, %v7094_v49  ;;  %v7117_v53 = vpop.f32.mrb[49].mxu1  ;;  %v7097_v54 = vpop.f32.mrb[50].mxu0 }
 0x27e   : > { %v7118_v55 = vadd.f32 %v7117_v53, %v7116_v50  ;;  %v7119_v56 = vpop.f32.mrb[50].mxu1  ;;  %v7098_v57 = vpop.f32.mrb[51].mxu0 }
 0x27f   : > { %v5575_v58 = vadd.f32 %v7096_v52, %v5535_v48  ;;  %v7120_v59 = vpop.f32.mrb[51].mxu1 }
 0x281   : > { %v5615_v60 = vadd.f32 %v7118_v55, %v5575_v58 }
 0x29b   : > { %v7138_v61 = vpop.f32.mrb[52].mxu0 }
 0x29c   : > { %v7160_v62 = vpop.f32.mrb[52].mxu1  ;;  %v7139_v63 = vpop.f32.mrb[53].mxu0 }
 0x29d   : > { %v7161_v0 = vpop.f32.mrb[53].mxu1  ;;  %v7140_v1 = vadd.f32 %v7139_v63, %v7138_v61  ;;  %v7141_v3 = vpop.f32.mrb[54].mxu0 }
 0x29e   : > { %v7162_v2 = vadd.f32 %v7161_v0, %v7160_v62  ;;  %v7163_v4 = vpop.f32.mrb[54].mxu1  ;;  %v7142_v5 = vpop.f32.mrb[55].mxu0 }
 0x29f   : > { %v7164_v6 = vpop.f32.mrb[55].mxu1  ;;  %v5655_v7 = vadd.f32 %v7140_v1, %v5615_v60 }
 0x2a1   : > { %v5695_v8 = vadd.f32 %v7162_v2, %v5655_v7 }
 0x2bb   : > { %v7182_v9 = vpop.f32.mrb[56].mxu0 }
 0x2bc   : > { %v7204_v10 = vpop.f32.mrb[56].mxu1  ;;  %v7183_v11 = vpop.f32.mrb[57].mxu0 }
 0x2bd   : > { %v7184_v12 = vadd.f32 %v7183_v11, %v7182_v9  ;;  %v7205_v13 = vpop.f32.mrb[57].mxu1  ;;  %v7185_v14 = vpop.f32.mrb[58].mxu0 }
 0x2be   : > { %v7206_v15 = vadd.f32 %v7205_v13, %v7204_v10  ;;  %v7207_v16 = vpop.f32.mrb[58].mxu1  ;;  %v7186_v17 = vpop.f32.mrb[59].mxu0 }
 0x2bf   : > { %v5735_v18 = vadd.f32 %v7184_v12, %v5695_v8  ;;  %v7208_v19 = vpop.f32.mrb[59].mxu1 }
 0x2c1   : > { %v5775_v20 = vadd.f32 %v7206_v15, %v5735_v18 }
 0x2db   : > { %v7226_v21 = vpop.f32.mrb[60].mxu0 }
 0x2dc   : > { %v7248_v22 = vpop.f32.mrb[60].mxu1  ;;  %v7227_v23 = vpop.f32.mrb[61].mxu0 }
 0x2dd   : > { %v7228_v24 = vadd.f32 %v7227_v23, %v7226_v21  ;;  %v7249_v25 = vpop.f32.mrb[61].mxu1  ;;  %v7229_v26 = vpop.f32.mrb[62].mxu0 }
 0x2de   : > { %v7250_v27 = vadd.f32 %v7249_v25, %v7248_v22  ;;  %v7251_v28 = vpop.f32.mrb[62].mxu1  ;;  %v7230_v29 = vpop.f32.mrb[63].mxu0 }
 0x2df   : > { %v5815_v30 = vadd.f32 %v7228_v24, %v5775_v20  ;;  %v7252_v31 = vpop.f32.mrb[63].mxu1 }
 0x2e1   : > { %v5855_v32 = vadd.f32 %v7250_v27, %v5815_v30 }
 0x2e3   : > { %5860 = vst [vmem:[%s219_s7] sm:$0xff] %v5855_v32 }
 0x2e4 PF: > { %s13_s14 = sadd.s32 1, %s7876_s14   ;;  %s9540_s12 = smov %s7872_s13 }
 0x2e5   : > { %p10_p5 = scmp.ge.s32.totalorder %s13_s14, 4   ;;  %s9541_s13 = smov %s9543_s15 }
 0x2e7   :  { %12 = sbr.rel (!%p10_p5) target bundleno = 2 (0x2), region = 68 }

</bundles_post_ra>
